<compile_context>
chip_gen: v7x
topology: tpu7x:2x2x1
jax: 0.10.0
libtpu: 0.0.40
codegen_flags: <defaults>
</compile_context>

<pallas_src>
import jax
import jax.numpy as jnp
from jax import lax
from jax.experimental import pallas as pl
from jax.experimental.pallas import tpu as pltpu

CP = 128          # padded channel / feature width (one full lane tile)
K1 = 5            # conv1 kernel size
K2 = 5            # conv2 kernel size
KP1 = 32          # conv1 im2col depth (25 taps) padded to 32


# ------------------------------ fused kernel ------------------------------- #

def _fused_forward_kernel(p1_ref, w1_ref, b1_ref, w2_ref, b2_ref,
                          wf1_ref, bf1_ref, wf2_ref, bf2_ref,
                          out_ref, m_ref, acc_ref):
    """Whole ExperimentNetwork forward for one batch tile of `nt` samples.

    p1_ref  : (1, 4, 256*nt, 32) bf16  conv1 phase patches; [plane] rows are
              4 sub-phase blocks of 64*nt rows ordered (u, v, n)
    w1_ref  : (32, 128)  bf16   conv1 weight (tap k = ky*5+kx, cout), 0-padded
    b1_ref  : (1, 128)   f32
    w2_ref  : (25, 128, 128) bf16  conv2 weight (tap k, cin, cout), 0-padded
    b2_ref  : (1, 128)   f32
    wf1_ref : (16, 128, 128) bf16  fc1 weight (spatial s = P*4+Q, cin, cout)
    bf1_ref : (1, 128)   f32
    wf2_ref : (128, 128) bf16   fc2 weight
    bf2_ref : (1, 128)   f32    (-1e30 in the padded class lanes)
    out_ref : (nt, 128)  f32    log-softmax logits (first 10 lanes valid)
    m_ref   : (6, 6, 16*nt, 128) bf16 scratch:
              M[ys, xs][(P*4+Q)*nt+n, c] = pool1[n, 2P+ys, 2Q+xs, c]
              where pool1 = relu(maxpool2(conv1(x)) + b1)
    acc_ref : (2, 32*nt, 128) f32 scratch: block `a` has rows (b, P, Q, n)
              holding conv2[n, :, 2P+a, 2Q+b] (pre-bias)
    """
    nt = out_ref.shape[0]
    f32, bf16 = jnp.float32, jnp.bfloat16

    # ---- stage 1: conv1 + ReLU + 2x2 maxpool, scattered straight into the
    # ---- conv2-friendly M layout (so every later matmul LHS is an aligned,
    # ---- leading-dim-indexed slab).
    w1 = w1_ref[...]
    b1 = b1_ref[...]
    for ey in range(2):
        for ex in range(2):
            # One tall matmul covers the 4 pooling sub-phases of this plane.
            lhs = p1_ref[0, 2 * ey + ex]                          # (256nt, 32)
            z4 = jnp.dot(lhs, w1, preferred_element_type=f32)     # (256nt,128)
            z = jnp.max(z4.reshape(4, 64 * nt, CP), axis=0)       # max over sub-phases
            zp3 = jnp.maximum(z + b1, 0.0).reshape(8, 8 * nt, CP)  # (u, v*nt+n, c)
            for u0 in range(3):
                for v0 in range(3):
                    slab = zp3[u0:u0 + 4, v0 * nt:(v0 + 4) * nt, :]
                    m_ref[2 * u0 + ey, 2 * v0 + ex] = (
                        slab.reshape(16 * nt, CP).astype(bf16))

    # ---- stage 2: conv2 + ReLU + 2x2 maxpool.  Shift-and-accumulate over the
    # ---- 25 taps; LHS slabs are pure views of m_ref; the two pool2 x-phases
    # ---- of one tap share one (32nt,128)x(128,128) matmul; accumulation is
    # ---- in the VMEM scratch acc_ref (no long-lived vreg accumulator).
    for a in range(2):
        for dy in range(K2):
            k0 = dy * K2
            part = jnp.dot(m_ref[a + dy, 0:2].reshape(32 * nt, CP),
                           w2_ref[k0], preferred_element_type=f32)
            for dx in range(1, K2):
                part = part + jnp.dot(
                    m_ref[a + dy, dx:dx + 2].reshape(32 * nt, CP),
                    w2_ref[k0 + dx], preferred_element_type=f32)
            if dy == 0:
                acc_ref[a] = part
            else:
                acc_ref[a] = acc_ref[a] + part

    b2 = b2_ref[...]
    z2 = jnp.max(jnp.maximum(acc_ref[0], acc_ref[1])               # max over a
                 .reshape(2, 16 * nt, CP), axis=0)                 # max over b
    pool2 = jnp.maximum(z2 + b2, 0.0)                              # (16nt,128) f32, rows (P,Q,n)
    pool2_bf = pool2.astype(bf16)

    # ---- stage 3: fc1 as a sum of 16 per-position matmuls (no lane concat).
    hacc = jnp.dot(pool2_bf[0:nt, :], wf1_ref[0], preferred_element_type=f32)
    for s in range(1, 16):
        hacc = hacc + jnp.dot(pool2_bf[s * nt:(s + 1) * nt, :], wf1_ref[s],
                              preferred_element_type=f32)
    h = jnp.maximum(hacc + bf1_ref[...], 0.0)                      # (nt, 128) f32

    # ---- stage 4: fc2 + log_softmax (padded classes carry a -1e30 bias).
    z = jnp.dot(h.astype(bf16), wf2_ref[...],
                preferred_element_type=f32) + bf2_ref[...]
    zs = z - jnp.max(z, axis=-1, keepdims=True)
    out_ref[...] = zs - jnp.log(jnp.sum(jnp.exp(zs), axis=-1, keepdims=True))


# --------------------------- one-time param prep --------------------------- #

def prepare_params(params):
    """Hoisted layout prep: transpose / regroup / zero-pad / bf16-cast all
    weights so the fused kernel only performs lane-dense bf16 matmuls with
    f32 accumulation.  Biases stay f32."""
    f32, bf16 = jnp.float32, jnp.bfloat16
    c1 = params["w_conv1"].shape[0]                       # 10
    c2 = params["w_conv2"].shape[0]                       # 20
    fc = params["w_fc1"].shape[0]                         # 50
    ncls = params["w_fc2"].shape[0]                       # 10
    sp2 = 16                                              # pool2 spatial (4*4)

    w1 = jnp.transpose(params["w_conv1"].astype(f32), (2, 3, 1, 0)).reshape(K1 * K1, c1)
    w1 = jnp.zeros((KP1, CP), f32).at[:K1 * K1, :c1].set(w1).astype(bf16)
    b1 = jnp.zeros((1, CP), f32).at[0, :c1].set(params["b_conv1"].astype(f32))

    w2 = jnp.transpose(params["w_conv2"].astype(f32), (2, 3, 1, 0)).reshape(K2 * K2, c1, c2)
    w2 = jnp.zeros((K2 * K2, CP, CP), f32).at[:, :c1, :c2].set(w2).astype(bf16)
    b2 = jnp.zeros((1, CP), f32).at[0, :c2].set(params["b_conv2"].astype(f32))

    # torch fc1 flat index = c*16 + s (s = P*4 + Q); kernel layout wf1[s, c, j].
    wf1 = params["w_fc1"].astype(f32).reshape(fc, c2, sp2).transpose(2, 1, 0)
    wf1 = jnp.zeros((sp2, CP, CP), f32).at[:, :c2, :fc].set(wf1).astype(bf16)
    bf1 = jnp.zeros((1, CP), f32).at[0, :fc].set(params["b_fc1"].astype(f32))

    wf2 = jnp.zeros((CP, CP), f32).at[:fc, :ncls].set(
        params["w_fc2"].astype(f32).T).astype(bf16)
    bf2 = jnp.full((1, CP), -1e30, f32).at[0, :ncls].set(params["b_fc2"].astype(f32))
    return dict(w1=w1, b1=b1, w2=w2, b2=b2, wf1=wf1, bf1=bf1, wf2=wf2, bf2=bf2)


# --------------------------- input-side plumbing --------------------------- #

def _conv1_phase_patches(x_img, nt):
    """x_img: (N, 28, 28) f32 -> (N//nt, 4, 256*nt, 32) bf16 conv1 phase patches.

    out[t, ey*2+ex, (da*2+db)*64*nt + (u*8+v)*nt + n, ky*5+kx] =
        x[t*nt + n, 4u + 2ey + da + ky, 4v + 2ex + db + kx]
    Rows with u >= 6 or v >= 6 are zero padding the kernel never reads.
    """
    # TODO(synk): for large batches build these patches in-kernel from the raw
    # (N, 32, 32) image to cut the ~21x (bf16) im2col HBM read amplification.
    N = x_img.shape[0]
    ho = x_img.shape[1] - K1 + 1                                    # 24
    cols = [x_img[:, dy:dy + ho, dx:dx + ho]
            for dy in range(K1) for dx in range(K1)]
    pf = jnp.stack(cols, axis=-1)                                   # (N,24,24,25)
    pf = jnp.pad(pf, ((0, 0), (0, 32 - ho), (0, 32 - ho), (0, 0)))  # (N,32,32,25)
    mats = []
    for ey in range(2):
        for ex in range(2):
            for da in range(2):
                for db in range(2):
                    sub = pf[:, 2 * ey + da::4, 2 * ex + db::4, :]  # (N,8,8,25)
                    mats.append(jnp.transpose(sub, (1, 2, 0, 3)))   # (8,8,N,25)
    p = jnp.stack(mats, axis=0)                                     # (16,8,8,N,25)
    p = jnp.pad(p, ((0, 0), (0, 0), (0, 0), (0, 0), (0, KP1 - K1 * K1)))
    p = p.reshape(16, 8, 8, N // nt, nt, KP1)
    p = jnp.transpose(p, (3, 0, 1, 2, 4, 5))                        # (T,16,8,8,nt,32)
    return p.reshape(N // nt, 4, 256 * nt, KP1).astype(jnp.bfloat16)


def _pick_tile(n):
    if n <= 8:
        return n
    assert n % 8 == 0, "batches > 8 must be a multiple of 8 for the batch grid"
    return 8


@jax.jit
def experiment_network_forward(x_nchw, prep):
    """Eval-mode forward of ExperimentNetwork (dropouts are identity)."""
    N = x_nchw.shape[0]
    nt = _pick_tile(N)
    n_tiles = N // nt
    p1 = _conv1_phase_patches(x_nchw[:, 0].astype(jnp.float32), nt)

    flops = 2 * N * (4 * 256 * KP1 * CP      # conv1: 4 tall plane matmuls
                     + 50 * 32 * CP * CP     # conv2: 50 two-phase tap matmuls
                     + 16 * CP * CP          # fc1
                     + CP * CP)              # fc2
    weight_bytes = sum(int(v.size) * v.dtype.itemsize for v in prep.values())
    scratch_bytes = 6 * 6 * 16 * nt * CP * 2 + 2 * 32 * nt * CP * 4
    bytes_accessed = (int(p1.size) * 2 + weight_bytes + N * CP * 4
                      + 2 * n_tiles * scratch_bytes)

    def const_spec(shape):
        return pl.BlockSpec(shape, lambda t, _nd=len(shape): (0,) * _nd)

    out_pad = pl.pallas_call(
        _fused_forward_kernel,
        out_shape=jax.ShapeDtypeStruct((N, CP), jnp.float32),
        grid_spec=pltpu.PrefetchScalarGridSpec(
            num_scalar_prefetch=0,
            grid=(n_tiles,),
            in_specs=[
                pl.BlockSpec((1, 4, 256 * nt, KP1), lambda t: (t, 0, 0, 0)),
                const_spec(prep["w1"].shape), const_spec(prep["b1"].shape),
                const_spec(prep["w2"].shape), const_spec(prep["b2"].shape),
                const_spec(prep["wf1"].shape), const_spec(prep["bf1"].shape),
                const_spec(prep["wf2"].shape), const_spec(prep["bf2"].shape),
            ],
            out_specs=pl.BlockSpec((nt, CP), lambda t: (t, 0)),
            scratch_shapes=[pltpu.VMEM((6, 6, 16 * nt, CP), jnp.bfloat16),
                            pltpu.VMEM((2, 32 * nt, CP), jnp.float32)],
        ),
        compiler_params=pltpu.CompilerParams(
            dimension_semantics=("parallel",),
            vmem_limit_bytes=32 * 1024 * 1024,
        ),
        cost_estimate=pl.CostEstimate(flops=flops,
                                      transcendentals=N * CP,
                                      bytes_accessed=bytes_accessed),
    )(p1, prep["w1"], prep["b1"], prep["w2"], prep["b2"],
      prep["wf1"], prep["bf1"], prep["wf2"], prep["bf2"])
    return out_pad[:, :10]


# ------------------------- pure-JAX reference model ------------------------ #

def reference_forward(x_nchw, params):
    dn = lax.conv_dimension_numbers(x_nchw.shape, params["w_conv1"].shape,
                                    ("NCHW", "OIHW", "NCHW"))
    y = lax.conv_general_dilated(x_nchw, params["w_conv1"], (1, 1), "VALID",
                                 dimension_numbers=dn, precision="highest")
    y = jax.nn.relu(y + params["b_conv1"].reshape(1, -1, 1, 1))
    y = lax.reduce_window(y, -jnp.inf, lax.max, (1, 1, 2, 2), (1, 1, 2, 2),
                          "VALID")
    dn2 = lax.conv_dimension_numbers(y.shape, params["w_conv2"].shape,
                                     ("NCHW", "OIHW", "NCHW"))
    y = lax.conv_general_dilated(y, params["w_conv2"], (1, 1), "VALID",
                                 dimension_numbers=dn2, precision="highest")
    y = jax.nn.relu(y + params["b_conv2"].reshape(1, -1, 1, 1))
    y = lax.reduce_window(y, -jnp.inf, lax.max, (1, 1, 2, 2), (1, 1, 2, 2),
                          "VALID")
    flat = y.reshape(y.shape[0], -1)
    h = jax.nn.relu(flat @ params["w_fc1"].T + params["b_fc1"])
    z = h @ params["w_fc2"].T + params["b_fc2"]
    return jax.nn.log_softmax(z, axis=1)


# ---------------------------------- main ----------------------------------- #

if __name__ == "__main__":
    key = jax.random.PRNGKey(0)
    ks = jax.random.split(key, 9)

    # Default ExperimentNetwork: conv_filters=[10,20], filter_sizes=[5,5],
    # fc_nodes=50, pool_size=2 -> flattened_size = 20*4*4 = 320 (28x28 input).
    params = {
        "w_conv1": 0.1 * jax.random.normal(ks[0], (10, 1, 5, 5), jnp.float32),
        "b_conv1": 0.1 * jax.random.normal(ks[1], (10,), jnp.float32),
        "w_conv2": 0.1 * jax.random.normal(ks[2], (20, 10, 5, 5), jnp.float32),
        "b_conv2": 0.1 * jax.random.normal(ks[3], (20,), jnp.float32),
        "w_fc1":   0.05 * jax.random.normal(ks[4], (50, 320), jnp.float32),
        "b_fc1":   0.05 * jax.random.normal(ks[5], (50,), jnp.float32),
        "w_fc2":   0.1 * jax.random.normal(ks[6], (10, 50), jnp.float32),
        "b_fc2":   0.1 * jax.random.normal(ks[7], (10,), jnp.float32),
    }

    x = jax.random.normal(ks[8], (2, 1, 28, 28), jnp.float32)

    prep = jax.tree_util.tree_map(jax.block_until_ready, prepare_params(params))

    out = jax.block_until_ready(experiment_network_forward(x, prep))
    ref = jax.block_until_ready(reference_forward(x, params))

    assert out.shape == (2, 10), out.shape
    assert jnp.allclose(out, ref, atol=1e-2, rtol=1e-2), (
        f"max abs err {jnp.max(jnp.abs(out - ref))}")

    print("KERNEL_OK")
</pallas_src>

<mosaic_0001>
module attributes {stable_mosaic.version = 11 : i64} {
  func.func @_fused_forward_kernel(%arg0: i32, %arg1: memref<1x4x512x32xbf16, #tpu.memory_space<vmem>>, %arg2: memref<32x128xbf16, #tpu.memory_space<vmem>>, %arg3: memref<1x128xf32, #tpu.memory_space<vmem>>, %arg4: memref<25x128x128xbf16, #tpu.memory_space<vmem>>, %arg5: memref<1x128xf32, #tpu.memory_space<vmem>>, %arg6: memref<16x128x128xbf16, #tpu.memory_space<vmem>>, %arg7: memref<1x128xf32, #tpu.memory_space<vmem>>, %arg8: memref<128x128xbf16, #tpu.memory_space<vmem>>, %arg9: memref<1x128xf32, #tpu.memory_space<vmem>>, %arg10: memref<2x128xf32, #tpu.memory_space<vmem>>, %arg11: memref<6x6x32x128xbf16, #tpu.memory_space<vmem>>, %arg12: memref<2x64x128xf32, #tpu.memory_space<vmem>>) attributes {dimension_semantics = [#tpu.dimension_semantics<parallel>], iteration_bounds = array<i64: 1>, scalar_prefetch = 0 : i64, scratch_operands = 2 : i64, tpu.core_type = #tpu.core_type<tc>, window_params = [{transform_indices = @transform_0, window_bounds = array<i64: 1, 4, 512, 32>}, {pipeline_mode = #tpu.pipeline_mode<synchronous>, transform_indices = @transform_1, window_bounds = array<i64: 32, 128>}, {pipeline_mode = #tpu.pipeline_mode<synchronous>, transform_indices = @transform_2, window_bounds = array<i64: 1, 128>}, {pipeline_mode = #tpu.pipeline_mode<synchronous>, transform_indices = @transform_3, window_bounds = array<i64: 25, 128, 128>}, {pipeline_mode = #tpu.pipeline_mode<synchronous>, transform_indices = @transform_4, window_bounds = array<i64: 1, 128>}, {pipeline_mode = #tpu.pipeline_mode<synchronous>, transform_indices = @transform_5, window_bounds = array<i64: 16, 128, 128>}, {pipeline_mode = #tpu.pipeline_mode<synchronous>, transform_indices = @transform_6, window_bounds = array<i64: 1, 128>}, {pipeline_mode = #tpu.pipeline_mode<synchronous>, transform_indices = @transform_7, window_bounds = array<i64: 128, 128>}, {pipeline_mode = #tpu.pipeline_mode<synchronous>, transform_indices = @transform_8, window_bounds = array<i64: 1, 128>}, {transform_indices = @transform_9, window_bounds = array<i64: 2, 128>}]} {
    %c0 = arith.constant 0 : index
    %c0_0 = arith.constant 0 : index
    %0 = vector.load %arg2[%c0, %c0_0] : memref<32x128xbf16, #tpu.memory_space<vmem>>, vector<32x128xbf16>
    %c0_1 = arith.constant 0 : index
    %c0_2 = arith.constant 0 : index
    %1 = vector.load %arg3[%c0_1, %c0_2] : memref<1x128xf32, #tpu.memory_space<vmem>>, vector<1x128xf32>
    %c0_3 = arith.constant 0 : index
    %c0_4 = arith.constant 0 : index
    %c0_5 = arith.constant 0 : index
    %c0_6 = arith.constant 0 : index
    %2 = vector.load %arg1[%c0_3, %c0_4, %c0_5, %c0_6] : memref<1x4x512x32xbf16, #tpu.memory_space<vmem>>, vector<1x1x512x32xbf16>
    %3 = vector.shape_cast %2 : vector<1x1x512x32xbf16> to vector<512x32xbf16>
    %cst = arith.constant dense<0.000000e+00> : vector<512x128xf32>
    %4 = tpu.matmul %3, %0, %cst {dimension_numbers = #tpu.dot_dimension_numbers<[1], [0], [0], [1], [0, 0, 1, 1], [], []>} : vector<512x32xbf16>, vector<32x128xbf16>, vector<512x128xf32> -> vector<512x128xf32>
    %5 = vector.shape_cast %4 : vector<512x128xf32> to vector<4x128x128xf32>
    %cst_7 = arith.constant dense<0xFF800000> : vector<128x128xf32>
    %6 = vector.multi_reduction <maximumf>, %5, %cst_7 [0] : vector<4x128x128xf32> to vector<128x128xf32>
    %7 = vector.broadcast %1 : vector<1x128xf32> to vector<128x128xf32>
    %8 = arith.addf %6, %7 : vector<128x128xf32>
    %cst_8 = arith.constant 0.000000e+00 : f32
    %9 = vector.broadcast %cst_8 : f32 to vector<128x128xf32>
    %10 = arith.maximumf %8, %9 : vector<128x128xf32>
    %11 = vector.shape_cast %10 : vector<128x128xf32> to vector<8x16x128xf32>
    %12 = vector.extract_strided_slice %11 {offsets = [0, 0, 0], sizes = [4, 8, 128], strides = [1, 1, 1]} : vector<8x16x128xf32> to vector<4x8x128xf32>
    %13 = vector.shape_cast %12 : vector<4x8x128xf32> to vector<32x128xf32>
    %14 = arith.truncf %13 : vector<32x128xf32> to vector<32x128xbf16>
    %c0_9 = arith.constant 0 : index
    %c0_10 = arith.constant 0 : index
    %c0_11 = arith.constant 0 : index
    %c0_12 = arith.constant 0 : index
    %15 = vector.load %arg11[%c0_9, %c0_10, %c0_11, %c0_12] : memref<6x6x32x128xbf16, #tpu.memory_space<vmem>>, vector<1x1x32x128xbf16>
    %16 = vector.shape_cast %15 : vector<1x1x32x128xbf16> to vector<32x128xbf16>
    %17 = vector.shape_cast %14 : vector<32x128xbf16> to vector<1x1x32x128xbf16>
    tpu.vector_store %arg11[%c0_9, %c0_10, %c0_11, %c0_12], %17 {strides = array<i32>} : memref<6x6x32x128xbf16, #tpu.memory_space<vmem>>, vector<1x1x32x128xbf16>,
    %18 = vector.extract_strided_slice %11 {offsets = [0, 2, 0], sizes = [4, 8, 128], strides = [1, 1, 1]} : vector<8x16x128xf32> to vector<4x8x128xf32>
    %19 = vector.shape_cast %18 : vector<4x8x128xf32> to vector<32x128xf32>
    %20 = arith.truncf %19 : vector<32x128xf32> to vector<32x128xbf16>
    %c0_13 = arith.constant 0 : index
    %c2 = arith.constant 2 : index
    %c0_14 = arith.constant 0 : index
    %c0_15 = arith.constant 0 : index
    %21 = vector.load %arg11[%c0_13, %c2, %c0_14, %c0_15] : memref<6x6x32x128xbf16, #tpu.memory_space<vmem>>, vector<1x1x32x128xbf16>
    %22 = vector.shape_cast %21 : vector<1x1x32x128xbf16> to vector<32x128xbf16>
    %23 = vector.shape_cast %20 : vector<32x128xbf16> to vector<1x1x32x128xbf16>
    tpu.vector_store %arg11[%c0_13, %c2, %c0_14, %c0_15], %23 {strides = array<i32>} : memref<6x6x32x128xbf16, #tpu.memory_space<vmem>>, vector<1x1x32x128xbf16>,
    %24 = vector.extract_strided_slice %11 {offsets = [0, 4, 0], sizes = [4, 8, 128], strides = [1, 1, 1]} : vector<8x16x128xf32> to vector<4x8x128xf32>
    %25 = vector.shape_cast %24 : vector<4x8x128xf32> to vector<32x128xf32>
    %26 = arith.truncf %25 : vector<32x128xf32> to vector<32x128xbf16>
    %c0_16 = arith.constant 0 : index
    %c4 = arith.constant 4 : index
    %c0_17 = arith.constant 0 : index
    %c0_18 = arith.constant 0 : index
    %27 = vector.load %arg11[%c0_16, %c4, %c0_17, %c0_18] : memref<6x6x32x128xbf16, #tpu.memory_space<vmem>>, vector<1x1x32x128xbf16>
    %28 = vector.shape_cast %27 : vector<1x1x32x128xbf16> to vector<32x128xbf16>
    %29 = vector.shape_cast %26 : vector<32x128xbf16> to vector<1x1x32x128xbf16>
    tpu.vector_store %arg11[%c0_16, %c4, %c0_17, %c0_18], %29 {strides = array<i32>} : memref<6x6x32x128xbf16, #tpu.memory_space<vmem>>, vector<1x1x32x128xbf16>,
    %30 = vector.extract_strided_slice %11 {offsets = [1, 0, 0], sizes = [4, 8, 128], strides = [1, 1, 1]} : vector<8x16x128xf32> to vector<4x8x128xf32>
    %31 = vector.shape_cast %30 : vector<4x8x128xf32> to vector<32x128xf32>
    %32 = arith.truncf %31 : vector<32x128xf32> to vector<32x128xbf16>
    %c2_19 = arith.constant 2 : index
    %c0_20 = arith.constant 0 : index
    %c0_21 = arith.constant 0 : index
    %c0_22 = arith.constant 0 : index
    %33 = vector.load %arg11[%c2_19, %c0_20, %c0_21, %c0_22] : memref<6x6x32x128xbf16, #tpu.memory_space<vmem>>, vector<1x1x32x128xbf16>
    %34 = vector.shape_cast %33 : vector<1x1x32x128xbf16> to vector<32x128xbf16>
    %35 = vector.shape_cast %32 : vector<32x128xbf16> to vector<1x1x32x128xbf16>
    tpu.vector_store %arg11[%c2_19, %c0_20, %c0_21, %c0_22], %35 {strides = array<i32>} : memref<6x6x32x128xbf16, #tpu.memory_space<vmem>>, vector<1x1x32x128xbf16>,
    %36 = vector.extract_strided_slice %11 {offsets = [1, 2, 0], sizes = [4, 8, 128], strides = [1, 1, 1]} : vector<8x16x128xf32> to vector<4x8x128xf32>
    %37 = vector.shape_cast %36 : vector<4x8x128xf32> to vector<32x128xf32>
    %38 = arith.truncf %37 : vector<32x128xf32> to vector<32x128xbf16>
    %c2_23 = arith.constant 2 : index
    %c2_24 = arith.constant 2 : index
    %c0_25 = arith.constant 0 : index
    %c0_26 = arith.constant 0 : index
    %39 = vector.load %arg11[%c2_23, %c2_24, %c0_25, %c0_26] : memref<6x6x32x128xbf16, #tpu.memory_space<vmem>>, vector<1x1x32x128xbf16>
    %40 = vector.shape_cast %39 : vector<1x1x32x128xbf16> to vector<32x128xbf16>
    %41 = vector.shape_cast %38 : vector<32x128xbf16> to vector<1x1x32x128xbf16>
    tpu.vector_store %arg11[%c2_23, %c2_24, %c0_25, %c0_26], %41 {strides = array<i32>} : memref<6x6x32x128xbf16, #tpu.memory_space<vmem>>, vector<1x1x32x128xbf16>,
    %42 = vector.extract_strided_slice %11 {offsets = [1, 4, 0], sizes = [4, 8, 128], strides = [1, 1, 1]} : vector<8x16x128xf32> to vector<4x8x128xf32>
    %43 = vector.shape_cast %42 : vector<4x8x128xf32> to vector<32x128xf32>
    %44 = arith.truncf %43 : vector<32x128xf32> to vector<32x128xbf16>
    %c2_27 = arith.constant 2 : index
    %c4_28 = arith.constant 4 : index
    %c0_29 = arith.constant 0 : index
    %c0_30 = arith.constant 0 : index
    %45 = vector.load %arg11[%c2_27, %c4_28, %c0_29, %c0_30] : memref<6x6x32x128xbf16, #tpu.memory_space<vmem>>, vector<1x1x32x128xbf16>
    %46 = vector.shape_cast %45 : vector<1x1x32x128xbf16> to vector<32x128xbf16>
    %47 = vector.shape_cast %44 : vector<32x128xbf16> to vector<1x1x32x128xbf16>
    tpu.vector_store %arg11[%c2_27, %c4_28, %c0_29, %c0_30], %47 {strides = array<i32>} : memref<6x6x32x128xbf16, #tpu.memory_space<vmem>>, vector<1x1x32x128xbf16>,
    %48 = vector.extract_strided_slice %11 {offsets = [2, 0, 0], sizes = [4, 8, 128], strides = [1, 1, 1]} : vector<8x16x128xf32> to vector<4x8x128xf32>
    %49 = vector.shape_cast %48 : vector<4x8x128xf32> to vector<32x128xf32>
    %50 = arith.truncf %49 : vector<32x128xf32> to vector<32x128xbf16>
    %c4_31 = arith.constant 4 : index
    %c0_32 = arith.constant 0 : index
    %c0_33 = arith.constant 0 : index
    %c0_34 = arith.constant 0 : index
    %51 = vector.load %arg11[%c4_31, %c0_32, %c0_33, %c0_34] : memref<6x6x32x128xbf16, #tpu.memory_space<vmem>>, vector<1x1x32x128xbf16>
    %52 = vector.shape_cast %51 : vector<1x1x32x128xbf16> to vector<32x128xbf16>
    %53 = vector.shape_cast %50 : vector<32x128xbf16> to vector<1x1x32x128xbf16>
    tpu.vector_store %arg11[%c4_31, %c0_32, %c0_33, %c0_34], %53 {strides = array<i32>} : memref<6x6x32x128xbf16, #tpu.memory_space<vmem>>, vector<1x1x32x128xbf16>,
    %54 = vector.extract_strided_slice %11 {offsets = [2, 2, 0], sizes = [4, 8, 128], strides = [1, 1, 1]} : vector<8x16x128xf32> to vector<4x8x128xf32>
    %55 = vector.shape_cast %54 : vector<4x8x128xf32> to vector<32x128xf32>
    %56 = arith.truncf %55 : vector<32x128xf32> to vector<32x128xbf16>
    %c4_35 = arith.constant 4 : index
    %c2_36 = arith.constant 2 : index
    %c0_37 = arith.constant 0 : index
    %c0_38 = arith.constant 0 : index
    %57 = vector.load %arg11[%c4_35, %c2_36, %c0_37, %c0_38] : memref<6x6x32x128xbf16, #tpu.memory_space<vmem>>, vector<1x1x32x128xbf16>
    %58 = vector.shape_cast %57 : vector<1x1x32x128xbf16> to vector<32x128xbf16>
    %59 = vector.shape_cast %56 : vector<32x128xbf16> to vector<1x1x32x128xbf16>
    tpu.vector_store %arg11[%c4_35, %c2_36, %c0_37, %c0_38], %59 {strides = array<i32>} : memref<6x6x32x128xbf16, #tpu.memory_space<vmem>>, vector<1x1x32x128xbf16>,
    %60 = vector.extract_strided_slice %11 {offsets = [2, 4, 0], sizes = [4, 8, 128], strides = [1, 1, 1]} : vector<8x16x128xf32> to vector<4x8x128xf32>
    %61 = vector.shape_cast %60 : vector<4x8x128xf32> to vector<32x128xf32>
    %62 = arith.truncf %61 : vector<32x128xf32> to vector<32x128xbf16>
    %c4_39 = arith.constant 4 : index
    %c4_40 = arith.constant 4 : index
    %c0_41 = arith.constant 0 : index
    %c0_42 = arith.constant 0 : index
    %63 = vector.load %arg11[%c4_39, %c4_40, %c0_41, %c0_42] : memref<6x6x32x128xbf16, #tpu.memory_space<vmem>>, vector<1x1x32x128xbf16>
    %64 = vector.shape_cast %63 : vector<1x1x32x128xbf16> to vector<32x128xbf16>
    %65 = vector.shape_cast %62 : vector<32x128xbf16> to vector<1x1x32x128xbf16>
    tpu.vector_store %arg11[%c4_39, %c4_40, %c0_41, %c0_42], %65 {strides = array<i32>} : memref<6x6x32x128xbf16, #tpu.memory_space<vmem>>, vector<1x1x32x128xbf16>,
    %c0_43 = arith.constant 0 : index
    %c1 = arith.constant 1 : index
    %c0_44 = arith.constant 0 : index
    %c0_45 = arith.constant 0 : index
    %66 = vector.load %arg1[%c0_43, %c1, %c0_44, %c0_45] : memref<1x4x512x32xbf16, #tpu.memory_space<vmem>>, vector<1x1x512x32xbf16>
    %67 = vector.shape_cast %66 : vector<1x1x512x32xbf16> to vector<512x32xbf16>
    %cst_46 = arith.constant dense<0.000000e+00> : vector<512x128xf32>
    %68 = tpu.matmul %67, %0, %cst_46 {dimension_numbers = #tpu.dot_dimension_numbers<[1], [0], [0], [1], [0, 0, 1, 1], [], []>} : vector<512x32xbf16>, vector<32x128xbf16>, vector<512x128xf32> -> vector<512x128xf32>
    %69 = vector.shape_cast %68 : vector<512x128xf32> to vector<4x128x128xf32>
    %cst_47 = arith.constant dense<0xFF800000> : vector<128x128xf32>
    %70 = vector.multi_reduction <maximumf>, %69, %cst_47 [0] : vector<4x128x128xf32> to vector<128x128xf32>
    %71 = vector.broadcast %1 : vector<1x128xf32> to vector<128x128xf32>
    %72 = arith.addf %70, %71 : vector<128x128xf32>
    %cst_48 = arith.constant 0.000000e+00 : f32
    %73 = vector.broadcast %cst_48 : f32 to vector<128x128xf32>
    %74 = arith.maximumf %72, %73 : vector<128x128xf32>
    %75 = vector.shape_cast %74 : vector<128x128xf32> to vector<8x16x128xf32>
    %76 = vector.extract_strided_slice %75 {offsets = [0, 0, 0], sizes = [4, 8, 128], strides = [1, 1, 1]} : vector<8x16x128xf32> to vector<4x8x128xf32>
    %77 = vector.shape_cast %76 : vector<4x8x128xf32> to vector<32x128xf32>
    %78 = arith.truncf %77 : vector<32x128xf32> to vector<32x128xbf16>
    %c0_49 = arith.constant 0 : index
    %c1_50 = arith.constant 1 : index
    %c0_51 = arith.constant 0 : index
    %c0_52 = arith.constant 0 : index
    %79 = vector.load %arg11[%c0_49, %c1_50, %c0_51, %c0_52] : memref<6x6x32x128xbf16, #tpu.memory_space<vmem>>, vector<1x1x32x128xbf16>
    %80 = vector.shape_cast %79 : vector<1x1x32x128xbf16> to vector<32x128xbf16>
    %81 = vector.shape_cast %78 : vector<32x128xbf16> to vector<1x1x32x128xbf16>
    tpu.vector_store %arg11[%c0_49, %c1_50, %c0_51, %c0_52], %81 {strides = array<i32>} : memref<6x6x32x128xbf16, #tpu.memory_space<vmem>>, vector<1x1x32x128xbf16>,
    %82 = vector.extract_strided_slice %75 {offsets = [0, 2, 0], sizes = [4, 8, 128], strides = [1, 1, 1]} : vector<8x16x128xf32> to vector<4x8x128xf32>
    %83 = vector.shape_cast %82 : vector<4x8x128xf32> to vector<32x128xf32>
    %84 = arith.truncf %83 : vector<32x128xf32> to vector<32x128xbf16>
    %c0_53 = arith.constant 0 : index
    %c3 = arith.constant 3 : index
    %c0_54 = arith.constant 0 : index
    %c0_55 = arith.constant 0 : index
    %85 = vector.load %arg11[%c0_53, %c3, %c0_54, %c0_55] : memref<6x6x32x128xbf16, #tpu.memory_space<vmem>>, vector<1x1x32x128xbf16>
    %86 = vector.shape_cast %85 : vector<1x1x32x128xbf16> to vector<32x128xbf16>
    %87 = vector.shape_cast %84 : vector<32x128xbf16> to vector<1x1x32x128xbf16>
    tpu.vector_store %arg11[%c0_53, %c3, %c0_54, %c0_55], %87 {strides = array<i32>} : memref<6x6x32x128xbf16, #tpu.memory_space<vmem>>, vector<1x1x32x128xbf16>,
    %88 = vector.extract_strided_slice %75 {offsets = [0, 4, 0], sizes = [4, 8, 128], strides = [1, 1, 1]} : vector<8x16x128xf32> to vector<4x8x128xf32>
    %89 = vector.shape_cast %88 : vector<4x8x128xf32> to vector<32x128xf32>
    %90 = arith.truncf %89 : vector<32x128xf32> to vector<32x128xbf16>
    %c0_56 = arith.constant 0 : index
    %c5 = arith.constant 5 : index
    %c0_57 = arith.constant 0 : index
    %c0_58 = arith.constant 0 : index
    %91 = vector.load %arg11[%c0_56, %c5, %c0_57, %c0_58] : memref<6x6x32x128xbf16, #tpu.memory_space<vmem>>, vector<1x1x32x128xbf16>
    %92 = vector.shape_cast %91 : vector<1x1x32x128xbf16> to vector<32x128xbf16>
    %93 = vector.shape_cast %90 : vector<32x128xbf16> to vector<1x1x32x128xbf16>
    tpu.vector_store %arg11[%c0_56, %c5, %c0_57, %c0_58], %93 {strides = array<i32>} : memref<6x6x32x128xbf16, #tpu.memory_space<vmem>>, vector<1x1x32x128xbf16>,
    %94 = vector.extract_strided_slice %75 {offsets = [1, 0, 0], sizes = [4, 8, 128], strides = [1, 1, 1]} : vector<8x16x128xf32> to vector<4x8x128xf32>
    %95 = vector.shape_cast %94 : vector<4x8x128xf32> to vector<32x128xf32>
    %96 = arith.truncf %95 : vector<32x128xf32> to vector<32x128xbf16>
    %c2_59 = arith.constant 2 : index
    %c1_60 = arith.constant 1 : index
    %c0_61 = arith.constant 0 : index
    %c0_62 = arith.constant 0 : index
    %97 = vector.load %arg11[%c2_59, %c1_60, %c0_61, %c0_62] : memref<6x6x32x128xbf16, #tpu.memory_space<vmem>>, vector<1x1x32x128xbf16>
    %98 = vector.shape_cast %97 : vector<1x1x32x128xbf16> to vector<32x128xbf16>
    %99 = vector.shape_cast %96 : vector<32x128xbf16> to vector<1x1x32x128xbf16>
    tpu.vector_store %arg11[%c2_59, %c1_60, %c0_61, %c0_62], %99 {strides = array<i32>} : memref<6x6x32x128xbf16, #tpu.memory_space<vmem>>, vector<1x1x32x128xbf16>,
    %100 = vector.extract_strided_slice %75 {offsets = [1, 2, 0], sizes = [4, 8, 128], strides = [1, 1, 1]} : vector<8x16x128xf32> to vector<4x8x128xf32>
    %101 = vector.shape_cast %100 : vector<4x8x128xf32> to vector<32x128xf32>
    %102 = arith.truncf %101 : vector<32x128xf32> to vector<32x128xbf16>
    %c2_63 = arith.constant 2 : index
    %c3_64 = arith.constant 3 : index
    %c0_65 = arith.constant 0 : index
    %c0_66 = arith.constant 0 : index
    %103 = vector.load %arg11[%c2_63, %c3_64, %c0_65, %c0_66] : memref<6x6x32x128xbf16, #tpu.memory_space<vmem>>, vector<1x1x32x128xbf16>
    %104 = vector.shape_cast %103 : vector<1x1x32x128xbf16> to vector<32x128xbf16>
    %105 = vector.shape_cast %102 : vector<32x128xbf16> to vector<1x1x32x128xbf16>
    tpu.vector_store %arg11[%c2_63, %c3_64, %c0_65, %c0_66], %105 {strides = array<i32>} : memref<6x6x32x128xbf16, #tpu.memory_space<vmem>>, vector<1x1x32x128xbf16>,
    %106 = vector.extract_strided_slice %75 {offsets = [1, 4, 0], sizes = [4, 8, 128], strides = [1, 1, 1]} : vector<8x16x128xf32> to vector<4x8x128xf32>
    %107 = vector.shape_cast %106 : vector<4x8x128xf32> to vector<32x128xf32>
    %108 = arith.truncf %107 : vector<32x128xf32> to vector<32x128xbf16>
    %c2_67 = arith.constant 2 : index
    %c5_68 = arith.constant 5 : index
    %c0_69 = arith.constant 0 : index
    %c0_70 = arith.constant 0 : index
    %109 = vector.load %arg11[%c2_67, %c5_68, %c0_69, %c0_70] : memref<6x6x32x128xbf16, #tpu.memory_space<vmem>>, vector<1x1x32x128xbf16>
    %110 = vector.shape_cast %109 : vector<1x1x32x128xbf16> to vector<32x128xbf16>
    %111 = vector.shape_cast %108 : vector<32x128xbf16> to vector<1x1x32x128xbf16>
    tpu.vector_store %arg11[%c2_67, %c5_68, %c0_69, %c0_70], %111 {strides = array<i32>} : memref<6x6x32x128xbf16, #tpu.memory_space<vmem>>, vector<1x1x32x128xbf16>,
    %112 = vector.extract_strided_slice %75 {offsets = [2, 0, 0], sizes = [4, 8, 128], strides = [1, 1, 1]} : vector<8x16x128xf32> to vector<4x8x128xf32>
    %113 = vector.shape_cast %112 : vector<4x8x128xf32> to vector<32x128xf32>
    %114 = arith.truncf %113 : vector<32x128xf32> to vector<32x128xbf16>
    %c4_71 = arith.constant 4 : index
    %c1_72 = arith.constant 1 : index
    %c0_73 = arith.constant 0 : index
    %c0_74 = arith.constant 0 : index
    %115 = vector.load %arg11[%c4_71, %c1_72, %c0_73, %c0_74] : memref<6x6x32x128xbf16, #tpu.memory_space<vmem>>, vector<1x1x32x128xbf16>
    %116 = vector.shape_cast %115 : vector<1x1x32x128xbf16> to vector<32x128xbf16>
    %117 = vector.shape_cast %114 : vector<32x128xbf16> to vector<1x1x32x128xbf16>
    tpu.vector_store %arg11[%c4_71, %c1_72, %c0_73, %c0_74], %117 {strides = array<i32>} : memref<6x6x32x128xbf16, #tpu.memory_space<vmem>>, vector<1x1x32x128xbf16>,
    %118 = vector.extract_strided_slice %75 {offsets = [2, 2, 0], sizes = [4, 8, 128], strides = [1, 1, 1]} : vector<8x16x128xf32> to vector<4x8x128xf32>
    %119 = vector.shape_cast %118 : vector<4x8x128xf32> to vector<32x128xf32>
    %120 = arith.truncf %119 : vector<32x128xf32> to vector<32x128xbf16>
    %c4_75 = arith.constant 4 : index
    %c3_76 = arith.constant 3 : index
    %c0_77 = arith.constant 0 : index
    %c0_78 = arith.constant 0 : index
    %121 = vector.load %arg11[%c4_75, %c3_76, %c0_77, %c0_78] : memref<6x6x32x128xbf16, #tpu.memory_space<vmem>>, vector<1x1x32x128xbf16>
    %122 = vector.shape_cast %121 : vector<1x1x32x128xbf16> to vector<32x128xbf16>
    %123 = vector.shape_cast %120 : vector<32x128xbf16> to vector<1x1x32x128xbf16>
    tpu.vector_store %arg11[%c4_75, %c3_76, %c0_77, %c0_78], %123 {strides = array<i32>} : memref<6x6x32x128xbf16, #tpu.memory_space<vmem>>, vector<1x1x32x128xbf16>,
    %124 = vector.extract_strided_slice %75 {offsets = [2, 4, 0], sizes = [4, 8, 128], strides = [1, 1, 1]} : vector<8x16x128xf32> to vector<4x8x128xf32>
    %125 = vector.shape_cast %124 : vector<4x8x128xf32> to vector<32x128xf32>
    %126 = arith.truncf %125 : vector<32x128xf32> to vector<32x128xbf16>
    %c4_79 = arith.constant 4 : index
    %c5_80 = arith.constant 5 : index
    %c0_81 = arith.constant 0 : index
    %c0_82 = arith.constant 0 : index
    %127 = vector.load %arg11[%c4_79, %c5_80, %c0_81, %c0_82] : memref<6x6x32x128xbf16, #tpu.memory_space<vmem>>, vector<1x1x32x128xbf16>
    %128 = vector.shape_cast %127 : vector<1x1x32x128xbf16> to vector<32x128xbf16>
    %129 = vector.shape_cast %126 : vector<32x128xbf16> to vector<1x1x32x128xbf16>
    tpu.vector_store %arg11[%c4_79, %c5_80, %c0_81, %c0_82], %129 {strides = array<i32>} : memref<6x6x32x128xbf16, #tpu.memory_space<vmem>>, vector<1x1x32x128xbf16>,
    %c0_83 = arith.constant 0 : index
    %c2_84 = arith.constant 2 : index
    %c0_85 = arith.constant 0 : index
    %c0_86 = arith.constant 0 : index
    %130 = vector.load %arg1[%c0_83, %c2_84, %c0_85, %c0_86] : memref<1x4x512x32xbf16, #tpu.memory_space<vmem>>, vector<1x1x512x32xbf16>
    %131 = vector.shape_cast %130 : vector<1x1x512x32xbf16> to vector<512x32xbf16>
    %cst_87 = arith.constant dense<0.000000e+00> : vector<512x128xf32>
    %132 = tpu.matmul %131, %0, %cst_87 {dimension_numbers = #tpu.dot_dimension_numbers<[1], [0], [0], [1], [0, 0, 1, 1], [], []>} : vector<512x32xbf16>, vector<32x128xbf16>, vector<512x128xf32> -> vector<512x128xf32>
    %133 = vector.shape_cast %132 : vector<512x128xf32> to vector<4x128x128xf32>
    %cst_88 = arith.constant dense<0xFF800000> : vector<128x128xf32>
    %134 = vector.multi_reduction <maximumf>, %133, %cst_88 [0] : vector<4x128x128xf32> to vector<128x128xf32>
    %135 = vector.broadcast %1 : vector<1x128xf32> to vector<128x128xf32>
    %136 = arith.addf %134, %135 : vector<128x128xf32>
    %cst_89 = arith.constant 0.000000e+00 : f32
    %137 = vector.broadcast %cst_89 : f32 to vector<128x128xf32>
    %138 = arith.maximumf %136, %137 : vector<128x128xf32>
    %139 = vector.shape_cast %138 : vector<128x128xf32> to vector<8x16x128xf32>
    %140 = vector.extract_strided_slice %139 {offsets = [0, 0, 0], sizes = [4, 8, 128], strides = [1, 1, 1]} : vector<8x16x128xf32> to vector<4x8x128xf32>
    %141 = vector.shape_cast %140 : vector<4x8x128xf32> to vector<32x128xf32>
    %142 = arith.truncf %141 : vector<32x128xf32> to vector<32x128xbf16>
    %c1_90 = arith.constant 1 : index
    %c0_91 = arith.constant 0 : index
    %c0_92 = arith.constant 0 : index
    %c0_93 = arith.constant 0 : index
    %143 = vector.load %arg11[%c1_90, %c0_91, %c0_92, %c0_93] : memref<6x6x32x128xbf16, #tpu.memory_space<vmem>>, vector<1x1x32x128xbf16>
    %144 = vector.shape_cast %143 : vector<1x1x32x128xbf16> to vector<32x128xbf16>
    %145 = vector.shape_cast %142 : vector<32x128xbf16> to vector<1x1x32x128xbf16>
    tpu.vector_store %arg11[%c1_90, %c0_91, %c0_92, %c0_93], %145 {strides = array<i32>} : memref<6x6x32x128xbf16, #tpu.memory_space<vmem>>, vector<1x1x32x128xbf16>,
    %146 = vector.extract_strided_slice %139 {offsets = [0, 2, 0], sizes = [4, 8, 128], strides = [1, 1, 1]} : vector<8x16x128xf32> to vector<4x8x128xf32>
    %147 = vector.shape_cast %146 : vector<4x8x128xf32> to vector<32x128xf32>
    %148 = arith.truncf %147 : vector<32x128xf32> to vector<32x128xbf16>
    %c1_94 = arith.constant 1 : index
    %c2_95 = arith.constant 2 : index
    %c0_96 = arith.constant 0 : index
    %c0_97 = arith.constant 0 : index
    %149 = vector.load %arg11[%c1_94, %c2_95, %c0_96, %c0_97] : memref<6x6x32x128xbf16, #tpu.memory_space<vmem>>, vector<1x1x32x128xbf16>
    %150 = vector.shape_cast %149 : vector<1x1x32x128xbf16> to vector<32x128xbf16>
    %151 = vector.shape_cast %148 : vector<32x128xbf16> to vector<1x1x32x128xbf16>
    tpu.vector_store %arg11[%c1_94, %c2_95, %c0_96, %c0_97], %151 {strides = array<i32>} : memref<6x6x32x128xbf16, #tpu.memory_space<vmem>>, vector<1x1x32x128xbf16>,
    %152 = vector.extract_strided_slice %139 {offsets = [0, 4, 0], sizes = [4, 8, 128], strides = [1, 1, 1]} : vector<8x16x128xf32> to vector<4x8x128xf32>
    %153 = vector.shape_cast %152 : vector<4x8x128xf32> to vector<32x128xf32>
    %154 = arith.truncf %153 : vector<32x128xf32> to vector<32x128xbf16>
    %c1_98 = arith.constant 1 : index
    %c4_99 = arith.constant 4 : index
    %c0_100 = arith.constant 0 : index
    %c0_101 = arith.constant 0 : index
    %155 = vector.load %arg11[%c1_98, %c4_99, %c0_100, %c0_101] : memref<6x6x32x128xbf16, #tpu.memory_space<vmem>>, vector<1x1x32x128xbf16>
    %156 = vector.shape_cast %155 : vector<1x1x32x128xbf16> to vector<32x128xbf16>
    %157 = vector.shape_cast %154 : vector<32x128xbf16> to vector<1x1x32x128xbf16>
    tpu.vector_store %arg11[%c1_98, %c4_99, %c0_100, %c0_101], %157 {strides = array<i32>} : memref<6x6x32x128xbf16, #tpu.memory_space<vmem>>, vector<1x1x32x128xbf16>,
    %158 = vector.extract_strided_slice %139 {offsets = [1, 0, 0], sizes = [4, 8, 128], strides = [1, 1, 1]} : vector<8x16x128xf32> to vector<4x8x128xf32>
    %159 = vector.shape_cast %158 : vector<4x8x128xf32> to vector<32x128xf32>
    %160 = arith.truncf %159 : vector<32x128xf32> to vector<32x128xbf16>
    %c3_102 = arith.constant 3 : index
    %c0_103 = arith.constant 0 : index
    %c0_104 = arith.constant 0 : index
    %c0_105 = arith.constant 0 : index
    %161 = vector.load %arg11[%c3_102, %c0_103, %c0_104, %c0_105] : memref<6x6x32x128xbf16, #tpu.memory_space<vmem>>, vector<1x1x32x128xbf16>
    %162 = vector.shape_cast %161 : vector<1x1x32x128xbf16> to vector<32x128xbf16>
    %163 = vector.shape_cast %160 : vector<32x128xbf16> to vector<1x1x32x128xbf16>
    tpu.vector_store %arg11[%c3_102, %c0_103, %c0_104, %c0_105], %163 {strides = array<i32>} : memref<6x6x32x128xbf16, #tpu.memory_space<vmem>>, vector<1x1x32x128xbf16>,
    %164 = vector.extract_strided_slice %139 {offsets = [1, 2, 0], sizes = [4, 8, 128], strides = [1, 1, 1]} : vector<8x16x128xf32> to vector<4x8x128xf32>
    %165 = vector.shape_cast %164 : vector<4x8x128xf32> to vector<32x128xf32>
    %166 = arith.truncf %165 : vector<32x128xf32> to vector<32x128xbf16>
    %c3_106 = arith.constant 3 : index
    %c2_107 = arith.constant 2 : index
    %c0_108 = arith.constant 0 : index
    %c0_109 = arith.constant 0 : index
    %167 = vector.load %arg11[%c3_106, %c2_107, %c0_108, %c0_109] : memref<6x6x32x128xbf16, #tpu.memory_space<vmem>>, vector<1x1x32x128xbf16>
    %168 = vector.shape_cast %167 : vector<1x1x32x128xbf16> to vector<32x128xbf16>
    %169 = vector.shape_cast %166 : vector<32x128xbf16> to vector<1x1x32x128xbf16>
    tpu.vector_store %arg11[%c3_106, %c2_107, %c0_108, %c0_109], %169 {strides = array<i32>} : memref<6x6x32x128xbf16, #tpu.memory_space<vmem>>, vector<1x1x32x128xbf16>,
    %170 = vector.extract_strided_slice %139 {offsets = [1, 4, 0], sizes = [4, 8, 128], strides = [1, 1, 1]} : vector<8x16x128xf32> to vector<4x8x128xf32>
    %171 = vector.shape_cast %170 : vector<4x8x128xf32> to vector<32x128xf32>
    %172 = arith.truncf %171 : vector<32x128xf32> to vector<32x128xbf16>
    %c3_110 = arith.constant 3 : index
    %c4_111 = arith.constant 4 : index
    %c0_112 = arith.constant 0 : index
    %c0_113 = arith.constant 0 : index
    %173 = vector.load %arg11[%c3_110, %c4_111, %c0_112, %c0_113] : memref<6x6x32x128xbf16, #tpu.memory_space<vmem>>, vector<1x1x32x128xbf16>
    %174 = vector.shape_cast %173 : vector<1x1x32x128xbf16> to vector<32x128xbf16>
    %175 = vector.shape_cast %172 : vector<32x128xbf16> to vector<1x1x32x128xbf16>
    tpu.vector_store %arg11[%c3_110, %c4_111, %c0_112, %c0_113], %175 {strides = array<i32>} : memref<6x6x32x128xbf16, #tpu.memory_space<vmem>>, vector<1x1x32x128xbf16>,
    %176 = vector.extract_strided_slice %139 {offsets = [2, 0, 0], sizes = [4, 8, 128], strides = [1, 1, 1]} : vector<8x16x128xf32> to vector<4x8x128xf32>
    %177 = vector.shape_cast %176 : vector<4x8x128xf32> to vector<32x128xf32>
    %178 = arith.truncf %177 : vector<32x128xf32> to vector<32x128xbf16>
    %c5_114 = arith.constant 5 : index
    %c0_115 = arith.constant 0 : index
    %c0_116 = arith.constant 0 : index
    %c0_117 = arith.constant 0 : index
    %179 = vector.load %arg11[%c5_114, %c0_115, %c0_116, %c0_117] : memref<6x6x32x128xbf16, #tpu.memory_space<vmem>>, vector<1x1x32x128xbf16>
    %180 = vector.shape_cast %179 : vector<1x1x32x128xbf16> to vector<32x128xbf16>
    %181 = vector.shape_cast %178 : vector<32x128xbf16> to vector<1x1x32x128xbf16>
    tpu.vector_store %arg11[%c5_114, %c0_115, %c0_116, %c0_117], %181 {strides = array<i32>} : memref<6x6x32x128xbf16, #tpu.memory_space<vmem>>, vector<1x1x32x128xbf16>,
    %182 = vector.extract_strided_slice %139 {offsets = [2, 2, 0], sizes = [4, 8, 128], strides = [1, 1, 1]} : vector<8x16x128xf32> to vector<4x8x128xf32>
    %183 = vector.shape_cast %182 : vector<4x8x128xf32> to vector<32x128xf32>
    %184 = arith.truncf %183 : vector<32x128xf32> to vector<32x128xbf16>
    %c5_118 = arith.constant 5 : index
    %c2_119 = arith.constant 2 : index
    %c0_120 = arith.constant 0 : index
    %c0_121 = arith.constant 0 : index
    %185 = vector.load %arg11[%c5_118, %c2_119, %c0_120, %c0_121] : memref<6x6x32x128xbf16, #tpu.memory_space<vmem>>, vector<1x1x32x128xbf16>
    %186 = vector.shape_cast %185 : vector<1x1x32x128xbf16> to vector<32x128xbf16>
    %187 = vector.shape_cast %184 : vector<32x128xbf16> to vector<1x1x32x128xbf16>
    tpu.vector_store %arg11[%c5_118, %c2_119, %c0_120, %c0_121], %187 {strides = array<i32>} : memref<6x6x32x128xbf16, #tpu.memory_space<vmem>>, vector<1x1x32x128xbf16>,
    %188 = vector.extract_strided_slice %139 {offsets = [2, 4, 0], sizes = [4, 8, 128], strides = [1, 1, 1]} : vector<8x16x128xf32> to vector<4x8x128xf32>
    %189 = vector.shape_cast %188 : vector<4x8x128xf32> to vector<32x128xf32>
    %190 = arith.truncf %189 : vector<32x128xf32> to vector<32x128xbf16>
    %c5_122 = arith.constant 5 : index
    %c4_123 = arith.constant 4 : index
    %c0_124 = arith.constant 0 : index
    %c0_125 = arith.constant 0 : index
    %191 = vector.load %arg11[%c5_122, %c4_123, %c0_124, %c0_125] : memref<6x6x32x128xbf16, #tpu.memory_space<vmem>>, vector<1x1x32x128xbf16>
    %192 = vector.shape_cast %191 : vector<1x1x32x128xbf16> to vector<32x128xbf16>
    %193 = vector.shape_cast %190 : vector<32x128xbf16> to vector<1x1x32x128xbf16>
    tpu.vector_store %arg11[%c5_122, %c4_123, %c0_124, %c0_125], %193 {strides = array<i32>} : memref<6x6x32x128xbf16, #tpu.memory_space<vmem>>, vector<1x1x32x128xbf16>,
    %c0_126 = arith.constant 0 : index
    %c3_127 = arith.constant 3 : index
    %c0_128 = arith.constant 0 : index
    %c0_129 = arith.constant 0 : index
    %194 = vector.load %arg1[%c0_126, %c3_127, %c0_128, %c0_129] : memref<1x4x512x32xbf16, #tpu.memory_space<vmem>>, vector<1x1x512x32xbf16>
    %195 = vector.shape_cast %194 : vector<1x1x512x32xbf16> to vector<512x32xbf16>
    %cst_130 = arith.constant dense<0.000000e+00> : vector<512x128xf32>
    %196 = tpu.matmul %195, %0, %cst_130 {dimension_numbers = #tpu.dot_dimension_numbers<[1], [0], [0], [1], [0, 0, 1, 1], [], []>} : vector<512x32xbf16>, vector<32x128xbf16>, vector<512x128xf32> -> vector<512x128xf32>
    %197 = vector.shape_cast %196 : vector<512x128xf32> to vector<4x128x128xf32>
    %cst_131 = arith.constant dense<0xFF800000> : vector<128x128xf32>
    %198 = vector.multi_reduction <maximumf>, %197, %cst_131 [0] : vector<4x128x128xf32> to vector<128x128xf32>
    %199 = vector.broadcast %1 : vector<1x128xf32> to vector<128x128xf32>
    %200 = arith.addf %198, %199 : vector<128x128xf32>
    %cst_132 = arith.constant 0.000000e+00 : f32
    %201 = vector.broadcast %cst_132 : f32 to vector<128x128xf32>
    %202 = arith.maximumf %200, %201 : vector<128x128xf32>
    %203 = vector.shape_cast %202 : vector<128x128xf32> to vector<8x16x128xf32>
    %204 = vector.extract_strided_slice %203 {offsets = [0, 0, 0], sizes = [4, 8, 128], strides = [1, 1, 1]} : vector<8x16x128xf32> to vector<4x8x128xf32>
    %205 = vector.shape_cast %204 : vector<4x8x128xf32> to vector<32x128xf32>
    %206 = arith.truncf %205 : vector<32x128xf32> to vector<32x128xbf16>
    %c1_133 = arith.constant 1 : index
    %c1_134 = arith.constant 1 : index
    %c0_135 = arith.constant 0 : index
    %c0_136 = arith.constant 0 : index
    %207 = vector.load %arg11[%c1_133, %c1_134, %c0_135, %c0_136] : memref<6x6x32x128xbf16, #tpu.memory_space<vmem>>, vector<1x1x32x128xbf16>
    %208 = vector.shape_cast %207 : vector<1x1x32x128xbf16> to vector<32x128xbf16>
    %209 = vector.shape_cast %206 : vector<32x128xbf16> to vector<1x1x32x128xbf16>
    tpu.vector_store %arg11[%c1_133, %c1_134, %c0_135, %c0_136], %209 {strides = array<i32>} : memref<6x6x32x128xbf16, #tpu.memory_space<vmem>>, vector<1x1x32x128xbf16>,
    %210 = vector.extract_strided_slice %203 {offsets = [0, 2, 0], sizes = [4, 8, 128], strides = [1, 1, 1]} : vector<8x16x128xf32> to vector<4x8x128xf32>
    %211 = vector.shape_cast %210 : vector<4x8x128xf32> to vector<32x128xf32>
    %212 = arith.truncf %211 : vector<32x128xf32> to vector<32x128xbf16>
    %c1_137 = arith.constant 1 : index
    %c3_138 = arith.constant 3 : index
    %c0_139 = arith.constant 0 : index
    %c0_140 = arith.constant 0 : index
    %213 = vector.load %arg11[%c1_137, %c3_138, %c0_139, %c0_140] : memref<6x6x32x128xbf16, #tpu.memory_space<vmem>>, vector<1x1x32x128xbf16>
    %214 = vector.shape_cast %213 : vector<1x1x32x128xbf16> to vector<32x128xbf16>
    %215 = vector.shape_cast %212 : vector<32x128xbf16> to vector<1x1x32x128xbf16>
    tpu.vector_store %arg11[%c1_137, %c3_138, %c0_139, %c0_140], %215 {strides = array<i32>} : memref<6x6x32x128xbf16, #tpu.memory_space<vmem>>, vector<1x1x32x128xbf16>,
    %216 = vector.extract_strided_slice %203 {offsets = [0, 4, 0], sizes = [4, 8, 128], strides = [1, 1, 1]} : vector<8x16x128xf32> to vector<4x8x128xf32>
    %217 = vector.shape_cast %216 : vector<4x8x128xf32> to vector<32x128xf32>
    %218 = arith.truncf %217 : vector<32x128xf32> to vector<32x128xbf16>
    %c1_141 = arith.constant 1 : index
    %c5_142 = arith.constant 5 : index
    %c0_143 = arith.constant 0 : index
    %c0_144 = arith.constant 0 : index
    %219 = vector.load %arg11[%c1_141, %c5_142, %c0_143, %c0_144] : memref<6x6x32x128xbf16, #tpu.memory_space<vmem>>, vector<1x1x32x128xbf16>
    %220 = vector.shape_cast %219 : vector<1x1x32x128xbf16> to vector<32x128xbf16>
    %221 = vector.shape_cast %218 : vector<32x128xbf16> to vector<1x1x32x128xbf16>
    tpu.vector_store %arg11[%c1_141, %c5_142, %c0_143, %c0_144], %221 {strides = array<i32>} : memref<6x6x32x128xbf16, #tpu.memory_space<vmem>>, vector<1x1x32x128xbf16>,
    %222 = vector.extract_strided_slice %203 {offsets = [1, 0, 0], sizes = [4, 8, 128], strides = [1, 1, 1]} : vector<8x16x128xf32> to vector<4x8x128xf32>
    %223 = vector.shape_cast %222 : vector<4x8x128xf32> to vector<32x128xf32>
    %224 = arith.truncf %223 : vector<32x128xf32> to vector<32x128xbf16>
    %c3_145 = arith.constant 3 : index
    %c1_146 = arith.constant 1 : index
    %c0_147 = arith.constant 0 : index
    %c0_148 = arith.constant 0 : index
    %225 = vector.load %arg11[%c3_145, %c1_146, %c0_147, %c0_148] : memref<6x6x32x128xbf16, #tpu.memory_space<vmem>>, vector<1x1x32x128xbf16>
    %226 = vector.shape_cast %225 : vector<1x1x32x128xbf16> to vector<32x128xbf16>
    %227 = vector.shape_cast %224 : vector<32x128xbf16> to vector<1x1x32x128xbf16>
    tpu.vector_store %arg11[%c3_145, %c1_146, %c0_147, %c0_148], %227 {strides = array<i32>} : memref<6x6x32x128xbf16, #tpu.memory_space<vmem>>, vector<1x1x32x128xbf16>,
    %228 = vector.extract_strided_slice %203 {offsets = [1, 2, 0], sizes = [4, 8, 128], strides = [1, 1, 1]} : vector<8x16x128xf32> to vector<4x8x128xf32>
    %229 = vector.shape_cast %228 : vector<4x8x128xf32> to vector<32x128xf32>
    %230 = arith.truncf %229 : vector<32x128xf32> to vector<32x128xbf16>
    %c3_149 = arith.constant 3 : index
    %c3_150 = arith.constant 3 : index
    %c0_151 = arith.constant 0 : index
    %c0_152 = arith.constant 0 : index
    %231 = vector.load %arg11[%c3_149, %c3_150, %c0_151, %c0_152] : memref<6x6x32x128xbf16, #tpu.memory_space<vmem>>, vector<1x1x32x128xbf16>
    %232 = vector.shape_cast %231 : vector<1x1x32x128xbf16> to vector<32x128xbf16>
    %233 = vector.shape_cast %230 : vector<32x128xbf16> to vector<1x1x32x128xbf16>
    tpu.vector_store %arg11[%c3_149, %c3_150, %c0_151, %c0_152], %233 {strides = array<i32>} : memref<6x6x32x128xbf16, #tpu.memory_space<vmem>>, vector<1x1x32x128xbf16>,
    %234 = vector.extract_strided_slice %203 {offsets = [1, 4, 0], sizes = [4, 8, 128], strides = [1, 1, 1]} : vector<8x16x128xf32> to vector<4x8x128xf32>
    %235 = vector.shape_cast %234 : vector<4x8x128xf32> to vector<32x128xf32>
    %236 = arith.truncf %235 : vector<32x128xf32> to vector<32x128xbf16>
    %c3_153 = arith.constant 3 : index
    %c5_154 = arith.constant 5 : index
    %c0_155 = arith.constant 0 : index
    %c0_156 = arith.constant 0 : index
    %237 = vector.load %arg11[%c3_153, %c5_154, %c0_155, %c0_156] : memref<6x6x32x128xbf16, #tpu.memory_space<vmem>>, vector<1x1x32x128xbf16>
    %238 = vector.shape_cast %237 : vector<1x1x32x128xbf16> to vector<32x128xbf16>
    %239 = vector.shape_cast %236 : vector<32x128xbf16> to vector<1x1x32x128xbf16>
    tpu.vector_store %arg11[%c3_153, %c5_154, %c0_155, %c0_156], %239 {strides = array<i32>} : memref<6x6x32x128xbf16, #tpu.memory_space<vmem>>, vector<1x1x32x128xbf16>,
    %240 = vector.extract_strided_slice %203 {offsets = [2, 0, 0], sizes = [4, 8, 128], strides = [1, 1, 1]} : vector<8x16x128xf32> to vector<4x8x128xf32>
    %241 = vector.shape_cast %240 : vector<4x8x128xf32> to vector<32x128xf32>
    %242 = arith.truncf %241 : vector<32x128xf32> to vector<32x128xbf16>
    %c5_157 = arith.constant 5 : index
    %c1_158 = arith.constant 1 : index
    %c0_159 = arith.constant 0 : index
    %c0_160 = arith.constant 0 : index
    %243 = vector.load %arg11[%c5_157, %c1_158, %c0_159, %c0_160] : memref<6x6x32x128xbf16, #tpu.memory_space<vmem>>, vector<1x1x32x128xbf16>
    %244 = vector.shape_cast %243 : vector<1x1x32x128xbf16> to vector<32x128xbf16>
    %245 = vector.shape_cast %242 : vector<32x128xbf16> to vector<1x1x32x128xbf16>
    tpu.vector_store %arg11[%c5_157, %c1_158, %c0_159, %c0_160], %245 {strides = array<i32>} : memref<6x6x32x128xbf16, #tpu.memory_space<vmem>>, vector<1x1x32x128xbf16>,
    %246 = vector.extract_strided_slice %203 {offsets = [2, 2, 0], sizes = [4, 8, 128], strides = [1, 1, 1]} : vector<8x16x128xf32> to vector<4x8x128xf32>
    %247 = vector.shape_cast %246 : vector<4x8x128xf32> to vector<32x128xf32>
    %248 = arith.truncf %247 : vector<32x128xf32> to vector<32x128xbf16>
    %c5_161 = arith.constant 5 : index
    %c3_162 = arith.constant 3 : index
    %c0_163 = arith.constant 0 : index
    %c0_164 = arith.constant 0 : index
    %249 = vector.load %arg11[%c5_161, %c3_162, %c0_163, %c0_164] : memref<6x6x32x128xbf16, #tpu.memory_space<vmem>>, vector<1x1x32x128xbf16>
    %250 = vector.shape_cast %249 : vector<1x1x32x128xbf16> to vector<32x128xbf16>
    %251 = vector.shape_cast %248 : vector<32x128xbf16> to vector<1x1x32x128xbf16>
    tpu.vector_store %arg11[%c5_161, %c3_162, %c0_163, %c0_164], %251 {strides = array<i32>} : memref<6x6x32x128xbf16, #tpu.memory_space<vmem>>, vector<1x1x32x128xbf16>,
    %252 = vector.extract_strided_slice %203 {offsets = [2, 4, 0], sizes = [4, 8, 128], strides = [1, 1, 1]} : vector<8x16x128xf32> to vector<4x8x128xf32>
    %253 = vector.shape_cast %252 : vector<4x8x128xf32> to vector<32x128xf32>
    %254 = arith.truncf %253 : vector<32x128xf32> to vector<32x128xbf16>
    %c5_165 = arith.constant 5 : index
    %c5_166 = arith.constant 5 : index
    %c0_167 = arith.constant 0 : index
    %c0_168 = arith.constant 0 : index
    %255 = vector.load %arg11[%c5_165, %c5_166, %c0_167, %c0_168] : memref<6x6x32x128xbf16, #tpu.memory_space<vmem>>, vector<1x1x32x128xbf16>
    %256 = vector.shape_cast %255 : vector<1x1x32x128xbf16> to vector<32x128xbf16>
    %257 = vector.shape_cast %254 : vector<32x128xbf16> to vector<1x1x32x128xbf16>
    tpu.vector_store %arg11[%c5_165, %c5_166, %c0_167, %c0_168], %257 {strides = array<i32>} : memref<6x6x32x128xbf16, #tpu.memory_space<vmem>>, vector<1x1x32x128xbf16>,
    %c0_169 = arith.constant 0 : index
    %c0_170 = arith.constant 0 : index
    %c0_171 = arith.constant 0 : index
    %c0_172 = arith.constant 0 : index
    %258 = vector.load %arg11[%c0_169, %c0_170, %c0_171, %c0_172] : memref<6x6x32x128xbf16, #tpu.memory_space<vmem>>, vector<1x2x32x128xbf16>
    %259 = vector.shape_cast %258 : vector<1x2x32x128xbf16> to vector<2x32x128xbf16>
    %260 = vector.shape_cast %259 : vector<2x32x128xbf16> to vector<64x128xbf16>
    %c0_173 = arith.constant 0 : index
    %c0_174 = arith.constant 0 : index
    %c0_175 = arith.constant 0 : index
    %261 = vector.load %arg4[%c0_173, %c0_174, %c0_175] : memref<25x128x128xbf16, #tpu.memory_space<vmem>>, vector<1x128x128xbf16>
    %262 = vector.shape_cast %261 : vector<1x128x128xbf16> to vector<128x128xbf16>
    %cst_176 = arith.constant dense<0.000000e+00> : vector<64x128xf32>
    %263 = tpu.matmul %260, %262, %cst_176 {dimension_numbers = #tpu.dot_dimension_numbers<[1], [0], [0], [1], [0, 0, 1, 1], [], []>} : vector<64x128xbf16>, vector<128x128xbf16>, vector<64x128xf32> -> vector<64x128xf32>
    %c0_177 = arith.constant 0 : index
    %c1_178 = arith.constant 1 : index
    %c0_179 = arith.constant 0 : index
    %c0_180 = arith.constant 0 : index
    %264 = vector.load %arg11[%c0_177, %c1_178, %c0_179, %c0_180] : memref<6x6x32x128xbf16, #tpu.memory_space<vmem>>, vector<1x2x32x128xbf16>
    %265 = vector.shape_cast %264 : vector<1x2x32x128xbf16> to vector<2x32x128xbf16>
    %266 = vector.shape_cast %265 : vector<2x32x128xbf16> to vector<64x128xbf16>
    %c1_181 = arith.constant 1 : index
    %c0_182 = arith.constant 0 : index
    %c0_183 = arith.constant 0 : index
    %267 = vector.load %arg4[%c1_181, %c0_182, %c0_183] : memref<25x128x128xbf16, #tpu.memory_space<vmem>>, vector<1x128x128xbf16>
    %268 = vector.shape_cast %267 : vector<1x128x128xbf16> to vector<128x128xbf16>
    %cst_184 = arith.constant dense<0.000000e+00> : vector<64x128xf32>
    %269 = tpu.matmul %266, %268, %cst_184 {dimension_numbers = #tpu.dot_dimension_numbers<[1], [0], [0], [1], [0, 0, 1, 1], [], []>} : vector<64x128xbf16>, vector<128x128xbf16>, vector<64x128xf32> -> vector<64x128xf32>
    %270 = arith.addf %263, %269 : vector<64x128xf32>
    %c0_185 = arith.constant 0 : index
    %c2_186 = arith.constant 2 : index
    %c0_187 = arith.constant 0 : index
    %c0_188 = arith.constant 0 : index
    %271 = vector.load %arg11[%c0_185, %c2_186, %c0_187, %c0_188] : memref<6x6x32x128xbf16, #tpu.memory_space<vmem>>, vector<1x2x32x128xbf16>
    %272 = vector.shape_cast %271 : vector<1x2x32x128xbf16> to vector<2x32x128xbf16>
    %273 = vector.shape_cast %272 : vector<2x32x128xbf16> to vector<64x128xbf16>
    %c2_189 = arith.constant 2 : index
    %c0_190 = arith.constant 0 : index
    %c0_191 = arith.constant 0 : index
    %274 = vector.load %arg4[%c2_189, %c0_190, %c0_191] : memref<25x128x128xbf16, #tpu.memory_space<vmem>>, vector<1x128x128xbf16>
    %275 = vector.shape_cast %274 : vector<1x128x128xbf16> to vector<128x128xbf16>
    %cst_192 = arith.constant dense<0.000000e+00> : vector<64x128xf32>
    %276 = tpu.matmul %273, %275, %cst_192 {dimension_numbers = #tpu.dot_dimension_numbers<[1], [0], [0], [1], [0, 0, 1, 1], [], []>} : vector<64x128xbf16>, vector<128x128xbf16>, vector<64x128xf32> -> vector<64x128xf32>
    %277 = arith.addf %270, %276 : vector<64x128xf32>
    %c0_193 = arith.constant 0 : index
    %c3_194 = arith.constant 3 : index
    %c0_195 = arith.constant 0 : index
    %c0_196 = arith.constant 0 : index
    %278 = vector.load %arg11[%c0_193, %c3_194, %c0_195, %c0_196] : memref<6x6x32x128xbf16, #tpu.memory_space<vmem>>, vector<1x2x32x128xbf16>
    %279 = vector.shape_cast %278 : vector<1x2x32x128xbf16> to vector<2x32x128xbf16>
    %280 = vector.shape_cast %279 : vector<2x32x128xbf16> to vector<64x128xbf16>
    %c3_197 = arith.constant 3 : index
    %c0_198 = arith.constant 0 : index
    %c0_199 = arith.constant 0 : index
    %281 = vector.load %arg4[%c3_197, %c0_198, %c0_199] : memref<25x128x128xbf16, #tpu.memory_space<vmem>>, vector<1x128x128xbf16>
    %282 = vector.shape_cast %281 : vector<1x128x128xbf16> to vector<128x128xbf16>
    %cst_200 = arith.constant dense<0.000000e+00> : vector<64x128xf32>
    %283 = tpu.matmul %280, %282, %cst_200 {dimension_numbers = #tpu.dot_dimension_numbers<[1], [0], [0], [1], [0, 0, 1, 1], [], []>} : vector<64x128xbf16>, vector<128x128xbf16>, vector<64x128xf32> -> vector<64x128xf32>
    %284 = arith.addf %277, %283 : vector<64x128xf32>
    %c0_201 = arith.constant 0 : index
    %c4_202 = arith.constant 4 : index
    %c0_203 = arith.constant 0 : index
    %c0_204 = arith.constant 0 : index
    %285 = vector.load %arg11[%c0_201, %c4_202, %c0_203, %c0_204] : memref<6x6x32x128xbf16, #tpu.memory_space<vmem>>, vector<1x2x32x128xbf16>
    %286 = vector.shape_cast %285 : vector<1x2x32x128xbf16> to vector<2x32x128xbf16>
    %287 = vector.shape_cast %286 : vector<2x32x128xbf16> to vector<64x128xbf16>
    %c4_205 = arith.constant 4 : index
    %c0_206 = arith.constant 0 : index
    %c0_207 = arith.constant 0 : index
    %288 = vector.load %arg4[%c4_205, %c0_206, %c0_207] : memref<25x128x128xbf16, #tpu.memory_space<vmem>>, vector<1x128x128xbf16>
    %289 = vector.shape_cast %288 : vector<1x128x128xbf16> to vector<128x128xbf16>
    %cst_208 = arith.constant dense<0.000000e+00> : vector<64x128xf32>
    %290 = tpu.matmul %287, %289, %cst_208 {dimension_numbers = #tpu.dot_dimension_numbers<[1], [0], [0], [1], [0, 0, 1, 1], [], []>} : vector<64x128xbf16>, vector<128x128xbf16>, vector<64x128xf32> -> vector<64x128xf32>
    %291 = arith.addf %284, %290 : vector<64x128xf32>
    %c0_209 = arith.constant 0 : index
    %c0_210 = arith.constant 0 : index
    %c0_211 = arith.constant 0 : index
    %292 = vector.load %arg12[%c0_209, %c0_210, %c0_211] : memref<2x64x128xf32, #tpu.memory_space<vmem>>, vector<1x64x128xf32>
    %293 = vector.shape_cast %292 : vector<1x64x128xf32> to vector<64x128xf32>
    %294 = vector.shape_cast %291 : vector<64x128xf32> to vector<1x64x128xf32>
    tpu.vector_store %arg12[%c0_209, %c0_210, %c0_211], %294 {strides = array<i32>} : memref<2x64x128xf32, #tpu.memory_space<vmem>>, vector<1x64x128xf32>,
    %c1_212 = arith.constant 1 : index
    %c0_213 = arith.constant 0 : index
    %c0_214 = arith.constant 0 : index
    %c0_215 = arith.constant 0 : index
    %295 = vector.load %arg11[%c1_212, %c0_213, %c0_214, %c0_215] : memref<6x6x32x128xbf16, #tpu.memory_space<vmem>>, vector<1x2x32x128xbf16>
    %296 = vector.shape_cast %295 : vector<1x2x32x128xbf16> to vector<2x32x128xbf16>
    %297 = vector.shape_cast %296 : vector<2x32x128xbf16> to vector<64x128xbf16>
    %c5_216 = arith.constant 5 : index
    %c0_217 = arith.constant 0 : index
    %c0_218 = arith.constant 0 : index
    %298 = vector.load %arg4[%c5_216, %c0_217, %c0_218] : memref<25x128x128xbf16, #tpu.memory_space<vmem>>, vector<1x128x128xbf16>
    %299 = vector.shape_cast %298 : vector<1x128x128xbf16> to vector<128x128xbf16>
    %cst_219 = arith.constant dense<0.000000e+00> : vector<64x128xf32>
    %300 = tpu.matmul %297, %299, %cst_219 {dimension_numbers = #tpu.dot_dimension_numbers<[1], [0], [0], [1], [0, 0, 1, 1], [], []>} : vector<64x128xbf16>, vector<128x128xbf16>, vector<64x128xf32> -> vector<64x128xf32>
    %c1_220 = arith.constant 1 : index
    %c1_221 = arith.constant 1 : index
    %c0_222 = arith.constant 0 : index
    %c0_223 = arith.constant 0 : index
    %301 = vector.load %arg11[%c1_220, %c1_221, %c0_222, %c0_223] : memref<6x6x32x128xbf16, #tpu.memory_space<vmem>>, vector<1x2x32x128xbf16>
    %302 = vector.shape_cast %301 : vector<1x2x32x128xbf16> to vector<2x32x128xbf16>
    %303 = vector.shape_cast %302 : vector<2x32x128xbf16> to vector<64x128xbf16>
    %c6 = arith.constant 6 : index
    %c0_224 = arith.constant 0 : index
    %c0_225 = arith.constant 0 : index
    %304 = vector.load %arg4[%c6, %c0_224, %c0_225] : memref<25x128x128xbf16, #tpu.memory_space<vmem>>, vector<1x128x128xbf16>
    %305 = vector.shape_cast %304 : vector<1x128x128xbf16> to vector<128x128xbf16>
    %cst_226 = arith.constant dense<0.000000e+00> : vector<64x128xf32>
    %306 = tpu.matmul %303, %305, %cst_226 {dimension_numbers = #tpu.dot_dimension_numbers<[1], [0], [0], [1], [0, 0, 1, 1], [], []>} : vector<64x128xbf16>, vector<128x128xbf16>, vector<64x128xf32> -> vector<64x128xf32>
    %307 = arith.addf %300, %306 : vector<64x128xf32>
    %c1_227 = arith.constant 1 : index
    %c2_228 = arith.constant 2 : index
    %c0_229 = arith.constant 0 : index
    %c0_230 = arith.constant 0 : index
    %308 = vector.load %arg11[%c1_227, %c2_228, %c0_229, %c0_230] : memref<6x6x32x128xbf16, #tpu.memory_space<vmem>>, vector<1x2x32x128xbf16>
    %309 = vector.shape_cast %308 : vector<1x2x32x128xbf16> to vector<2x32x128xbf16>
    %310 = vector.shape_cast %309 : vector<2x32x128xbf16> to vector<64x128xbf16>
    %c7 = arith.constant 7 : index
    %c0_231 = arith.constant 0 : index
    %c0_232 = arith.constant 0 : index
    %311 = vector.load %arg4[%c7, %c0_231, %c0_232] : memref<25x128x128xbf16, #tpu.memory_space<vmem>>, vector<1x128x128xbf16>
    %312 = vector.shape_cast %311 : vector<1x128x128xbf16> to vector<128x128xbf16>
    %cst_233 = arith.constant dense<0.000000e+00> : vector<64x128xf32>
    %313 = tpu.matmul %310, %312, %cst_233 {dimension_numbers = #tpu.dot_dimension_numbers<[1], [0], [0], [1], [0, 0, 1, 1], [], []>} : vector<64x128xbf16>, vector<128x128xbf16>, vector<64x128xf32> -> vector<64x128xf32>
    %314 = arith.addf %307, %313 : vector<64x128xf32>
    %c1_234 = arith.constant 1 : index
    %c3_235 = arith.constant 3 : index
    %c0_236 = arith.constant 0 : index
    %c0_237 = arith.constant 0 : index
    %315 = vector.load %arg11[%c1_234, %c3_235, %c0_236, %c0_237] : memref<6x6x32x128xbf16, #tpu.memory_space<vmem>>, vector<1x2x32x128xbf16>
    %316 = vector.shape_cast %315 : vector<1x2x32x128xbf16> to vector<2x32x128xbf16>
    %317 = vector.shape_cast %316 : vector<2x32x128xbf16> to vector<64x128xbf16>
    %c8 = arith.constant 8 : index
    %c0_238 = arith.constant 0 : index
    %c0_239 = arith.constant 0 : index
    %318 = vector.load %arg4[%c8, %c0_238, %c0_239] : memref<25x128x128xbf16, #tpu.memory_space<vmem>>, vector<1x128x128xbf16>
    %319 = vector.shape_cast %318 : vector<1x128x128xbf16> to vector<128x128xbf16>
    %cst_240 = arith.constant dense<0.000000e+00> : vector<64x128xf32>
    %320 = tpu.matmul %317, %319, %cst_240 {dimension_numbers = #tpu.dot_dimension_numbers<[1], [0], [0], [1], [0, 0, 1, 1], [], []>} : vector<64x128xbf16>, vector<128x128xbf16>, vector<64x128xf32> -> vector<64x128xf32>
    %321 = arith.addf %314, %320 : vector<64x128xf32>
    %c1_241 = arith.constant 1 : index
    %c4_242 = arith.constant 4 : index
    %c0_243 = arith.constant 0 : index
    %c0_244 = arith.constant 0 : index
    %322 = vector.load %arg11[%c1_241, %c4_242, %c0_243, %c0_244] : memref<6x6x32x128xbf16, #tpu.memory_space<vmem>>, vector<1x2x32x128xbf16>
    %323 = vector.shape_cast %322 : vector<1x2x32x128xbf16> to vector<2x32x128xbf16>
    %324 = vector.shape_cast %323 : vector<2x32x128xbf16> to vector<64x128xbf16>
    %c9 = arith.constant 9 : index
    %c0_245 = arith.constant 0 : index
    %c0_246 = arith.constant 0 : index
    %325 = vector.load %arg4[%c9, %c0_245, %c0_246] : memref<25x128x128xbf16, #tpu.memory_space<vmem>>, vector<1x128x128xbf16>
    %326 = vector.shape_cast %325 : vector<1x128x128xbf16> to vector<128x128xbf16>
    %cst_247 = arith.constant dense<0.000000e+00> : vector<64x128xf32>
    %327 = tpu.matmul %324, %326, %cst_247 {dimension_numbers = #tpu.dot_dimension_numbers<[1], [0], [0], [1], [0, 0, 1, 1], [], []>} : vector<64x128xbf16>, vector<128x128xbf16>, vector<64x128xf32> -> vector<64x128xf32>
    %328 = arith.addf %321, %327 : vector<64x128xf32>
    %c0_248 = arith.constant 0 : index
    %c0_249 = arith.constant 0 : index
    %c0_250 = arith.constant 0 : index
    %329 = vector.load %arg12[%c0_248, %c0_249, %c0_250] : memref<2x64x128xf32, #tpu.memory_space<vmem>>, vector<1x64x128xf32>
    %330 = vector.shape_cast %329 : vector<1x64x128xf32> to vector<64x128xf32>
    %331 = arith.addf %330, %328 : vector<64x128xf32>
    %c0_251 = arith.constant 0 : index
    %c0_252 = arith.constant 0 : index
    %c0_253 = arith.constant 0 : index
    %332 = vector.load %arg12[%c0_251, %c0_252, %c0_253] : memref<2x64x128xf32, #tpu.memory_space<vmem>>, vector<1x64x128xf32>
    %333 = vector.shape_cast %332 : vector<1x64x128xf32> to vector<64x128xf32>
    %334 = vector.shape_cast %331 : vector<64x128xf32> to vector<1x64x128xf32>
    tpu.vector_store %arg12[%c0_251, %c0_252, %c0_253], %334 {strides = array<i32>} : memref<2x64x128xf32, #tpu.memory_space<vmem>>, vector<1x64x128xf32>,
    %c2_254 = arith.constant 2 : index
    %c0_255 = arith.constant 0 : index
    %c0_256 = arith.constant 0 : index
    %c0_257 = arith.constant 0 : index
    %335 = vector.load %arg11[%c2_254, %c0_255, %c0_256, %c0_257] : memref<6x6x32x128xbf16, #tpu.memory_space<vmem>>, vector<1x2x32x128xbf16>
    %336 = vector.shape_cast %335 : vector<1x2x32x128xbf16> to vector<2x32x128xbf16>
    %337 = vector.shape_cast %336 : vector<2x32x128xbf16> to vector<64x128xbf16>
    %c10 = arith.constant 10 : index
    %c0_258 = arith.constant 0 : index
    %c0_259 = arith.constant 0 : index
    %338 = vector.load %arg4[%c10, %c0_258, %c0_259] : memref<25x128x128xbf16, #tpu.memory_space<vmem>>, vector<1x128x128xbf16>
    %339 = vector.shape_cast %338 : vector<1x128x128xbf16> to vector<128x128xbf16>
    %cst_260 = arith.constant dense<0.000000e+00> : vector<64x128xf32>
    %340 = tpu.matmul %337, %339, %cst_260 {dimension_numbers = #tpu.dot_dimension_numbers<[1], [0], [0], [1], [0, 0, 1, 1], [], []>} : vector<64x128xbf16>, vector<128x128xbf16>, vector<64x128xf32> -> vector<64x128xf32>
    %c2_261 = arith.constant 2 : index
    %c1_262 = arith.constant 1 : index
    %c0_263 = arith.constant 0 : index
    %c0_264 = arith.constant 0 : index
    %341 = vector.load %arg11[%c2_261, %c1_262, %c0_263, %c0_264] : memref<6x6x32x128xbf16, #tpu.memory_space<vmem>>, vector<1x2x32x128xbf16>
    %342 = vector.shape_cast %341 : vector<1x2x32x128xbf16> to vector<2x32x128xbf16>
    %343 = vector.shape_cast %342 : vector<2x32x128xbf16> to vector<64x128xbf16>
    %c11 = arith.constant 11 : index
    %c0_265 = arith.constant 0 : index
    %c0_266 = arith.constant 0 : index
    %344 = vector.load %arg4[%c11, %c0_265, %c0_266] : memref<25x128x128xbf16, #tpu.memory_space<vmem>>, vector<1x128x128xbf16>
    %345 = vector.shape_cast %344 : vector<1x128x128xbf16> to vector<128x128xbf16>
    %cst_267 = arith.constant dense<0.000000e+00> : vector<64x128xf32>
    %346 = tpu.matmul %343, %345, %cst_267 {dimension_numbers = #tpu.dot_dimension_numbers<[1], [0], [0], [1], [0, 0, 1, 1], [], []>} : vector<64x128xbf16>, vector<128x128xbf16>, vector<64x128xf32> -> vector<64x128xf32>
    %347 = arith.addf %340, %346 : vector<64x128xf32>
    %c2_268 = arith.constant 2 : index
    %c2_269 = arith.constant 2 : index
    %c0_270 = arith.constant 0 : index
    %c0_271 = arith.constant 0 : index
    %348 = vector.load %arg11[%c2_268, %c2_269, %c0_270, %c0_271] : memref<6x6x32x128xbf16, #tpu.memory_space<vmem>>, vector<1x2x32x128xbf16>
    %349 = vector.shape_cast %348 : vector<1x2x32x128xbf16> to vector<2x32x128xbf16>
    %350 = vector.shape_cast %349 : vector<2x32x128xbf16> to vector<64x128xbf16>
    %c12 = arith.constant 12 : index
    %c0_272 = arith.constant 0 : index
    %c0_273 = arith.constant 0 : index
    %351 = vector.load %arg4[%c12, %c0_272, %c0_273] : memref<25x128x128xbf16, #tpu.memory_space<vmem>>, vector<1x128x128xbf16>
    %352 = vector.shape_cast %351 : vector<1x128x128xbf16> to vector<128x128xbf16>
    %cst_274 = arith.constant dense<0.000000e+00> : vector<64x128xf32>
    %353 = tpu.matmul %350, %352, %cst_274 {dimension_numbers = #tpu.dot_dimension_numbers<[1], [0], [0], [1], [0, 0, 1, 1], [], []>} : vector<64x128xbf16>, vector<128x128xbf16>, vector<64x128xf32> -> vector<64x128xf32>
    %354 = arith.addf %347, %353 : vector<64x128xf32>
    %c2_275 = arith.constant 2 : index
    %c3_276 = arith.constant 3 : index
    %c0_277 = arith.constant 0 : index
    %c0_278 = arith.constant 0 : index
    %355 = vector.load %arg11[%c2_275, %c3_276, %c0_277, %c0_278] : memref<6x6x32x128xbf16, #tpu.memory_space<vmem>>, vector<1x2x32x128xbf16>
    %356 = vector.shape_cast %355 : vector<1x2x32x128xbf16> to vector<2x32x128xbf16>
    %357 = vector.shape_cast %356 : vector<2x32x128xbf16> to vector<64x128xbf16>
    %c13 = arith.constant 13 : index
    %c0_279 = arith.constant 0 : index
    %c0_280 = arith.constant 0 : index
    %358 = vector.load %arg4[%c13, %c0_279, %c0_280] : memref<25x128x128xbf16, #tpu.memory_space<vmem>>, vector<1x128x128xbf16>
    %359 = vector.shape_cast %358 : vector<1x128x128xbf16> to vector<128x128xbf16>
    %cst_281 = arith.constant dense<0.000000e+00> : vector<64x128xf32>
    %360 = tpu.matmul %357, %359, %cst_281 {dimension_numbers = #tpu.dot_dimension_numbers<[1], [0], [0], [1], [0, 0, 1, 1], [], []>} : vector<64x128xbf16>, vector<128x128xbf16>, vector<64x128xf32> -> vector<64x128xf32>
    %361 = arith.addf %354, %360 : vector<64x128xf32>
    %c2_282 = arith.constant 2 : index
    %c4_283 = arith.constant 4 : index
    %c0_284 = arith.constant 0 : index
    %c0_285 = arith.constant 0 : index
    %362 = vector.load %arg11[%c2_282, %c4_283, %c0_284, %c0_285] : memref<6x6x32x128xbf16, #tpu.memory_space<vmem>>, vector<1x2x32x128xbf16>
    %363 = vector.shape_cast %362 : vector<1x2x32x128xbf16> to vector<2x32x128xbf16>
    %364 = vector.shape_cast %363 : vector<2x32x128xbf16> to vector<64x128xbf16>
    %c14 = arith.constant 14 : index
    %c0_286 = arith.constant 0 : index
    %c0_287 = arith.constant 0 : index
    %365 = vector.load %arg4[%c14, %c0_286, %c0_287] : memref<25x128x128xbf16, #tpu.memory_space<vmem>>, vector<1x128x128xbf16>
    %366 = vector.shape_cast %365 : vector<1x128x128xbf16> to vector<128x128xbf16>
    %cst_288 = arith.constant dense<0.000000e+00> : vector<64x128xf32>
    %367 = tpu.matmul %364, %366, %cst_288 {dimension_numbers = #tpu.dot_dimension_numbers<[1], [0], [0], [1], [0, 0, 1, 1], [], []>} : vector<64x128xbf16>, vector<128x128xbf16>, vector<64x128xf32> -> vector<64x128xf32>
    %368 = arith.addf %361, %367 : vector<64x128xf32>
    %c0_289 = arith.constant 0 : index
    %c0_290 = arith.constant 0 : index
    %c0_291 = arith.constant 0 : index
    %369 = vector.load %arg12[%c0_289, %c0_290, %c0_291] : memref<2x64x128xf32, #tpu.memory_space<vmem>>, vector<1x64x128xf32>
    %370 = vector.shape_cast %369 : vector<1x64x128xf32> to vector<64x128xf32>
    %371 = arith.addf %370, %368 : vector<64x128xf32>
    %c0_292 = arith.constant 0 : index
    %c0_293 = arith.constant 0 : index
    %c0_294 = arith.constant 0 : index
    %372 = vector.load %arg12[%c0_292, %c0_293, %c0_294] : memref<2x64x128xf32, #tpu.memory_space<vmem>>, vector<1x64x128xf32>
    %373 = vector.shape_cast %372 : vector<1x64x128xf32> to vector<64x128xf32>
    %374 = vector.shape_cast %371 : vector<64x128xf32> to vector<1x64x128xf32>
    tpu.vector_store %arg12[%c0_292, %c0_293, %c0_294], %374 {strides = array<i32>} : memref<2x64x128xf32, #tpu.memory_space<vmem>>, vector<1x64x128xf32>,
    %c3_295 = arith.constant 3 : index
    %c0_296 = arith.constant 0 : index
    %c0_297 = arith.constant 0 : index
    %c0_298 = arith.constant 0 : index
    %375 = vector.load %arg11[%c3_295, %c0_296, %c0_297, %c0_298] : memref<6x6x32x128xbf16, #tpu.memory_space<vmem>>, vector<1x2x32x128xbf16>
    %376 = vector.shape_cast %375 : vector<1x2x32x128xbf16> to vector<2x32x128xbf16>
    %377 = vector.shape_cast %376 : vector<2x32x128xbf16> to vector<64x128xbf16>
    %c15 = arith.constant 15 : index
    %c0_299 = arith.constant 0 : index
    %c0_300 = arith.constant 0 : index
    %378 = vector.load %arg4[%c15, %c0_299, %c0_300] : memref<25x128x128xbf16, #tpu.memory_space<vmem>>, vector<1x128x128xbf16>
    %379 = vector.shape_cast %378 : vector<1x128x128xbf16> to vector<128x128xbf16>
    %cst_301 = arith.constant dense<0.000000e+00> : vector<64x128xf32>
    %380 = tpu.matmul %377, %379, %cst_301 {dimension_numbers = #tpu.dot_dimension_numbers<[1], [0], [0], [1], [0, 0, 1, 1], [], []>} : vector<64x128xbf16>, vector<128x128xbf16>, vector<64x128xf32> -> vector<64x128xf32>
    %c3_302 = arith.constant 3 : index
    %c1_303 = arith.constant 1 : index
    %c0_304 = arith.constant 0 : index
    %c0_305 = arith.constant 0 : index
    %381 = vector.load %arg11[%c3_302, %c1_303, %c0_304, %c0_305] : memref<6x6x32x128xbf16, #tpu.memory_space<vmem>>, vector<1x2x32x128xbf16>
    %382 = vector.shape_cast %381 : vector<1x2x32x128xbf16> to vector<2x32x128xbf16>
    %383 = vector.shape_cast %382 : vector<2x32x128xbf16> to vector<64x128xbf16>
    %c16 = arith.constant 16 : index
    %c0_306 = arith.constant 0 : index
    %c0_307 = arith.constant 0 : index
    %384 = vector.load %arg4[%c16, %c0_306, %c0_307] : memref<25x128x128xbf16, #tpu.memory_space<vmem>>, vector<1x128x128xbf16>
    %385 = vector.shape_cast %384 : vector<1x128x128xbf16> to vector<128x128xbf16>
    %cst_308 = arith.constant dense<0.000000e+00> : vector<64x128xf32>
    %386 = tpu.matmul %383, %385, %cst_308 {dimension_numbers = #tpu.dot_dimension_numbers<[1], [0], [0], [1], [0, 0, 1, 1], [], []>} : vector<64x128xbf16>, vector<128x128xbf16>, vector<64x128xf32> -> vector<64x128xf32>
    %387 = arith.addf %380, %386 : vector<64x128xf32>
    %c3_309 = arith.constant 3 : index
    %c2_310 = arith.constant 2 : index
    %c0_311 = arith.constant 0 : index
    %c0_312 = arith.constant 0 : index
    %388 = vector.load %arg11[%c3_309, %c2_310, %c0_311, %c0_312] : memref<6x6x32x128xbf16, #tpu.memory_space<vmem>>, vector<1x2x32x128xbf16>
    %389 = vector.shape_cast %388 : vector<1x2x32x128xbf16> to vector<2x32x128xbf16>
    %390 = vector.shape_cast %389 : vector<2x32x128xbf16> to vector<64x128xbf16>
    %c17 = arith.constant 17 : index
    %c0_313 = arith.constant 0 : index
    %c0_314 = arith.constant 0 : index
    %391 = vector.load %arg4[%c17, %c0_313, %c0_314] : memref<25x128x128xbf16, #tpu.memory_space<vmem>>, vector<1x128x128xbf16>
    %392 = vector.shape_cast %391 : vector<1x128x128xbf16> to vector<128x128xbf16>
    %cst_315 = arith.constant dense<0.000000e+00> : vector<64x128xf32>
    %393 = tpu.matmul %390, %392, %cst_315 {dimension_numbers = #tpu.dot_dimension_numbers<[1], [0], [0], [1], [0, 0, 1, 1], [], []>} : vector<64x128xbf16>, vector<128x128xbf16>, vector<64x128xf32> -> vector<64x128xf32>
    %394 = arith.addf %387, %393 : vector<64x128xf32>
    %c3_316 = arith.constant 3 : index
    %c3_317 = arith.constant 3 : index
    %c0_318 = arith.constant 0 : index
    %c0_319 = arith.constant 0 : index
    %395 = vector.load %arg11[%c3_316, %c3_317, %c0_318, %c0_319] : memref<6x6x32x128xbf16, #tpu.memory_space<vmem>>, vector<1x2x32x128xbf16>
    %396 = vector.shape_cast %395 : vector<1x2x32x128xbf16> to vector<2x32x128xbf16>
    %397 = vector.shape_cast %396 : vector<2x32x128xbf16> to vector<64x128xbf16>
    %c18 = arith.constant 18 : index
    %c0_320 = arith.constant 0 : index
    %c0_321 = arith.constant 0 : index
    %398 = vector.load %arg4[%c18, %c0_320, %c0_321] : memref<25x128x128xbf16, #tpu.memory_space<vmem>>, vector<1x128x128xbf16>
    %399 = vector.shape_cast %398 : vector<1x128x128xbf16> to vector<128x128xbf16>
    %cst_322 = arith.constant dense<0.000000e+00> : vector<64x128xf32>
    %400 = tpu.matmul %397, %399, %cst_322 {dimension_numbers = #tpu.dot_dimension_numbers<[1], [0], [0], [1], [0, 0, 1, 1], [], []>} : vector<64x128xbf16>, vector<128x128xbf16>, vector<64x128xf32> -> vector<64x128xf32>
    %401 = arith.addf %394, %400 : vector<64x128xf32>
    %c3_323 = arith.constant 3 : index
    %c4_324 = arith.constant 4 : index
    %c0_325 = arith.constant 0 : index
    %c0_326 = arith.constant 0 : index
    %402 = vector.load %arg11[%c3_323, %c4_324, %c0_325, %c0_326] : memref<6x6x32x128xbf16, #tpu.memory_space<vmem>>, vector<1x2x32x128xbf16>
    %403 = vector.shape_cast %402 : vector<1x2x32x128xbf16> to vector<2x32x128xbf16>
    %404 = vector.shape_cast %403 : vector<2x32x128xbf16> to vector<64x128xbf16>
    %c19 = arith.constant 19 : index
    %c0_327 = arith.constant 0 : index
    %c0_328 = arith.constant 0 : index
    %405 = vector.load %arg4[%c19, %c0_327, %c0_328] : memref<25x128x128xbf16, #tpu.memory_space<vmem>>, vector<1x128x128xbf16>
    %406 = vector.shape_cast %405 : vector<1x128x128xbf16> to vector<128x128xbf16>
    %cst_329 = arith.constant dense<0.000000e+00> : vector<64x128xf32>
    %407 = tpu.matmul %404, %406, %cst_329 {dimension_numbers = #tpu.dot_dimension_numbers<[1], [0], [0], [1], [0, 0, 1, 1], [], []>} : vector<64x128xbf16>, vector<128x128xbf16>, vector<64x128xf32> -> vector<64x128xf32>
    %408 = arith.addf %401, %407 : vector<64x128xf32>
    %c0_330 = arith.constant 0 : index
    %c0_331 = arith.constant 0 : index
    %c0_332 = arith.constant 0 : index
    %409 = vector.load %arg12[%c0_330, %c0_331, %c0_332] : memref<2x64x128xf32, #tpu.memory_space<vmem>>, vector<1x64x128xf32>
    %410 = vector.shape_cast %409 : vector<1x64x128xf32> to vector<64x128xf32>
    %411 = arith.addf %410, %408 : vector<64x128xf32>
    %c0_333 = arith.constant 0 : index
    %c0_334 = arith.constant 0 : index
    %c0_335 = arith.constant 0 : index
    %412 = vector.load %arg12[%c0_333, %c0_334, %c0_335] : memref<2x64x128xf32, #tpu.memory_space<vmem>>, vector<1x64x128xf32>
    %413 = vector.shape_cast %412 : vector<1x64x128xf32> to vector<64x128xf32>
    %414 = vector.shape_cast %411 : vector<64x128xf32> to vector<1x64x128xf32>
    tpu.vector_store %arg12[%c0_333, %c0_334, %c0_335], %414 {strides = array<i32>} : memref<2x64x128xf32, #tpu.memory_space<vmem>>, vector<1x64x128xf32>,
    %c4_336 = arith.constant 4 : index
    %c0_337 = arith.constant 0 : index
    %c0_338 = arith.constant 0 : index
    %c0_339 = arith.constant 0 : index
    %415 = vector.load %arg11[%c4_336, %c0_337, %c0_338, %c0_339] : memref<6x6x32x128xbf16, #tpu.memory_space<vmem>>, vector<1x2x32x128xbf16>
    %416 = vector.shape_cast %415 : vector<1x2x32x128xbf16> to vector<2x32x128xbf16>
    %417 = vector.shape_cast %416 : vector<2x32x128xbf16> to vector<64x128xbf16>
    %c20 = arith.constant 20 : index
    %c0_340 = arith.constant 0 : index
    %c0_341 = arith.constant 0 : index
    %418 = vector.load %arg4[%c20, %c0_340, %c0_341] : memref<25x128x128xbf16, #tpu.memory_space<vmem>>, vector<1x128x128xbf16>
    %419 = vector.shape_cast %418 : vector<1x128x128xbf16> to vector<128x128xbf16>
    %cst_342 = arith.constant dense<0.000000e+00> : vector<64x128xf32>
    %420 = tpu.matmul %417, %419, %cst_342 {dimension_numbers = #tpu.dot_dimension_numbers<[1], [0], [0], [1], [0, 0, 1, 1], [], []>} : vector<64x128xbf16>, vector<128x128xbf16>, vector<64x128xf32> -> vector<64x128xf32>
    %c4_343 = arith.constant 4 : index
    %c1_344 = arith.constant 1 : index
    %c0_345 = arith.constant 0 : index
    %c0_346 = arith.constant 0 : index
    %421 = vector.load %arg11[%c4_343, %c1_344, %c0_345, %c0_346] : memref<6x6x32x128xbf16, #tpu.memory_space<vmem>>, vector<1x2x32x128xbf16>
    %422 = vector.shape_cast %421 : vector<1x2x32x128xbf16> to vector<2x32x128xbf16>
    %423 = vector.shape_cast %422 : vector<2x32x128xbf16> to vector<64x128xbf16>
    %c21 = arith.constant 21 : index
    %c0_347 = arith.constant 0 : index
    %c0_348 = arith.constant 0 : index
    %424 = vector.load %arg4[%c21, %c0_347, %c0_348] : memref<25x128x128xbf16, #tpu.memory_space<vmem>>, vector<1x128x128xbf16>
    %425 = vector.shape_cast %424 : vector<1x128x128xbf16> to vector<128x128xbf16>
    %cst_349 = arith.constant dense<0.000000e+00> : vector<64x128xf32>
    %426 = tpu.matmul %423, %425, %cst_349 {dimension_numbers = #tpu.dot_dimension_numbers<[1], [0], [0], [1], [0, 0, 1, 1], [], []>} : vector<64x128xbf16>, vector<128x128xbf16>, vector<64x128xf32> -> vector<64x128xf32>
    %427 = arith.addf %420, %426 : vector<64x128xf32>
    %c4_350 = arith.constant 4 : index
    %c2_351 = arith.constant 2 : index
    %c0_352 = arith.constant 0 : index
    %c0_353 = arith.constant 0 : index
    %428 = vector.load %arg11[%c4_350, %c2_351, %c0_352, %c0_353] : memref<6x6x32x128xbf16, #tpu.memory_space<vmem>>, vector<1x2x32x128xbf16>
    %429 = vector.shape_cast %428 : vector<1x2x32x128xbf16> to vector<2x32x128xbf16>
    %430 = vector.shape_cast %429 : vector<2x32x128xbf16> to vector<64x128xbf16>
    %c22 = arith.constant 22 : index
    %c0_354 = arith.constant 0 : index
    %c0_355 = arith.constant 0 : index
    %431 = vector.load %arg4[%c22, %c0_354, %c0_355] : memref<25x128x128xbf16, #tpu.memory_space<vmem>>, vector<1x128x128xbf16>
    %432 = vector.shape_cast %431 : vector<1x128x128xbf16> to vector<128x128xbf16>
    %cst_356 = arith.constant dense<0.000000e+00> : vector<64x128xf32>
    %433 = tpu.matmul %430, %432, %cst_356 {dimension_numbers = #tpu.dot_dimension_numbers<[1], [0], [0], [1], [0, 0, 1, 1], [], []>} : vector<64x128xbf16>, vector<128x128xbf16>, vector<64x128xf32> -> vector<64x128xf32>
    %434 = arith.addf %427, %433 : vector<64x128xf32>
    %c4_357 = arith.constant 4 : index
    %c3_358 = arith.constant 3 : index
    %c0_359 = arith.constant 0 : index
    %c0_360 = arith.constant 0 : index
    %435 = vector.load %arg11[%c4_357, %c3_358, %c0_359, %c0_360] : memref<6x6x32x128xbf16, #tpu.memory_space<vmem>>, vector<1x2x32x128xbf16>
    %436 = vector.shape_cast %435 : vector<1x2x32x128xbf16> to vector<2x32x128xbf16>
    %437 = vector.shape_cast %436 : vector<2x32x128xbf16> to vector<64x128xbf16>
    %c23 = arith.constant 23 : index
    %c0_361 = arith.constant 0 : index
    %c0_362 = arith.constant 0 : index
    %438 = vector.load %arg4[%c23, %c0_361, %c0_362] : memref<25x128x128xbf16, #tpu.memory_space<vmem>>, vector<1x128x128xbf16>
    %439 = vector.shape_cast %438 : vector<1x128x128xbf16> to vector<128x128xbf16>
    %cst_363 = arith.constant dense<0.000000e+00> : vector<64x128xf32>
    %440 = tpu.matmul %437, %439, %cst_363 {dimension_numbers = #tpu.dot_dimension_numbers<[1], [0], [0], [1], [0, 0, 1, 1], [], []>} : vector<64x128xbf16>, vector<128x128xbf16>, vector<64x128xf32> -> vector<64x128xf32>
    %441 = arith.addf %434, %440 : vector<64x128xf32>
    %c4_364 = arith.constant 4 : index
    %c4_365 = arith.constant 4 : index
    %c0_366 = arith.constant 0 : index
    %c0_367 = arith.constant 0 : index
    %442 = vector.load %arg11[%c4_364, %c4_365, %c0_366, %c0_367] : memref<6x6x32x128xbf16, #tpu.memory_space<vmem>>, vector<1x2x32x128xbf16>
    %443 = vector.shape_cast %442 : vector<1x2x32x128xbf16> to vector<2x32x128xbf16>
    %444 = vector.shape_cast %443 : vector<2x32x128xbf16> to vector<64x128xbf16>
    %c24 = arith.constant 24 : index
    %c0_368 = arith.constant 0 : index
    %c0_369 = arith.constant 0 : index
    %445 = vector.load %arg4[%c24, %c0_368, %c0_369] : memref<25x128x128xbf16, #tpu.memory_space<vmem>>, vector<1x128x128xbf16>
    %446 = vector.shape_cast %445 : vector<1x128x128xbf16> to vector<128x128xbf16>
    %cst_370 = arith.constant dense<0.000000e+00> : vector<64x128xf32>
    %447 = tpu.matmul %444, %446, %cst_370 {dimension_numbers = #tpu.dot_dimension_numbers<[1], [0], [0], [1], [0, 0, 1, 1], [], []>} : vector<64x128xbf16>, vector<128x128xbf16>, vector<64x128xf32> -> vector<64x128xf32>
    %448 = arith.addf %441, %447 : vector<64x128xf32>
    %c0_371 = arith.constant 0 : index
    %c0_372 = arith.constant 0 : index
    %c0_373 = arith.constant 0 : index
    %449 = vector.load %arg12[%c0_371, %c0_372, %c0_373] : memref<2x64x128xf32, #tpu.memory_space<vmem>>, vector<1x64x128xf32>
    %450 = vector.shape_cast %449 : vector<1x64x128xf32> to vector<64x128xf32>
    %451 = arith.addf %450, %448 : vector<64x128xf32>
    %c0_374 = arith.constant 0 : index
    %c0_375 = arith.constant 0 : index
    %c0_376 = arith.constant 0 : index
    %452 = vector.load %arg12[%c0_374, %c0_375, %c0_376] : memref<2x64x128xf32, #tpu.memory_space<vmem>>, vector<1x64x128xf32>
    %453 = vector.shape_cast %452 : vector<1x64x128xf32> to vector<64x128xf32>
    %454 = vector.shape_cast %451 : vector<64x128xf32> to vector<1x64x128xf32>
    tpu.vector_store %arg12[%c0_374, %c0_375, %c0_376], %454 {strides = array<i32>} : memref<2x64x128xf32, #tpu.memory_space<vmem>>, vector<1x64x128xf32>,
    %c1_377 = arith.constant 1 : index
    %c0_378 = arith.constant 0 : index
    %c0_379 = arith.constant 0 : index
    %c0_380 = arith.constant 0 : index
    %455 = vector.load %arg11[%c1_377, %c0_378, %c0_379, %c0_380] : memref<6x6x32x128xbf16, #tpu.memory_space<vmem>>, vector<1x2x32x128xbf16>
    %456 = vector.shape_cast %455 : vector<1x2x32x128xbf16> to vector<2x32x128xbf16>
    %457 = vector.shape_cast %456 : vector<2x32x128xbf16> to vector<64x128xbf16>
    %c0_381 = arith.constant 0 : index
    %c0_382 = arith.constant 0 : index
    %c0_383 = arith.constant 0 : index
    %458 = vector.load %arg4[%c0_381, %c0_382, %c0_383] : memref<25x128x128xbf16, #tpu.memory_space<vmem>>, vector<1x128x128xbf16>
    %459 = vector.shape_cast %458 : vector<1x128x128xbf16> to vector<128x128xbf16>
    %cst_384 = arith.constant dense<0.000000e+00> : vector<64x128xf32>
    %460 = tpu.matmul %457, %459, %cst_384 {dimension_numbers = #tpu.dot_dimension_numbers<[1], [0], [0], [1], [0, 0, 1, 1], [], []>} : vector<64x128xbf16>, vector<128x128xbf16>, vector<64x128xf32> -> vector<64x128xf32>
    %c1_385 = arith.constant 1 : index
    %c1_386 = arith.constant 1 : index
    %c0_387 = arith.constant 0 : index
    %c0_388 = arith.constant 0 : index
    %461 = vector.load %arg11[%c1_385, %c1_386, %c0_387, %c0_388] : memref<6x6x32x128xbf16, #tpu.memory_space<vmem>>, vector<1x2x32x128xbf16>
    %462 = vector.shape_cast %461 : vector<1x2x32x128xbf16> to vector<2x32x128xbf16>
    %463 = vector.shape_cast %462 : vector<2x32x128xbf16> to vector<64x128xbf16>
    %c1_389 = arith.constant 1 : index
    %c0_390 = arith.constant 0 : index
    %c0_391 = arith.constant 0 : index
    %464 = vector.load %arg4[%c1_389, %c0_390, %c0_391] : memref<25x128x128xbf16, #tpu.memory_space<vmem>>, vector<1x128x128xbf16>
    %465 = vector.shape_cast %464 : vector<1x128x128xbf16> to vector<128x128xbf16>
    %cst_392 = arith.constant dense<0.000000e+00> : vector<64x128xf32>
    %466 = tpu.matmul %463, %465, %cst_392 {dimension_numbers = #tpu.dot_dimension_numbers<[1], [0], [0], [1], [0, 0, 1, 1], [], []>} : vector<64x128xbf16>, vector<128x128xbf16>, vector<64x128xf32> -> vector<64x128xf32>
    %467 = arith.addf %460, %466 : vector<64x128xf32>
    %c1_393 = arith.constant 1 : index
    %c2_394 = arith.constant 2 : index
    %c0_395 = arith.constant 0 : index
    %c0_396 = arith.constant 0 : index
    %468 = vector.load %arg11[%c1_393, %c2_394, %c0_395, %c0_396] : memref<6x6x32x128xbf16, #tpu.memory_space<vmem>>, vector<1x2x32x128xbf16>
    %469 = vector.shape_cast %468 : vector<1x2x32x128xbf16> to vector<2x32x128xbf16>
    %470 = vector.shape_cast %469 : vector<2x32x128xbf16> to vector<64x128xbf16>
    %c2_397 = arith.constant 2 : index
    %c0_398 = arith.constant 0 : index
    %c0_399 = arith.constant 0 : index
    %471 = vector.load %arg4[%c2_397, %c0_398, %c0_399] : memref<25x128x128xbf16, #tpu.memory_space<vmem>>, vector<1x128x128xbf16>
    %472 = vector.shape_cast %471 : vector<1x128x128xbf16> to vector<128x128xbf16>
    %cst_400 = arith.constant dense<0.000000e+00> : vector<64x128xf32>
    %473 = tpu.matmul %470, %472, %cst_400 {dimension_numbers = #tpu.dot_dimension_numbers<[1], [0], [0], [1], [0, 0, 1, 1], [], []>} : vector<64x128xbf16>, vector<128x128xbf16>, vector<64x128xf32> -> vector<64x128xf32>
    %474 = arith.addf %467, %473 : vector<64x128xf32>
    %c1_401 = arith.constant 1 : index
    %c3_402 = arith.constant 3 : index
    %c0_403 = arith.constant 0 : index
    %c0_404 = arith.constant 0 : index
    %475 = vector.load %arg11[%c1_401, %c3_402, %c0_403, %c0_404] : memref<6x6x32x128xbf16, #tpu.memory_space<vmem>>, vector<1x2x32x128xbf16>
    %476 = vector.shape_cast %475 : vector<1x2x32x128xbf16> to vector<2x32x128xbf16>
    %477 = vector.shape_cast %476 : vector<2x32x128xbf16> to vector<64x128xbf16>
    %c3_405 = arith.constant 3 : index
    %c0_406 = arith.constant 0 : index
    %c0_407 = arith.constant 0 : index
    %478 = vector.load %arg4[%c3_405, %c0_406, %c0_407] : memref<25x128x128xbf16, #tpu.memory_space<vmem>>, vector<1x128x128xbf16>
    %479 = vector.shape_cast %478 : vector<1x128x128xbf16> to vector<128x128xbf16>
    %cst_408 = arith.constant dense<0.000000e+00> : vector<64x128xf32>
    %480 = tpu.matmul %477, %479, %cst_408 {dimension_numbers = #tpu.dot_dimension_numbers<[1], [0], [0], [1], [0, 0, 1, 1], [], []>} : vector<64x128xbf16>, vector<128x128xbf16>, vector<64x128xf32> -> vector<64x128xf32>
    %481 = arith.addf %474, %480 : vector<64x128xf32>
    %c1_409 = arith.constant 1 : index
    %c4_410 = arith.constant 4 : index
    %c0_411 = arith.constant 0 : index
    %c0_412 = arith.constant 0 : index
    %482 = vector.load %arg11[%c1_409, %c4_410, %c0_411, %c0_412] : memref<6x6x32x128xbf16, #tpu.memory_space<vmem>>, vector<1x2x32x128xbf16>
    %483 = vector.shape_cast %482 : vector<1x2x32x128xbf16> to vector<2x32x128xbf16>
    %484 = vector.shape_cast %483 : vector<2x32x128xbf16> to vector<64x128xbf16>
    %c4_413 = arith.constant 4 : index
    %c0_414 = arith.constant 0 : index
    %c0_415 = arith.constant 0 : index
    %485 = vector.load %arg4[%c4_413, %c0_414, %c0_415] : memref<25x128x128xbf16, #tpu.memory_space<vmem>>, vector<1x128x128xbf16>
    %486 = vector.shape_cast %485 : vector<1x128x128xbf16> to vector<128x128xbf16>
    %cst_416 = arith.constant dense<0.000000e+00> : vector<64x128xf32>
    %487 = tpu.matmul %484, %486, %cst_416 {dimension_numbers = #tpu.dot_dimension_numbers<[1], [0], [0], [1], [0, 0, 1, 1], [], []>} : vector<64x128xbf16>, vector<128x128xbf16>, vector<64x128xf32> -> vector<64x128xf32>
    %488 = arith.addf %481, %487 : vector<64x128xf32>
    %c1_417 = arith.constant 1 : index
    %c0_418 = arith.constant 0 : index
    %c0_419 = arith.constant 0 : index
    %489 = vector.load %arg12[%c1_417, %c0_418, %c0_419] : memref<2x64x128xf32, #tpu.memory_space<vmem>>, vector<1x64x128xf32>
    %490 = vector.shape_cast %489 : vector<1x64x128xf32> to vector<64x128xf32>
    %491 = vector.shape_cast %488 : vector<64x128xf32> to vector<1x64x128xf32>
    tpu.vector_store %arg12[%c1_417, %c0_418, %c0_419], %491 {strides = array<i32>} : memref<2x64x128xf32, #tpu.memory_space<vmem>>, vector<1x64x128xf32>,
    %c2_420 = arith.constant 2 : index
    %c0_421 = arith.constant 0 : index
    %c0_422 = arith.constant 0 : index
    %c0_423 = arith.constant 0 : index
    %492 = vector.load %arg11[%c2_420, %c0_421, %c0_422, %c0_423] : memref<6x6x32x128xbf16, #tpu.memory_space<vmem>>, vector<1x2x32x128xbf16>
    %493 = vector.shape_cast %492 : vector<1x2x32x128xbf16> to vector<2x32x128xbf16>
    %494 = vector.shape_cast %493 : vector<2x32x128xbf16> to vector<64x128xbf16>
    %c5_424 = arith.constant 5 : index
    %c0_425 = arith.constant 0 : index
    %c0_426 = arith.constant 0 : index
    %495 = vector.load %arg4[%c5_424, %c0_425, %c0_426] : memref<25x128x128xbf16, #tpu.memory_space<vmem>>, vector<1x128x128xbf16>
    %496 = vector.shape_cast %495 : vector<1x128x128xbf16> to vector<128x128xbf16>
    %cst_427 = arith.constant dense<0.000000e+00> : vector<64x128xf32>
    %497 = tpu.matmul %494, %496, %cst_427 {dimension_numbers = #tpu.dot_dimension_numbers<[1], [0], [0], [1], [0, 0, 1, 1], [], []>} : vector<64x128xbf16>, vector<128x128xbf16>, vector<64x128xf32> -> vector<64x128xf32>
    %c2_428 = arith.constant 2 : index
    %c1_429 = arith.constant 1 : index
    %c0_430 = arith.constant 0 : index
    %c0_431 = arith.constant 0 : index
    %498 = vector.load %arg11[%c2_428, %c1_429, %c0_430, %c0_431] : memref<6x6x32x128xbf16, #tpu.memory_space<vmem>>, vector<1x2x32x128xbf16>
    %499 = vector.shape_cast %498 : vector<1x2x32x128xbf16> to vector<2x32x128xbf16>
    %500 = vector.shape_cast %499 : vector<2x32x128xbf16> to vector<64x128xbf16>
    %c6_432 = arith.constant 6 : index
    %c0_433 = arith.constant 0 : index
    %c0_434 = arith.constant 0 : index
    %501 = vector.load %arg4[%c6_432, %c0_433, %c0_434] : memref<25x128x128xbf16, #tpu.memory_space<vmem>>, vector<1x128x128xbf16>
    %502 = vector.shape_cast %501 : vector<1x128x128xbf16> to vector<128x128xbf16>
    %cst_435 = arith.constant dense<0.000000e+00> : vector<64x128xf32>
    %503 = tpu.matmul %500, %502, %cst_435 {dimension_numbers = #tpu.dot_dimension_numbers<[1], [0], [0], [1], [0, 0, 1, 1], [], []>} : vector<64x128xbf16>, vector<128x128xbf16>, vector<64x128xf32> -> vector<64x128xf32>
    %504 = arith.addf %497, %503 : vector<64x128xf32>
    %c2_436 = arith.constant 2 : index
    %c2_437 = arith.constant 2 : index
    %c0_438 = arith.constant 0 : index
    %c0_439 = arith.constant 0 : index
    %505 = vector.load %arg11[%c2_436, %c2_437, %c0_438, %c0_439] : memref<6x6x32x128xbf16, #tpu.memory_space<vmem>>, vector<1x2x32x128xbf16>
    %506 = vector.shape_cast %505 : vector<1x2x32x128xbf16> to vector<2x32x128xbf16>
    %507 = vector.shape_cast %506 : vector<2x32x128xbf16> to vector<64x128xbf16>
    %c7_440 = arith.constant 7 : index
    %c0_441 = arith.constant 0 : index
    %c0_442 = arith.constant 0 : index
    %508 = vector.load %arg4[%c7_440, %c0_441, %c0_442] : memref<25x128x128xbf16, #tpu.memory_space<vmem>>, vector<1x128x128xbf16>
    %509 = vector.shape_cast %508 : vector<1x128x128xbf16> to vector<128x128xbf16>
    %cst_443 = arith.constant dense<0.000000e+00> : vector<64x128xf32>
    %510 = tpu.matmul %507, %509, %cst_443 {dimension_numbers = #tpu.dot_dimension_numbers<[1], [0], [0], [1], [0, 0, 1, 1], [], []>} : vector<64x128xbf16>, vector<128x128xbf16>, vector<64x128xf32> -> vector<64x128xf32>
    %511 = arith.addf %504, %510 : vector<64x128xf32>
    %c2_444 = arith.constant 2 : index
    %c3_445 = arith.constant 3 : index
    %c0_446 = arith.constant 0 : index
    %c0_447 = arith.constant 0 : index
    %512 = vector.load %arg11[%c2_444, %c3_445, %c0_446, %c0_447] : memref<6x6x32x128xbf16, #tpu.memory_space<vmem>>, vector<1x2x32x128xbf16>
    %513 = vector.shape_cast %512 : vector<1x2x32x128xbf16> to vector<2x32x128xbf16>
    %514 = vector.shape_cast %513 : vector<2x32x128xbf16> to vector<64x128xbf16>
    %c8_448 = arith.constant 8 : index
    %c0_449 = arith.constant 0 : index
    %c0_450 = arith.constant 0 : index
    %515 = vector.load %arg4[%c8_448, %c0_449, %c0_450] : memref<25x128x128xbf16, #tpu.memory_space<vmem>>, vector<1x128x128xbf16>
    %516 = vector.shape_cast %515 : vector<1x128x128xbf16> to vector<128x128xbf16>
    %cst_451 = arith.constant dense<0.000000e+00> : vector<64x128xf32>
    %517 = tpu.matmul %514, %516, %cst_451 {dimension_numbers = #tpu.dot_dimension_numbers<[1], [0], [0], [1], [0, 0, 1, 1], [], []>} : vector<64x128xbf16>, vector<128x128xbf16>, vector<64x128xf32> -> vector<64x128xf32>
    %518 = arith.addf %511, %517 : vector<64x128xf32>
    %c2_452 = arith.constant 2 : index
    %c4_453 = arith.constant 4 : index
    %c0_454 = arith.constant 0 : index
    %c0_455 = arith.constant 0 : index
    %519 = vector.load %arg11[%c2_452, %c4_453, %c0_454, %c0_455] : memref<6x6x32x128xbf16, #tpu.memory_space<vmem>>, vector<1x2x32x128xbf16>
    %520 = vector.shape_cast %519 : vector<1x2x32x128xbf16> to vector<2x32x128xbf16>
    %521 = vector.shape_cast %520 : vector<2x32x128xbf16> to vector<64x128xbf16>
    %c9_456 = arith.constant 9 : index
    %c0_457 = arith.constant 0 : index
    %c0_458 = arith.constant 0 : index
    %522 = vector.load %arg4[%c9_456, %c0_457, %c0_458] : memref<25x128x128xbf16, #tpu.memory_space<vmem>>, vector<1x128x128xbf16>
    %523 = vector.shape_cast %522 : vector<1x128x128xbf16> to vector<128x128xbf16>
    %cst_459 = arith.constant dense<0.000000e+00> : vector<64x128xf32>
    %524 = tpu.matmul %521, %523, %cst_459 {dimension_numbers = #tpu.dot_dimension_numbers<[1], [0], [0], [1], [0, 0, 1, 1], [], []>} : vector<64x128xbf16>, vector<128x128xbf16>, vector<64x128xf32> -> vector<64x128xf32>
    %525 = arith.addf %518, %524 : vector<64x128xf32>
    %c1_460 = arith.constant 1 : index
    %c0_461 = arith.constant 0 : index
    %c0_462 = arith.constant 0 : index
    %526 = vector.load %arg12[%c1_460, %c0_461, %c0_462] : memref<2x64x128xf32, #tpu.memory_space<vmem>>, vector<1x64x128xf32>
    %527 = vector.shape_cast %526 : vector<1x64x128xf32> to vector<64x128xf32>
    %528 = arith.addf %527, %525 : vector<64x128xf32>
    %c1_463 = arith.constant 1 : index
    %c0_464 = arith.constant 0 : index
    %c0_465 = arith.constant 0 : index
    %529 = vector.load %arg12[%c1_463, %c0_464, %c0_465] : memref<2x64x128xf32, #tpu.memory_space<vmem>>, vector<1x64x128xf32>
    %530 = vector.shape_cast %529 : vector<1x64x128xf32> to vector<64x128xf32>
    %531 = vector.shape_cast %528 : vector<64x128xf32> to vector<1x64x128xf32>
    tpu.vector_store %arg12[%c1_463, %c0_464, %c0_465], %531 {strides = array<i32>} : memref<2x64x128xf32, #tpu.memory_space<vmem>>, vector<1x64x128xf32>,
    %c3_466 = arith.constant 3 : index
    %c0_467 = arith.constant 0 : index
    %c0_468 = arith.constant 0 : index
    %c0_469 = arith.constant 0 : index
    %532 = vector.load %arg11[%c3_466, %c0_467, %c0_468, %c0_469] : memref<6x6x32x128xbf16, #tpu.memory_space<vmem>>, vector<1x2x32x128xbf16>
    %533 = vector.shape_cast %532 : vector<1x2x32x128xbf16> to vector<2x32x128xbf16>
    %534 = vector.shape_cast %533 : vector<2x32x128xbf16> to vector<64x128xbf16>
    %c10_470 = arith.constant 10 : index
    %c0_471 = arith.constant 0 : index
    %c0_472 = arith.constant 0 : index
    %535 = vector.load %arg4[%c10_470, %c0_471, %c0_472] : memref<25x128x128xbf16, #tpu.memory_space<vmem>>, vector<1x128x128xbf16>
    %536 = vector.shape_cast %535 : vector<1x128x128xbf16> to vector<128x128xbf16>
    %cst_473 = arith.constant dense<0.000000e+00> : vector<64x128xf32>
    %537 = tpu.matmul %534, %536, %cst_473 {dimension_numbers = #tpu.dot_dimension_numbers<[1], [0], [0], [1], [0, 0, 1, 1], [], []>} : vector<64x128xbf16>, vector<128x128xbf16>, vector<64x128xf32> -> vector<64x128xf32>
    %c3_474 = arith.constant 3 : index
    %c1_475 = arith.constant 1 : index
    %c0_476 = arith.constant 0 : index
    %c0_477 = arith.constant 0 : index
    %538 = vector.load %arg11[%c3_474, %c1_475, %c0_476, %c0_477] : memref<6x6x32x128xbf16, #tpu.memory_space<vmem>>, vector<1x2x32x128xbf16>
    %539 = vector.shape_cast %538 : vector<1x2x32x128xbf16> to vector<2x32x128xbf16>
    %540 = vector.shape_cast %539 : vector<2x32x128xbf16> to vector<64x128xbf16>
    %c11_478 = arith.constant 11 : index
    %c0_479 = arith.constant 0 : index
    %c0_480 = arith.constant 0 : index
    %541 = vector.load %arg4[%c11_478, %c0_479, %c0_480] : memref<25x128x128xbf16, #tpu.memory_space<vmem>>, vector<1x128x128xbf16>
    %542 = vector.shape_cast %541 : vector<1x128x128xbf16> to vector<128x128xbf16>
    %cst_481 = arith.constant dense<0.000000e+00> : vector<64x128xf32>
    %543 = tpu.matmul %540, %542, %cst_481 {dimension_numbers = #tpu.dot_dimension_numbers<[1], [0], [0], [1], [0, 0, 1, 1], [], []>} : vector<64x128xbf16>, vector<128x128xbf16>, vector<64x128xf32> -> vector<64x128xf32>
    %544 = arith.addf %537, %543 : vector<64x128xf32>
    %c3_482 = arith.constant 3 : index
    %c2_483 = arith.constant 2 : index
    %c0_484 = arith.constant 0 : index
    %c0_485 = arith.constant 0 : index
    %545 = vector.load %arg11[%c3_482, %c2_483, %c0_484, %c0_485] : memref<6x6x32x128xbf16, #tpu.memory_space<vmem>>, vector<1x2x32x128xbf16>
    %546 = vector.shape_cast %545 : vector<1x2x32x128xbf16> to vector<2x32x128xbf16>
    %547 = vector.shape_cast %546 : vector<2x32x128xbf16> to vector<64x128xbf16>
    %c12_486 = arith.constant 12 : index
    %c0_487 = arith.constant 0 : index
    %c0_488 = arith.constant 0 : index
    %548 = vector.load %arg4[%c12_486, %c0_487, %c0_488] : memref<25x128x128xbf16, #tpu.memory_space<vmem>>, vector<1x128x128xbf16>
    %549 = vector.shape_cast %548 : vector<1x128x128xbf16> to vector<128x128xbf16>
    %cst_489 = arith.constant dense<0.000000e+00> : vector<64x128xf32>
    %550 = tpu.matmul %547, %549, %cst_489 {dimension_numbers = #tpu.dot_dimension_numbers<[1], [0], [0], [1], [0, 0, 1, 1], [], []>} : vector<64x128xbf16>, vector<128x128xbf16>, vector<64x128xf32> -> vector<64x128xf32>
    %551 = arith.addf %544, %550 : vector<64x128xf32>
    %c3_490 = arith.constant 3 : index
    %c3_491 = arith.constant 3 : index
    %c0_492 = arith.constant 0 : index
    %c0_493 = arith.constant 0 : index
    %552 = vector.load %arg11[%c3_490, %c3_491, %c0_492, %c0_493] : memref<6x6x32x128xbf16, #tpu.memory_space<vmem>>, vector<1x2x32x128xbf16>
    %553 = vector.shape_cast %552 : vector<1x2x32x128xbf16> to vector<2x32x128xbf16>
    %554 = vector.shape_cast %553 : vector<2x32x128xbf16> to vector<64x128xbf16>
    %c13_494 = arith.constant 13 : index
    %c0_495 = arith.constant 0 : index
    %c0_496 = arith.constant 0 : index
    %555 = vector.load %arg4[%c13_494, %c0_495, %c0_496] : memref<25x128x128xbf16, #tpu.memory_space<vmem>>, vector<1x128x128xbf16>
    %556 = vector.shape_cast %555 : vector<1x128x128xbf16> to vector<128x128xbf16>
    %cst_497 = arith.constant dense<0.000000e+00> : vector<64x128xf32>
    %557 = tpu.matmul %554, %556, %cst_497 {dimension_numbers = #tpu.dot_dimension_numbers<[1], [0], [0], [1], [0, 0, 1, 1], [], []>} : vector<64x128xbf16>, vector<128x128xbf16>, vector<64x128xf32> -> vector<64x128xf32>
    %558 = arith.addf %551, %557 : vector<64x128xf32>
    %c3_498 = arith.constant 3 : index
    %c4_499 = arith.constant 4 : index
    %c0_500 = arith.constant 0 : index
    %c0_501 = arith.constant 0 : index
    %559 = vector.load %arg11[%c3_498, %c4_499, %c0_500, %c0_501] : memref<6x6x32x128xbf16, #tpu.memory_space<vmem>>, vector<1x2x32x128xbf16>
    %560 = vector.shape_cast %559 : vector<1x2x32x128xbf16> to vector<2x32x128xbf16>
    %561 = vector.shape_cast %560 : vector<2x32x128xbf16> to vector<64x128xbf16>
    %c14_502 = arith.constant 14 : index
    %c0_503 = arith.constant 0 : index
    %c0_504 = arith.constant 0 : index
    %562 = vector.load %arg4[%c14_502, %c0_503, %c0_504] : memref<25x128x128xbf16, #tpu.memory_space<vmem>>, vector<1x128x128xbf16>
    %563 = vector.shape_cast %562 : vector<1x128x128xbf16> to vector<128x128xbf16>
    %cst_505 = arith.constant dense<0.000000e+00> : vector<64x128xf32>
    %564 = tpu.matmul %561, %563, %cst_505 {dimension_numbers = #tpu.dot_dimension_numbers<[1], [0], [0], [1], [0, 0, 1, 1], [], []>} : vector<64x128xbf16>, vector<128x128xbf16>, vector<64x128xf32> -> vector<64x128xf32>
    %565 = arith.addf %558, %564 : vector<64x128xf32>
    %c1_506 = arith.constant 1 : index
    %c0_507 = arith.constant 0 : index
    %c0_508 = arith.constant 0 : index
    %566 = vector.load %arg12[%c1_506, %c0_507, %c0_508] : memref<2x64x128xf32, #tpu.memory_space<vmem>>, vector<1x64x128xf32>
    %567 = vector.shape_cast %566 : vector<1x64x128xf32> to vector<64x128xf32>
    %568 = arith.addf %567, %565 : vector<64x128xf32>
    %c1_509 = arith.constant 1 : index
    %c0_510 = arith.constant 0 : index
    %c0_511 = arith.constant 0 : index
    %569 = vector.load %arg12[%c1_509, %c0_510, %c0_511] : memref<2x64x128xf32, #tpu.memory_space<vmem>>, vector<1x64x128xf32>
    %570 = vector.shape_cast %569 : vector<1x64x128xf32> to vector<64x128xf32>
    %571 = vector.shape_cast %568 : vector<64x128xf32> to vector<1x64x128xf32>
    tpu.vector_store %arg12[%c1_509, %c0_510, %c0_511], %571 {strides = array<i32>} : memref<2x64x128xf32, #tpu.memory_space<vmem>>, vector<1x64x128xf32>,
    %c4_512 = arith.constant 4 : index
    %c0_513 = arith.constant 0 : index
    %c0_514 = arith.constant 0 : index
    %c0_515 = arith.constant 0 : index
    %572 = vector.load %arg11[%c4_512, %c0_513, %c0_514, %c0_515] : memref<6x6x32x128xbf16, #tpu.memory_space<vmem>>, vector<1x2x32x128xbf16>
    %573 = vector.shape_cast %572 : vector<1x2x32x128xbf16> to vector<2x32x128xbf16>
    %574 = vector.shape_cast %573 : vector<2x32x128xbf16> to vector<64x128xbf16>
    %c15_516 = arith.constant 15 : index
    %c0_517 = arith.constant 0 : index
    %c0_518 = arith.constant 0 : index
    %575 = vector.load %arg4[%c15_516, %c0_517, %c0_518] : memref<25x128x128xbf16, #tpu.memory_space<vmem>>, vector<1x128x128xbf16>
    %576 = vector.shape_cast %575 : vector<1x128x128xbf16> to vector<128x128xbf16>
    %cst_519 = arith.constant dense<0.000000e+00> : vector<64x128xf32>
    %577 = tpu.matmul %574, %576, %cst_519 {dimension_numbers = #tpu.dot_dimension_numbers<[1], [0], [0], [1], [0, 0, 1, 1], [], []>} : vector<64x128xbf16>, vector<128x128xbf16>, vector<64x128xf32> -> vector<64x128xf32>
    %c4_520 = arith.constant 4 : index
    %c1_521 = arith.constant 1 : index
    %c0_522 = arith.constant 0 : index
    %c0_523 = arith.constant 0 : index
    %578 = vector.load %arg11[%c4_520, %c1_521, %c0_522, %c0_523] : memref<6x6x32x128xbf16, #tpu.memory_space<vmem>>, vector<1x2x32x128xbf16>
    %579 = vector.shape_cast %578 : vector<1x2x32x128xbf16> to vector<2x32x128xbf16>
    %580 = vector.shape_cast %579 : vector<2x32x128xbf16> to vector<64x128xbf16>
    %c16_524 = arith.constant 16 : index
    %c0_525 = arith.constant 0 : index
    %c0_526 = arith.constant 0 : index
    %581 = vector.load %arg4[%c16_524, %c0_525, %c0_526] : memref<25x128x128xbf16, #tpu.memory_space<vmem>>, vector<1x128x128xbf16>
    %582 = vector.shape_cast %581 : vector<1x128x128xbf16> to vector<128x128xbf16>
    %cst_527 = arith.constant dense<0.000000e+00> : vector<64x128xf32>
    %583 = tpu.matmul %580, %582, %cst_527 {dimension_numbers = #tpu.dot_dimension_numbers<[1], [0], [0], [1], [0, 0, 1, 1], [], []>} : vector<64x128xbf16>, vector<128x128xbf16>, vector<64x128xf32> -> vector<64x128xf32>
    %584 = arith.addf %577, %583 : vector<64x128xf32>
    %c4_528 = arith.constant 4 : index
    %c2_529 = arith.constant 2 : index
    %c0_530 = arith.constant 0 : index
    %c0_531 = arith.constant 0 : index
    %585 = vector.load %arg11[%c4_528, %c2_529, %c0_530, %c0_531] : memref<6x6x32x128xbf16, #tpu.memory_space<vmem>>, vector<1x2x32x128xbf16>
    %586 = vector.shape_cast %585 : vector<1x2x32x128xbf16> to vector<2x32x128xbf16>
    %587 = vector.shape_cast %586 : vector<2x32x128xbf16> to vector<64x128xbf16>
    %c17_532 = arith.constant 17 : index
    %c0_533 = arith.constant 0 : index
    %c0_534 = arith.constant 0 : index
    %588 = vector.load %arg4[%c17_532, %c0_533, %c0_534] : memref<25x128x128xbf16, #tpu.memory_space<vmem>>, vector<1x128x128xbf16>
    %589 = vector.shape_cast %588 : vector<1x128x128xbf16> to vector<128x128xbf16>
    %cst_535 = arith.constant dense<0.000000e+00> : vector<64x128xf32>
    %590 = tpu.matmul %587, %589, %cst_535 {dimension_numbers = #tpu.dot_dimension_numbers<[1], [0], [0], [1], [0, 0, 1, 1], [], []>} : vector<64x128xbf16>, vector<128x128xbf16>, vector<64x128xf32> -> vector<64x128xf32>
    %591 = arith.addf %584, %590 : vector<64x128xf32>
    %c4_536 = arith.constant 4 : index
    %c3_537 = arith.constant 3 : index
    %c0_538 = arith.constant 0 : index
    %c0_539 = arith.constant 0 : index
    %592 = vector.load %arg11[%c4_536, %c3_537, %c0_538, %c0_539] : memref<6x6x32x128xbf16, #tpu.memory_space<vmem>>, vector<1x2x32x128xbf16>
    %593 = vector.shape_cast %592 : vector<1x2x32x128xbf16> to vector<2x32x128xbf16>
    %594 = vector.shape_cast %593 : vector<2x32x128xbf16> to vector<64x128xbf16>
    %c18_540 = arith.constant 18 : index
    %c0_541 = arith.constant 0 : index
    %c0_542 = arith.constant 0 : index
    %595 = vector.load %arg4[%c18_540, %c0_541, %c0_542] : memref<25x128x128xbf16, #tpu.memory_space<vmem>>, vector<1x128x128xbf16>
    %596 = vector.shape_cast %595 : vector<1x128x128xbf16> to vector<128x128xbf16>
    %cst_543 = arith.constant dense<0.000000e+00> : vector<64x128xf32>
    %597 = tpu.matmul %594, %596, %cst_543 {dimension_numbers = #tpu.dot_dimension_numbers<[1], [0], [0], [1], [0, 0, 1, 1], [], []>} : vector<64x128xbf16>, vector<128x128xbf16>, vector<64x128xf32> -> vector<64x128xf32>
    %598 = arith.addf %591, %597 : vector<64x128xf32>
    %c4_544 = arith.constant 4 : index
    %c4_545 = arith.constant 4 : index
    %c0_546 = arith.constant 0 : index
    %c0_547 = arith.constant 0 : index
    %599 = vector.load %arg11[%c4_544, %c4_545, %c0_546, %c0_547] : memref<6x6x32x128xbf16, #tpu.memory_space<vmem>>, vector<1x2x32x128xbf16>
    %600 = vector.shape_cast %599 : vector<1x2x32x128xbf16> to vector<2x32x128xbf16>
    %601 = vector.shape_cast %600 : vector<2x32x128xbf16> to vector<64x128xbf16>
    %c19_548 = arith.constant 19 : index
    %c0_549 = arith.constant 0 : index
    %c0_550 = arith.constant 0 : index
    %602 = vector.load %arg4[%c19_548, %c0_549, %c0_550] : memref<25x128x128xbf16, #tpu.memory_space<vmem>>, vector<1x128x128xbf16>
    %603 = vector.shape_cast %602 : vector<1x128x128xbf16> to vector<128x128xbf16>
    %cst_551 = arith.constant dense<0.000000e+00> : vector<64x128xf32>
    %604 = tpu.matmul %601, %603, %cst_551 {dimension_numbers = #tpu.dot_dimension_numbers<[1], [0], [0], [1], [0, 0, 1, 1], [], []>} : vector<64x128xbf16>, vector<128x128xbf16>, vector<64x128xf32> -> vector<64x128xf32>
    %605 = arith.addf %598, %604 : vector<64x128xf32>
    %c1_552 = arith.constant 1 : index
    %c0_553 = arith.constant 0 : index
    %c0_554 = arith.constant 0 : index
    %606 = vector.load %arg12[%c1_552, %c0_553, %c0_554] : memref<2x64x128xf32, #tpu.memory_space<vmem>>, vector<1x64x128xf32>
    %607 = vector.shape_cast %606 : vector<1x64x128xf32> to vector<64x128xf32>
    %608 = arith.addf %607, %605 : vector<64x128xf32>
    %c1_555 = arith.constant 1 : index
    %c0_556 = arith.constant 0 : index
    %c0_557 = arith.constant 0 : index
    %609 = vector.load %arg12[%c1_555, %c0_556, %c0_557] : memref<2x64x128xf32, #tpu.memory_space<vmem>>, vector<1x64x128xf32>
    %610 = vector.shape_cast %609 : vector<1x64x128xf32> to vector<64x128xf32>
    %611 = vector.shape_cast %608 : vector<64x128xf32> to vector<1x64x128xf32>
    tpu.vector_store %arg12[%c1_555, %c0_556, %c0_557], %611 {strides = array<i32>} : memref<2x64x128xf32, #tpu.memory_space<vmem>>, vector<1x64x128xf32>,
    %c5_558 = arith.constant 5 : index
    %c0_559 = arith.constant 0 : index
    %c0_560 = arith.constant 0 : index
    %c0_561 = arith.constant 0 : index
    %612 = vector.load %arg11[%c5_558, %c0_559, %c0_560, %c0_561] : memref<6x6x32x128xbf16, #tpu.memory_space<vmem>>, vector<1x2x32x128xbf16>
    %613 = vector.shape_cast %612 : vector<1x2x32x128xbf16> to vector<2x32x128xbf16>
    %614 = vector.shape_cast %613 : vector<2x32x128xbf16> to vector<64x128xbf16>
    %c20_562 = arith.constant 20 : index
    %c0_563 = arith.constant 0 : index
    %c0_564 = arith.constant 0 : index
    %615 = vector.load %arg4[%c20_562, %c0_563, %c0_564] : memref<25x128x128xbf16, #tpu.memory_space<vmem>>, vector<1x128x128xbf16>
    %616 = vector.shape_cast %615 : vector<1x128x128xbf16> to vector<128x128xbf16>
    %cst_565 = arith.constant dense<0.000000e+00> : vector<64x128xf32>
    %617 = tpu.matmul %614, %616, %cst_565 {dimension_numbers = #tpu.dot_dimension_numbers<[1], [0], [0], [1], [0, 0, 1, 1], [], []>} : vector<64x128xbf16>, vector<128x128xbf16>, vector<64x128xf32> -> vector<64x128xf32>
    %c5_566 = arith.constant 5 : index
    %c1_567 = arith.constant 1 : index
    %c0_568 = arith.constant 0 : index
    %c0_569 = arith.constant 0 : index
    %618 = vector.load %arg11[%c5_566, %c1_567, %c0_568, %c0_569] : memref<6x6x32x128xbf16, #tpu.memory_space<vmem>>, vector<1x2x32x128xbf16>
    %619 = vector.shape_cast %618 : vector<1x2x32x128xbf16> to vector<2x32x128xbf16>
    %620 = vector.shape_cast %619 : vector<2x32x128xbf16> to vector<64x128xbf16>
    %c21_570 = arith.constant 21 : index
    %c0_571 = arith.constant 0 : index
    %c0_572 = arith.constant 0 : index
    %621 = vector.load %arg4[%c21_570, %c0_571, %c0_572] : memref<25x128x128xbf16, #tpu.memory_space<vmem>>, vector<1x128x128xbf16>
    %622 = vector.shape_cast %621 : vector<1x128x128xbf16> to vector<128x128xbf16>
    %cst_573 = arith.constant dense<0.000000e+00> : vector<64x128xf32>
    %623 = tpu.matmul %620, %622, %cst_573 {dimension_numbers = #tpu.dot_dimension_numbers<[1], [0], [0], [1], [0, 0, 1, 1], [], []>} : vector<64x128xbf16>, vector<128x128xbf16>, vector<64x128xf32> -> vector<64x128xf32>
    %624 = arith.addf %617, %623 : vector<64x128xf32>
    %c5_574 = arith.constant 5 : index
    %c2_575 = arith.constant 2 : index
    %c0_576 = arith.constant 0 : index
    %c0_577 = arith.constant 0 : index
    %625 = vector.load %arg11[%c5_574, %c2_575, %c0_576, %c0_577] : memref<6x6x32x128xbf16, #tpu.memory_space<vmem>>, vector<1x2x32x128xbf16>
    %626 = vector.shape_cast %625 : vector<1x2x32x128xbf16> to vector<2x32x128xbf16>
    %627 = vector.shape_cast %626 : vector<2x32x128xbf16> to vector<64x128xbf16>
    %c22_578 = arith.constant 22 : index
    %c0_579 = arith.constant 0 : index
    %c0_580 = arith.constant 0 : index
    %628 = vector.load %arg4[%c22_578, %c0_579, %c0_580] : memref<25x128x128xbf16, #tpu.memory_space<vmem>>, vector<1x128x128xbf16>
    %629 = vector.shape_cast %628 : vector<1x128x128xbf16> to vector<128x128xbf16>
    %cst_581 = arith.constant dense<0.000000e+00> : vector<64x128xf32>
    %630 = tpu.matmul %627, %629, %cst_581 {dimension_numbers = #tpu.dot_dimension_numbers<[1], [0], [0], [1], [0, 0, 1, 1], [], []>} : vector<64x128xbf16>, vector<128x128xbf16>, vector<64x128xf32> -> vector<64x128xf32>
    %631 = arith.addf %624, %630 : vector<64x128xf32>
    %c5_582 = arith.constant 5 : index
    %c3_583 = arith.constant 3 : index
    %c0_584 = arith.constant 0 : index
    %c0_585 = arith.constant 0 : index
    %632 = vector.load %arg11[%c5_582, %c3_583, %c0_584, %c0_585] : memref<6x6x32x128xbf16, #tpu.memory_space<vmem>>, vector<1x2x32x128xbf16>
    %633 = vector.shape_cast %632 : vector<1x2x32x128xbf16> to vector<2x32x128xbf16>
    %634 = vector.shape_cast %633 : vector<2x32x128xbf16> to vector<64x128xbf16>
    %c23_586 = arith.constant 23 : index
    %c0_587 = arith.constant 0 : index
    %c0_588 = arith.constant 0 : index
    %635 = vector.load %arg4[%c23_586, %c0_587, %c0_588] : memref<25x128x128xbf16, #tpu.memory_space<vmem>>, vector<1x128x128xbf16>
    %636 = vector.shape_cast %635 : vector<1x128x128xbf16> to vector<128x128xbf16>
    %cst_589 = arith.constant dense<0.000000e+00> : vector<64x128xf32>
    %637 = tpu.matmul %634, %636, %cst_589 {dimension_numbers = #tpu.dot_dimension_numbers<[1], [0], [0], [1], [0, 0, 1, 1], [], []>} : vector<64x128xbf16>, vector<128x128xbf16>, vector<64x128xf32> -> vector<64x128xf32>
    %638 = arith.addf %631, %637 : vector<64x128xf32>
    %c5_590 = arith.constant 5 : index
    %c4_591 = arith.constant 4 : index
    %c0_592 = arith.constant 0 : index
    %c0_593 = arith.constant 0 : index
    %639 = vector.load %arg11[%c5_590, %c4_591, %c0_592, %c0_593] : memref<6x6x32x128xbf16, #tpu.memory_space<vmem>>, vector<1x2x32x128xbf16>
    %640 = vector.shape_cast %639 : vector<1x2x32x128xbf16> to vector<2x32x128xbf16>
    %641 = vector.shape_cast %640 : vector<2x32x128xbf16> to vector<64x128xbf16>
    %c24_594 = arith.constant 24 : index
    %c0_595 = arith.constant 0 : index
    %c0_596 = arith.constant 0 : index
    %642 = vector.load %arg4[%c24_594, %c0_595, %c0_596] : memref<25x128x128xbf16, #tpu.memory_space<vmem>>, vector<1x128x128xbf16>
    %643 = vector.shape_cast %642 : vector<1x128x128xbf16> to vector<128x128xbf16>
    %cst_597 = arith.constant dense<0.000000e+00> : vector<64x128xf32>
    %644 = tpu.matmul %641, %643, %cst_597 {dimension_numbers = #tpu.dot_dimension_numbers<[1], [0], [0], [1], [0, 0, 1, 1], [], []>} : vector<64x128xbf16>, vector<128x128xbf16>, vector<64x128xf32> -> vector<64x128xf32>
    %645 = arith.addf %638, %644 : vector<64x128xf32>
    %c1_598 = arith.constant 1 : index
    %c0_599 = arith.constant 0 : index
    %c0_600 = arith.constant 0 : index
    %646 = vector.load %arg12[%c1_598, %c0_599, %c0_600] : memref<2x64x128xf32, #tpu.memory_space<vmem>>, vector<1x64x128xf32>
    %647 = vector.shape_cast %646 : vector<1x64x128xf32> to vector<64x128xf32>
    %648 = arith.addf %647, %645 : vector<64x128xf32>
    %c1_601 = arith.constant 1 : index
    %c0_602 = arith.constant 0 : index
    %c0_603 = arith.constant 0 : index
    %649 = vector.load %arg12[%c1_601, %c0_602, %c0_603] : memref<2x64x128xf32, #tpu.memory_space<vmem>>, vector<1x64x128xf32>
    %650 = vector.shape_cast %649 : vector<1x64x128xf32> to vector<64x128xf32>
    %651 = vector.shape_cast %648 : vector<64x128xf32> to vector<1x64x128xf32>
    tpu.vector_store %arg12[%c1_601, %c0_602, %c0_603], %651 {strides = array<i32>} : memref<2x64x128xf32, #tpu.memory_space<vmem>>, vector<1x64x128xf32>,
    %c0_604 = arith.constant 0 : index
    %c0_605 = arith.constant 0 : index
    %652 = vector.load %arg5[%c0_604, %c0_605] : memref<1x128xf32, #tpu.memory_space<vmem>>, vector<1x128xf32>
    %c0_606 = arith.constant 0 : index
    %c0_607 = arith.constant 0 : index
    %c0_608 = arith.constant 0 : index
    %653 = vector.load %arg12[%c0_606, %c0_607, %c0_608] : memref<2x64x128xf32, #tpu.memory_space<vmem>>, vector<1x64x128xf32>
    %654 = vector.shape_cast %653 : vector<1x64x128xf32> to vector<64x128xf32>
    %c1_609 = arith.constant 1 : index
    %c0_610 = arith.constant 0 : index
    %c0_611 = arith.constant 0 : index
    %655 = vector.load %arg12[%c1_609, %c0_610, %c0_611] : memref<2x64x128xf32, #tpu.memory_space<vmem>>, vector<1x64x128xf32>
    %656 = vector.shape_cast %655 : vector<1x64x128xf32> to vector<64x128xf32>
    %657 = arith.maximumf %654, %656 : vector<64x128xf32>
    %658 = vector.shape_cast %657 : vector<64x128xf32> to vector<2x32x128xf32>
    %cst_612 = arith.constant dense<0xFF800000> : vector<32x128xf32>
    %659 = vector.multi_reduction <maximumf>, %658, %cst_612 [0] : vector<2x32x128xf32> to vector<32x128xf32>
    %660 = vector.broadcast %652 : vector<1x128xf32> to vector<32x128xf32>
    %661 = arith.addf %659, %660 : vector<32x128xf32>
    %cst_613 = arith.constant 0.000000e+00 : f32
    %662 = vector.broadcast %cst_613 : f32 to vector<32x128xf32>
    %663 = arith.maximumf %661, %662 : vector<32x128xf32>
    %664 = arith.truncf %663 : vector<32x128xf32> to vector<32x128xbf16>
    %665 = vector.extract_strided_slice %664 {offsets = [0, 0], sizes = [2, 128], strides = [1, 1]} : vector<32x128xbf16> to vector<2x128xbf16>
    %c0_614 = arith.constant 0 : index
    %c0_615 = arith.constant 0 : index
    %c0_616 = arith.constant 0 : index
    %666 = vector.load %arg6[%c0_614, %c0_615, %c0_616] : memref<16x128x128xbf16, #tpu.memory_space<vmem>>, vector<1x128x128xbf16>
    %667 = vector.shape_cast %666 : vector<1x128x128xbf16> to vector<128x128xbf16>
    %cst_617 = arith.constant dense<0.000000e+00> : vector<2x128xf32>
    %668 = tpu.matmul %665, %667, %cst_617 {dimension_numbers = #tpu.dot_dimension_numbers<[1], [0], [0], [1], [0, 0, 1, 1], [], []>} : vector<2x128xbf16>, vector<128x128xbf16>, vector<2x128xf32> -> vector<2x128xf32>
    %669 = vector.extract_strided_slice %664 {offsets = [2, 0], sizes = [2, 128], strides = [1, 1]} : vector<32x128xbf16> to vector<2x128xbf16>
    %c1_618 = arith.constant 1 : index
    %c0_619 = arith.constant 0 : index
    %c0_620 = arith.constant 0 : index
    %670 = vector.load %arg6[%c1_618, %c0_619, %c0_620] : memref<16x128x128xbf16, #tpu.memory_space<vmem>>, vector<1x128x128xbf16>
    %671 = vector.shape_cast %670 : vector<1x128x128xbf16> to vector<128x128xbf16>
    %cst_621 = arith.constant dense<0.000000e+00> : vector<2x128xf32>
    %672 = tpu.matmul %669, %671, %cst_621 {dimension_numbers = #tpu.dot_dimension_numbers<[1], [0], [0], [1], [0, 0, 1, 1], [], []>} : vector<2x128xbf16>, vector<128x128xbf16>, vector<2x128xf32> -> vector<2x128xf32>
    %673 = arith.addf %668, %672 : vector<2x128xf32>
    %674 = vector.extract_strided_slice %664 {offsets = [4, 0], sizes = [2, 128], strides = [1, 1]} : vector<32x128xbf16> to vector<2x128xbf16>
    %c2_622 = arith.constant 2 : index
    %c0_623 = arith.constant 0 : index
    %c0_624 = arith.constant 0 : index
    %675 = vector.load %arg6[%c2_622, %c0_623, %c0_624] : memref<16x128x128xbf16, #tpu.memory_space<vmem>>, vector<1x128x128xbf16>
    %676 = vector.shape_cast %675 : vector<1x128x128xbf16> to vector<128x128xbf16>
    %cst_625 = arith.constant dense<0.000000e+00> : vector<2x128xf32>
    %677 = tpu.matmul %674, %676, %cst_625 {dimension_numbers = #tpu.dot_dimension_numbers<[1], [0], [0], [1], [0, 0, 1, 1], [], []>} : vector<2x128xbf16>, vector<128x128xbf16>, vector<2x128xf32> -> vector<2x128xf32>
    %678 = arith.addf %673, %677 : vector<2x128xf32>
    %679 = vector.extract_strided_slice %664 {offsets = [6, 0], sizes = [2, 128], strides = [1, 1]} : vector<32x128xbf16> to vector<2x128xbf16>
    %c3_626 = arith.constant 3 : index
    %c0_627 = arith.constant 0 : index
    %c0_628 = arith.constant 0 : index
    %680 = vector.load %arg6[%c3_626, %c0_627, %c0_628] : memref<16x128x128xbf16, #tpu.memory_space<vmem>>, vector<1x128x128xbf16>
    %681 = vector.shape_cast %680 : vector<1x128x128xbf16> to vector<128x128xbf16>
    %cst_629 = arith.constant dense<0.000000e+00> : vector<2x128xf32>
    %682 = tpu.matmul %679, %681, %cst_629 {dimension_numbers = #tpu.dot_dimension_numbers<[1], [0], [0], [1], [0, 0, 1, 1], [], []>} : vector<2x128xbf16>, vector<128x128xbf16>, vector<2x128xf32> -> vector<2x128xf32>
    %683 = arith.addf %678, %682 : vector<2x128xf32>
    %684 = vector.extract_strided_slice %664 {offsets = [8, 0], sizes = [2, 128], strides = [1, 1]} : vector<32x128xbf16> to vector<2x128xbf16>
    %c4_630 = arith.constant 4 : index
    %c0_631 = arith.constant 0 : index
    %c0_632 = arith.constant 0 : index
    %685 = vector.load %arg6[%c4_630, %c0_631, %c0_632] : memref<16x128x128xbf16, #tpu.memory_space<vmem>>, vector<1x128x128xbf16>
    %686 = vector.shape_cast %685 : vector<1x128x128xbf16> to vector<128x128xbf16>
    %cst_633 = arith.constant dense<0.000000e+00> : vector<2x128xf32>
    %687 = tpu.matmul %684, %686, %cst_633 {dimension_numbers = #tpu.dot_dimension_numbers<[1], [0], [0], [1], [0, 0, 1, 1], [], []>} : vector<2x128xbf16>, vector<128x128xbf16>, vector<2x128xf32> -> vector<2x128xf32>
    %688 = arith.addf %683, %687 : vector<2x128xf32>
    %689 = vector.extract_strided_slice %664 {offsets = [10, 0], sizes = [2, 128], strides = [1, 1]} : vector<32x128xbf16> to vector<2x128xbf16>
    %c5_634 = arith.constant 5 : index
    %c0_635 = arith.constant 0 : index
    %c0_636 = arith.constant 0 : index
    %690 = vector.load %arg6[%c5_634, %c0_635, %c0_636] : memref<16x128x128xbf16, #tpu.memory_space<vmem>>, vector<1x128x128xbf16>
    %691 = vector.shape_cast %690 : vector<1x128x128xbf16> to vector<128x128xbf16>
    %cst_637 = arith.constant dense<0.000000e+00> : vector<2x128xf32>
    %692 = tpu.matmul %689, %691, %cst_637 {dimension_numbers = #tpu.dot_dimension_numbers<[1], [0], [0], [1], [0, 0, 1, 1], [], []>} : vector<2x128xbf16>, vector<128x128xbf16>, vector<2x128xf32> -> vector<2x128xf32>
    %693 = arith.addf %688, %692 : vector<2x128xf32>
    %694 = vector.extract_strided_slice %664 {offsets = [12, 0], sizes = [2, 128], strides = [1, 1]} : vector<32x128xbf16> to vector<2x128xbf16>
    %c6_638 = arith.constant 6 : index
    %c0_639 = arith.constant 0 : index
    %c0_640 = arith.constant 0 : index
    %695 = vector.load %arg6[%c6_638, %c0_639, %c0_640] : memref<16x128x128xbf16, #tpu.memory_space<vmem>>, vector<1x128x128xbf16>
    %696 = vector.shape_cast %695 : vector<1x128x128xbf16> to vector<128x128xbf16>
    %cst_641 = arith.constant dense<0.000000e+00> : vector<2x128xf32>
    %697 = tpu.matmul %694, %696, %cst_641 {dimension_numbers = #tpu.dot_dimension_numbers<[1], [0], [0], [1], [0, 0, 1, 1], [], []>} : vector<2x128xbf16>, vector<128x128xbf16>, vector<2x128xf32> -> vector<2x128xf32>
    %698 = arith.addf %693, %697 : vector<2x128xf32>
    %699 = vector.extract_strided_slice %664 {offsets = [14, 0], sizes = [2, 128], strides = [1, 1]} : vector<32x128xbf16> to vector<2x128xbf16>
    %c7_642 = arith.constant 7 : index
    %c0_643 = arith.constant 0 : index
    %c0_644 = arith.constant 0 : index
    %700 = vector.load %arg6[%c7_642, %c0_643, %c0_644] : memref<16x128x128xbf16, #tpu.memory_space<vmem>>, vector<1x128x128xbf16>
    %701 = vector.shape_cast %700 : vector<1x128x128xbf16> to vector<128x128xbf16>
    %cst_645 = arith.constant dense<0.000000e+00> : vector<2x128xf32>
    %702 = tpu.matmul %699, %701, %cst_645 {dimension_numbers = #tpu.dot_dimension_numbers<[1], [0], [0], [1], [0, 0, 1, 1], [], []>} : vector<2x128xbf16>, vector<128x128xbf16>, vector<2x128xf32> -> vector<2x128xf32>
    %703 = arith.addf %698, %702 : vector<2x128xf32>
    %704 = vector.extract_strided_slice %664 {offsets = [16, 0], sizes = [2, 128], strides = [1, 1]} : vector<32x128xbf16> to vector<2x128xbf16>
    %c8_646 = arith.constant 8 : index
    %c0_647 = arith.constant 0 : index
    %c0_648 = arith.constant 0 : index
    %705 = vector.load %arg6[%c8_646, %c0_647, %c0_648] : memref<16x128x128xbf16, #tpu.memory_space<vmem>>, vector<1x128x128xbf16>
    %706 = vector.shape_cast %705 : vector<1x128x128xbf16> to vector<128x128xbf16>
    %cst_649 = arith.constant dense<0.000000e+00> : vector<2x128xf32>
    %707 = tpu.matmul %704, %706, %cst_649 {dimension_numbers = #tpu.dot_dimension_numbers<[1], [0], [0], [1], [0, 0, 1, 1], [], []>} : vector<2x128xbf16>, vector<128x128xbf16>, vector<2x128xf32> -> vector<2x128xf32>
    %708 = arith.addf %703, %707 : vector<2x128xf32>
    %709 = vector.extract_strided_slice %664 {offsets = [18, 0], sizes = [2, 128], strides = [1, 1]} : vector<32x128xbf16> to vector<2x128xbf16>
    %c9_650 = arith.constant 9 : index
    %c0_651 = arith.constant 0 : index
    %c0_652 = arith.constant 0 : index
    %710 = vector.load %arg6[%c9_650, %c0_651, %c0_652] : memref<16x128x128xbf16, #tpu.memory_space<vmem>>, vector<1x128x128xbf16>
    %711 = vector.shape_cast %710 : vector<1x128x128xbf16> to vector<128x128xbf16>
    %cst_653 = arith.constant dense<0.000000e+00> : vector<2x128xf32>
    %712 = tpu.matmul %709, %711, %cst_653 {dimension_numbers = #tpu.dot_dimension_numbers<[1], [0], [0], [1], [0, 0, 1, 1], [], []>} : vector<2x128xbf16>, vector<128x128xbf16>, vector<2x128xf32> -> vector<2x128xf32>
    %713 = arith.addf %708, %712 : vector<2x128xf32>
    %714 = vector.extract_strided_slice %664 {offsets = [20, 0], sizes = [2, 128], strides = [1, 1]} : vector<32x128xbf16> to vector<2x128xbf16>
    %c10_654 = arith.constant 10 : index
    %c0_655 = arith.constant 0 : index
    %c0_656 = arith.constant 0 : index
    %715 = vector.load %arg6[%c10_654, %c0_655, %c0_656] : memref<16x128x128xbf16, #tpu.memory_space<vmem>>, vector<1x128x128xbf16>
    %716 = vector.shape_cast %715 : vector<1x128x128xbf16> to vector<128x128xbf16>
    %cst_657 = arith.constant dense<0.000000e+00> : vector<2x128xf32>
    %717 = tpu.matmul %714, %716, %cst_657 {dimension_numbers = #tpu.dot_dimension_numbers<[1], [0], [0], [1], [0, 0, 1, 1], [], []>} : vector<2x128xbf16>, vector<128x128xbf16>, vector<2x128xf32> -> vector<2x128xf32>
    %718 = arith.addf %713, %717 : vector<2x128xf32>
    %719 = vector.extract_strided_slice %664 {offsets = [22, 0], sizes = [2, 128], strides = [1, 1]} : vector<32x128xbf16> to vector<2x128xbf16>
    %c11_658 = arith.constant 11 : index
    %c0_659 = arith.constant 0 : index
    %c0_660 = arith.constant 0 : index
    %720 = vector.load %arg6[%c11_658, %c0_659, %c0_660] : memref<16x128x128xbf16, #tpu.memory_space<vmem>>, vector<1x128x128xbf16>
    %721 = vector.shape_cast %720 : vector<1x128x128xbf16> to vector<128x128xbf16>
    %cst_661 = arith.constant dense<0.000000e+00> : vector<2x128xf32>
    %722 = tpu.matmul %719, %721, %cst_661 {dimension_numbers = #tpu.dot_dimension_numbers<[1], [0], [0], [1], [0, 0, 1, 1], [], []>} : vector<2x128xbf16>, vector<128x128xbf16>, vector<2x128xf32> -> vector<2x128xf32>
    %723 = arith.addf %718, %722 : vector<2x128xf32>
    %724 = vector.extract_strided_slice %664 {offsets = [24, 0], sizes = [2, 128], strides = [1, 1]} : vector<32x128xbf16> to vector<2x128xbf16>
    %c12_662 = arith.constant 12 : index
    %c0_663 = arith.constant 0 : index
    %c0_664 = arith.constant 0 : index
    %725 = vector.load %arg6[%c12_662, %c0_663, %c0_664] : memref<16x128x128xbf16, #tpu.memory_space<vmem>>, vector<1x128x128xbf16>
    %726 = vector.shape_cast %725 : vector<1x128x128xbf16> to vector<128x128xbf16>
    %cst_665 = arith.constant dense<0.000000e+00> : vector<2x128xf32>
    %727 = tpu.matmul %724, %726, %cst_665 {dimension_numbers = #tpu.dot_dimension_numbers<[1], [0], [0], [1], [0, 0, 1, 1], [], []>} : vector<2x128xbf16>, vector<128x128xbf16>, vector<2x128xf32> -> vector<2x128xf32>
    %728 = arith.addf %723, %727 : vector<2x128xf32>
    %729 = vector.extract_strided_slice %664 {offsets = [26, 0], sizes = [2, 128], strides = [1, 1]} : vector<32x128xbf16> to vector<2x128xbf16>
    %c13_666 = arith.constant 13 : index
    %c0_667 = arith.constant 0 : index
    %c0_668 = arith.constant 0 : index
    %730 = vector.load %arg6[%c13_666, %c0_667, %c0_668] : memref<16x128x128xbf16, #tpu.memory_space<vmem>>, vector<1x128x128xbf16>
    %731 = vector.shape_cast %730 : vector<1x128x128xbf16> to vector<128x128xbf16>
    %cst_669 = arith.constant dense<0.000000e+00> : vector<2x128xf32>
    %732 = tpu.matmul %729, %731, %cst_669 {dimension_numbers = #tpu.dot_dimension_numbers<[1], [0], [0], [1], [0, 0, 1, 1], [], []>} : vector<2x128xbf16>, vector<128x128xbf16>, vector<2x128xf32> -> vector<2x128xf32>
    %733 = arith.addf %728, %732 : vector<2x128xf32>
    %734 = vector.extract_strided_slice %664 {offsets = [28, 0], sizes = [2, 128], strides = [1, 1]} : vector<32x128xbf16> to vector<2x128xbf16>
    %c14_670 = arith.constant 14 : index
    %c0_671 = arith.constant 0 : index
    %c0_672 = arith.constant 0 : index
    %735 = vector.load %arg6[%c14_670, %c0_671, %c0_672] : memref<16x128x128xbf16, #tpu.memory_space<vmem>>, vector<1x128x128xbf16>
    %736 = vector.shape_cast %735 : vector<1x128x128xbf16> to vector<128x128xbf16>
    %cst_673 = arith.constant dense<0.000000e+00> : vector<2x128xf32>
    %737 = tpu.matmul %734, %736, %cst_673 {dimension_numbers = #tpu.dot_dimension_numbers<[1], [0], [0], [1], [0, 0, 1, 1], [], []>} : vector<2x128xbf16>, vector<128x128xbf16>, vector<2x128xf32> -> vector<2x128xf32>
    %738 = arith.addf %733, %737 : vector<2x128xf32>
    %739 = vector.extract_strided_slice %664 {offsets = [30, 0], sizes = [2, 128], strides = [1, 1]} : vector<32x128xbf16> to vector<2x128xbf16>
    %c15_674 = arith.constant 15 : index
    %c0_675 = arith.constant 0 : index
    %c0_676 = arith.constant 0 : index
    %740 = vector.load %arg6[%c15_674, %c0_675, %c0_676] : memref<16x128x128xbf16, #tpu.memory_space<vmem>>, vector<1x128x128xbf16>
    %741 = vector.shape_cast %740 : vector<1x128x128xbf16> to vector<128x128xbf16>
    %cst_677 = arith.constant dense<0.000000e+00> : vector<2x128xf32>
    %742 = tpu.matmul %739, %741, %cst_677 {dimension_numbers = #tpu.dot_dimension_numbers<[1], [0], [0], [1], [0, 0, 1, 1], [], []>} : vector<2x128xbf16>, vector<128x128xbf16>, vector<2x128xf32> -> vector<2x128xf32>
    %743 = arith.addf %738, %742 : vector<2x128xf32>
    %c0_678 = arith.constant 0 : index
    %c0_679 = arith.constant 0 : index
    %744 = vector.load %arg7[%c0_678, %c0_679] : memref<1x128xf32, #tpu.memory_space<vmem>>, vector<1x128xf32>
    %745 = vector.broadcast %744 : vector<1x128xf32> to vector<2x128xf32>
    %746 = arith.addf %743, %745 : vector<2x128xf32>
    %cst_680 = arith.constant 0.000000e+00 : f32
    %747 = vector.broadcast %cst_680 : f32 to vector<2x128xf32>
    %748 = arith.maximumf %746, %747 : vector<2x128xf32>
    %749 = arith.truncf %748 : vector<2x128xf32> to vector<2x128xbf16>
    %c0_681 = arith.constant 0 : index
    %c0_682 = arith.constant 0 : index
    %750 = vector.load %arg8[%c0_681, %c0_682] : memref<128x128xbf16, #tpu.memory_space<vmem>>, vector<128x128xbf16>
    %cst_683 = arith.constant dense<0.000000e+00> : vector<2x128xf32>
    %751 = tpu.matmul %749, %750, %cst_683 {dimension_numbers = #tpu.dot_dimension_numbers<[1], [0], [0], [1], [0, 0, 1, 1], [], []>} : vector<2x128xbf16>, vector<128x128xbf16>, vector<2x128xf32> -> vector<2x128xf32>
    %c0_684 = arith.constant 0 : index
    %c0_685 = arith.constant 0 : index
    %752 = vector.load %arg9[%c0_684, %c0_685] : memref<1x128xf32, #tpu.memory_space<vmem>>, vector<1x128xf32>
    %753 = vector.broadcast %752 : vector<1x128xf32> to vector<2x128xf32>
    %754 = arith.addf %751, %753 : vector<2x128xf32>
    %cst_686 = arith.constant dense<0xFF800000> : vector<2xf32>
    %755 = vector.multi_reduction <maximumf>, %754, %cst_686 [1] : vector<2x128xf32> to vector<2xf32>
    %756 = vector.shape_cast %755 : vector<2xf32> to vector<2x1xf32>
    %757 = vector.broadcast %756 : vector<2x1xf32> to vector<2x128xf32>
    %758 = arith.subf %754, %757 : vector<2x128xf32>
    %759 = math.exp %758 : vector<2x128xf32>
    %cst_687 = arith.constant dense<0.000000e+00> : vector<2xf32>
    %760 = vector.multi_reduction <add>, %759, %cst_687 [1] : vector<2x128xf32> to vector<2xf32>
    %761 = vector.shape_cast %760 : vector<2xf32> to vector<2x1xf32>
    %762 = math.log %761 : vector<2x1xf32>
    %763 = vector.broadcast %762 : vector<2x1xf32> to vector<2x128xf32>
    %764 = arith.subf %758, %763 : vector<2x128xf32>
    %c0_688 = arith.constant 0 : index
    %c0_689 = arith.constant 0 : index
    %765 = vector.load %arg10[%c0_688, %c0_689] : memref<2x128xf32, #tpu.memory_space<vmem>>, vector<2x128xf32>
    tpu.vector_store %arg10[%c0_688, %c0_689], %764 {strides = array<i32>} : memref<2x128xf32, #tpu.memory_space<vmem>>, vector<2x128xf32>,
    return
  }
  func.func @transform_0(%arg0: i32) -> (i32, i32, i32, i32) {
    %c0_i32 = arith.constant 0 : i32
    %c0_i32_0 = arith.constant 0 : i32
    %c0_i32_1 = arith.constant 0 : i32
    %c0_i32_2 = arith.constant 0 : i32
    return %arg0, %c0_i32, %c0_i32_0, %c0_i32_1 : i32, i32, i32, i32
  }
  func.func @transform_1(%arg0: i32) -> (i32, i32) {
    %c0_i32 = arith.constant 0 : i32
    %c0_i32_0 = arith.constant 0 : i32
    %c0_i32_1 = arith.constant 0 : i32
    return %c0_i32, %c0_i32_0 : i32, i32
  }
  func.func @transform_2(%arg0: i32) -> (i32, i32) {
    %c0_i32 = arith.constant 0 : i32
    %c0_i32_0 = arith.constant 0 : i32
    %c0_i32_1 = arith.constant 0 : i32
    return %c0_i32, %c0_i32_0 : i32, i32
  }
  func.func @transform_3(%arg0: i32) -> (i32, i32, i32) {
    %c0_i32 = arith.constant 0 : i32
    %c0_i32_0 = arith.constant 0 : i32
    %c0_i32_1 = arith.constant 0 : i32
    %c0_i32_2 = arith.constant 0 : i32
    return %c0_i32, %c0_i32_0, %c0_i32_1 : i32, i32, i32
  }
  func.func @transform_4(%arg0: i32) -> (i32, i32) {
    %c0_i32 = arith.constant 0 : i32
    %c0_i32_0 = arith.constant 0 : i32
    %c0_i32_1 = arith.constant 0 : i32
    return %c0_i32, %c0_i32_0 : i32, i32
  }
  func.func @transform_5(%arg0: i32) -> (i32, i32, i32) {
    %c0_i32 = arith.constant 0 : i32
    %c0_i32_0 = arith.constant 0 : i32
    %c0_i32_1 = arith.constant 0 : i32
    %c0_i32_2 = arith.constant 0 : i32
    return %c0_i32, %c0_i32_0, %c0_i32_1 : i32, i32, i32
  }
  func.func @transform_6(%arg0: i32) -> (i32, i32) {
    %c0_i32 = arith.constant 0 : i32
    %c0_i32_0 = arith.constant 0 : i32
    %c0_i32_1 = arith.constant 0 : i32
    return %c0_i32, %c0_i32_0 : i32, i32
  }
  func.func @transform_7(%arg0: i32) -> (i32, i32) {
    %c0_i32 = arith.constant 0 : i32
    %c0_i32_0 = arith.constant 0 : i32
    %c0_i32_1 = arith.constant 0 : i32
    return %c0_i32, %c0_i32_0 : i32, i32
  }
  func.func @transform_8(%arg0: i32) -> (i32, i32) {
    %c0_i32 = arith.constant 0 : i32
    %c0_i32_0 = arith.constant 0 : i32
    %c0_i32_1 = arith.constant 0 : i32
    return %c0_i32, %c0_i32_0 : i32, i32
  }
  func.func @transform_9(%arg0: i32) -> (i32, i32) {
    %c0_i32 = arith.constant 0 : i32
    %c0_i32_0 = arith.constant 0 : i32
    return %arg0, %c0_i32 : i32, i32
  }
}

</mosaic_0001>

<bundles_post_ra>
// kernel: experiment_network_forward.1
= control target key start
LH: loop header
LB: loop body
LE: loop exit
PB: predicated region body
PF: predicated region fallthrough
CT: control target
= control target key end

     0   :  { %vm275_vm0 = vcmask 261120   ;;  %vm723_vm1 = vcmask 1045504   ;;  %vm745_vm2 = vcmask 1043456   ;;  %s21353_s0 = inlined_call_operand.vmem [shape: bf16[1,4,512,32], index: 0, kind: input, shape index: {}]   ;;  %s21354_s1 = inlined_call_operand.vmem [shape: bf16[32,128], index: 1, kind: input, shape index: {}]   ;;  %s21355_s2 = inlined_call_operand.vmem [shape: f32[1,128], index: 2, kind: input, shape index: {}]   ;;  %s21356_s3 = inlined_call_operand.vmem [shape: bf16[25,128,128], index: 3, kind: input, shape index: {}]   ;;  %s21357_s4 = inlined_call_operand.vmem [shape: f32[1,128], index: 4, kind: input, shape index: {}]   ;;  %s21358_s5 = inlined_call_operand.vmem [shape: bf16[16,128,128], index: 5, kind: input, shape index: {}]   ;;  %s21359_s6 = inlined_call_operand.vmem [shape: f32[1,128], index: 6, kind: input, shape index: {}]   ;;  %s21360_s7 = inlined_call_operand.vmem [shape: bf16[128,128], index: 7, kind: input, shape index: {}]   ;;  %s21361_s8 = inlined_call_operand.vmem [shape: f32[1,128], index: 8, kind: input, shape index: {}]   ;;  %s21362_s9 = inlined_call_operand.hbm [shape: f32[2,128], index: 9, kind: output, shape index: {}]  }
   0x1   :  { %v17212_v0 = vld [vmem:[%s21354_s1] sm:$0xff]   ;;  %v17213_v1 = vld [vmem:[%s21354_s1 + $0x8] sm:$0xff]   ;;  %v17218_v6 = vld [vmem:[%s21353_s0 + $0x10] sm:$0xff]  }
   0x2   :  { %15009 = vmatprep.subr.bf16.mxu0 %v17212_v0  ;;  %16821 = vmatprep.subr.bf16.mxu1 %v17212_v0  ;;  %v17214_v2 = vld [vmem:[%s21353_s0] sm:$0xff]   ;;  %v17216_v4 = vld [vmem:[%s21353_s0 + $0x8] sm:$0xff]   ;;  %v17219_v7 = vld [vmem:[%s21353_s0 + $0xf0] sm:$0xff]  }
   0x3   :  { %15010 = vmatpush3.bf16.msra.mxu0 %v17212_v0  ;;  %16823 = vmatpush3.bf16.msra.mxu1 %v17212_v0  ;;  %v17215_v3 = vld [vmem:[%s21353_s0 + $0xe0] sm:$0xff]   ;;  %v17217_v5 = vld [vmem:[%s21353_s0 + $0xe8] sm:$0xff]   ;;  %v17220_v8 = vld [vmem:[%s21353_s0 + $0x18] sm:$0xff]  }
   0x4   :  { %15011 = vmatprep.subr.bf16.mxu0 %v17213_v1  ;;  %16822 = vmatprep.subr.bf16.mxu1 %v17213_v1  ;;  %v17221_v9 = vld [vmem:[%s21353_s0 + $0xf8] sm:$0xff]   ;;  %v17222_v10 = vld [vmem:[%s21353_s0 + $0x20] sm:$0xff]   ;;  %v17224_v12 = vld [vmem:[%s21353_s0 + $0x28] sm:$0xff]  }
   0x5   :  { %15013 = vmatprep.mubr.msk.bf16.mxu0 %vm275_vm0, %v17214_v2  ;;  %15069 = vmatprep.mubr.msk.bf16.mxu1 %vm275_vm0, %v17215_v3  ;;  %v17223_v11 = vld [vmem:[%s21353_s0 + $0x100] sm:$0xff]   ;;  %v17225_v13 = vld [vmem:[%s21353_s0 + $0x108] sm:$0xff]   ;;  %v17226_v14 = vld [vmem:[%s21353_s0 + $0x30] sm:$0xff]  }
   0x6   :  { %v17227_v15 = vld [vmem:[%s21353_s0 + $0x110] sm:$0xff]   ;;  %v17228_v16 = vld [vmem:[%s21353_s0 + $0x38] sm:$0xff]   ;;  %v17230_v18 = vld [vmem:[%s21353_s0 + $0x40] sm:$0xff]  }
   0x7   :  { %15012 = vmatpush3.bf16.msra.mxu0 %v17213_v1  ;;  %16824 = vmatpush3.bf16.msra.mxu1 %v17213_v1  ;;  %v17229_v17 = vld [vmem:[%s21353_s0 + $0x118] sm:$0xff]   ;;  %v17231_v19 = vld [vmem:[%s21353_s0 + $0x120] sm:$0xff]   ;;  %v17232_v20 = vld [vmem:[%s21353_s0 + $0x48] sm:$0xff]  }
   0x8   :  { %15077 = vmatprep.subr.bf16.mxu1 %v17212_v0  ;;  %15145 = vmatprep.subr.bf16.mxu0 %v17212_v0  ;;  %v17233_v21 = vld [vmem:[%s21353_s0 + $0x128] sm:$0xff]   ;;  %v17234_v22 = vld [vmem:[%s21353_s0 + $0x50] sm:$0xff]   ;;  %v17236_v24 = vld [vmem:[%s21353_s0 + $0x58] sm:$0xff]  }
   0x9   :  { %v17235_v23 = vld [vmem:[%s21353_s0 + $0x130] sm:$0xff]   ;;  %v17237_v25 = vld [vmem:[%s21353_s0 + $0x138] sm:$0xff]   ;;  %v17238_v26 = vld [vmem:[%s21353_s0 + $0x60] sm:$0xff]  }
   0xa   :  { %15014 = vmatmul.mubr.msk.bf16.vlgmr.msra.gmra.mrb[0].mxu0 %vm275_vm0, %v17216_v4  ;;  %15070 = vmatmul.mubr.msk.bf16.vlgmr.msra.gmra.mrb[0].mxu1 %vm275_vm0, %v17217_v5  ;;  %v17239_v27 = vld [vmem:[%s21353_s0 + $0x140] sm:$0xff]   ;;  %v17240_v28 = vld [vmem:[%s21353_s0 + $0x68] sm:$0xff]   ;;  %v17242_v30 = vld [vmem:[%s21353_s0 + $0x70] sm:$0xff]  }
   0xb   :  { %15078 = vmatpush3.bf16.msra.mxu1 %v17212_v0  ;;  %15017 = vmatprep.mubr.msk.bf16.mxu0 %vm275_vm0, %v17218_v6  ;;  %v17241_v29 = vld [vmem:[%s21353_s0 + $0x148] sm:$0xff]   ;;  %v17243_v31 = vld [vmem:[%s21353_s0 + $0x150] sm:$0xff]   ;;  %v17244_v32 = vld [vmem:[%s21353_s0 + $0x78] sm:$0xff]  }
   0xc   :  { %15073 = vmatprep.mubr.msk.bf16.mxu1 %vm275_vm0, %v17219_v7  ;;  %15079 = vmatprep.subr.bf16.mxu1 %v17213_v1  ;;  %v17245_v33 = vld [vmem:[%s21353_s0 + $0x158] sm:$0xff]   ;;  %v17246_v34 = vld [vmem:[%s21353_s0 + $0x80] sm:$0xff]   ;;  %v17248_v36 = vld [vmem:[%s21353_s0 + $0x88] sm:$0xff]  }
   0xd   :  { %15146 = vmatpush3.bf16.msra.mxu0 %v17212_v0  ;;  %v17247_v35 = vld [vmem:[%s21353_s0 + $0x160] sm:$0xff]   ;;  %v17249_v37 = vld [vmem:[%s21353_s0 + $0x168] sm:$0xff]   ;;  %v17250_v38 = vld [vmem:[%s21353_s0 + $0x90] sm:$0xff]  }
   0xe   :  { %15147 = vmatprep.subr.bf16.mxu0 %v17213_v1  ;;  %v17251_v39 = vld [vmem:[%s21353_s0 + $0x170] sm:$0xff]   ;;  %v17252_v40 = vld [vmem:[%s21353_s0 + $0x98] sm:$0xff]   ;;  %v17254_v42 = vld [vmem:[%s21353_s0 + $0xa0] sm:$0xff]  }
   0xf   :  { %15080 = vmatpush3.bf16.msra.mxu1 %v17213_v1  ;;  %v17253_v41 = vld [vmem:[%s21353_s0 + $0x178] sm:$0xff]   ;;  %v17255_v43 = vld [vmem:[%s21353_s0 + $0x180] sm:$0xff]   ;;  %v17256_v44 = vld [vmem:[%s21353_s0 + $0xa8] sm:$0xff]  }
  0x10   :  { %15213 = vmatprep.subr.bf16.mxu1 %v17212_v0  ;;  %v17257_v45 = vld [vmem:[%s21353_s0 + $0x188] sm:$0xff]   ;;  %v17258_v46 = vld [vmem:[%s21353_s0 + $0xb0] sm:$0xff]   ;;  %v17260_v48 = vld [vmem:[%s21353_s0 + $0xb8] sm:$0xff]  }
  0x11   :  { %15148 = vmatpush3.bf16.msra.mxu0 %v17213_v1  ;;  %v17259_v47 = vld [vmem:[%s21353_s0 + $0x190] sm:$0xff]   ;;  %v17261_v49 = vld [vmem:[%s21353_s0 + $0x198] sm:$0xff]   ;;  %v17262_v50 = vld [vmem:[%s21353_s0 + $0xc0] sm:$0xff]  }
  0x12   :  { %15018 = vmatmul.mubr.msk.bf16.gmra.mrb[4].mxu0 %vm275_vm0, %v17220_v8  ;;  %15074 = vmatmul.mubr.msk.bf16.gmra.mrb[4].mxu1 %vm275_vm0, %v17221_v9  ;;  %v17263_v51 = vld [vmem:[%s21353_s0 + $0x1a0] sm:$0xff]   ;;  %v17264_v52 = vld [vmem:[%s21353_s0 + $0xc8] sm:$0xff]   ;;  %v17266_v54 = vld [vmem:[%s21353_s0 + $0xd0] sm:$0xff]  }
  0x13   :  { %15021 = vmatprep.mubr.msk.bf16.mxu0 %vm275_vm0, %v17222_v10  ;;  %15081 = vmatprep.mubr.msk.bf16.mxu1 %vm275_vm0, %v17223_v11  ;;  %v17265_v53 = vld [vmem:[%s21353_s0 + $0x1a8] sm:$0xff]   ;;  %v17267_v55 = vld [vmem:[%s21353_s0 + $0x1b0] sm:$0xff]   ;;  %v17268_v56 = vld [vmem:[%s21353_s0 + $0xd8] sm:$0xff]  }
  0x14   :  { %v17269_v57 = vld [vmem:[%s21353_s0 + $0x1b8] sm:$0xff]   ;;  %v17270_v58 = vld [vmem:[%s21353_s0 + $0x1c0] sm:$0xff]   ;;  %v17272_v60 = vld [vmem:[%s21353_s0 + $0x1c8] sm:$0xff]  }
  0x15   :  { %v17271_v59 = vld [vmem:[%s21353_s0 + $0x200] sm:$0xff]   ;;  %v17273_v61 = vld [vmem:[%s21353_s0 + $0x208] sm:$0xff]   ;;  %v17274_v62 = vld [vmem:[%s21353_s0 + $0x1d0] sm:$0xff]  }
  0x16   :  { %v17275_v63 = vld [vmem:[%s21353_s0 + $0x210] sm:$0xff]   ;;  %v17278_v2 = vld [vmem:[%s21353_s0 + $0x1e0] sm:$0xff]   ;;  %v17280_v4 = vld [vmem:[%s21353_s0 + $0x1e8] sm:$0xff]  }
  0x17   :  { %v17279_v3 = vld [vmem:[%s21353_s0 + $0x220] sm:$0xff]   ;;  %v17281_v5 = vld [vmem:[%s21353_s0 + $0x228] sm:$0xff]   ;;  %v17282_v6 = vld [vmem:[%s21353_s0 + $0x1f0] sm:$0xff]  }
  0x18   :  { %v17283_v7 = vld [vmem:[%s21353_s0 + $0x230] sm:$0xff]   ;;  %v17284_v8 = vld [vmem:[%s21353_s0 + $0x1f8] sm:$0xff]   ;;  %v17286_v10 = vld [vmem:[%s21353_s0 + $0x240] sm:$0xff]  }
  0x19   :  { %v17285_v9 = vld [vmem:[%s21353_s0 + $0x238] sm:$0xff]   ;;  %v17287_v11 = vld [vmem:[%s21353_s0 + $0x300] sm:$0xff]  }
  0x1a   :  { %15022 = vmatmul.mubr.msk.bf16.gmra.mrb[8].mxu0 %vm275_vm0, %v17224_v12  ;;  %15082 = vmatmul.mubr.msk.bf16.vlgmr.msra.gmra.mrb[8].mxu1 %vm275_vm0, %v17225_v13  ;;  %v17288_v12 = vld [vmem:[%s21353_s0 + $0x248] sm:$0xff]  }
  0x1b   :  { %15214 = vmatpush3.bf16.msra.mxu1 %v17212_v0  ;;  %15025 = vmatprep.mubr.msk.bf16.mxu0 %vm275_vm0, %v17226_v14  ;;  %v17276_v0 = vld [vmem:[%s21353_s0 + $0x1d8] sm:$0xff]   ;;  %v17289_v13 = vld [vmem:[%s21353_s0 + $0x308] sm:$0xff]   ;;  %v17290_v14 = vld [vmem:[%s21353_s0 + $0x250] sm:$0xff]  }
  0x1c   :  { %15085 = vmatprep.mubr.msk.bf16.mxu1 %vm275_vm0, %v17227_v15  ;;  %15215 = vmatprep.subr.bf16.mxu1 %v17213_v1  ;;  %v17291_v15 = vld [vmem:[%s21353_s0 + $0x310] sm:$0xff]  }
  0x1f   :  { %15216 = vmatpush3.bf16.msra.mxu1 %v17213_v1  ;;  %v17277_v1 = vld [vmem:[%s21353_s0 + $0x218] sm:$0xff]  }
  0x22   :  { %15026 = vmatmul.mubr.msk.bf16.gmra.mrb[12].mxu0 %vm275_vm0, %v17228_v16  ;;  %15086 = vmatmul.mubr.msk.bf16.gmra.mrb[12].mxu1 %vm275_vm0, %v17229_v17  ;;  %v17292_v16 = vld [vmem:[%s21353_s0 + $0x258] sm:$0xff]  }
  0x23   :  { %15029 = vmatprep.mubr.msk.bf16.mxu0 %vm275_vm0, %v17230_v18  ;;  %15089 = vmatprep.mubr.msk.bf16.mxu1 %vm275_vm0, %v17231_v19  ;;  %v17293_v17 = vld [vmem:[%s21353_s0 + $0x318] sm:$0xff]   ;;  %v17294_v18 = vld [vmem:[%s21353_s0 + $0x260] sm:$0xff]  }
  0x24   :  { %v17295_v19 = vld [vmem:[%s21353_s0 + $0x320] sm:$0xff]  }
  0x2a   :  { %15030 = vmatmul.mubr.msk.bf16.gmra.mrb[16].mxu0 %vm275_vm0, %v17232_v20  ;;  %15090 = vmatmul.mubr.msk.bf16.gmra.mrb[16].mxu1 %vm275_vm0, %v17233_v21  ;;  %v17296_v20 = vld [vmem:[%s21353_s0 + $0x268] sm:$0xff]  }
  0x2b   :  { %15033 = vmatprep.mubr.msk.bf16.mxu0 %vm275_vm0, %v17234_v22  ;;  %15093 = vmatprep.mubr.msk.bf16.mxu1 %vm275_vm0, %v17235_v23  ;;  %v17297_v21 = vld [vmem:[%s21353_s0 + $0x328] sm:$0xff]   ;;  %v17298_v22 = vld [vmem:[%s21353_s0 + $0x270] sm:$0xff]  }
  0x2c   :  { %v17299_v23 = vld [vmem:[%s21353_s0 + $0x330] sm:$0xff]  }
  0x32   :  { %15034 = vmatmul.mubr.msk.bf16.gmra.mrb[20].mxu0 %vm275_vm0, %v17236_v24  ;;  %15094 = vmatmul.mubr.msk.bf16.gmra.mrb[20].mxu1 %vm275_vm0, %v17237_v25  ;;  %v17300_v24 = vld [vmem:[%s21353_s0 + $0x278] sm:$0xff]  }
  0x33   :  { %15037 = vmatprep.mubr.msk.bf16.mxu0 %vm275_vm0, %v17238_v26  ;;  %15097 = vmatprep.mubr.msk.bf16.mxu1 %vm275_vm0, %v17239_v27  ;;  %v17301_v25 = vld [vmem:[%s21353_s0 + $0x338] sm:$0xff]   ;;  %v17302_v26 = vld [vmem:[%s21353_s0 + $0x280] sm:$0xff]  }
  0x34   :  { %v17303_v27 = vld [vmem:[%s21353_s0 + $0x340] sm:$0xff]  }
  0x3a   :  { %15038 = vmatmul.mubr.msk.bf16.gmra.mrb[24].mxu0 %vm275_vm0, %v17240_v28  ;;  %15098 = vmatmul.mubr.msk.bf16.gmra.mrb[24].mxu1 %vm275_vm0, %v17241_v29  ;;  %v17304_v28 = vld [vmem:[%s21353_s0 + $0x288] sm:$0xff]  }
  0x3b   :  { %15041 = vmatprep.mubr.msk.bf16.mxu0 %vm275_vm0, %v17242_v30  ;;  %15101 = vmatprep.mubr.msk.bf16.mxu1 %vm275_vm0, %v17243_v31  ;;  %v17305_v29 = vld [vmem:[%s21353_s0 + $0x348] sm:$0xff]   ;;  %v17306_v30 = vld [vmem:[%s21353_s0 + $0x290] sm:$0xff]  }
  0x3c   :  { %v17307_v31 = vld [vmem:[%s21353_s0 + $0x350] sm:$0xff]  }
  0x42   :  { %15042 = vmatmul.mubr.msk.bf16.gmra.mrb[28].mxu0 %vm275_vm0, %v17244_v32  ;;  %15102 = vmatmul.mubr.msk.bf16.gmra.mrb[28].mxu1 %vm275_vm0, %v17245_v33  ;;  %v17308_v32 = vld [vmem:[%s21353_s0 + $0x298] sm:$0xff]  }
  0x43   :  { %15045 = vmatprep.mubr.msk.bf16.mxu0 %vm275_vm0, %v17246_v34  ;;  %15105 = vmatprep.mubr.msk.bf16.mxu1 %vm275_vm0, %v17247_v35  ;;  %v17309_v33 = vld [vmem:[%s21353_s0 + $0x358] sm:$0xff]   ;;  %v17338_v34 = vld [vmem:[%s21356_s3 + $0x40] sm:$0xff]  }
  0x44   :  { %v17310_v35 = vld [vmem:[%s21353_s0 + $0x2a0] sm:$0xff]   ;;  %15281 = vmatprep.subr.bf16.mxu0 %v17338_v34 }
  0x4a   :  { %15046 = vmatmul.mubr.msk.bf16.gmra.mrb[32].mxu0 %vm275_vm0, %v17248_v36  ;;  %15106 = vmatmul.mubr.msk.bf16.gmra.mrb[32].mxu1 %vm275_vm0, %v17249_v37  ;;  %v17311_v36 = vld [vmem:[%s21353_s0 + $0x360] sm:$0xff]   ;;  %v17339_v37 = vld [vmem:[%s21356_s3 + $0x48] sm:$0xff]  }
  0x4b   :  { %15049 = vmatprep.mubr.msk.bf16.mxu0 %vm275_vm0, %v17250_v38  ;;  %15109 = vmatprep.mubr.msk.bf16.mxu1 %vm275_vm0, %v17251_v39  ;;  %v17312_v38 = vld [vmem:[%s21353_s0 + $0x2a8] sm:$0xff]  }
  0x4c   :  { %v17313_v39 = vld [vmem:[%s21353_s0 + $0x368] sm:$0xff]  }
  0x52   :  { %15050 = vmatmul.mubr.msk.bf16.gmra.mrb[36].mxu0 %vm275_vm0, %v17252_v40  ;;  %15110 = vmatmul.mubr.msk.bf16.gmra.mrb[36].mxu1 %vm275_vm0, %v17253_v41  ;;  %v17340_v40 = vld [vmem:[%s21356_s3 + $0x50] sm:$0xff]  }
  0x53   :  { %15053 = vmatprep.mubr.msk.bf16.mxu0 %vm275_vm0, %v17254_v42  ;;  %15113 = vmatprep.mubr.msk.bf16.mxu1 %vm275_vm0, %v17255_v43  ;;  %v17314_v41 = vld [vmem:[%s21353_s0 + $0x2b0] sm:$0xff]   ;;  %v17341_v43 = vld [vmem:[%s21356_s3 + $0x58] sm:$0xff]  }
  0x54   :  { %v17315_v42 = vld [vmem:[%s21353_s0 + $0x370] sm:$0xff]  }
  0x5a   :  { %15054 = vmatmul.mubr.msk.bf16.gmra.mrb[40].mxu0 %vm275_vm0, %v17256_v44  ;;  %15114 = vmatmul.mubr.msk.bf16.gmra.mrb[40].mxu1 %vm275_vm0, %v17257_v45  ;;  %v17316_v44 = vld [vmem:[%s21353_s0 + $0x2b8] sm:$0xff]  }
  0x5b   :  { %15057 = vmatprep.mubr.msk.bf16.mxu0 %vm275_vm0, %v17258_v46  ;;  %15117 = vmatprep.mubr.msk.bf16.mxu1 %vm275_vm0, %v17259_v47  ;;  %v17317_v45 = vld [vmem:[%s21353_s0 + $0x378] sm:$0xff]   ;;  %v17342_v46 = vld [vmem:[%s21356_s3 + $0x60] sm:$0xff]  }
  0x5c   :  { %v17318_v47 = vld [vmem:[%s21353_s0 + $0x2c0] sm:$0xff]  }
  0x62   :  { %15058 = vmatmul.mubr.msk.bf16.gmra.mrb[44].mxu0 %vm275_vm0, %v17260_v48  ;;  %15118 = vmatmul.mubr.msk.bf16.gmra.mrb[44].mxu1 %vm275_vm0, %v17261_v49  ;;  %v17319_v48 = vld [vmem:[%s21353_s0 + $0x380] sm:$0xff]   ;;  %v17343_v49 = vld [vmem:[%s21356_s3 + $0x68] sm:$0xff]  }
  0x63   :  { %15061 = vmatprep.mubr.msk.bf16.mxu0 %vm275_vm0, %v17262_v50  ;;  %15121 = vmatprep.mubr.msk.bf16.mxu1 %vm275_vm0, %v17263_v51  ;;  %v17320_v50 = vld [vmem:[%s21353_s0 + $0x2c8] sm:$0xff]  }
  0x64   :  { %v17321_v51 = vld [vmem:[%s21353_s0 + $0x388] sm:$0xff]  }
  0x6a   :  { %15062 = vmatmul.mubr.msk.bf16.gmra.mrb[48].mxu0 %vm275_vm0, %v17264_v52  ;;  %15122 = vmatmul.mubr.msk.bf16.gmra.mrb[48].mxu1 %vm275_vm0, %v17265_v53  ;;  %v17346_v52 = vld [vmem:[%s21356_s3 + $0x70] sm:$0xff]  }
  0x6b   :  { %15065 = vmatprep.mubr.msk.bf16.mxu0 %vm275_vm0, %v17266_v54  ;;  %15125 = vmatprep.mubr.msk.bf16.mxu1 %vm275_vm0, %v17267_v55  ;;  %v17322_v53 = vld [vmem:[%s21353_s0 + $0x2d0] sm:$0xff]   ;;  %v17347_v55 = vld [vmem:[%s21356_s3 + $0x78] sm:$0xff]  }
  0x6c   :  { %v17323_v54 = vld [vmem:[%s21353_s0 + $0x390] sm:$0xff]  }
  0x72   :  { %15066 = vmatmul.mubr.msk.bf16.gmra.mrb[52].mxu0 %vm275_vm0, %v17268_v56  ;;  %15126 = vmatmul.mubr.msk.bf16.gmra.mrb[52].mxu1 %vm275_vm0, %v17269_v57  ;;  %v17324_v56 = vld [vmem:[%s21353_s0 + $0x2d8] sm:$0xff]  }
  0x73   :  { %15129 = vmatprep.mubr.msk.bf16.mxu1 %vm275_vm0, %v17270_v58  ;;  %15149 = vmatprep.mubr.msk.bf16.mxu0 %vm275_vm0, %v17271_v59  ;;  %v17325_v57 = vld [vmem:[%s21353_s0 + $0x398] sm:$0xff]   ;;  %v17348_v58 = vld [vmem:[%s21356_s3] sm:$0xff]  }
  0x7a   :  { %15130 = vmatmul.mubr.msk.bf16.gmra.mrb[56].mxu1 %vm275_vm0, %v17272_v60  ;;  %15150 = vmatmul.mubr.msk.bf16.vlgmr.msra.gmra.mrb[56].mxu0 %vm275_vm0, %v17273_v61  ;;  %v17326_v60 = vld [vmem:[%s21353_s0 + $0x2e0] sm:$0xff]  }
  0x7b   :  { %15133 = vmatprep.mubr.msk.bf16.mxu1 %vm275_vm0, %v17274_v62  ;;  %15153 = vmatprep.mubr.msk.bf16.mxu0 %vm275_vm0, %v17275_v63  ;;  %v17327_v61 = vld [vmem:[%s21353_s0 + $0x3a0] sm:$0xff]  }
  0x7c   :  { %15282 = vmatpush3.bf16.msra.mxu0 %v17338_v34 }
  0x7d   :  { %15283 = vmatprep.subr.bf16.mxu0 %v17339_v37 }
  0x80   :  { %15284 = vmatpush3.bf16.msra.mxu0 %v17339_v37 }
  0x81   :  { %15285 = vmatprep.subr.bf16.mxu0 %v17340_v40 }
  0x82   :  { %15134 = vmatmul.mubr.msk.bf16.gmra.mrb[60].mxu1 %vm275_vm0, %v17276_v0  ;;  %15154 = vmatmul.mubr.msk.bf16.gmra.mrb[60].mxu0 %vm275_vm0, %v17277_v1 }
  0x83   :  { %15137 = vmatprep.mubr.msk.bf16.mxu1 %vm275_vm0, %v17278_v2  ;;  %15157 = vmatprep.mubr.msk.bf16.mxu0 %vm275_vm0, %v17279_v3 }
  0x84   :  { %15286 = vmatpush3.bf16.msra.mxu0 %v17340_v40 }
  0x85   :  { %15287 = vmatprep.subr.bf16.mxu0 %v17341_v43 }
  0x88   :  { %15288 = vmatpush3.bf16.msra.mxu0 %v17341_v43 }
  0x89   :  { %15289 = vmatprep.subr.bf16.mxu0 %v17342_v46 }
  0x8a   :  { %15138 = vmatmul.mubr.msk.bf16.gmra.mrb[64].mxu1 %vm275_vm0, %v17280_v4  ;;  %15158 = vmatmul.mubr.msk.bf16.gmra.mrb[64].mxu0 %vm275_vm0, %v17281_v5  ;;  %v17328_v5 = vld [vmem:[%s21353_s0 + $0x2e8] sm:$0xff]  }
  0x8b   :  { %15141 = vmatprep.mubr.msk.bf16.mxu1 %vm275_vm0, %v17282_v6  ;;  %15161 = vmatprep.mubr.msk.bf16.mxu0 %vm275_vm0, %v17283_v7  ;;  %v17329_v7 = vld [vmem:[%s21353_s0 + $0x3a8] sm:$0xff]  }
  0x8c   :  { %15290 = vmatpush3.bf16.msra.mxu0 %v17342_v46 }
  0x8d   :  { %15291 = vmatprep.subr.bf16.mxu0 %v17343_v49 }
  0x90   :  { %15292 = vmatpush3.bf16.msra.mxu0 %v17343_v49 }
  0x91   :  { %15293 = vmatprep.subr.bf16.mxu0 %v17346_v52 }
  0x92   :  { %15142 = vmatmul.mubr.msk.bf16.gmra.mrb[68].mxu1 %vm275_vm0, %v17284_v8  ;;  %15162 = vmatmul.mubr.msk.bf16.gmra.mrb[68].mxu0 %vm275_vm0, %v17285_v9  ;;  %v17330_v8 = vld [vmem:[%s21353_s0 + $0x3b0] sm:$0xff]  }
  0x93   :  { %15165 = vmatprep.mubr.msk.bf16.mxu0 %vm275_vm0, %v17286_v10  ;;  %15217 = vmatprep.mubr.msk.bf16.mxu1 %vm275_vm0, %v17287_v11 }
  0x94   :  { %15294 = vmatpush3.bf16.msra.mxu0 %v17346_v52 }
  0x95   :  { %15295 = vmatprep.subr.bf16.mxu0 %v17347_v55 }
  0x98   :  { %15296 = vmatpush3.bf16.msra.mxu0 %v17347_v55 }
  0x99   :  { %15305 = vmatprep.subr.bf16.mxu0 %v17348_v58 }
  0x9a   :  { %15166 = vmatmul.mubr.msk.bf16.gmra.mrb[72].mxu0 %vm275_vm0, %v17288_v12  ;;  %15218 = vmatmul.mubr.msk.bf16.vlgmr.msra.gmra.mrb[72].mxu1 %vm275_vm0, %v17289_v13  ;;  %v17344_v12 = vld [vmem:[%s21353_s0 + $0x2f0] sm:$0xff]   ;;  %v17349_v13 = vld [vmem:[%s21356_s3 + $0x40] sm:$0xff]  }
  0x9b   :  { %15169 = vmatprep.mubr.msk.bf16.mxu0 %vm275_vm0, %v17290_v14  ;;  %15221 = vmatprep.mubr.msk.bf16.mxu1 %vm275_vm0, %v17291_v15 }
  0x9c   :  { %15881 = vmatprep.subr.bf16.mxu1 %v17349_v13 }
  0x9d   :  { %15882 = vmatpush3.bf16.msra.mxu1 %v17349_v13 }
  0xa2   :  { %15170 = vmatmul.mubr.msk.bf16.gmra.mrb[76].mxu0 %vm275_vm0, %v17292_v16  ;;  %15222 = vmatmul.mubr.msk.bf16.gmra.mrb[76].mxu1 %vm275_vm0, %v17293_v17 }
  0xa3   :  { %15173 = vmatprep.mubr.msk.bf16.mxu0 %vm275_vm0, %v17294_v18  ;;  %15225 = vmatprep.mubr.msk.bf16.mxu1 %vm275_vm0, %v17295_v19  ;;  %v17331_v18 = vld [vmem:[%s21353_s0 + $0x3b8] sm:$0xff]  }
  0xaa   :  { %15174 = vmatmul.mubr.msk.bf16.gmra.mrb[80].mxu0 %vm275_vm0, %v17296_v20  ;;  %15226 = vmatmul.mubr.msk.bf16.gmra.mrb[80].mxu1 %vm275_vm0, %v17297_v21  ;;  %v17332_v20 = vld [vmem:[%s21353_s0 + $0x3c0] sm:$0xff]  }
  0xab   :  { %15177 = vmatprep.mubr.msk.bf16.mxu0 %vm275_vm0, %v17298_v22  ;;  %15229 = vmatprep.mubr.msk.bf16.mxu1 %vm275_vm0, %v17299_v23  ;;  %v17345_v22 = vld [vmem:[%s21353_s0 + $0x2f8] sm:$0xff]  }
  0xb2   :  { %15178 = vmatmul.mubr.msk.bf16.gmra.mrb[84].mxu0 %vm275_vm0, %v17300_v24  ;;  %15230 = vmatmul.mubr.msk.bf16.gmra.mrb[84].mxu1 %vm275_vm0, %v17301_v25 }
  0xb3   :  { %15181 = vmatprep.mubr.msk.bf16.mxu0 %vm275_vm0, %v17302_v26  ;;  %15233 = vmatprep.mubr.msk.bf16.mxu1 %vm275_vm0, %v17303_v27 }
  0xba   :  { %15182 = vmatmul.mubr.msk.bf16.gmra.mrb[88].mxu0 %vm275_vm0, %v17304_v28  ;;  %15234 = vmatmul.mubr.msk.bf16.gmra.mrb[88].mxu1 %vm275_vm0, %v17305_v29  ;;  %v17354_v29 = vld [vmem:[%s21356_s3 + $0x48] sm:$0xff]  }
  0xbb   :  { %15185 = vmatprep.mubr.msk.bf16.mxu0 %vm275_vm0, %v17306_v30  ;;  %15237 = vmatprep.mubr.msk.bf16.mxu1 %vm275_vm0, %v17307_v31  ;;  %v17333_v31 = vld [vmem:[%s21353_s0 + $0x3c8] sm:$0xff]  }
  0xbc   :  { %15883 = vmatprep.subr.bf16.mxu1 %v17354_v29 }
  0xbd   :  { %15884 = vmatpush3.bf16.msra.mxu1 %v17354_v29 }
  0xc2   :  { %15186 = vmatmul.mubr.msk.bf16.gmra.mrb[92].mxu0 %vm275_vm0, %v17308_v32  ;;  %15238 = vmatmul.mubr.msk.bf16.gmra.mrb[92].mxu1 %vm275_vm0, %v17309_v33  ;;  %v17334_v32 = vld [vmem:[%s21353_s0 + $0x3d0] sm:$0xff]  }
  0xc3   :  { %15189 = vmatprep.mubr.msk.bf16.mxu0 %vm275_vm0, %v17310_v35  ;;  %15241 = vmatprep.mubr.msk.bf16.mxu1 %vm275_vm0, %v17311_v36 }
  0xca   :  { %15190 = vmatmul.mubr.msk.bf16.gmra.mrb[96].mxu0 %vm275_vm0, %v17312_v38  ;;  %15242 = vmatmul.mubr.msk.bf16.gmra.mrb[96].mxu1 %vm275_vm0, %v17313_v39 }
  0xcb   :  { %15193 = vmatprep.mubr.msk.bf16.mxu0 %vm275_vm0, %v17314_v41  ;;  %15245 = vmatprep.mubr.msk.bf16.mxu1 %vm275_vm0, %v17315_v42  ;;  %v17335_v41 = vld [vmem:[%s21353_s0 + $0x3d8] sm:$0xff]   ;;  %v17336_v42 = vld [vmem:[%s21353_s0 + $0x3e0] sm:$0xff]  }
  0xd2   :  { %15194 = vmatmul.mubr.msk.bf16.gmra.mrb[100].mxu0 %vm275_vm0, %v17316_v44  ;;  %15246 = vmatmul.mubr.msk.bf16.gmra.mrb[100].mxu1 %vm275_vm0, %v17317_v45 }
  0xd3   :  { %15197 = vmatprep.mubr.msk.bf16.mxu0 %vm275_vm0, %v17318_v47  ;;  %15249 = vmatprep.mubr.msk.bf16.mxu1 %vm275_vm0, %v17319_v48 }
  0xda   :  { %15198 = vmatmul.mubr.msk.bf16.gmra.mrb[104].mxu0 %vm275_vm0, %v17320_v50  ;;  %15250 = vmatmul.mubr.msk.bf16.gmra.mrb[104].mxu1 %vm275_vm0, %v17321_v51 }
  0xdb   :  { %15201 = vmatprep.mubr.msk.bf16.mxu0 %vm275_vm0, %v17322_v53  ;;  %15253 = vmatprep.mubr.msk.bf16.mxu1 %vm275_vm0, %v17323_v54  ;;  %v17359_v53 = vld [vmem:[%s21356_s3 + $0x50] sm:$0xff]  }
  0xdc   :  { %15885 = vmatprep.subr.bf16.mxu1 %v17359_v53 }
  0xdd   :  { %v18441_v59 = vpop.f32.mrb[0].mxu1  ;;  %v18449_v62 = vpop.f32.mrb[0].mxu0  ;;  %15886 = vmatpush3.bf16.msra.mxu1 %v17359_v53 }
  0xde   :  { %v18451_v63 = vpop.f32.mrb[1].mxu1  ;;  %v18453_v0 = vpop.f32.mrb[1].mxu0 }
  0xdf   :  { %v18455_v1 = vpop.f32.mrb[2].mxu1  ;;  %v18457_v2 = vpop.f32.mrb[2].mxu0 }
  0xe0   :  { %v18459_v3 = vpop.f32.mrb[3].mxu1  ;;  %v18461_v4 = vpop.f32.mrb[3].mxu0 }
  0xe2   :  { %15202 = vmatmul.mubr.msk.bf16.gmra.mrb[108].mxu0 %vm275_vm0, %v17324_v56  ;;  %15254 = vmatmul.mubr.msk.bf16.gmra.mrb[108].mxu1 %vm275_vm0, %v17325_v57  ;;  %v17337_v56 = vld [vmem:[%s21353_s0 + $0x3e8] sm:$0xff]  }
  0xe3   :  { %15205 = vmatprep.mubr.msk.bf16.mxu0 %vm275_vm0, %v17326_v60  ;;  %15257 = vmatprep.mubr.msk.bf16.mxu1 %vm275_vm0, %v17327_v61 }
  0xe5   :  { %v15075_v6 = vpop.f32.mrb[4].mxu1  ;;  %v18476_v9 = vpop.f32.mrb[4].mxu0 }
  0xe6   :  { %v634_v10 = vpop.f32.mrb[5].mxu1  ;;  %v18478_v11 = vpop.f32.mrb[5].mxu0 }
  0xe7   :  { %v15076_v14 = vpop.f32.mrb[6].mxu1  ;;  %v18486_v15 = vpop.f32.mrb[6].mxu0 }
  0xe8   :  { %v636_v16 = vpop.f32.mrb[7].mxu1  ;;  %v18488_v17 = vpop.f32.mrb[7].mxu0 }
  0xea   :  { %15206 = vmatmul.mubr.msk.bf16.gmra.mrb[112].mxu0 %vm275_vm0, %v17328_v5  ;;  %15258 = vmatmul.mubr.msk.bf16.gmra.mrb[112].mxu1 %vm275_vm0, %v17329_v7 }
  0xeb   :  { %15261 = vmatprep.mubr.msk.bf16.mxu1 %vm275_vm0, %v17330_v8  ;;  %15209 = vmatprep.mubr.msk.bf16.mxu0 %vm275_vm0, %v17344_v12 }
  0xed   :  { %v18497_v19 = vpop.f32.mrb[8].mxu1  ;;  %v18502_v21 = vpop.f32.mrb[8].mxu0 }
  0xee   :  { %v18507_v23 = vpop.f32.mrb[9].mxu1  ;;  %v18509_v24 = vpop.f32.mrb[9].mxu0 }
  0xef   :  { %v18511_v25 = vpop.f32.mrb[10].mxu1  ;;  %v18513_v26 = vpop.f32.mrb[10].mxu0 }
  0xf0   :  { %v18515_v27 = vpop.f32.mrb[11].mxu1  ;;  %v18517_v28 = vpop.f32.mrb[11].mxu0 }
  0xf2   :  { %15262 = vmatmul.mubr.msk.bf16.gmra.mrb[116].mxu1 %vm275_vm0, %v17331_v18  ;;  %15210 = vmatmul.mubr.msk.bf16.gmra.mrb[116].mxu0 %vm275_vm0, %v17345_v22 }
  0xf3   :  { %15265 = vmatprep.mubr.msk.bf16.mxu1 %vm275_vm0, %v17332_v20 }
  0xf5   :  { %v18525_v30 = vpop.f32.mrb[12].mxu1  ;;  %v15027_v33 = vpop.f32.mrb[12].mxu0 }
  0xf6   :  { %v18533_v34 = vpop.f32.mrb[13].mxu1  ;;  %v454_v35 = vpop.f32.mrb[13].mxu0  ;;  %v17364_v33 = vld [vmem:[%s21356_s3 + $0x58] sm:$0xff]  }
  0xf7   :  { %v18535_v36 = vpop.f32.mrb[14].mxu1  ;;  %v15028_v37 = vpop.f32.mrb[14].mxu0  ;;  %15887 = vmatprep.subr.bf16.mxu1 %v17364_v33 }
  0xf8   :  { %v18537_v38 = vpop.f32.mrb[15].mxu1  ;;  %v456_v39 = vpop.f32.mrb[15].mxu0  ;;  %15888 = vmatpush3.bf16.msra.mxu1 %v17364_v33 }
  0xfa   :  { %15266 = vmatmul.mubr.msk.bf16.gmra.mrb[120].mxu1 %vm275_vm0, %v17333_v31 }
  0xfb   :  { %15269 = vmatprep.mubr.msk.bf16.mxu1 %vm275_vm0, %v17334_v32 }
  0xfd   :  { %v18541_v40 = vpop.f32.mrb[16].mxu1  ;;  %v18549_v43 = vpop.f32.mrb[16].mxu0 }
  0xfe   :  { %v18551_v44 = vpop.f32.mrb[17].mxu1  ;;  %v651_v45 = vmax.f32 %v18449_v62, %v18549_v43  ;;  %v18555_v46 = vpop.f32.mrb[17].mxu0 }
  0xff   :  { %v18557_v47 = vpop.f32.mrb[18].mxu1  ;;  %v645_v48 = vmax.f32 %v18453_v0, %v18555_v46  ;;  %v18561_v49 = vpop.f32.mrb[18].mxu0 }
 0x100   :  { %v18563_v50 = vpop.f32.mrb[19].mxu1  ;;  %v654_v51 = vmax.f32 %v18457_v2, %v18561_v49  ;;  %v18567_v52 = vpop.f32.mrb[19].mxu0 }
 0x101   :  { %v648_v54 = vmax.f32 %v18461_v4, %v18567_v52 }
 0x102   :  { %15270 = vmatmul.mubr.msk.bf16.gmra.mrb[124].mxu1 %vm275_vm0, %v17335_v41 }
 0x103   :  { %15273 = vmatprep.mubr.msk.bf16.mxu1 %vm275_vm0, %v17336_v42 }
 0x105   :  { %v15095_v55 = vpop.f32.mrb[20].mxu1  ;;  %v18579_v57 = vpop.f32.mrb[20].mxu0 }
 0x106   :  { %v1217_v58 = vpop.f32.mrb[21].mxu1  ;;  %v663_v60 = vmax.f32 %v18476_v9, %v18579_v57  ;;  %v18583_v61 = vpop.f32.mrb[21].mxu0 }
 0x107   :  { %v15096_v62 = vpop.f32.mrb[22].mxu1  ;;  %v657_v0 = vmax.f32 %v18478_v11, %v18583_v61  ;;  %v18587_v5 = vpop.f32.mrb[22].mxu0 }
 0x108   :  { %v1219_v6 = vpop.f32.mrb[23].mxu1  ;;  %v666_v7 = vmax.f32 %v18486_v15, %v18587_v5  ;;  %v18591_v8 = vpop.f32.mrb[23].mxu0 }
 0x109   :  { %v660_v10 = vmax.f32 %v18488_v17, %v18591_v8 }
 0x10a   :  { %15274 = vmatmul.mubr.msk.bf16.gmra.mrb[128].mxu1 %vm275_vm0, %v17337_v56 }
 0x10d   :  { %v18596_v9 = vpop.f32.mrb[24].mxu1  ;;  %v18598_v12 = vpop.f32.mrb[24].mxu0 }
 0x10e   :  { %v1414_v11 = vmax.f32 %v18497_v19, %v18596_v9  ;;  %v18602_v13 = vpop.f32.mrb[25].mxu1  ;;  %v675_v14 = vmax.f32 %v18502_v21, %v18598_v12  ;;  %v18606_v15 = vpop.f32.mrb[25].mxu0 }
 0x10f   :  { %v1408_v16 = vmax.f32 %v18507_v23, %v18602_v13  ;;  %v18610_v18 = vpop.f32.mrb[26].mxu1  ;;  %v669_v20 = vmax.f32 %v18509_v24, %v18606_v15  ;;  %v18614_v22 = vpop.f32.mrb[26].mxu0 }
 0x110   :  { %v1417_v29 = vmax.f32 %v18511_v25, %v18610_v18  ;;  %v18618_v31 = vpop.f32.mrb[27].mxu1  ;;  %v678_v21 = vmax.f32 %v18513_v26, %v18614_v22  ;;  %v18622_v32 = vpop.f32.mrb[27].mxu0 }
 0x111   :  { %v1411_v35 = vmax.f32 %v18515_v27, %v18618_v31  ;;  %v672_v24 = vmax.f32 %v18517_v28, %v18622_v32 }
 0x115   :  { %v18631_v37 = vpop.f32.mrb[28].mxu1  ;;  %v15043_v39 = vpop.f32.mrb[28].mxu0 }
 0x116   :  { %v1426_v26 = vmax.f32 %v18525_v30, %v18631_v37  ;;  %v18635_v41 = vpop.f32.mrb[29].mxu1  ;;  %v514_v42 = vpop.f32.mrb[29].mxu0 }
 0x117   :  { %v18639_v46 = vpop.f32.mrb[30].mxu1  ;;  %v15044_v53 = vpop.f32.mrb[30].mxu0 }
 0x118   :  { %v18643_v56 = vpop.f32.mrb[31].mxu1  ;;  %v516_v57 = vpop.f32.mrb[31].mxu0 }
 0x11d   :  { %v15047_v61 = vpop.f32.mrb[32].mxu0  ;;  %v18647_v62 = vpop.f32.mrb[32].mxu1 }
 0x11e   :  { %v18649_v5 = vmax.f32 %v651_v45, %v15047_v61  ;;  %v526_v12 = vpop.f32.mrb[33].mxu0  ;;  %v18653_v15 = vpop.f32.mrb[33].mxu1 }
 0x11f   :  { %v18655_v22 = vmax.f32 %v645_v48, %v526_v12  ;;  %v15048_v39 = vpop.f32.mrb[34].mxu0  ;;  %v18659_v42 = vpop.f32.mrb[34].mxu1  ;;  %v17369_v48 = vld [vmem:[%s21356_s3 + $0x60] sm:$0xff]  }
 0x120   :  { %v18664_v53 = vmax.f32 %v654_v51, %v15048_v39  ;;  %v529_v57 = vpop.f32.mrb[35].mxu0  ;;  %v18668_v61 = vpop.f32.mrb[35].mxu1  ;;  %15889 = vmatprep.subr.bf16.mxu1 %v17369_v48 }
 0x121   :  { %v18676_v12 = vmax.f32 %v648_v54, %v529_v57  ;;  %v1435_v2 = vmax.f32 %v18563_v50, %v18668_v61  ;;  %15890 = vmatpush3.bf16.msra.mxu1 %v17369_v48 }
 0x125   :  { %v15051_v49 = vpop.f32.mrb[36].mxu0  ;;  %v15111_v51 = vpop.f32.mrb[36].mxu1 }
 0x126   :  { %v18680_v39 = vmax.f32 %v663_v60, %v15051_v49  ;;  %v542_v45 = vpop.f32.mrb[37].mxu0  ;;  %v1277_v33 = vpop.f32.mrb[37].mxu1  ;;  %v18694_v60 = vld [vmem:[%s21355_s2] ss:$0 sm:$0xff] }
 0x127   :  { %v18682_v6 = vmax.f32 %v657_v0, %v542_v45  ;;  %v15052_v58 = vpop.f32.mrb[38].mxu0  ;;  %v15112_v55 = vpop.f32.mrb[38].mxu1 }
 0x128   :  { %v18684_v43 = vmax.f32 %v666_v7, %v15052_v58  ;;  %v545_v4 = vpop.f32.mrb[39].mxu0  ;;  %v1279_v52 = vpop.f32.mrb[39].mxu1 }
 0x129   :  { %v18689_v54 = vmax.f32 %v660_v10, %v545_v4  ;;  %v21383_v52 = vmax.f32 %v18533_v34, %v18635_v41 }
 0x12d   :  { %v15055_v57 = vpop.f32.mrb[40].mxu0  ;;  %v15115_v33 = vpop.f32.mrb[40].mxu1 }
 0x12e   :  { %v676_v0 = vmax.f32 %v675_v14, %v15055_v57  ;;  %v18699_v7 = vmax.f32 %v1414_v11, %v15115_v33  ;;  %v558_v55 = vpop.f32.mrb[41].mxu0  ;;  %v1289_v58 = vpop.f32.mrb[41].mxu1 }
 0x12f   :  { %v670_v45 = vmax.f32 %v669_v20, %v558_v55  ;;  %v18704_v17 = vmax.f32 %v1408_v16, %v1289_v58  ;;  %v15056_v8 = vpop.f32.mrb[42].mxu0  ;;  %v15116_v10 = vpop.f32.mrb[42].mxu1  ;;  %v21384_v55 = vmax.f32 %v18535_v36, %v18639_v46 }
 0x130   :  { %v677_v48 = vmax.f32 %v676_v0, %v18441_v59  ;;  %v679_v49 = vmax.f32 %v678_v21, %v15056_v8  ;;  %v18710_v14 = vmax.f32 %v1417_v29, %v15116_v10  ;;  %v561_v19 = vpop.f32.mrb[43].mxu0  ;;  %v1292_v9 = vpop.f32.mrb[43].mxu1 }
 0x131   :  { %v671_v11 = vmax.f32 %v670_v45, %v18451_v63  ;;  %v673_v23 = vmax.f32 %v672_v24, %v561_v19  ;;  %v18719_v13 = vmax.f32 %v1411_v35, %v1292_v9 }
 0x132   :  { %v697_v59 = vadd.f32 %v18694_v60, %v677_v48  ;;  %v680_v16 = vmax.f32 %v679_v49, %v18455_v1  ;;  %v21386_v48 = vmax.f32 %v18537_v38, %v18643_v56 }
 0x133   :  { %v695_v25 = vadd.f32 %v18694_v60, %v671_v11  ;;  %v674_v18 = vmax.f32 %v673_v23, %v18459_v3  ;;  %v17374_v3 = vld [vmem:[%s21356_s3 + $0x68] sm:$0xff]  }
 0x134   :  { %v709_v20 = vmax.f32 %v697_v59, 0.0  ;;  %v698_v63 = vadd.f32 %v18694_v60, %v680_v16  ;;  %15891 = vmatprep.subr.bf16.mxu1 %v17374_v3 }
 0x135   :  { %v18726_v29 = vmax.f32 %v695_v25, 0.0  ;;  %v696_v28 = vadd.f32 %v18694_v60, %v674_v18  ;;  %v15119_v21 = vpop.f32.mrb[44].mxu1  ;;  %v15059_v32 = vpop.f32.mrb[44].mxu0  ;;  %15892 = vmatpush3.bf16.msra.mxu1 %v17374_v3  ;;  %v21389_v25 = vmax.f32 %v18541_v40, %v18647_v62  ;;  %v21391_v40 = vmax.f32 %v18557_v47, %v18659_v42 }
 0x136   :  { %v798_v27 = vrot.slane %v709_v20, 2  ;;  %v710_v31 = vmax.f32 %v698_v63, 0.0  ;;  %v18732_v1 = vmax.f32 %v1426_v26, %v15119_v21  ;;  %v1305_v35 = vpop.f32.mrb[45].mxu1  ;;  %v574_v24 = vpop.f32.mrb[45].mxu0  ;;  %v806_v51 = vrot.slane %v709_v20, 4 }
 0x137   :  { %v708_v4 = vmax.f32 %v696_v28, 0.0  ;;  %v18740_v57 = vmax.f32 %v21383_v52, %v1305_v35  ;;  %v15120_v33 = vpop.f32.mrb[46].mxu1  ;;  %v15060_v0 = vpop.f32.mrb[46].mxu0  ;;  %v774_v30 = vrot.slane %v18726_v29, 2  ;;  %v18749_v10 = vpack.c.bf16 %v709_v20, %v18726_v29 }
 0x138   :  { %v799_v37 = vrot.slane %v710_v31, 2  ;;  %v807_v26 = vrot.slane %v710_v31, 4  ;;  %v18746_v58 = vmax.f32 %v21384_v55, %v15120_v33  ;;  %v1308_v45 = vpop.f32.mrb[47].mxu1  ;;  %v576_v8 = vpop.f32.mrb[47].mxu0  ;;  %v783_v19 = vrot.slane %v18726_v29, 4 }
 0x139   :  { %21385 = vst [vmem:[#allocation7_spill] sm:$0xff] %v18749_v10  ;;  %v775_v34 = vrot.slane %v708_v4, 2  ;;  %v784_v41 = vrot.slane %v708_v4, 4  ;;  %v18754_v49 = vmax.f32 %v21386_v48, %v1308_v45  ;;  %v21390_v21 = vmax.f32 %v18551_v44, %v18653_v15  ;;  %v17379_v8 = vld [vmem:[%s21356_s3 + $0x70] sm:$0xff]  }
 0x13a   :  { %v800_v36 = vsel %vm723_vm1, %v798_v27, %v799_v37  ;;  %v808_v46 = vsel %vm745_vm2, %v806_v51, %v807_v26  ;;  %15893 = vmatprep.subr.bf16.mxu1 %v17379_v8 }
 0x13b   :  { %v18760_v9 = vsel %vm723_vm1, %v774_v30, %v775_v34  ;;  %v18763_v11 = vsel %vm745_vm2, %v783_v19, %v784_v41  ;;  %15894 = vmatpush3.bf16.msra.mxu1 %v17379_v8 }
 0x13c   :  { %v18766_v23 = vpack.c.bf16 %v800_v36, %v18760_v9  ;;  %v18769_v38 = vpack.c.bf16 %v808_v46, %v18763_v11 }
 0x13d   :  { %v15063_v56 = vpop.f32.mrb[48].mxu0  ;;  %v15123_v59 = vpop.f32.mrb[48].mxu1 }
 0x13e   :  { %21387 = vst [vmem:[#allocation8_spill] sm:$0xff] %v18766_v23  ;;  %21388 = vst [vmem:[#allocation9_spill] sm:$0xff] %v18769_v38  ;;  %v653_v16 = vmax.f32 %v18649_v5, %v15063_v56  ;;  %v18775_v18 = vmax.f32 %v21389_v25, %v15123_v59  ;;  %v586_v20 = vpop.f32.mrb[49].mxu0  ;;  %v1321_v63 = vpop.f32.mrb[49].mxu1 }
 0x13f   :  { %v647_v28 = vmax.f32 %v18655_v22, %v586_v20  ;;  %v18781_v32 = vmax.f32 %v21390_v21, %v1321_v63  ;;  %v15064_v27 = vpop.f32.mrb[50].mxu0  ;;  %v15124_v31 = vpop.f32.mrb[50].mxu1 }
 0x140   :  { %v689_v35 = vadd.f32 %v18694_v60, %v653_v16  ;;  %v656_v5 = vmax.f32 %v18664_v53, %v15064_v27  ;;  %v18788_v62 = vmax.f32 %v21391_v40, %v15124_v31  ;;  %v589_v24 = vpop.f32.mrb[51].mxu0  ;;  %v1324_v3 = vpop.f32.mrb[51].mxu1 }
 0x141   :  { %v687_v22 = vadd.f32 %v18694_v60, %v647_v28  ;;  %v650_v51 = vmax.f32 %v18676_v12, %v589_v24  ;;  %v18795_v44 = vmax.f32 %v1435_v2, %v1324_v3 }
 0x142   :  { %v18797_v15 = vmax.f32 %v689_v35, 0.0  ;;  %v690_v53 = vadd.f32 %v18694_v60, %v656_v5 }
 0x143   :  { %v18800_v4 = vmax.f32 %v687_v22, 0.0  ;;  %v688_v47 = vadd.f32 %v18694_v60, %v650_v51 }
 0x144   :  { %v702_v42 = vmax.f32 %v690_v53, 0.0  ;;  %v727_v30 = vrot.slane %v18797_v15, 2  ;;  %v749_v50 = vrot.slane %v18797_v15, 4 }
 0x145   :  { %v700_v52 = vmax.f32 %v688_v47, 0.0  ;;  %v15067_v33 = vpop.f32.mrb[52].mxu0  ;;  %v15127_v0 = vpop.f32.mrb[52].mxu1  ;;  %v711_v12 = vpack.c.bf16 %v18797_v15, %v18800_v4  ;;  %v724_v61 = vrot.slane %v18800_v4, 2  ;;  %v746_v34 = vrot.slane %v18800_v4, 4  ;;  %v17355_v4 = vld [vmem:[%s21356_s3 + $0x28] sm:$0xff]  }
 0x146   :  { %v728_v2 = vrot.slane %v702_v42, 2  ;;  %v750_v37 = vrot.slane %v702_v42, 4  ;;  %v665_v26 = vmax.f32 %v18680_v39, %v15067_v33  ;;  %v602_v55 = vpop.f32.mrb[53].mxu0  ;;  %v1337_v45 = vpop.f32.mrb[53].mxu1 }
 0x147   :  { %v725_v41 = vrot.slane %v700_v52, 2  ;;  %v747_v48 = vrot.slane %v700_v52, 4  ;;  %v659_v19 = vmax.f32 %v18682_v6, %v602_v55  ;;  %v15068_v36 = vpop.f32.mrb[54].mxu0  ;;  %v15128_v46 = vpop.f32.mrb[54].mxu1 }
 0x148   :  { %v693_v56 = vadd.f32 %v18694_v60, %v665_v26  ;;  %v668_v59 = vmax.f32 %v18684_v43, %v15068_v36  ;;  %v605_v16 = vpop.f32.mrb[55].mxu0  ;;  %v1339_v39 = vpop.f32.mrb[55].mxu1  ;;  %v729_v25 = vsel %vm723_vm1, %v727_v30, %v728_v2  ;;  %v751_v20 = vsel %vm745_vm2, %v749_v50, %v750_v37 }
 0x149   :  { %v691_v63 = vadd.f32 %v18694_v60, %v659_v19  ;;  %v662_v28 = vmax.f32 %v18689_v54, %v605_v16  ;;  %v726_v21 = vsel %vm723_vm1, %v724_v61, %v725_v41  ;;  %v748_v6 = vsel %vm745_vm2, %v746_v34, %v747_v48 }
 0x14a   :  { %v705_v27 = vmax.f32 %v693_v56, 0.0  ;;  %v694_v31 = vadd.f32 %v18694_v60, %v668_v59  ;;  %v18823_v43 = vpack.c.bf16 %v729_v25, %v726_v21  ;;  %v18825_v35 = vpack.c.bf16 %v751_v20, %v748_v6 }
 0x14b   :  { %v703_v5 = vmax.f32 %v691_v63, 0.0  ;;  %v692_v40 = vadd.f32 %v18694_v60, %v662_v28 }
 0x14c   :  { %v733_v24 = vrot.slane %v705_v27, 2  ;;  %v18829_v3 = vpack.c.bf16 %v18726_v29, %v705_v27  ;;  %v706_v54 = vmax.f32 %v694_v31, 0.0  ;;  %v755_v22 = vrot.slane %v705_v27, 4 }
 0x14d   :  { %v18831_v51 = vpack.c.bf16 %v705_v27, %v703_v5  ;;  %v730_v53 = vrot.slane %v703_v5, 2  ;;  %v704_v47 = vmax.f32 %v692_v40, 0.0  ;;  %v15131_v42 = vpop.f32.mrb[56].mxu1  ;;  %v18833_v52 = vpop.f32.mrb[56].mxu0  ;;  %v18839_v2 = vpack.c.bf16 %v703_v5, %v18797_v15 }
 0x14e   :  { %21392 = vst [vmem:[#allocation10_spill] sm:$0xff] %v18829_v3  ;;  %v734_v33 = vrot.slane %v706_v54, 2  ;;  %v756_v0 = vrot.slane %v706_v54, 4  ;;  %v1416_v30 = vmax.f32 %v18699_v7, %v15131_v42  ;;  %v1349_v50 = vpop.f32.mrb[57].mxu1  ;;  %v18836_v61 = vpop.f32.mrb[57].mxu0  ;;  %v752_v29 = vrot.slane %v703_v5, 4 }
 0x14f   :  { %21393 = vst [vmem:[#allocation11_spill] sm:$0xff] %v18831_v51  ;;  %21394 = vst [vmem:[#allocation12_spill] sm:$0xff] %v18839_v2  ;;  %v731_v37 = vrot.slane %v704_v47, 2  ;;  %v753_v26 = vrot.slane %v704_v47, 4  ;;  %v1410_v55 = vmax.f32 %v18704_v17, %v1349_v50  ;;  %v15132_v45 = vpop.f32.mrb[58].mxu1  ;;  %v18842_v8 = vpop.f32.mrb[58].mxu0 }
 0x150   :  { %v1446_v34 = vadd.f32 %v18694_v60, %v1416_v30  ;;  %v1419_v41 = vmax.f32 %v18710_v14, %v15132_v45  ;;  %v1352_v48 = vpop.f32.mrb[59].mxu1  ;;  %v735_v7 = vsel %vm723_vm1, %v733_v24, %v734_v33  ;;  %v18847_v19 = vpop.f32.mrb[59].mxu0  ;;  %v757_v36 = vsel %vm745_vm2, %v755_v22, %v756_v0  ;;  %v17386_v5 = vld [vmem:[%s21353_s0 + $0x3f0] sm:$0xff]   ;;  %v17384_v50 = vld [vmem:[%s21356_s3 + $0x78] sm:$0xff]  }
 0x151   :  { %v1444_v46 = vadd.f32 %v18694_v60, %v1410_v55  ;;  %v1413_v56 = vmax.f32 %v18719_v13, %v1352_v48  ;;  %v732_v17 = vsel %vm723_vm1, %v730_v53, %v731_v37  ;;  %v754_v59 = vsel %vm745_vm2, %v752_v29, %v753_v26  ;;  %15277 = vmatprep.mubr.msk.bf16.mxu1 %vm275_vm0, %v17386_v5 }
 0x152   :  { %v18854_v16 = vmax.f32 %v1446_v34, 0.0  ;;  %v1447_v39 = vadd.f32 %v18694_v60, %v1419_v41  ;;  %v18857_v14 = vpack.c.bf16 %v735_v7, %v732_v17  ;;  %v18859_v63 = vpack.c.bf16 %v732_v17, %v729_v25  ;;  %15895 = vmatprep.subr.bf16.mxu1 %v17384_v50 }
 0x153   :  { %v1456_v28 = vmax.f32 %v1444_v46, 0.0  ;;  %v1445_v21 = vadd.f32 %v18694_v60, %v1413_v56  ;;  %v18862_v6 = vpack.c.bf16 %v757_v36, %v754_v59  ;;  %v18864_v27 = vpack.c.bf16 %v754_v59, %v751_v20  ;;  %v17387_v20 = vld [vmem:[%s21353_s0 + $0x3f8] sm:$0xff]   ;;  %15896 = vmatpush3.bf16.msra.mxu1 %v17384_v50 }
 0x154   :  { %21395 = vst [vmem:[#allocation13_spill] sm:$0xff] %v18857_v14  ;;  %v1459_v13 = vmax.f32 %v1447_v39, 0.0  ;;  %v1484_v31 = vrot.slane %v18854_v16, 2  ;;  %v18871_v40 = vpack.c.bf16 %v18760_v9, %v735_v7  ;;  %v1505_v47 = vrot.slane %v18854_v16, 4  ;;  %15278 = vmatmul.mubr.msk.bf16.gmra.mrb[132].mxu1 %vm275_vm0, %v17387_v20 }
 0x155   :  { %21396 = vst [vmem:[#allocation14_spill] sm:$0xff] %v18864_v27  ;;  %v1481_v24 = vrot.slane %v1456_v28, 2  ;;  %v1457_v25 = vmax.f32 %v1445_v21, 0.0  ;;  %v15135_v54 = vpop.f32.mrb[60].mxu1  ;;  %v18874_v22 = vpack.c.bf16 %v18854_v16, %v1456_v28  ;;  %v18876_v53 = vpop.f32.mrb[60].mxu0  ;;  %v18890_v29 = vpack.c.bf16 %v18763_v11, %v757_v36 }
 0x156   :  { %v1485_v42 = vrot.slane %v1459_v13, 2  ;;  %v1506_v33 = vrot.slane %v1459_v13, 4  ;;  %v1428_v0 = vmax.f32 %v18732_v1, %v15135_v54  ;;  %v1365_v9 = vpop.f32.mrb[61].mxu1  ;;  %v18883_v30 = vpop.f32.mrb[61].mxu0  ;;  %v1502_v37 = vrot.slane %v1456_v28, 4 }
 0x157   :  { %21397 = vst [vmem:[#allocation15_spill] sm:$0xff] %v18890_v29  ;;  %v1482_v26 = vrot.slane %v1457_v25, 2  ;;  %v1503_v55 = vrot.slane %v1457_v25, 4  ;;  %v1422_v45 = vmax.f32 %v18740_v57, %v1365_v9  ;;  %v15136_v34 = vpop.f32.mrb[62].mxu1  ;;  %15297 = vmatprep.mubr.bf16.mxu0 %v18874_v22  ;;  %v18894_v1 = vpop.f32.mrb[62].mxu0 }
 0x158   :  { %v1450_v41 = vadd.f32 %v18694_v60, %v1428_v0  ;;  %v1431_v48 = vmax.f32 %v18746_v58, %v15136_v34  ;;  %v1368_v7 = vpop.f32.mrb[63].mxu1  ;;  %v18899_v46 = vpop.f32.mrb[63].mxu0  ;;  %v1486_v11 = vsel %vm723_vm1, %v1484_v31, %v1485_v42  ;;  %v18903_v36 = vsel %vm745_vm2, %v1505_v47, %v1506_v33  ;;  %v17350_v47 = vld [vmem:[%s21356_s3 + $0x8] sm:$0xff]  }
 0x159   :  { %v1448_v57 = vadd.f32 %v18694_v60, %v1422_v45  ;;  %v1425_v56 = vmax.f32 %v18754_v49, %v1368_v7  ;;  %v1483_v17 = vsel %vm723_vm1, %v1481_v24, %v1482_v26  ;;  %v18909_v59 = vsel %vm745_vm2, %v1502_v37, %v1503_v55 }
 0x15a   :  { %v1462_v58 = vmax.f32 %v1450_v41, 0.0  ;;  %v1451_v39 = vadd.f32 %v18694_v60, %v1431_v48  ;;  %v18912_v28 = vpack.c.bf16 %v1486_v11, %v1483_v17 }
 0x15b   :  { %v1460_v13 = vmax.f32 %v1448_v57, 0.0  ;;  %v1449_v31 = vadd.f32 %v18694_v60, %v1425_v56  ;;  %v17351_v57 = vld [vmem:[%s21356_s3 + $0x10] sm:$0xff]   ;;  %v17391_v56 = vld [vmem:[%s21356_s3] sm:$0xff]  }
 0x15c   :  { %v1490_v5 = vrot.slane %v1462_v58, 2  ;;  %v1463_v25 = vmax.f32 %v1451_v39, 0.0  ;;  %v1511_v33 = vrot.slane %v1462_v58, 4  ;;  %15905 = vmatprep.subr.bf16.mxu1 %v17391_v56 }
 0x15d   :  { %v18917_v49 = vpack.c.bf16 %v1462_v58, %v1460_v13  ;;  %v1487_v24 = vrot.slane %v1460_v13, 2  ;;  %v1461_v54 = vmax.f32 %v1449_v31, 0.0  ;;  %v15139_v20 = vpop.f32.mrb[64].mxu1  ;;  %v18922_v42 = vpop.f32.mrb[64].mxu0  ;;  %v1508_v26 = vrot.slane %v1460_v13, 4 }
 0x15e   :  { %v1491_v0 = vrot.slane %v1463_v25, 2  ;;  %v1440_v9 = vmax.f32 %v18775_v18, %v15139_v20  ;;  %v1381_v50 = vpop.f32.mrb[65].mxu1  ;;  %v18925_v37 = vpop.f32.mrb[65].mxu0  ;;  %v18928_v55 = vpack.c.bf16 %v1460_v13, %v18854_v16  ;;  %v1512_v45 = vrot.slane %v1463_v25, 4 }
 0x15f   :  { %21398 = vst [vmem:[#allocation16_spill] sm:$0xff] %v18917_v49  ;;  %v1488_v34 = vrot.slane %v1461_v54, 2  ;;  %v1509_v41 = vrot.slane %v1461_v54, 4  ;;  %v1434_v48 = vmax.f32 %v18781_v32, %v1381_v50  ;;  %v15140_v7 = vpop.f32.mrb[66].mxu1  ;;  %15298 = vmatmul.mubr.bf16.vlgmr.msra.gmra.mrb[120].mxu0 %v18917_v49  ;;  %v18935_v18 = vpop.f32.mrb[66].mxu0  ;;  %v17882_v32 = vld [vmem:[%s21356_s3] sm:$0xff]  }
 0x160   :  { %v1454_v16 = vadd.f32 %v18694_v60, %v1440_v9  ;;  %v1443_v17 = vmax.f32 %v18788_v62, %v15140_v7  ;;  %15306 = vmatpush3.bf16.msra.mxu0 %v17882_v32  ;;  %v1384_v39 = vpop.f32.mrb[67].mxu1  ;;  %15301 = vmatprep.mubr.bf16.mxu0 %v18823_v43  ;;  %v18946_v13 = vpop.f32.mrb[67].mxu0  ;;  %v1492_v31 = vsel %vm723_vm1, %v1490_v5, %v1491_v0 }
 0x161   :  { %v1452_v25 = vadd.f32 %v18694_v60, %v1434_v48  ;;  %v1437_v54 = vmax.f32 %v18795_v44, %v1384_v39  ;;  %15307 = vmatprep.subr.bf16.mxu0 %v17350_v47  ;;  %v1489_v20 = vsel %vm723_vm1, %v1487_v24, %v1488_v34  ;;  %v1510_v5 = vsel %vm745_vm2, %v1508_v26, %v1509_v41  ;;  %v17352_v44 = vld [vmem:[%s21356_s3 + $0x18] sm:$0xff]  }
 0x162   :  { %v1466_v62 = vmax.f32 %v1454_v16, 0.0  ;;  %v1455_v9 = vadd.f32 %v18694_v60, %v1443_v17  ;;  %v18953_v50 = vpack.c.bf16 %v1492_v31, %v1489_v20  ;;  %v18955_v7 = vpack.c.bf16 %v1489_v20, %v1486_v11 }
 0x163   :  { %v1464_v32 = vmax.f32 %v1452_v25, 0.0  ;;  %v1453_v21 = vadd.f32 %v18694_v60, %v1437_v54  ;;  %v1513_v0 = vsel %vm745_vm2, %v1511_v33, %v1512_v45  ;;  %v18970_v39 = vpack.c.bf16 %v1510_v5, %v18903_v36 }
 0x164   :  { %21399 = vst [vmem:[#allocation17_spill] sm:$0xff] %v18955_v7  ;;  %v1467_v48 = vmax.f32 %v1455_v9, 0.0  ;;  %15308 = vmatpush3.bf16.msra.mxu0 %v17350_v47  ;;  %v18963_v24 = vpack.c.bf16 %v1513_v0, %v1510_v5  ;;  %v1554_v34 = vrot.slane %v1466_v62, 2  ;;  %v1562_v26 = vrot.slane %v1466_v62, 4 }
 0x165   :  { %v18965_v56 = vpack.c.bf16 %v1464_v32, %v1462_v58  ;;  %v18967_v11 = vpack.c.bf16 %v1466_v62, %v1464_v32  ;;  %v1465_v16 = vmax.f32 %v1453_v21, 0.0  ;;  %v15143_v17 = vpop.f32.mrb[68].mxu1  ;;  %15309 = vmatprep.subr.bf16.mxu0 %v17351_v57  ;;  %v15163_v60 = vpop.f32.mrb[68].mxu0  ;;  %21401 = vst [vmem:[#allocation19_spill] sm:$0xff] %v18970_v39  ;;  %v1530_v25 = vrot.slane %v1464_v32, 2  ;;  %v17353_v58 = vld [vmem:[%s21356_s3 + $0x20] sm:$0xff]  }
 0x166   :  { %v1555_v41 = vrot.slane %v1467_v48, 2  ;;  %v1563_v33 = vrot.slane %v1467_v48, 4  ;;  %v1397_v45 = vpop.f32.mrb[69].mxu1  ;;  %v1973_v47 = vpop.f32.mrb[69].mxu0  ;;  %v1539_v17 = vrot.slane %v1464_v32, 4 }
 0x167   :  { %21400 = vst [vmem:[#allocation18_spill] sm:$0xff] %v18967_v11  ;;  %v1531_v54 = vrot.slane %v1465_v16, 2  ;;  %v1540_v20 = vrot.slane %v1465_v16, 4  ;;  %v15144_v9 = vpop.f32.mrb[70].mxu1  ;;  %15302 = vmatmul.mubr.bf16.gmra.mrb[124].mxu0 %v18857_v14  ;;  %v15164_v21 = vpop.f32.mrb[70].mxu0 }
 0x168   :  { %15310 = vmatpush3.bf16.msra.mxu0 %v17351_v57  ;;  %v1399_v62 = vpop.f32.mrb[71].mxu1  ;;  %15321 = vmatprep.mubr.bf16.mxu0 %v711_v12  ;;  %v1975_v5 = vpop.f32.mrb[71].mxu0  ;;  %v1556_v48 = vsel %vm723_vm1, %v1554_v34, %v1555_v41  ;;  %v1564_v16 = vsel %vm745_vm2, %v1562_v26, %v1563_v33 }
 0x169   :  { %15311 = vmatprep.subr.bf16.mxu0 %v17352_v44  ;;  %v1532_v60 = vsel %vm723_vm1, %v1530_v25, %v1531_v54  ;;  %v1541_v45 = vsel %vm745_vm2, %v1539_v17, %v1540_v20  ;;  %v17356_v20 = vld [vmem:[%s21356_s3 + $0x30] sm:$0xff]  }
 0x16a   :  { %v18983_v47 = vpack.c.bf16 %v1532_v60, %v1492_v31  ;;  %v18985_v9 = vpack.c.bf16 %v1541_v45, %v1513_v0  ;;  %v18987_v57 = vpack.c.bf16 %v1556_v48, %v1532_v60  ;;  %v18989_v32 = vpack.c.bf16 %v1564_v16, %v1541_v45  ;;  %v17358_v48 = vld [vmem:[%s21356_s3 + $0x80] sm:$0xff]   ;;  %v17360_v45 = vld [vmem:[%s21356_s3 + $0x88] sm:$0xff]  }
 0x16c   :  { %21402 = vst [vmem:[#allocation20_spill] sm:$0xff] %v18983_v47  ;;  %21403 = vst [vmem:[#allocation21_spill] sm:$0xff] %v18985_v9  ;;  %15312 = vmatpush3.bf16.msra.mxu0 %v17352_v44  ;;  %v17362_v9 = vld [vmem:[%s21356_s3 + $0x98] sm:$0xff]   ;;  %v17363_v47 = vld [vmem:[%s21356_s3 + $0xa0] sm:$0xff]  }
 0x16d   :  { %21404 = vst [vmem:[#allocation22_spill] sm:$0xff] %v18987_v57  ;;  %21405 = vst [vmem:[#allocation23_spill] sm:$0xff] %v18989_v32  ;;  %v18991_v15 = vpop.f32.mrb[72].mxu1  ;;  %15313 = vmatprep.subr.bf16.mxu0 %v17353_v58  ;;  %v18996_v12 = vpop.f32.mrb[72].mxu0 }
 0x16e   :  { %v18998_v34 = vpop.f32.mrb[73].mxu1  ;;  %v19002_v0 = vpop.f32.mrb[73].mxu0 }
 0x16f   :  { %v19004_v26 = vpop.f32.mrb[74].mxu1  ;;  %v19008_v41 = vpop.f32.mrb[74].mxu0 }
 0x170   :  { %15314 = vmatpush3.bf16.msra.mxu0 %v17353_v58  ;;  %v19010_v33 = vpop.f32.mrb[75].mxu1  ;;  %v19014_v54 = vpop.f32.mrb[75].mxu0  ;;  %v17357_v58 = vld [vmem:[%s21356_s3 + $0x38] sm:$0xff]  }
 0x171   :  { %15315 = vmatprep.subr.bf16.mxu0 %v17355_v4 }
 0x174   :  { %15316 = vmatpush3.bf16.msra.mxu0 %v17355_v4 }
 0x175   :  { %v19021_v17 = vpop.f32.mrb[76].mxu1  ;;  %15317 = vmatprep.subr.bf16.mxu0 %v17356_v20  ;;  %v19026_v62 = vpop.f32.mrb[76].mxu0 }
 0x176   :  { %v19028_v5 = vpop.f32.mrb[77].mxu1  ;;  %v19032_v16 = vpop.f32.mrb[77].mxu0 }
 0x177   :  { %v19034_v60 = vpop.f32.mrb[78].mxu1  ;;  %v19038_v4 = vpop.f32.mrb[78].mxu0 }
 0x178   :  { %15318 = vmatpush3.bf16.msra.mxu0 %v17356_v20  ;;  %v19040_v21 = vpop.f32.mrb[79].mxu1  ;;  %v19044_v44 = vpop.f32.mrb[79].mxu0 }
 0x179   :  { %15319 = vmatprep.subr.bf16.mxu0 %v17357_v58 }
 0x17c   :  { %15320 = vmatpush3.bf16.msra.mxu0 %v17357_v58  ;;  %v17361_v58 = vld [vmem:[%s21356_s3 + $0x90] sm:$0xff]  }
 0x17d   :  { %v19054_v20 = vpop.f32.mrb[80].mxu1  ;;  %15329 = vmatprep.subr.bf16.mxu0 %v17358_v48  ;;  %v19056_v32 = vpop.f32.mrb[80].mxu0 }
 0x17e   :  { %v19058_v25 = vpop.f32.mrb[81].mxu1  ;;  %v19062_v57 = vpop.f32.mrb[81].mxu0 }
 0x17f   :  { %15322 = vmatmul.mubr.bf16.vlgmr.msra.gmra.mrb[120].mxu0 %v18831_v51  ;;  %v19065_v31 = vpop.f32.mrb[82].mxu1  ;;  %v19072_v23 = vpop.f32.mrb[82].mxu0 }
 0x180   :  { %15325 = vmatprep.mubr.bf16.mxu0 %v18874_v22  ;;  %15330 = vmatpush3.bf16.msra.mxu0 %v17358_v48  ;;  %v19075_v11 = vpop.f32.mrb[83].mxu1  ;;  %v19079_v51 = vpop.f32.mrb[83].mxu0 }
 0x181   :  { %15331 = vmatprep.subr.bf16.mxu0 %v17360_v45 }
 0x184   :  { %15332 = vmatpush3.bf16.msra.mxu0 %v17360_v45 }
 0x185   :  { %v15231_v39 = vpop.f32.mrb[84].mxu1  ;;  %15333 = vmatprep.subr.bf16.mxu0 %v17361_v58  ;;  %v15179_v22 = vpop.f32.mrb[84].mxu0 }
 0x186   :  { %v2729_v48 = vpop.f32.mrb[85].mxu1  ;;  %v2033_v29 = vpop.f32.mrb[85].mxu0  ;;  %v17365_v39 = vld [vmem:[%s21356_s3 + $0xa8] sm:$0xff]  }
 0x187   :  { %15326 = vmatmul.mubr.bf16.gmra.mrb[124].mxu0 %v18917_v49  ;;  %v15232_v27 = vpop.f32.mrb[86].mxu1  ;;  %v15180_v38 = vpop.f32.mrb[86].mxu0 }
 0x188   :  { %15334 = vmatpush3.bf16.msra.mxu0 %v17361_v58  ;;  %15345 = vmatprep.mubr.bf16.mxu0 %v18823_v43  ;;  %v2731_v10 = vpop.f32.mrb[87].mxu1  ;;  %v2035_v7 = vpop.f32.mrb[87].mxu0  ;;  %v21406_v38 = vmax.f32 %v18833_v52, %v18996_v12  ;;  %v21407_v58 = vmax.f32 %v18836_v61, %v19002_v0  ;;  %v17366_v52 = vld [vmem:[%s21356_s3 + $0xb0] sm:$0xff]   ;;  %v21408_v12 = vmax.f32 %v18842_v8, %v19008_v41  ;;  %v17367_v8 = vld [vmem:[%s21356_s3 + $0xb8] sm:$0xff]  }
 0x189   :  { %15335 = vmatprep.subr.bf16.mxu0 %v17362_v9 }
 0x18c   :  { %15336 = vmatpush3.bf16.msra.mxu0 %v17362_v9 }
 0x18d   :  { %v15183_v29 = vpop.f32.mrb[88].mxu0  ;;  %v19094_v45 = vpop.f32.mrb[88].mxu1  ;;  %15337 = vmatprep.subr.bf16.mxu0 %v17363_v47 }
 0x18e   :  { %v19099_v27 = vmax.f32 %v21406_v38, %v15183_v29  ;;  %v2045_v10 = vpop.f32.mrb[89].mxu0  ;;  %v19103_v7 = vpop.f32.mrb[89].mxu1 }
 0x18f   :  { %v19108_v22 = vmax.f32 %v21407_v58, %v2045_v10  ;;  %v15184_v48 = vpop.f32.mrb[90].mxu0  ;;  %v19112_v49 = vpop.f32.mrb[90].mxu1  ;;  %v21409_v10 = vmax.f32 %v18847_v19, %v19014_v54 }
 0x190   :  { %v19120_v29 = vmax.f32 %v21408_v12, %v15184_v48  ;;  %15338 = vmatpush3.bf16.msra.mxu0 %v17363_v47  ;;  %v2048_v0 = vpop.f32.mrb[91].mxu0  ;;  %v19124_v38 = vpop.f32.mrb[91].mxu1  ;;  %v21410_v47 = vmax.f32 %v18876_v53, %v19026_v62  ;;  %v17368_v53 = vld [vmem:[%s21356_s3 + $0xc0] sm:$0xff]   ;;  %v21412_v62 = vmax.f32 %v18894_v1, %v19038_v4  ;;  %v17370_v1 = vld [vmem:[%s21356_s3 + $0xc8] sm:$0xff]  }
 0x191   :  { %v19129_v58 = vmax.f32 %v21409_v10, %v2048_v0  ;;  %15339 = vmatprep.subr.bf16.mxu0 %v17365_v39  ;;  %v21411_v10 = vmax.f32 %v18883_v30, %v19032_v16 }
 0x194   :  { %15340 = vmatpush3.bf16.msra.mxu0 %v17365_v39 }
 0x195   :  { %v15187_v41 = vpop.f32.mrb[92].mxu0  ;;  %v19136_v48 = vpop.f32.mrb[92].mxu1  ;;  %15341 = vmatprep.subr.bf16.mxu0 %v17366_v52 }
 0x196   :  { %v19141_v12 = vmax.f32 %v21410_v47, %v15187_v41  ;;  %v2938_v19 = vmax.f32 %v19021_v17, %v19136_v48  ;;  %v2061_v54 = vpop.f32.mrb[93].mxu0  ;;  %v19145_v0 = vpop.f32.mrb[93].mxu1 }
 0x197   :  { %v19150_v9 = vmax.f32 %v21411_v10, %v2061_v54  ;;  %v15188_v61 = vpop.f32.mrb[94].mxu0  ;;  %v19154_v43 = vpop.f32.mrb[94].mxu1  ;;  %v21413_v54 = vmax.f32 %v18899_v46, %v19044_v44  ;;  %v21422_v3 = vmax.f32 %v19028_v5, %v19145_v0 }
 0x198   :  { %v19162_v41 = vmax.f32 %v21412_v62, %v15188_v61  ;;  %15342 = vmatpush3.bf16.msra.mxu0 %v17366_v52  ;;  %v2064_v16 = vpop.f32.mrb[95].mxu0  ;;  %v19166_v47 = vpop.f32.mrb[95].mxu1  ;;  %v21414_v52 = vmax.f32 %v18922_v42, %v19056_v32  ;;  %v17371_v32 = vld [vmem:[%s21356_s3 + $0xd0] sm:$0xff]  }
 0x199   :  { %v19171_v10 = vmax.f32 %v21413_v54, %v2064_v16  ;;  %15343 = vmatprep.subr.bf16.mxu0 %v17367_v8  ;;  %v21415_v54 = vmax.f32 %v18925_v37, %v19062_v57 }
 0x19c   :  { %15344 = vmatpush3.bf16.msra.mxu0 %v17367_v8 }
 0x19d   :  { %v15191_v4 = vpop.f32.mrb[96].mxu0  ;;  %v19178_v61 = vpop.f32.mrb[96].mxu1  ;;  %15353 = vmatprep.subr.bf16.mxu0 %v17368_v53 }
 0x19e   :  { %v19183_v62 = vmax.f32 %v21414_v52, %v15191_v4  ;;  %v2077_v44 = vpop.f32.mrb[97].mxu0  ;;  %v19187_v16 = vpop.f32.mrb[97].mxu1  ;;  %v21416_v4 = vmax.f32 %v18935_v18, %v19072_v23  ;;  %v17372_v23 = vld [vmem:[%s21356_s3 + $0xd8] sm:$0xff]  }
 0x19f   :  { %v19192_v39 = vmax.f32 %v21415_v54, %v2077_v44  ;;  %15346 = vmatmul.mubr.bf16.vlgmr.msra.gmra.mrb[120].mxu0 %v18857_v14  ;;  %v15192_v30 = vpop.f32.mrb[98].mxu0  ;;  %v19197_v42 = vpop.f32.mrb[98].mxu1  ;;  %v21417_v54 = vmax.f32 %v18946_v13, %v19079_v51 }
 0x1a0   :  { %v19205_v52 = vmax.f32 %v21416_v4, %v15192_v30  ;;  %15349 = vmatprep.mubr.bf16.mxu0 %v18912_v28  ;;  %15354 = vmatpush3.bf16.msra.mxu0 %v17368_v53  ;;  %v2080_v57 = vpop.f32.mrb[99].mxu0  ;;  %v19210_v44 = vpop.f32.mrb[99].mxu1 }
 0x1a1   :  { %v19215_v8 = vmax.f32 %v21417_v54, %v2080_v57  ;;  %15355 = vmatprep.subr.bf16.mxu0 %v17370_v1  ;;  %v17373_v54 = vld [vmem:[%s21356_s3 + $0xe0] sm:$0xff]  }
 0x1a4   :  { %15356 = vmatpush3.bf16.msra.mxu0 %v17370_v1  ;;  %v17375_v1 = vld [vmem:[%s21356_s3 + $0xe8] sm:$0xff]  }
 0x1a5   :  { %v15247_v18 = vpop.f32.mrb[100].mxu1  ;;  %15357 = vmatprep.subr.bf16.mxu0 %v17371_v32  ;;  %v15195_v53 = vpop.f32.mrb[100].mxu0 }
 0x1a6   :  { %v2789_v30 = vpop.f32.mrb[101].mxu1  ;;  %v2093_v4 = vpop.f32.mrb[101].mxu0 }
 0x1a7   :  { %15350 = vmatmul.mubr.bf16.gmra.mrb[124].mxu0 %v18953_v50  ;;  %v15248_v37 = vpop.f32.mrb[102].mxu1  ;;  %v15196_v51 = vpop.f32.mrb[102].mxu0 }
 0x1a8   :  { %15358 = vmatpush3.bf16.msra.mxu0 %v17371_v32  ;;  %15369 = vmatprep.mubr.bf16.mxu0 %v18912_v28  ;;  %v2791_v13 = vpop.f32.mrb[103].mxu1  ;;  %v2095_v57 = vpop.f32.mrb[103].mxu0  ;;  %v21418_v28 = vmax.f32 %v18991_v15, %v19094_v45  ;;  %v19248_v15 = vld [vmem:[%s21355_s2] ss:$0 sm:$0xff] }
 0x1a9   :  { %15359 = vmatprep.subr.bf16.mxu0 %v17372_v23  ;;  %v21419_v13 = vmax.f32 %v18998_v34, %v19103_v7  ;;  %v21420_v34 = vmax.f32 %v19004_v26, %v19112_v49 }
 0x1ac   :  { %15360 = vmatpush3.bf16.msra.mxu0 %v17372_v23 }
 0x1ad   :  { %v15199_v18 = vpop.f32.mrb[104].mxu0  ;;  %v15251_v53 = vpop.f32.mrb[104].mxu1  ;;  %15361 = vmatprep.subr.bf16.mxu0 %v17373_v54 }
 0x1ae   :  { %v2172_v37 = vmax.f32 %v19099_v27, %v15199_v18  ;;  %v19234_v32 = vmax.f32 %v21418_v28, %v15251_v53  ;;  %v2105_v30 = vpop.f32.mrb[105].mxu0  ;;  %v2801_v4 = vpop.f32.mrb[105].mxu1  ;;  %v17376_v27 = vld [vmem:[%s21356_s3 + $0xf0] sm:$0xff]  }
 0x1af   :  { %v2166_v51 = vmax.f32 %v19108_v22, %v2105_v30  ;;  %v19240_v57 = vmax.f32 %v21419_v13, %v2801_v4  ;;  %v15200_v23 = vpop.f32.mrb[106].mxu0  ;;  %v15252_v46 = vpop.f32.mrb[106].mxu1  ;;  %v21421_v4 = vmax.f32 %v19010_v33, %v19124_v38 }
 0x1b0   :  { %v2202_v45 = vadd.f32 %v19248_v15, %v2172_v37  ;;  %v2175_v22 = vmax.f32 %v19120_v29, %v15200_v23  ;;  %v19255_v7 = vmax.f32 %v21420_v34, %v15252_v46  ;;  %15362 = vmatpush3.bf16.msra.mxu0 %v17373_v54  ;;  %v2108_v18 = vpop.f32.mrb[107].mxu0  ;;  %v2804_v53 = vpop.f32.mrb[107].mxu1 }
 0x1b1   :  { %v2200_v28 = vadd.f32 %v19248_v15, %v2166_v51  ;;  %v2169_v30 = vmax.f32 %v19129_v58, %v2108_v18  ;;  %v19262_v13 = vmax.f32 %v21421_v4, %v2804_v53  ;;  %15363 = vmatprep.subr.bf16.mxu0 %v17375_v1 }
 0x1b2   :  { %v19264_v37 = vmax.f32 %v2202_v45, 0.0  ;;  %v2203_v29 = vadd.f32 %v19248_v15, %v2175_v22  ;;  %v17377_v45 = vld [vmem:[%s21356_s3 + $0xf8] sm:$0xff]  }
 0x1b3   :  { %v2212_v49 = vmax.f32 %v2200_v28, 0.0  ;;  %v2201_v26 = vadd.f32 %v19248_v15, %v2169_v30 }
 0x1b4   :  { %v2240_v46 = vrot.slane %v19264_v37, 2  ;;  %v2261_v54 = vrot.slane %v19264_v37, 4  ;;  %v2215_v51 = vmax.f32 %v2203_v29, 0.0  ;;  %15364 = vmatpush3.bf16.msra.mxu0 %v17375_v1 }
 0x1b5   :  { %v2237_v58 = vrot.slane %v2212_v49, 2  ;;  %v2258_v23 = vrot.slane %v2212_v49, 4  ;;  %v2213_v34 = vmax.f32 %v2201_v26, 0.0  ;;  %v15203_v33 = vpop.f32.mrb[108].mxu0  ;;  %v15255_v38 = vpop.f32.mrb[108].mxu1  ;;  %15365 = vmatprep.subr.bf16.mxu0 %v17376_v27  ;;  %v19274_v22 = vpack.c.bf16 %v19264_v37, %v2212_v49 }
 0x1b6   :  { %v2241_v18 = vrot.slane %v2215_v51, 2  ;;  %v2262_v53 = vrot.slane %v2215_v51, 4  ;;  %v2184_v28 = vmax.f32 %v19141_v12, %v15203_v33  ;;  %v19280_v1 = vmax.f32 %v2938_v19, %v15255_v38  ;;  %v2121_v30 = vpop.f32.mrb[109].mxu0  ;;  %v2817_v4 = vpop.f32.mrb[109].mxu1  ;;  %v17378_v12 = vld [vmem:[%s21356_s3 + $0x100] sm:$0xff]  }
 0x1b7   :  { %v2238_v29 = vrot.slane %v2213_v34, 2  ;;  %v2259_v26 = vrot.slane %v2213_v34, 4  ;;  %v2178_v14 = vmax.f32 %v19150_v9, %v2121_v30  ;;  %v19286_v49 = vmax.f32 %v21422_v3, %v2817_v4  ;;  %v15204_v2 = vpop.f32.mrb[110].mxu0  ;;  %v15256_v51 = vpop.f32.mrb[110].mxu1 }
 0x1b8   :  { %v2206_v17 = vadd.f32 %v19248_v15, %v2184_v28  ;;  %v2187_v48 = vmax.f32 %v19162_v41, %v15204_v2  ;;  %v21423_v19 = vmax.f32 %v19034_v60, %v19154_v43  ;;  %15366 = vmatpush3.bf16.msra.mxu0 %v17376_v27  ;;  %v2124_v9 = vpop.f32.mrb[111].mxu0  ;;  %v2820_v5 = vpop.f32.mrb[111].mxu1  ;;  %v2242_v3 = vsel %vm723_vm1, %v2240_v46, %v2241_v18 }
 0x1b9   :  { %v2204_v0 = vadd.f32 %v19248_v15, %v2178_v14  ;;  %v2181_v33 = vmax.f32 %v19171_v10, %v2124_v9  ;;  %v21424_v38 = vmax.f32 %v19040_v21, %v19166_v47  ;;  %15367 = vmatprep.subr.bf16.mxu0 %v17377_v45  ;;  %v2239_v2 = vsel %vm723_vm1, %v2237_v58, %v2238_v29 }
 0x1ba   :  { %v19296_v34 = vmax.f32 %v21423_v19, %v15256_v51  ;;  %v2218_v60 = vmax.f32 %v2206_v17, 0.0  ;;  %v2207_v43 = vadd.f32 %v19248_v15, %v2187_v48  ;;  %v19308_v41 = vpack.c.bf16 %v2242_v3, %v2239_v2 }
 0x1bb   :  { %v19304_v28 = vmax.f32 %v21424_v38, %v2820_v5  ;;  %v2260_v27 = vsel %vm745_vm2, %v2258_v23, %v2259_v26  ;;  %v2216_v46 = vmax.f32 %v2204_v0, 0.0  ;;  %v2205_v14 = vadd.f32 %v19248_v15, %v2181_v33 }
 0x1bc   :  { %v19313_v10 = vsel %vm745_vm2, %v2261_v54, %v2262_v53  ;;  %v2246_v18 = vrot.slane %v2218_v60, 2  ;;  %v2267_v21 = vrot.slane %v2218_v60, 4  ;;  %v2219_v47 = vmax.f32 %v2207_v43, 0.0  ;;  %15368 = vmatpush3.bf16.msra.mxu0 %v17377_v45  ;;  %v17380_v54 = vld [vmem:[%s21356_s3 + $0x108] sm:$0xff]  }
 0x1bd   :  { %v19316_v30 = vpack.c.bf16 %v19313_v10, %v2260_v27  ;;  %v19318_v58 = vpack.c.bf16 %v2218_v60, %v2216_v46  ;;  %v2243_v4 = vrot.slane %v2216_v46, 2  ;;  %v2264_v29 = vrot.slane %v2216_v46, 4  ;;  %v15207_v17 = vpop.f32.mrb[112].mxu0  ;;  %v15259_v23 = vpop.f32.mrb[112].mxu1  ;;  %15377 = vmatprep.subr.bf16.mxu0 %v17378_v12 }
 0x1be   :  { %v2217_v51 = vmax.f32 %v2205_v14, 0.0  ;;  %v2247_v53 = vrot.slane %v2219_v47, 2  ;;  %v2268_v26 = vrot.slane %v2219_v47, 4  ;;  %v2196_v48 = vmax.f32 %v19183_v62, %v15207_v17  ;;  %v2137_v9 = vpop.f32.mrb[113].mxu0  ;;  %v2833_v5 = vpop.f32.mrb[113].mxu1 }
 0x1bf   :  { %v21425_v45 = vmax.f32 %v19054_v20, %v19178_v61  ;;  %v2190_v38 = vmax.f32 %v19192_v39, %v2137_v9  ;;  %v21426_v2 = vmax.f32 %v19058_v25, %v19187_v16  ;;  %15370 = vmatmul.mubr.bf16.vlgmr.msra.gmra.mrb[120].mxu0 %v18953_v50  ;;  %v15208_v27 = vpop.f32.mrb[114].mxu0  ;;  %v15260_v62 = vpop.f32.mrb[114].mxu1  ;;  %v17382_v9 = vld [vmem:[%s21356_s3 + $0x118] sm:$0xff]  }
 0x1c0   :  { %v2244_v0 = vrot.slane %v2217_v51, 2  ;;  %v2265_v33 = vrot.slane %v2217_v51, 4  ;;  %v2248_v14 = vsel %vm723_vm1, %v2246_v18, %v2247_v53  ;;  %v2269_v20 = vsel %vm745_vm2, %v2267_v21, %v2268_v26  ;;  %15373 = vmatprep.mubr.bf16.mxu0 %v18825_v35  ;;  %v2140_v39 = vpop.f32.mrb[115].mxu0  ;;  %v2836_v51 = vpop.f32.mrb[115].mxu1  ;;  %15378 = vmatpush3.bf16.msra.mxu0 %v17378_v12 }
 0x1c1   :  { %v19327_v19 = vmax.f32 %v21425_v45, %v15259_v23  ;;  %v19333_v43 = vmax.f32 %v21426_v2, %v2833_v5  ;;  %v2210_v61 = vadd.f32 %v19248_v15, %v2196_v48  ;;  %v2199_v47 = vmax.f32 %v19205_v52, %v15208_v27  ;;  %15379 = vmatprep.subr.bf16.mxu0 %v17380_v54 }
 0x1c2   :  { %v2245_v25 = vsel %vm723_vm1, %v2243_v4, %v2244_v0  ;;  %v2266_v16 = vsel %vm745_vm2, %v2264_v29, %v2265_v33  ;;  %v2208_v17 = vadd.f32 %v19248_v15, %v2190_v38  ;;  %v21427_v23 = vmax.f32 %v19065_v31, %v19197_v42  ;;  %v17381_v4 = vld [vmem:[%s21356_s3 + $0x110] sm:$0xff]  }
 0x1c3   :  { %v19349_v21 = vpack.c.bf16 %v2248_v14, %v2245_v25  ;;  %v19351_v53 = vpack.c.bf16 %v2269_v20, %v2266_v16  ;;  %v19353_v52 = vmax.f32 %v2210_v61, 0.0  ;;  %v2211_v26 = vadd.f32 %v19248_v15, %v2199_v47 }
 0x1c4   :  { %v19347_v18 = vmax.f32 %v21427_v23, %v15260_v62  ;;  %v19359_v29 = vmax.f32 %v2208_v17, 0.0  ;;  %v2193_v31 = vmax.f32 %v19215_v8, %v2140_v39  ;;  %v21428_v42 = vmax.f32 %v19075_v11, %v19210_v44  ;;  %15380 = vmatpush3.bf16.msra.mxu0 %v17380_v54 }
 0x1c5   :  { %v19367_v48 = vpack.c.bf16 %v2245_v25, %v2242_v3  ;;  %v2223_v45 = vmax.f32 %v2211_v26, 0.0  ;;  %v19373_v5 = vpack.c.bf16 %v2216_v46, %v19264_v37  ;;  %v2310_v0 = vrot.slane %v19353_v52, 2  ;;  %v15263_v44 = vpop.f32.mrb[116].mxu1  ;;  %v15211_v3 = vpop.f32.mrb[116].mxu0  ;;  %15381 = vmatprep.subr.bf16.mxu0 %v17381_v4 }
 0x1c6   :  { %v19365_v12 = vmax.f32 %v21428_v42, %v2836_v51  ;;  %v2318_v33 = vrot.slane %v19353_v52, 4  ;;  %v19378_v8 = vpack.c.bf16 %v19359_v29, %v2218_v60  ;;  %v2304_v11 = vpack.c.bf16 %v19353_v52, %v19359_v29  ;;  %v2849_v62 = vpop.f32.mrb[117].mxu1  ;;  %v2153_v37 = vpop.f32.mrb[117].mxu0 }
 0x1c7   :  { %v2311_v38 = vrot.slane %v2223_v45, 2  ;;  %v2319_v2 = vrot.slane %v2223_v45, 4  ;;  %v2209_v27 = vadd.f32 %v19248_v15, %v2193_v31  ;;  %v19384_v46 = vpack.c.bf16 %v2266_v16, %v19313_v10  ;;  %15374 = vmatmul.mubr.bf16.gmra.mrb[124].mxu0 %v18862_v6  ;;  %v15264_v60 = vpop.f32.mrb[118].mxu1  ;;  %v15212_v61 = vpop.f32.mrb[118].mxu0  ;;  %v17383_v10 = vld [vmem:[%s21356_s3 + $0x120] sm:$0xff]  }
 0x1c8   :  { %15393 = vmatprep.mubr.bf16.mxu0 %v18825_v35  ;;  %v2851_v54 = vpop.f32.mrb[119].mxu1  ;;  %v2155_v39 = vpop.f32.mrb[119].mxu0  ;;  %v2286_v17 = vrot.slane %v19359_v29, 2  ;;  %v2295_v23 = vrot.slane %v19359_v29, 4  ;;  %15382 = vmatpush3.bf16.msra.mxu0 %v17381_v4  ;;  %v17388_v61 = vld [vmem:[%s21356_s3 + $0x130] sm:$0xff]  }
 0x1c9   :  { %v2221_v47 = vmax.f32 %v2209_v27, 0.0  ;;  %v2312_v51 = vsel %vm723_vm1, %v2310_v0, %v2311_v38  ;;  %v2320_v25 = vsel %vm745_vm2, %v2318_v33, %v2319_v2  ;;  %15383 = vmatprep.subr.bf16.mxu0 %v17382_v9  ;;  %v17385_v38 = vld [vmem:[%s21356_s3 + $0x128] sm:$0xff]  }
 0x1cb   :  { %v2287_v16 = vrot.slane %v2221_v47, 2  ;;  %v2296_v26 = vrot.slane %v2221_v47, 4 }
 0x1cc   :  { %15384 = vmatpush3.bf16.msra.mxu0 %v17382_v9 }
 0x1cd   :  { %v2288_v35 = vsel %vm723_vm1, %v2286_v17, %v2287_v16  ;;  %v2297_v31 = vsel %vm745_vm2, %v2295_v23, %v2296_v26  ;;  %v15267_v42 = vpop.f32.mrb[120].mxu1  ;;  %15385 = vmatprep.subr.bf16.mxu0 %v17383_v10 }
 0x1ce   :  { %v19397_v45 = vpack.c.bf16 %v2288_v35, %v2248_v14  ;;  %v19399_v0 = vpack.c.bf16 %v2297_v31, %v2269_v20  ;;  %v19401_v33 = vpack.c.bf16 %v2312_v51, %v2288_v35  ;;  %v19403_v4 = vpack.c.bf16 %v2320_v25, %v2297_v31  ;;  %v2861_v3 = vpop.f32.mrb[121].mxu1 }
 0x1cf   :  { %v2928_v44 = vmax.f32 %v19234_v32, %v15267_v42  ;;  %v2922_v2 = vmax.f32 %v19240_v57, %v2861_v3  ;;  %v15268_v9 = vpop.f32.mrb[122].mxu1 }
 0x1d0   :  { %v2931_v20 = vmax.f32 %v19255_v7, %v15268_v9  ;;  %v2864_v27 = vpop.f32.mrb[123].mxu1  ;;  %15386 = vmatpush3.bf16.msra.mxu0 %v17383_v10  ;;  %v17389_v7 = vld [vmem:[%s21356_s3 + $0x138] sm:$0xff]  }
 0x1d1   :  { %v2958_v14 = vadd.f32 %v19248_v15, %v2928_v44  ;;  %v2956_v62 = vadd.f32 %v19248_v15, %v2922_v2  ;;  %v2925_v37 = vmax.f32 %v19262_v13, %v2864_v27  ;;  %15387 = vmatprep.subr.bf16.mxu0 %v17385_v38 }
 0x1d2   :  { %v2959_v60 = vadd.f32 %v19248_v15, %v2931_v20 }
 0x1d3   :  { %v2970_v32 = vmax.f32 %v2958_v14, 0.0  ;;  %v2968_v57 = vmax.f32 %v2956_v62, 0.0  ;;  %v2957_v47 = vadd.f32 %v19248_v15, %v2925_v37 }
 0x1d4   :  { %v2971_v54 = vmax.f32 %v2959_v60, 0.0  ;;  %15388 = vmatpush3.bf16.msra.mxu0 %v17385_v38 }
 0x1d5   :  { %v2996_v39 = vrot.slane %v2970_v32, 2  ;;  %v2969_v51 = vmax.f32 %v2957_v47, 0.0  ;;  %v15271_v13 = vpop.f32.mrb[124].mxu1  ;;  %v19422_v25 = vpack.c.bf16 %v2970_v32, %v2968_v57  ;;  %v3017_v17 = vrot.slane %v2970_v32, 4  ;;  %15389 = vmatprep.subr.bf16.mxu0 %v17388_v61 }
 0x1d6   :  { %v2993_v23 = vrot.slane %v2968_v57, 2  ;;  %v2997_v10 = vrot.slane %v2971_v54, 2  ;;  %v3018_v16 = vrot.slane %v2971_v54, 4  ;;  %v2940_v26 = vmax.f32 %v19280_v1, %v15271_v13  ;;  %v2877_v35 = vpop.f32.mrb[125].mxu1 }
 0x1d7   :  { %v3014_v31 = vrot.slane %v2968_v57, 4  ;;  %v2994_v42 = vrot.slane %v2969_v51, 2  ;;  %v3015_v44 = vrot.slane %v2969_v51, 4  ;;  %v2934_v3 = vmax.f32 %v19286_v49, %v2877_v35  ;;  %v15272_v2 = vpop.f32.mrb[126].mxu1  ;;  %15897 = vmatprep.mubr.bf16.mxu1 %v19422_v25 }
 0x1d8   :  { %v2962_v38 = vadd.f32 %v19248_v15, %v2940_v26  ;;  %v2943_v9 = vmax.f32 %v19296_v34, %v15272_v2  ;;  %v2880_v14 = vpop.f32.mrb[127].mxu1  ;;  %v2998_v20 = vsel %vm723_vm1, %v2996_v39, %v2997_v10  ;;  %v19431_v27 = vsel %vm745_vm2, %v3017_v17, %v3018_v16  ;;  %15390 = vmatpush3.bf16.msra.mxu0 %v17388_v61  ;;  %v17390_v34 = vld [vmem:[%s21356_s3 + $0x180] sm:$0xff]   ;;  %v17392_v10 = vld [vmem:[%s21356_s3 + $0x188] sm:$0xff]  }
 0x1d9   :  { %v2960_v1 = vadd.f32 %v19248_v15, %v2934_v3  ;;  %v2937_v62 = vmax.f32 %v19304_v28, %v2880_v14  ;;  %v2995_v49 = vsel %vm723_vm1, %v2993_v23, %v2994_v42  ;;  %v3016_v37 = vsel %vm745_vm2, %v3014_v31, %v3015_v44  ;;  %15391 = vmatprep.subr.bf16.mxu0 %v17389_v7  ;;  %v17393_v42 = vld [vmem:[%s21356_s3 + $0x8] sm:$0xff]  }
 0x1da   :  { %v2974_v60 = vmax.f32 %v2962_v38, 0.0  ;;  %v2963_v57 = vadd.f32 %v19248_v15, %v2943_v9  ;;  %v19441_v47 = vpack.c.bf16 %v2998_v20, %v2995_v49  ;;  %v19444_v54 = vpack.c.bf16 %v19431_v27, %v3016_v37 }
 0x1db   :  { %v2972_v61 = vmax.f32 %v2960_v1, 0.0  ;;  %v2961_v28 = vadd.f32 %v19248_v15, %v2937_v62 }
 0x1dc   :  { %v2975_v39 = vmax.f32 %v2963_v57, 0.0  ;;  %v3002_v51 = vrot.slane %v2974_v60, 2  ;;  %15392 = vmatpush3.bf16.msra.mxu0 %v17389_v7  ;;  %v21429_v57 = vpack.c.bf16 %v18903_v36, %v18909_v59  ;;  %v17394_v36 = vld [vmem:[%s21356_s3 + $0x190] sm:$0xff]  }
 0x1dd   :  { %v19447_v13 = vpack.c.bf16 %v2974_v60, %v2972_v61  ;;  %v2973_v17 = vmax.f32 %v2961_v28, 0.0  ;;  %v15275_v23 = vpop.f32.mrb[128].mxu1  ;;  %v2999_v16 = vrot.slane %v2972_v61, 2  ;;  %15401 = vmatprep.subr.bf16.mxu0 %v17390_v34  ;;  %v19456_v44 = vpack.c.bf16 %v2972_v61, %v2970_v32  ;;  %v17884_v32 = vld [vmem:[%s21356_s3] sm:$0xff]  }
 0x1de   :  { %v3003_v26 = vrot.slane %v2975_v39, 2  ;;  %v2952_v35 = vmax.f32 %v19327_v19, %v15275_v23  ;;  %v2893_v31 = vpop.f32.mrb[129].mxu1  ;;  %v3024_v3 = vrot.slane %v2975_v39, 4  ;;  %v3020_v49 = vrot.slane %v2972_v61, 4 }
 0x1df   :  { %v3000_v2 = vrot.slane %v2973_v17, 2  ;;  %v3021_v7 = vrot.slane %v2973_v17, 4  ;;  %v2946_v38 = vmax.f32 %v19333_v43, %v2893_v31  ;;  %v15276_v9 = vpop.f32.mrb[130].mxu1  ;;  %15898 = vmatmul.mubr.bf16.vlgmr.msra.gmra.mrb[136].mxu1 %v19447_v13  ;;  %15394 = vmatmul.mubr.bf16.vlgmr.msra.gmra.mrb[120].mxu0 %v18862_v6  ;;  %v3023_v39 = vrot.slane %v2974_v60, 4 }
 0x1e0   :  { %v3004_v14 = vsel %vm723_vm1, %v3002_v51, %v3003_v26  ;;  %v2966_v19 = vadd.f32 %v19248_v15, %v2952_v35  ;;  %v2955_v1 = vmax.f32 %v19347_v18, %v15276_v9  ;;  %15906 = vmatpush3.bf16.msra.mxu1 %v17884_v32  ;;  %v2896_v62 = vpop.f32.mrb[131].mxu1  ;;  %15397 = vmatprep.mubr.bf16.mxu0 %v21429_v57  ;;  %v17395_v18 = vld [vmem:[%s21356_s3 + $0x10] sm:$0xff]   ;;  %v17398_v57 = vld [vmem:[%s21356_s3 + $0x1a0] sm:$0xff]  }
 0x1e1   :  { %v3001_v43 = vsel %vm723_vm1, %v2999_v16, %v3000_v2  ;;  %v2964_v37 = vadd.f32 %v19248_v15, %v2946_v38  ;;  %15402 = vmatpush3.bf16.msra.mxu0 %v17390_v34  ;;  %v2949_v28 = vmax.f32 %v19365_v12, %v2896_v62  ;;  %15901 = vmatprep.mubr.bf16.mxu1 %v19308_v41 }
 0x1e2   :  { %v19476_v51 = vpack.c.bf16 %v3004_v14, %v3001_v43  ;;  %v2978_v17 = vmax.f32 %v2966_v19, 0.0  ;;  %v2967_v61 = vadd.f32 %v19248_v15, %v2955_v1  ;;  %15403 = vmatprep.subr.bf16.mxu0 %v17392_v10  ;;  %v3022_v59 = vsel %vm745_vm2, %v3020_v49, %v3021_v7  ;;  %15907 = vmatprep.subr.bf16.mxu1 %v17393_v42 }
 0x1e3   :  { %v2976_v12 = vmax.f32 %v2964_v37, 0.0  ;;  %v2965_v34 = vadd.f32 %v19248_v15, %v2949_v28  ;;  %v3025_v23 = vsel %vm745_vm2, %v3023_v39, %v3024_v3  ;;  %v19486_v16 = vpack.c.bf16 %v3001_v43, %v2998_v20  ;;  %v17396_v15 = vld [vmem:[%s21356_s3 + $0x198] sm:$0xff]  }
 0x1e4   :  { %v3066_v26 = vrot.slane %v2978_v17, 2  ;;  %v3074_v35 = vrot.slane %v2978_v17, 4  ;;  %v2979_v31 = vmax.f32 %v2967_v61, 0.0  ;;  %15908 = vmatpush3.bf16.msra.mxu1 %v17393_v42  ;;  %v19488_v2 = vpack.c.bf16 %v3025_v23, %v3022_v59  ;;  %v17397_v42 = vld [vmem:[%s21356_s3 + $0x18] sm:$0xff]   ;;  %v17400_v61 = vld [vmem:[%s21356_s3 + $0x1a8] sm:$0xff]  }
 0x1e5   :  { %v19490_v38 = vpack.c.bf16 %v2976_v12, %v2974_v60  ;;  %v3042_v9 = vrot.slane %v2976_v12, 2  ;;  %v19492_v19 = vpack.c.bf16 %v2978_v17, %v2976_v12  ;;  %v2977_v7 = vmax.f32 %v2965_v34, 0.0  ;;  %15404 = vmatpush3.bf16.msra.mxu0 %v17392_v10  ;;  %15909 = vmatprep.subr.bf16.mxu1 %v17395_v18  ;;  %v17399_v10 = vld [vmem:[%s21356_s3 + $0x20] sm:$0xff]   ;;  %v17405_v34 = vld [vmem:[%s21356_s3 + $0x38] sm:$0xff]  }
 0x1e6   :  { %v3067_v20 = vrot.slane %v2979_v31, 2  ;;  %v3075_v3 = vrot.slane %v2979_v31, 4  ;;  %15405 = vmatprep.subr.bf16.mxu0 %v17394_v36  ;;  %v19501_v60 = vpack.c.bf16 %v3022_v59, %v19431_v27  ;;  %v3051_v1 = vrot.slane %v2976_v12, 4  ;;  %v17403_v59 = vld [vmem:[%s21356_s3 + $0x30] sm:$0xff]   ;;  %v17404_v12 = vld [vmem:[%s21356_s3 + $0x1b8] sm:$0xff]   ;;  %v17409_v31 = vld [vmem:[%s21356_s3 + $0x88] sm:$0xff]  }
 0x1e7   :  { %v3043_v32 = vrot.slane %v2977_v7, 2  ;;  %v3052_v62 = vrot.slane %v2977_v7, 4  ;;  %15902 = vmatmul.mubr.bf16.gmra.mrb[140].mxu1 %v19349_v21  ;;  %15398 = vmatmul.mubr.bf16.gmra.mrb[124].mxu0 %v18963_v24  ;;  %v17411_v7 = vld [vmem:[%s21356_s3 + $0x90] sm:$0xff]  }
 0x1e8   :  { %15910 = vmatpush3.bf16.msra.mxu1 %v17395_v18  ;;  %v3068_v49 = vsel %vm723_vm1, %v3066_v26, %v3067_v20  ;;  %v19510_v43 = vsel %vm745_vm2, %v3074_v35, %v3075_v3  ;;  %15417 = vmatprep.mubr.bf16.mxu0 %v19422_v25  ;;  %v17407_v26 = vld [vmem:[%s21356_s3 + $0x80] sm:$0xff]   ;;  %v17408_v35 = vld [vmem:[%s21356_s3 + $0x148] sm:$0xff]   ;;  %v17413_v20 = vld [vmem:[%s21356_s3 + $0x98] sm:$0xff]  }
 0x1e9   :  { %15406 = vmatpush3.bf16.msra.mxu0 %v17394_v36  ;;  %v3044_v27 = vsel %vm723_vm1, %v3042_v9, %v3043_v32  ;;  %v19515_v37 = vsel %vm745_vm2, %v3051_v1, %v3052_v62  ;;  %15921 = vmatprep.mubr.bf16.mxu1 %v19274_v22  ;;  %v17402_v36 = vld [vmem:[%s21356_s3 + $0x1b0] sm:$0xff]   ;;  %v17414_v3 = vld [vmem:[%s21356_s3 + $0x160] sm:$0xff]   ;;  %v17416_v1 = vld [vmem:[%s21356_s3 + $0x168] sm:$0xff]  }
 0x1ea   :  { %15407 = vmatprep.subr.bf16.mxu0 %v17396_v15  ;;  %v19521_v28 = vpack.c.bf16 %v3044_v27, %v3004_v14  ;;  %v19524_v18 = vpack.c.bf16 %v19515_v37, %v3025_v23  ;;  %v19526_v39 = vpack.c.bf16 %v3068_v49, %v3044_v27  ;;  %15911 = vmatprep.subr.bf16.mxu1 %v17397_v42  ;;  %v17401_v14 = vld [vmem:[%s21356_s3 + $0x28] sm:$0xff]   ;;  %v17406_v23 = vld [vmem:[%s21356_s3 + $0x140] sm:$0xff]   ;;  %v17410_v9 = vld [vmem:[%s21356_s3 + $0x150] sm:$0xff]  }
 0x1eb   :  { %v3078_v17 = vpack.c.bf16 %v19510_v43, %v19515_v37  ;;  %v17417_v32 = vld [vmem:[%s21356_s3 + $0xa8] sm:$0xff]   ;;  %v17419_v62 = vld [vmem:[%s21356_s3 + $0xb0] sm:$0xff]   ;;  %v17421_v49 = vld [vmem:[%s21356_s3 + $0xb8] sm:$0xff]  }
 0x1ec   :  { %15912 = vmatpush3.bf16.msra.mxu1 %v17397_v42  ;;  %v17415_v42 = vld [vmem:[%s21356_s3 + $0xa0] sm:$0xff]  }
 0x1ed   :  { %15408 = vmatpush3.bf16.msra.mxu0 %v17396_v15  ;;  %15913 = vmatprep.subr.bf16.mxu1 %v17399_v10  ;;  %v17412_v15 = vld [vmem:[%s21356_s3 + $0x158] sm:$0xff]   ;;  %v17422_v27 = vld [vmem:[%s21356_s3 + $0x1c0] sm:$0xff]  }
 0x1ee   :  { %15409 = vmatprep.subr.bf16.mxu0 %v17398_v57 }
 0x1f0   :  { %15914 = vmatpush3.bf16.msra.mxu1 %v17399_v10  ;;  %v17420_v10 = vld [vmem:[%s21356_s3 + $0x178] sm:$0xff]  }
 0x1f1   :  { %15410 = vmatpush3.bf16.msra.mxu0 %v17398_v57  ;;  %15915 = vmatprep.subr.bf16.mxu1 %v17401_v14  ;;  %v17423_v57 = vld [vmem:[%s21356_s3 + $0xc0] sm:$0xff]  }
 0x1f2   :  { %15411 = vmatprep.subr.bf16.mxu0 %v17400_v61 }
 0x1f4   :  { %15916 = vmatpush3.bf16.msra.mxu1 %v17401_v14  ;;  %v17425_v14 = vld [vmem:[%s21356_s3 + $0xc8] sm:$0xff]  }
 0x1f5   :  { %15412 = vmatpush3.bf16.msra.mxu0 %v17400_v61  ;;  %15917 = vmatprep.subr.bf16.mxu1 %v17403_v59  ;;  %v17424_v61 = vld [vmem:[%s21356_s3 + $0x1c8] sm:$0xff]  }
 0x1f6   :  { %15413 = vmatprep.subr.bf16.mxu0 %v17402_v36 }
 0x1f8   :  { %15918 = vmatpush3.bf16.msra.mxu1 %v17403_v59  ;;  %v17427_v59 = vld [vmem:[%s21356_s3 + $0xd0] sm:$0xff]  }
 0x1f9   :  { %15414 = vmatpush3.bf16.msra.mxu0 %v17402_v36  ;;  %15919 = vmatprep.subr.bf16.mxu1 %v17405_v34  ;;  %v17426_v36 = vld [vmem:[%s21356_s3 + $0x1d0] sm:$0xff]  }
 0x1fa   :  { %15415 = vmatprep.subr.bf16.mxu0 %v17404_v12 }
 0x1fc   :  { %15920 = vmatpush3.bf16.msra.mxu1 %v17405_v34 }
 0x1fd   :  { %15416 = vmatpush3.bf16.msra.mxu0 %v17404_v12  ;;  %15929 = vmatprep.subr.bf16.mxu1 %v17407_v26  ;;  %v17429_v12 = vld [vmem:[%s21356_s3 + $0xd8] sm:$0xff]  }
 0x1fe   :  { %15425 = vmatprep.subr.bf16.mxu0 %v17406_v23 }
 0x1ff   :  { %15922 = vmatmul.mubr.bf16.vlgmr.msra.gmra.mrb[136].mxu1 %v19318_v58 }
 0x200   :  { %15418 = vmatmul.mubr.bf16.vlgmr.msra.gmra.mrb[120].mxu0 %v19447_v13  ;;  %15925 = vmatprep.mubr.bf16.mxu1 %v19422_v25 }
 0x201   :  { %15421 = vmatprep.mubr.bf16.mxu0 %v19308_v41  ;;  %15426 = vmatpush3.bf16.msra.mxu0 %v17406_v23  ;;  %v17430_v23 = vld [vmem:[%s21356_s3 + $0x1e0] sm:$0xff]  }
 0x202   :  { %15930 = vmatpush3.bf16.msra.mxu1 %v17407_v26  ;;  %15427 = vmatprep.subr.bf16.mxu0 %v17408_v35 }
 0x203   :  { %15931 = vmatprep.subr.bf16.mxu1 %v17409_v31 }
 0x205   :  { %15428 = vmatpush3.bf16.msra.mxu0 %v17408_v35  ;;  %v17431_v35 = vld [vmem:[%s21356_s3 + $0xe0] sm:$0xff]  }
 0x206   :  { %15932 = vmatpush3.bf16.msra.mxu1 %v17409_v31  ;;  %15429 = vmatprep.subr.bf16.mxu0 %v17410_v9 }
 0x207   :  { %15926 = vmatmul.mubr.bf16.gmra.mrb[140].mxu1 %v19447_v13  ;;  %15933 = vmatprep.subr.bf16.mxu1 %v17411_v7 }
 0x208   :  { %15422 = vmatmul.mubr.bf16.gmra.mrb[124].mxu0 %v19349_v21  ;;  %15945 = vmatprep.mubr.bf16.mxu1 %v19308_v41 }
 0x209   :  { %15430 = vmatpush3.bf16.msra.mxu0 %v17410_v9  ;;  %15441 = vmatprep.mubr.bf16.mxu0 %v19274_v22  ;;  %v17418_v22 = vld [vmem:[%s21356_s3 + $0x170] sm:$0xff]  }
 0x20a   :  { %15934 = vmatpush3.bf16.msra.mxu1 %v17411_v7  ;;  %15431 = vmatprep.subr.bf16.mxu0 %v17412_v15  ;;  %v17433_v7 = vld [vmem:[%s21356_s3 + $0xe8] sm:$0xff]  }
 0x20b   :  { %15935 = vmatprep.subr.bf16.mxu1 %v17413_v20 }
 0x20d   :  { %15432 = vmatpush3.bf16.msra.mxu0 %v17412_v15  ;;  %v17434_v15 = vld [vmem:[%s21356_s3 + $0x1f0] sm:$0xff]  }
 0x20e   :  { %15936 = vmatpush3.bf16.msra.mxu1 %v17413_v20  ;;  %15433 = vmatprep.subr.bf16.mxu0 %v17414_v3  ;;  %v17435_v20 = vld [vmem:[%s21356_s3 + $0xf0] sm:$0xff]  }
 0x20f   :  { %15937 = vmatprep.subr.bf16.mxu1 %v17415_v42 }
 0x211   :  { %15434 = vmatpush3.bf16.msra.mxu0 %v17414_v3  ;;  %v17436_v3 = vld [vmem:[%s21356_s3 + $0x1f8] sm:$0xff]  }
 0x212   :  { %15938 = vmatpush3.bf16.msra.mxu1 %v17415_v42  ;;  %15435 = vmatprep.subr.bf16.mxu0 %v17416_v1  ;;  %v17437_v42 = vld [vmem:[%s21356_s3 + $0xf8] sm:$0xff]  }
 0x213   :  { %15939 = vmatprep.subr.bf16.mxu1 %v17417_v32 }
 0x215   :  { %15436 = vmatpush3.bf16.msra.mxu0 %v17416_v1  ;;  %v17438_v1 = vld [vmem:[%s21356_s3 + $0x200] sm:$0xff]  }
 0x216   :  { %15940 = vmatpush3.bf16.msra.mxu1 %v17417_v32  ;;  %15437 = vmatprep.subr.bf16.mxu0 %v17418_v22  ;;  %v17439_v32 = vld [vmem:[%s21356_s3 + $0x100] sm:$0xff]  }
 0x217   :  { %15941 = vmatprep.subr.bf16.mxu1 %v17419_v62 }
 0x219   :  { %15438 = vmatpush3.bf16.msra.mxu0 %v17418_v22  ;;  %v17440_v22 = vld [vmem:[%s21356_s3 + $0x208] sm:$0xff]  }
 0x21a   :  { %15942 = vmatpush3.bf16.msra.mxu1 %v17419_v62  ;;  %15439 = vmatprep.subr.bf16.mxu0 %v17420_v10  ;;  %v17441_v62 = vld [vmem:[%s21356_s3 + $0x108] sm:$0xff]  }
 0x21b   :  { %15943 = vmatprep.subr.bf16.mxu1 %v17421_v49 }
 0x21d   :  { %15440 = vmatpush3.bf16.msra.mxu0 %v17420_v10  ;;  %v17442_v10 = vld [vmem:[%s21356_s3 + $0x210] sm:$0xff]  }
 0x21e   :  { %15944 = vmatpush3.bf16.msra.mxu1 %v17421_v49  ;;  %15449 = vmatprep.subr.bf16.mxu0 %v17422_v27  ;;  %v17443_v49 = vld [vmem:[%s21356_s3 + $0x110] sm:$0xff]  }
 0x21f   :  { %15953 = vmatprep.subr.bf16.mxu1 %v17423_v57 }
 0x220   :  { %15442 = vmatmul.mubr.bf16.vlgmr.msra.gmra.mrb[120].mxu0 %v19318_v58 }
 0x221   :  { %15946 = vmatmul.mubr.bf16.vlgmr.msra.gmra.mrb[136].mxu1 %v19349_v21  ;;  %15445 = vmatprep.mubr.bf16.mxu0 %v19422_v25  ;;  %v17428_v25 = vld [vmem:[%s21356_s3 + $0x1d8] sm:$0xff]  }
 0x222   :  { %15450 = vmatpush3.bf16.msra.mxu0 %v17422_v27  ;;  %15949 = vmatprep.mubr.bf16.mxu1 %v19441_v47  ;;  %v17444_v27 = vld [vmem:[%s21356_s3 + $0x218] sm:$0xff]  }
 0x223   :  { %15954 = vmatpush3.bf16.msra.mxu1 %v17423_v57  ;;  %15451 = vmatprep.subr.bf16.mxu0 %v17424_v61  ;;  %v17445_v57 = vld [vmem:[%s21356_s3 + $0x118] sm:$0xff]  }
 0x224   :  { %15955 = vmatprep.subr.bf16.mxu1 %v17425_v14 }
 0x226   :  { %15452 = vmatpush3.bf16.msra.mxu0 %v17424_v61  ;;  %v17446_v61 = vld [vmem:[%s21356_s3 + $0x220] sm:$0xff]  }
 0x227   :  { %15956 = vmatpush3.bf16.msra.mxu1 %v17425_v14  ;;  %15453 = vmatprep.subr.bf16.mxu0 %v17426_v36  ;;  %v15279_v34 = vpop.f32.mrb[132].mxu1  ;;  %v17447_v14 = vld [vmem:[%s21356_s3 + $0x120] sm:$0xff]  }
 0x228   :  { %15446 = vmatmul.mubr.bf16.gmra.mrb[124].mxu0 %v19447_v13  ;;  %15957 = vmatprep.subr.bf16.mxu1 %v17427_v59  ;;  %v2909_v26 = vpop.f32.mrb[133].mxu1  ;;  %v17453_v34 = vld [vmem:[%s21356_s3 + $0x138] sm:$0xff]  }
 0x229   :  { %15950 = vmatmul.mubr.bf16.gmra.mrb[140].mxu1 %v19476_v51  ;;  %15465 = vmatprep.mubr.bf16.mxu0 %v19308_v41  ;;  %v15280_v31 = vpop.f32.mrb[134].mxu1  ;;  %v17432_v41 = vld [vmem:[%s21356_s3 + $0x1e8] sm:$0xff]   ;;  %v17455_v26 = vld [vmem:[%s21356_s3 + $0x180] sm:$0xff]  }
 0x22a   :  { %15454 = vmatpush3.bf16.msra.mxu0 %v17426_v36  ;;  %15969 = vmatprep.mubr.bf16.mxu1 %v19441_v47  ;;  %v2911_v9 = vpop.f32.mrb[135].mxu1  ;;  %v17449_v36 = vld [vmem:[%s21356_s3 + $0x128] sm:$0xff]  }
 0x22b   :  { %15958 = vmatpush3.bf16.msra.mxu1 %v17427_v59  ;;  %15455 = vmatprep.subr.bf16.mxu0 %v17428_v25  ;;  %v17450_v59 = vld [vmem:[%s21356_s3 + $0x230] sm:$0xff]   ;;  %v17457_v31 = vld [vmem:[%s21356_s3 + $0x188] sm:$0xff]  }
 0x22c   :  { %15959 = vmatprep.subr.bf16.mxu1 %v17429_v12  ;;  %v17458_v9 = vld [vmem:[%s21356_s3 + $0x250] sm:$0xff]  }
 0x22e   :  { %15456 = vmatpush3.bf16.msra.mxu0 %v17428_v25  ;;  %v17451_v25 = vld [vmem:[%s21356_s3 + $0x130] sm:$0xff]  }
 0x22f   :  { %15960 = vmatpush3.bf16.msra.mxu1 %v17429_v12  ;;  %15457 = vmatprep.subr.bf16.mxu0 %v17430_v23  ;;  %v17452_v12 = vld [vmem:[%s21356_s3 + $0x238] sm:$0xff]  }
 0x230   :  { %15961 = vmatprep.subr.bf16.mxu1 %v17431_v35 }
 0x232   :  { %15458 = vmatpush3.bf16.msra.mxu0 %v17430_v23  ;;  %v17454_v23 = vld [vmem:[%s21356_s3 + $0x240] sm:$0xff]  }
 0x233   :  { %15962 = vmatpush3.bf16.msra.mxu1 %v17431_v35  ;;  %15459 = vmatprep.subr.bf16.mxu0 %v17432_v41  ;;  %v17456_v35 = vld [vmem:[%s21356_s3 + $0x248] sm:$0xff]  }
 0x234   :  { %15963 = vmatprep.subr.bf16.mxu1 %v17433_v7 }
 0x236   :  { %15460 = vmatpush3.bf16.msra.mxu0 %v17432_v41 }
 0x237   :  { %15964 = vmatpush3.bf16.msra.mxu1 %v17433_v7  ;;  %15461 = vmatprep.subr.bf16.mxu0 %v17434_v15 }
 0x238   :  { %15965 = vmatprep.subr.bf16.mxu1 %v17435_v20 }
 0x23a   :  { %15462 = vmatpush3.bf16.msra.mxu0 %v17434_v15 }
 0x23b   :  { %15966 = vmatpush3.bf16.msra.mxu1 %v17435_v20  ;;  %15463 = vmatprep.subr.bf16.mxu0 %v17436_v3 }
 0x23c   :  { %15967 = vmatprep.subr.bf16.mxu1 %v17437_v42 }
 0x23e   :  { %15464 = vmatpush3.bf16.msra.mxu0 %v17436_v3 }
 0x23f   :  { %15968 = vmatpush3.bf16.msra.mxu1 %v17437_v42  ;;  %15473 = vmatprep.subr.bf16.mxu0 %v17438_v1 }
 0x240   :  { %15977 = vmatprep.subr.bf16.mxu1 %v17439_v32 }
 0x241   :  { %15466 = vmatmul.mubr.bf16.vlgmr.msra.gmra.mrb[120].mxu0 %v19349_v21 }
 0x242   :  { %15970 = vmatmul.mubr.bf16.vlgmr.msra.gmra.mrb[136].mxu1 %v19476_v51  ;;  %15469 = vmatprep.mubr.bf16.mxu0 %v19441_v47 }
 0x243   :  { %15474 = vmatpush3.bf16.msra.mxu0 %v17438_v1  ;;  %15973 = vmatprep.mubr.bf16.mxu1 %v19316_v30 }
 0x244   :  { %15978 = vmatpush3.bf16.msra.mxu1 %v17439_v32  ;;  %15475 = vmatprep.subr.bf16.mxu0 %v17440_v22 }
 0x245   :  { %15979 = vmatprep.subr.bf16.mxu1 %v17441_v62 }
 0x247   :  { %15476 = vmatpush3.bf16.msra.mxu0 %v17440_v22 }
 0x248   :  { %15980 = vmatpush3.bf16.msra.mxu1 %v17441_v62  ;;  %15477 = vmatprep.subr.bf16.mxu0 %v17442_v10 }
 0x249   :  { %15470 = vmatmul.mubr.bf16.gmra.mrb[124].mxu0 %v19476_v51  ;;  %15981 = vmatprep.subr.bf16.mxu1 %v17443_v49 }
 0x24a   :  { %15974 = vmatmul.mubr.bf16.gmra.mrb[140].mxu1 %v19351_v53  ;;  %15489 = vmatprep.mubr.bf16.mxu0 %v19441_v47  ;;  %v17448_v47 = vld [vmem:[%s21356_s3 + $0x228] sm:$0xff]  }
 0x24b   :  { %15478 = vmatpush3.bf16.msra.mxu0 %v17442_v10  ;;  %15993 = vmatprep.mubr.bf16.mxu1 %v19316_v30 }
 0x24c   :  { %15982 = vmatpush3.bf16.msra.mxu1 %v17443_v49  ;;  %15479 = vmatprep.subr.bf16.mxu0 %v17444_v27 }
 0x24d   :  { %15983 = vmatprep.subr.bf16.mxu1 %v17445_v57 }
 0x24f   :  { %15480 = vmatpush3.bf16.msra.mxu0 %v17444_v27 }
 0x250   :  { %15984 = vmatpush3.bf16.msra.mxu1 %v17445_v57  ;;  %15481 = vmatprep.subr.bf16.mxu0 %v17446_v61 }
 0x251   :  { %15985 = vmatprep.subr.bf16.mxu1 %v17447_v14 }
 0x253   :  { %15482 = vmatpush3.bf16.msra.mxu0 %v17446_v61 }
 0x254   :  { %15986 = vmatpush3.bf16.msra.mxu1 %v17447_v14  ;;  %15483 = vmatprep.subr.bf16.mxu0 %v17448_v47 }
 0x255   :  { %15987 = vmatprep.subr.bf16.mxu1 %v17449_v36 }
 0x257   :  { %15484 = vmatpush3.bf16.msra.mxu0 %v17448_v47 }
 0x258   :  { %15988 = vmatpush3.bf16.msra.mxu1 %v17449_v36  ;;  %15485 = vmatprep.subr.bf16.mxu0 %v17450_v59 }
 0x259   :  { %15989 = vmatprep.subr.bf16.mxu1 %v17451_v25 }
 0x25b   :  { %15486 = vmatpush3.bf16.msra.mxu0 %v17450_v59 }
 0x25c   :  { %15990 = vmatpush3.bf16.msra.mxu1 %v17451_v25  ;;  %15487 = vmatprep.subr.bf16.mxu0 %v17452_v12 }
 0x25d   :  { %15991 = vmatprep.subr.bf16.mxu1 %v17453_v34 }
 0x25f   :  { %15488 = vmatpush3.bf16.msra.mxu0 %v17452_v12 }
 0x260   :  { %15992 = vmatpush3.bf16.msra.mxu1 %v17453_v34  ;;  %15497 = vmatprep.subr.bf16.mxu0 %v17454_v23 }
 0x261   :  { %16001 = vmatprep.subr.bf16.mxu1 %v17455_v26 }
 0x262   :  { %15490 = vmatmul.mubr.bf16.vlgmr.msra.gmra.mrb[120].mxu0 %v19476_v51 }
 0x263   :  { %15994 = vmatmul.mubr.bf16.vlgmr.msra.gmra.mrb[136].mxu1 %v19351_v53  ;;  %15493 = vmatprep.mubr.bf16.mxu0 %v19316_v30 }
 0x264   :  { %15498 = vmatpush3.bf16.msra.mxu0 %v17454_v23  ;;  %15997 = vmatprep.mubr.bf16.mxu1 %v19444_v54 }
 0x265   :  { %16002 = vmatpush3.bf16.msra.mxu1 %v17455_v26  ;;  %15499 = vmatprep.subr.bf16.mxu0 %v17456_v35 }
 0x266   :  { %14 = vsyncpa [#allocation5], 0  ;;  %16003 = vmatprep.subr.bf16.mxu1 %v17457_v31  ;;  %v17459_v41 = vld [vmem:[%s21356_s3 + $0x190] sm:$0xff]   ;;  %v17460_v7 = vld [vmem:[%s21356_s3 + $0x258] sm:$0xff]   ;;  %vm17910_vm3 = vmmov 0   ;;  %vm12094_vm4 = vcmask 1041408  }
 0x267   :  { %v17461_v15 = vld [vmem:[%s21356_s3 + $0x198] sm:$0xff]   ;;  %v17462_v20 = vld [vmem:[%s21356_s3 + $0x260] sm:$0xff]   ;;  %v17465_v42 = vld [vmem:[%s21356_s3 + $0x1a8] sm:$0xff]  }
 0x268   :  { %15500 = vmatpush3.bf16.msra.mxu0 %v17456_v35  ;;  %v17463_v3 = vld [vmem:[%s21356_s3 + $0x1a0] sm:$0xff]   ;;  %v17466_v1 = vld [vmem:[%s21356_s3 + $0x270] sm:$0xff]   ;;  %v17468_v22 = vld [vmem:[%s21356_s3 + $0x278] sm:$0xff]  }
 0x269   :  { %16004 = vmatpush3.bf16.msra.mxu1 %v17457_v31  ;;  %15501 = vmatprep.subr.bf16.mxu0 %v17458_v9  ;;  %v17467_v32 = vld [vmem:[%s21356_s3 + $0x1b0] sm:$0xff]   ;;  %v17469_v62 = vld [vmem:[%s21356_s3 + $0x1b8] sm:$0xff]   ;;  %v17470_v10 = vld [vmem:[%s21356_s3 + $0x2c0] sm:$0xff]  }
 0x26a   :  { %15494 = vmatmul.mubr.bf16.gmra.mrb[124].mxu0 %v19351_v53  ;;  %16005 = vmatprep.subr.bf16.mxu1 %v17459_v41  ;;  %v17471_v49 = vld [vmem:[%s21356_s3 + $0x140] sm:$0xff]   ;;  %v17472_v27 = vld [vmem:[%s21356_s3 + $0x2c8] sm:$0xff]   ;;  %v17474_v61 = vld [vmem:[%s21356_s3 + $0x2d0] sm:$0xff]  }
 0x26b   :  { %15998 = vmatmul.mubr.bf16.gmra.mrb[140].mxu1 %v19488_v2  ;;  %15513 = vmatprep.mubr.bf16.mxu0 %v19316_v30  ;;  %v17464_v30 = vld [vmem:[%s21356_s3 + $0x268] sm:$0xff]   ;;  %v17475_v14 = vld [vmem:[%s21356_s3 + $0x150] sm:$0xff]   ;;  %v17477_v47 = vld [vmem:[%s21356_s3 + $0x158] sm:$0xff]  }
 0x26c   :  { %15502 = vmatpush3.bf16.msra.mxu0 %v17458_v9  ;;  %16017 = vmatprep.mubr.bf16.mxu1 %v18928_v55  ;;  %v17473_v57 = vld [vmem:[%s21356_s3 + $0x148] sm:$0xff]   ;;  %v17478_v59 = vld [vmem:[%s21356_s3 + $0x2e0] sm:$0xff]   ;;  %v17482_v23 = vld [vmem:[%s21356_s3 + $0x2f0] sm:$0xff]  }
 0x26d   :  { %16006 = vmatpush3.bf16.msra.mxu1 %v17459_v41  ;;  %15503 = vmatprep.subr.bf16.mxu0 %v17460_v7  ;;  %v21430_v36 = vld [vmem:[#allocation12_spill] sm:$0xff]  ;;  %v17479_v25 = vld [vmem:[%s21356_s3 + $0x160] sm:$0xff]   ;;  %v17484_v35 = vld [vmem:[%s21356_s3 + $0x2f8] sm:$0xff]  }
 0x26e   :  { %16007 = vmatprep.subr.bf16.mxu1 %v17461_v15  ;;  %v17480_v12 = vld [vmem:[%s21356_s3 + $0x2e8] sm:$0xff]   ;;  %v17483_v26 = vld [vmem:[%s21356_s3 + $0x170] sm:$0xff]   ;;  %v17485_v31 = vld [vmem:[%s21356_s3 + $0x178] sm:$0xff]  }
 0x26f   :  { %v17481_v34 = vld [vmem:[%s21356_s3 + $0x168] sm:$0xff]   ;;  %v17486_v9 = vld [vmem:[%s21356_s3 + $0x280] sm:$0xff]   ;;  %v17749_v43 = vld [vmem:[%s21358_s5 + $0x58] sm:$0xff]  }
 0x270   :  { %15504 = vmatpush3.bf16.msra.mxu0 %v17460_v7  ;;  %v17487_v41 = vld [vmem:[%s21356_s3 + $0x1c0] sm:$0xff]   ;;  %v17488_v7 = vld [vmem:[%s21356_s3 + $0x288] sm:$0xff]  }
 0x271   :  { %16008 = vmatpush3.bf16.msra.mxu1 %v17461_v15  ;;  %15505 = vmatprep.subr.bf16.mxu0 %v17462_v20  ;;  %v17489_v15 = vld [vmem:[%s21356_s3 + $0x1c8] sm:$0xff]   ;;  %v17722_v52 = vld [vmem:[%s21356_s3 + $0x5a0] sm:$0xff]  }
 0x272   :  { %16009 = vmatprep.subr.bf16.mxu1 %v17463_v3  ;;  %v17723_v29 = vld [vmem:[%s21356_s3 + $0x5a8] sm:$0xff]   ;;  %v17750_v37 = vld [vmem:[%s21358_s5 + $0x20] sm:$0xff]  }
 0x274   :  { %15506 = vmatpush3.bf16.msra.mxu0 %v17462_v20  ;;  %v21431_v20 = vld [vmem:[#allocation10_spill] sm:$0xff] }
 0x275   :  { %16010 = vmatpush3.bf16.msra.mxu1 %v17463_v3  ;;  %15507 = vmatprep.subr.bf16.mxu0 %v17464_v30  ;;  %v17490_v3 = vld [vmem:[%s21356_s3 + $0x290] sm:$0xff]  }
 0x276   :  { %16011 = vmatprep.subr.bf16.mxu1 %v17465_v42 }
 0x278   :  { %15508 = vmatpush3.bf16.msra.mxu0 %v17464_v30  ;;  %v17491_v30 = vld [vmem:[%s21356_s3 + $0x1d0] sm:$0xff]  }
 0x279   :  { %16012 = vmatpush3.bf16.msra.mxu1 %v17465_v42  ;;  %15509 = vmatprep.subr.bf16.mxu0 %v17466_v1  ;;  %v17492_v42 = vld [vmem:[%s21356_s3 + $0x298] sm:$0xff]  }
 0x27a   :  { %16013 = vmatprep.subr.bf16.mxu1 %v17467_v32 }
 0x27c   :  { %15510 = vmatpush3.bf16.msra.mxu0 %v17466_v1  ;;  %v17493_v1 = vld [vmem:[%s21356_s3 + $0x1d8] sm:$0xff]  }
 0x27d   :  { %16014 = vmatpush3.bf16.msra.mxu1 %v17467_v32  ;;  %15511 = vmatprep.subr.bf16.mxu0 %v17468_v22  ;;  %v17494_v32 = vld [vmem:[%s21356_s3 + $0x2a0] sm:$0xff]  }
 0x27e   :  { %16015 = vmatprep.subr.bf16.mxu1 %v17469_v62 }
 0x280   :  { %15512 = vmatpush3.bf16.msra.mxu0 %v17468_v22  ;;  %v17495_v22 = vld [vmem:[%s21356_s3 + $0x1e0] sm:$0xff]  }
 0x281   :  { %16016 = vmatpush3.bf16.msra.mxu1 %v17469_v62  ;;  %15521 = vmatprep.subr.bf16.mxu0 %v17470_v10  ;;  %v17496_v62 = vld [vmem:[%s21356_s3 + $0x2a8] sm:$0xff]  }
 0x282   :  { %16025 = vmatprep.subr.bf16.mxu1 %v17471_v49 }
 0x283   :  { %15514 = vmatmul.mubr.bf16.vlgmr.msra.gmra.mrb[120].mxu0 %v19351_v53 }
 0x284   :  { %16018 = vmatmul.mubr.bf16.vlgmr.msra.gmra.mrb[136].mxu1 %v18965_v56  ;;  %15517 = vmatprep.mubr.bf16.mxu0 %v19444_v54  ;;  %v17476_v54 = vld [vmem:[%s21356_s3 + $0x2d8] sm:$0xff]  }
 0x285   :  { %15522 = vmatpush3.bf16.msra.mxu0 %v17470_v10  ;;  %16021 = vmatprep.mubr.bf16.mxu1 %v18859_v63  ;;  %v17497_v10 = vld [vmem:[%s21356_s3 + $0x1e8] sm:$0xff]  }
 0x286   :  { %16026 = vmatpush3.bf16.msra.mxu1 %v17471_v49  ;;  %15523 = vmatprep.subr.bf16.mxu0 %v17472_v27  ;;  %v17498_v49 = vld [vmem:[%s21356_s3 + $0x2b0] sm:$0xff]  }
 0x287   :  { %16027 = vmatprep.subr.bf16.mxu1 %v17473_v57 }
 0x289   :  { %15524 = vmatpush3.bf16.msra.mxu0 %v17472_v27  ;;  %v17499_v27 = vld [vmem:[%s21356_s3 + $0x1f0] sm:$0xff]  }
 0x28a   :  { %16028 = vmatpush3.bf16.msra.mxu1 %v17473_v57  ;;  %15525 = vmatprep.subr.bf16.mxu0 %v17474_v61  ;;  %v17500_v57 = vld [vmem:[%s21356_s3 + $0x2b8] sm:$0xff]  }
 0x28b   :  { %15518 = vmatmul.mubr.bf16.gmra.mrb[124].mxu0 %v19488_v2  ;;  %16029 = vmatprep.subr.bf16.mxu1 %v17475_v14 }
 0x28c   :  { %16022 = vmatmul.mubr.bf16.gmra.mrb[140].mxu1 %v18871_v40  ;;  %15537 = vmatprep.mubr.bf16.mxu0 %v18928_v55 }
 0x28d   :  { %15526 = vmatpush3.bf16.msra.mxu0 %v17474_v61  ;;  %16041 = vmatprep.mubr.bf16.mxu1 %v21430_v36  ;;  %v17501_v61 = vld [vmem:[%s21356_s3 + $0x1f8] sm:$0xff]  }
 0x28e   :  { %16030 = vmatpush3.bf16.msra.mxu1 %v17475_v14  ;;  %15527 = vmatprep.subr.bf16.mxu0 %v17476_v54  ;;  %v17502_v14 = vld [vmem:[%s21356_s3 + $0x300] sm:$0xff]  }
 0x28f   :  { %16031 = vmatprep.subr.bf16.mxu1 %v17477_v47 }
 0x291   :  { %15528 = vmatpush3.bf16.msra.mxu0 %v17476_v54  ;;  %v17503_v54 = vld [vmem:[%s21356_s3 + $0x200] sm:$0xff]  }
 0x292   :  { %16032 = vmatpush3.bf16.msra.mxu1 %v17477_v47  ;;  %15529 = vmatprep.subr.bf16.mxu0 %v17478_v59  ;;  %v17504_v47 = vld [vmem:[%s21356_s3 + $0x308] sm:$0xff]  }
 0x293   :  { %16033 = vmatprep.subr.bf16.mxu1 %v17479_v25 }
 0x295   :  { %15530 = vmatpush3.bf16.msra.mxu0 %v17478_v59  ;;  %v21432_v59 = vld [vmem:[#allocation17_spill] sm:$0xff] }
 0x296   :  { %16034 = vmatpush3.bf16.msra.mxu1 %v17479_v25  ;;  %15531 = vmatprep.subr.bf16.mxu0 %v17480_v12  ;;  %v17506_v25 = vld [vmem:[%s21356_s3 + $0x310] sm:$0xff]  }
 0x297   :  { %16035 = vmatprep.subr.bf16.mxu1 %v17481_v34 }
 0x299   :  { %15532 = vmatpush3.bf16.msra.mxu0 %v17480_v12  ;;  %v17507_v12 = vld [vmem:[%s21356_s3 + $0x210] sm:$0xff]  }
 0x29a   :  { %16036 = vmatpush3.bf16.msra.mxu1 %v17481_v34  ;;  %15533 = vmatprep.subr.bf16.mxu0 %v17482_v23  ;;  %v17509_v34 = vld [vmem:[%s21356_s3 + $0x218] sm:$0xff]  }
 0x29b   :  { %16037 = vmatprep.subr.bf16.mxu1 %v17483_v26 }
 0x29d   :  { %15534 = vmatpush3.bf16.msra.mxu0 %v17482_v23  ;;  %v21433_v23 = vld [vmem:[#allocation20_spill] sm:$0xff] }
 0x29e   :  { %16038 = vmatpush3.bf16.msra.mxu1 %v17483_v26  ;;  %15535 = vmatprep.subr.bf16.mxu0 %v17484_v35  ;;  %v17510_v26 = vld [vmem:[%s21356_s3 + $0x320] sm:$0xff]  }
 0x29f   :  { %16039 = vmatprep.subr.bf16.mxu1 %v17485_v31 }
 0x2a1   :  { %15536 = vmatpush3.bf16.msra.mxu0 %v17484_v35  ;;  %v17513_v35 = vld [vmem:[%s21356_s3 + $0x228] sm:$0xff]  }
 0x2a2   :  { %16040 = vmatpush3.bf16.msra.mxu1 %v17485_v31  ;;  %15545 = vmatprep.subr.bf16.mxu0 %v17486_v9  ;;  %v17514_v31 = vld [vmem:[%s21356_s3 + $0x330] sm:$0xff]  }
 0x2a3   :  { %16049 = vmatprep.subr.bf16.mxu1 %v17487_v41 }
 0x2a4   :  { %15538 = vmatmul.mubr.bf16.vlgmr.msra.gmra.mrb[120].mxu0 %v18965_v56 }
 0x2a5   :  { %16042 = vmatmul.mubr.bf16.vlgmr.msra.gmra.mrb[136].mxu1 %v21431_v20  ;;  %15541 = vmatprep.mubr.bf16.mxu0 %v18859_v63 }
 0x2a6   :  { %15546 = vmatpush3.bf16.msra.mxu0 %v17486_v9  ;;  %16045 = vmatprep.mubr.bf16.mxu1 %v18928_v55  ;;  %v17515_v9 = vld [vmem:[%s21356_s3 + $0x230] sm:$0xff]  }
 0x2a7   :  { %16050 = vmatpush3.bf16.msra.mxu1 %v17487_v41  ;;  %15547 = vmatprep.subr.bf16.mxu0 %v17488_v7  ;;  %v17516_v41 = vld [vmem:[%s21356_s3 + $0x338] sm:$0xff]  }
 0x2a8   :  { %16051 = vmatprep.subr.bf16.mxu1 %v17489_v15 }
 0x2aa   :  { %15548 = vmatpush3.bf16.msra.mxu0 %v17488_v7  ;;  %v17517_v7 = vld [vmem:[%s21356_s3 + $0x238] sm:$0xff]  }
 0x2ab   :  { %16052 = vmatpush3.bf16.msra.mxu1 %v17489_v15  ;;  %15549 = vmatprep.subr.bf16.mxu0 %v17490_v3  ;;  %v17518_v15 = vld [vmem:[%s21356_s3 + $0x340] sm:$0xff]  }
 0x2ac   :  { %15542 = vmatmul.mubr.bf16.gmra.mrb[124].mxu0 %v18871_v40  ;;  %16053 = vmatprep.subr.bf16.mxu1 %v17491_v30 }
 0x2ad   :  { %16046 = vmatmul.mubr.bf16.gmra.mrb[140].mxu1 %v18965_v56  ;;  %15561 = vmatprep.mubr.bf16.mxu0 %v21430_v36  ;;  %v17505_v36 = vld [vmem:[%s21356_s3 + $0x208] sm:$0xff]  }
 0x2ae   :  { %15550 = vmatpush3.bf16.msra.mxu0 %v17490_v3  ;;  %16065 = vmatprep.mubr.bf16.mxu1 %v18859_v63  ;;  %v17520_v3 = vld [vmem:[%s21356_s3 + $0x348] sm:$0xff]  }
 0x2af   :  { %16054 = vmatpush3.bf16.msra.mxu1 %v17491_v30  ;;  %15551 = vmatprep.subr.bf16.mxu0 %v17492_v42  ;;  %v17521_v30 = vld [vmem:[%s21356_s3 + $0x248] sm:$0xff]  }
 0x2b0   :  { %16055 = vmatprep.subr.bf16.mxu1 %v17493_v1 }
 0x2b2   :  { %15552 = vmatpush3.bf16.msra.mxu0 %v17492_v42  ;;  %v21434_v42 = vld [vmem:[#allocation14_spill] sm:$0xff] }
 0x2b3   :  { %16056 = vmatpush3.bf16.msra.mxu1 %v17493_v1  ;;  %15553 = vmatprep.subr.bf16.mxu0 %v17494_v32  ;;  %v17522_v1 = vld [vmem:[%s21356_s3 + $0x350] sm:$0xff]  }
 0x2b4   :  { %16057 = vmatprep.subr.bf16.mxu1 %v17495_v22 }
 0x2b6   :  { %15554 = vmatpush3.bf16.msra.mxu0 %v17494_v32  ;;  %v17524_v32 = vld [vmem:[%s21356_s3 + $0x358] sm:$0xff]  }
 0x2b7   :  { %16058 = vmatpush3.bf16.msra.mxu1 %v17495_v22  ;;  %15555 = vmatprep.subr.bf16.mxu0 %v17496_v62  ;;  %v17525_v22 = vld [vmem:[%s21356_s3 + $0x258] sm:$0xff]  }
 0x2b8   :  { %16059 = vmatprep.subr.bf16.mxu1 %v17497_v10 }
 0x2ba   :  { %15556 = vmatpush3.bf16.msra.mxu0 %v17496_v62  ;;  %v21435_v62 = vld [vmem:[#allocation15_spill] sm:$0xff] }
 0x2bb   :  { %16060 = vmatpush3.bf16.msra.mxu1 %v17497_v10  ;;  %15557 = vmatprep.subr.bf16.mxu0 %v17498_v49  ;;  %v17526_v10 = vld [vmem:[%s21356_s3 + $0x360] sm:$0xff]  }
 0x2bc   :  { %16061 = vmatprep.subr.bf16.mxu1 %v17499_v27 }
 0x2be   :  { %15558 = vmatpush3.bf16.msra.mxu0 %v17498_v49  ;;  %v17527_v49 = vld [vmem:[%s21356_s3 + $0x260] sm:$0xff]  }
 0x2bf   :  { %16062 = vmatpush3.bf16.msra.mxu1 %v17499_v27  ;;  %15559 = vmatprep.subr.bf16.mxu0 %v17500_v57  ;;  %v17528_v27 = vld [vmem:[%s21356_s3 + $0x368] sm:$0xff]  }
 0x2c0   :  { %16063 = vmatprep.subr.bf16.mxu1 %v17501_v61 }
 0x2c2   :  { %15560 = vmatpush3.bf16.msra.mxu0 %v17500_v57  ;;  %v17529_v57 = vld [vmem:[%s21356_s3 + $0x268] sm:$0xff]  }
 0x2c3   :  { %16064 = vmatpush3.bf16.msra.mxu1 %v17501_v61  ;;  %15569 = vmatprep.subr.bf16.mxu0 %v17502_v14  ;;  %v17530_v61 = vld [vmem:[%s21356_s3 + $0x370] sm:$0xff]  }
 0x2c4   :  { %16073 = vmatprep.subr.bf16.mxu1 %v17503_v54 }
 0x2c5   :  { %15562 = vmatmul.mubr.bf16.vlgmr.msra.gmra.mrb[120].mxu0 %v21431_v20  ;;  %v17519_v20 = vld [vmem:[%s21356_s3 + $0x240] sm:$0xff]  }
 0x2c6   :  { %16066 = vmatmul.mubr.bf16.vlgmr.msra.gmra.mrb[136].mxu1 %v18871_v40  ;;  %15565 = vmatprep.mubr.bf16.mxu0 %v18928_v55  ;;  %v17508_v55 = vld [vmem:[%s21356_s3 + $0x318] sm:$0xff]  }
 0x2c7   :  { %15570 = vmatpush3.bf16.msra.mxu0 %v17502_v14  ;;  %16069 = vmatprep.mubr.bf16.mxu1 %v21432_v59  ;;  %v17531_v14 = vld [vmem:[%s21356_s3 + $0x270] sm:$0xff]  }
 0x2c8   :  { %16074 = vmatpush3.bf16.msra.mxu1 %v17503_v54  ;;  %15571 = vmatprep.subr.bf16.mxu0 %v17504_v47  ;;  %v17532_v54 = vld [vmem:[%s21356_s3 + $0x378] sm:$0xff]  }
 0x2c9   :  { %16075 = vmatprep.subr.bf16.mxu1 %v17505_v36 }
 0x2cb   :  { %15572 = vmatpush3.bf16.msra.mxu0 %v17504_v47  ;;  %v17533_v47 = vld [vmem:[%s21356_s3 + $0x278] sm:$0xff]  }
 0x2cc   :  { %16076 = vmatpush3.bf16.msra.mxu1 %v17505_v36  ;;  %15573 = vmatprep.subr.bf16.mxu0 %v17506_v25  ;;  %v17534_v36 = vld [vmem:[%s21356_s3 + $0x380] sm:$0xff]  }
 0x2cd   :  { %15566 = vmatmul.mubr.bf16.gmra.mrb[124].mxu0 %v18965_v56  ;;  %16077 = vmatprep.subr.bf16.mxu1 %v17507_v12  ;;  %v17511_v56 = vld [vmem:[%s21356_s3 + $0x220] sm:$0xff]  }
 0x2ce   :  { %16070 = vmatmul.mubr.bf16.gmra.mrb[140].mxu1 %v21433_v23  ;;  %15585 = vmatprep.mubr.bf16.mxu0 %v18859_v63  ;;  %v17512_v63 = vld [vmem:[%s21356_s3 + $0x328] sm:$0xff]  }
 0x2cf   :  { %15574 = vmatpush3.bf16.msra.mxu0 %v17506_v25  ;;  %16089 = vmatprep.mubr.bf16.mxu1 %v21432_v59  ;;  %v17536_v25 = vld [vmem:[%s21356_s3 + $0x388] sm:$0xff]  }
 0x2d0   :  { %16078 = vmatpush3.bf16.msra.mxu1 %v17507_v12  ;;  %15575 = vmatprep.subr.bf16.mxu0 %v17508_v55  ;;  %v17537_v12 = vld [vmem:[%s21356_s3 + $0x2c8] sm:$0xff]  }
 0x2d1   :  { %16079 = vmatprep.subr.bf16.mxu1 %v17509_v34 }
 0x2d3   :  { %15576 = vmatpush3.bf16.msra.mxu0 %v17508_v55  ;;  %v21436_v55 = vld [vmem:[#allocation19_spill] sm:$0xff] }
 0x2d4   :  { %16080 = vmatpush3.bf16.msra.mxu1 %v17509_v34  ;;  %15577 = vmatprep.subr.bf16.mxu0 %v17510_v26  ;;  %v17538_v34 = vld [vmem:[%s21356_s3 + $0x390] sm:$0xff]  }
 0x2d5   :  { %16081 = vmatprep.subr.bf16.mxu1 %v17511_v56 }
 0x2d7   :  { %15578 = vmatpush3.bf16.msra.mxu0 %v17510_v26  ;;  %v17540_v26 = vld [vmem:[%s21356_s3 + $0x398] sm:$0xff]  }
 0x2d8   :  { %16082 = vmatpush3.bf16.msra.mxu1 %v17511_v56  ;;  %15579 = vmatprep.subr.bf16.mxu0 %v17512_v63  ;;  %v17541_v56 = vld [vmem:[%s21356_s3 + $0x2d8] sm:$0xff]  }
 0x2d9   :  { %16083 = vmatprep.subr.bf16.mxu1 %v17513_v35 }
 0x2db   :  { %15580 = vmatpush3.bf16.msra.mxu0 %v17512_v63  ;;  %v21437_v63 = vld [vmem:[#allocation21_spill] sm:$0xff] }
 0x2dc   :  { %16084 = vmatpush3.bf16.msra.mxu1 %v17513_v35  ;;  %15581 = vmatprep.subr.bf16.mxu0 %v17514_v31  ;;  %v17542_v35 = vld [vmem:[%s21356_s3 + $0x3a0] sm:$0xff]  }
 0x2dd   :  { %16085 = vmatprep.subr.bf16.mxu1 %v17515_v9 }
 0x2df   :  { %15582 = vmatpush3.bf16.msra.mxu0 %v17514_v31  ;;  %v17543_v31 = vld [vmem:[%s21356_s3 + $0x2e0] sm:$0xff]  }
 0x2e0   :  { %16086 = vmatpush3.bf16.msra.mxu1 %v17515_v9  ;;  %15583 = vmatprep.subr.bf16.mxu0 %v17516_v41  ;;  %v17544_v9 = vld [vmem:[%s21356_s3 + $0x3a8] sm:$0xff]  }
 0x2e1   :  { %16087 = vmatprep.subr.bf16.mxu1 %v17517_v7 }
 0x2e3   :  { %15584 = vmatpush3.bf16.msra.mxu0 %v17516_v41  ;;  %v17545_v41 = vld [vmem:[%s21356_s3 + $0x2e8] sm:$0xff]  }
 0x2e4   :  { %16088 = vmatpush3.bf16.msra.mxu1 %v17517_v7  ;;  %15593 = vmatprep.subr.bf16.mxu0 %v17518_v15  ;;  %v17546_v7 = vld [vmem:[%s21356_s3 + $0x3b0] sm:$0xff]  }
 0x2e5   :  { %16097 = vmatprep.subr.bf16.mxu1 %v17519_v20 }
 0x2e6   :  { %15586 = vmatmul.mubr.bf16.vlgmr.msra.gmra.mrb[120].mxu0 %v18871_v40  ;;  %v17523_v40 = vld [vmem:[%s21356_s3 + $0x250] sm:$0xff]  }
 0x2e7   :  { %16090 = vmatmul.mubr.bf16.vlgmr.msra.gmra.mrb[136].mxu1 %v21433_v23  ;;  %15589 = vmatprep.mubr.bf16.mxu0 %v21432_v59 }
 0x2e8   :  { %15594 = vmatpush3.bf16.msra.mxu0 %v17518_v15  ;;  %16093 = vmatprep.mubr.bf16.mxu1 %v21434_v42  ;;  %v17547_v15 = vld [vmem:[%s21356_s3 + $0x2f0] sm:$0xff]  }
 0x2e9   :  { %16098 = vmatpush3.bf16.msra.mxu1 %v17519_v20  ;;  %15595 = vmatprep.subr.bf16.mxu0 %v17520_v3  ;;  %v17548_v20 = vld [vmem:[%s21356_s3 + $0x3b8] sm:$0xff]  }
 0x2ea   :  { %16099 = vmatprep.subr.bf16.mxu1 %v17521_v30 }
 0x2ec   :  { %15596 = vmatpush3.bf16.msra.mxu0 %v17520_v3  ;;  %v17549_v3 = vld [vmem:[%s21356_s3 + $0x2f8] sm:$0xff]  }
 0x2ed   :  { %16100 = vmatpush3.bf16.msra.mxu1 %v17521_v30  ;;  %15597 = vmatprep.subr.bf16.mxu0 %v17522_v1  ;;  %v17550_v30 = vld [vmem:[%s21356_s3 + $0x400] sm:$0xff]  }
 0x2ee   :  { %15590 = vmatmul.mubr.bf16.gmra.mrb[124].mxu0 %v21433_v23  ;;  %16101 = vmatprep.subr.bf16.mxu1 %v17523_v40 }
 0x2ef   :  { %16094 = vmatmul.mubr.bf16.gmra.mrb[140].mxu1 %v21435_v62  ;;  %15609 = vmatprep.mubr.bf16.mxu0 %v21432_v59  ;;  %v17535_v59 = vld [vmem:[%s21356_s3 + $0x2c0] sm:$0xff]  }
 0x2f0   :  { %15598 = vmatpush3.bf16.msra.mxu0 %v17522_v1  ;;  %16113 = vmatprep.mubr.bf16.mxu1 %v21434_v42  ;;  %v17552_v1 = vld [vmem:[%s21356_s3 + $0x408] sm:$0xff]  }
 0x2f1   :  { %16102 = vmatpush3.bf16.msra.mxu1 %v17523_v40  ;;  %15599 = vmatprep.subr.bf16.mxu0 %v17524_v32  ;;  %v17553_v40 = vld [vmem:[%s21356_s3 + $0x288] sm:$0xff]  }
 0x2f2   :  { %16103 = vmatprep.subr.bf16.mxu1 %v17525_v22 }
 0x2f4   :  { %15600 = vmatpush3.bf16.msra.mxu0 %v17524_v32  ;;  %v17554_v32 = vld [vmem:[%s21356_s3 + $0x410] sm:$0xff]  }
 0x2f5   :  { %16104 = vmatpush3.bf16.msra.mxu1 %v17525_v22  ;;  %15601 = vmatprep.subr.bf16.mxu0 %v17526_v10  ;;  %v17555_v22 = vld [vmem:[%s21356_s3 + $0x290] sm:$0xff]  }
 0x2f6   :  { %16105 = vmatprep.subr.bf16.mxu1 %v17527_v49 }
 0x2f8   :  { %15602 = vmatpush3.bf16.msra.mxu0 %v17526_v10  ;;  %v17557_v10 = vld [vmem:[%s21356_s3 + $0x298] sm:$0xff]  }
 0x2f9   :  { %16106 = vmatpush3.bf16.msra.mxu1 %v17527_v49  ;;  %15603 = vmatprep.subr.bf16.mxu0 %v17528_v27  ;;  %v17558_v49 = vld [vmem:[%s21356_s3 + $0x420] sm:$0xff]  }
 0x2fa   :  { %16107 = vmatprep.subr.bf16.mxu1 %v17529_v57 }
 0x2fc   :  { %15604 = vmatpush3.bf16.msra.mxu0 %v17528_v27  ;;  %v17559_v27 = vld [vmem:[%s21356_s3 + $0x2a0] sm:$0xff]  }
 0x2fd   :  { %16108 = vmatpush3.bf16.msra.mxu1 %v17529_v57  ;;  %15605 = vmatprep.subr.bf16.mxu0 %v17530_v61  ;;  %v17560_v57 = vld [vmem:[%s21356_s3 + $0x428] sm:$0xff]  }
 0x2fe   :  { %16109 = vmatprep.subr.bf16.mxu1 %v17531_v14 }
 0x300   :  { %15606 = vmatpush3.bf16.msra.mxu0 %v17530_v61  ;;  %v17561_v61 = vld [vmem:[%s21356_s3 + $0x2a8] sm:$0xff]  }
 0x301   :  { %16110 = vmatpush3.bf16.msra.mxu1 %v17531_v14  ;;  %15607 = vmatprep.subr.bf16.mxu0 %v17532_v54  ;;  %v17562_v14 = vld [vmem:[%s21356_s3 + $0x430] sm:$0xff]  }
 0x302   :  { %16111 = vmatprep.subr.bf16.mxu1 %v17533_v47 }
 0x304   :  { %15608 = vmatpush3.bf16.msra.mxu0 %v17532_v54  ;;  %v17563_v54 = vld [vmem:[%s21356_s3 + $0x2b0] sm:$0xff]  }
 0x305   :  { %16112 = vmatpush3.bf16.msra.mxu1 %v17533_v47  ;;  %15617 = vmatprep.subr.bf16.mxu0 %v17534_v36  ;;  %v17564_v47 = vld [vmem:[%s21356_s3 + $0x438] sm:$0xff]  }
 0x306   :  { %16121 = vmatprep.subr.bf16.mxu1 %v17535_v59 }
 0x307   :  { %15610 = vmatmul.mubr.bf16.vlgmr.msra.gmra.mrb[120].mxu0 %v21433_v23  ;;  %v17539_v23 = vld [vmem:[%s21356_s3 + $0x2d0] sm:$0xff]  }
 0x308   :  { %16114 = vmatmul.mubr.bf16.vlgmr.msra.gmra.mrb[136].mxu1 %v21435_v62  ;;  %15613 = vmatprep.mubr.bf16.mxu0 %v21434_v42 }
 0x309   :  { %15618 = vmatpush3.bf16.msra.mxu0 %v17534_v36  ;;  %16117 = vmatprep.mubr.bf16.mxu1 %v21436_v55  ;;  %v17565_v36 = vld [vmem:[%s21356_s3 + $0x2b8] sm:$0xff]  }
 0x30a   :  { %16122 = vmatpush3.bf16.msra.mxu1 %v17535_v59  ;;  %15619 = vmatprep.subr.bf16.mxu0 %v17536_v25  ;;  %v17566_v59 = vld [vmem:[%s21356_s3 + $0x3c0] sm:$0xff]  }
 0x30b   :  { %16123 = vmatprep.subr.bf16.mxu1 %v17537_v12 }
 0x30d   :  { %15620 = vmatpush3.bf16.msra.mxu0 %v17536_v25  ;;  %v17567_v25 = vld [vmem:[%s21356_s3 + $0x300] sm:$0xff]  }
 0x30e   :  { %16124 = vmatpush3.bf16.msra.mxu1 %v17537_v12  ;;  %15621 = vmatprep.subr.bf16.mxu0 %v17538_v34  ;;  %v17568_v12 = vld [vmem:[%s21356_s3 + $0x3c8] sm:$0xff]  }
 0x30f   :  { %15614 = vmatmul.mubr.bf16.gmra.mrb[124].mxu0 %v21435_v62  ;;  %16125 = vmatprep.subr.bf16.mxu1 %v17539_v23 }
 0x310   :  { %16118 = vmatmul.mubr.bf16.gmra.mrb[140].mxu1 %v21437_v63  ;;  %15633 = vmatprep.mubr.bf16.mxu0 %v21434_v42  ;;  %v17551_v42 = vld [vmem:[%s21356_s3 + $0x280] sm:$0xff]  }
 0x311   :  { %15622 = vmatpush3.bf16.msra.mxu0 %v17538_v34  ;;  %16137 = vmatprep.mubr.bf16.mxu1 %v19456_v44  ;;  %v17570_v34 = vld [vmem:[%s21356_s3 + $0x3d0] sm:$0xff]  }
 0x312   :  { %16126 = vmatpush3.bf16.msra.mxu1 %v17539_v23  ;;  %15623 = vmatprep.subr.bf16.mxu0 %v17540_v26  ;;  %v17571_v23 = vld [vmem:[%s21356_s3 + $0x310] sm:$0xff]  }
 0x313   :  { %16127 = vmatprep.subr.bf16.mxu1 %v17541_v56 }
 0x315   :  { %15624 = vmatpush3.bf16.msra.mxu0 %v17540_v26  ;;  %v17572_v26 = vld [vmem:[%s21356_s3 + $0x3d8] sm:$0xff]  }
 0x316   :  { %16128 = vmatpush3.bf16.msra.mxu1 %v17541_v56  ;;  %15625 = vmatprep.subr.bf16.mxu0 %v17542_v35  ;;  %v17573_v56 = vld [vmem:[%s21356_s3 + $0x318] sm:$0xff]  }
 0x317   :  { %16129 = vmatprep.subr.bf16.mxu1 %v17543_v31 }
 0x319   :  { %15626 = vmatpush3.bf16.msra.mxu0 %v17542_v35  ;;  %v17575_v35 = vld [vmem:[%s21356_s3 + $0x320] sm:$0xff]  }
 0x31a   :  { %16130 = vmatpush3.bf16.msra.mxu1 %v17543_v31  ;;  %15627 = vmatprep.subr.bf16.mxu0 %v17544_v9  ;;  %v17577_v31 = vld [vmem:[%s21356_s3 + $0x328] sm:$0xff]  }
 0x31b   :  { %16131 = vmatprep.subr.bf16.mxu1 %v17545_v41 }
 0x31d   :  { %15628 = vmatpush3.bf16.msra.mxu0 %v17544_v9  ;;  %v17578_v9 = vld [vmem:[%s21356_s3 + $0x3f0] sm:$0xff]  }
 0x31e   :  { %16132 = vmatpush3.bf16.msra.mxu1 %v17545_v41  ;;  %15629 = vmatprep.subr.bf16.mxu0 %v17546_v7  ;;  %v17579_v41 = vld [vmem:[%s21356_s3 + $0x330] sm:$0xff]  }
 0x31f   :  { %16133 = vmatprep.subr.bf16.mxu1 %v17547_v15 }
 0x321   :  { %15630 = vmatpush3.bf16.msra.mxu0 %v17546_v7  ;;  %v17580_v7 = vld [vmem:[%s21356_s3 + $0x3f8] sm:$0xff]  }
 0x322   :  { %16134 = vmatpush3.bf16.msra.mxu1 %v17547_v15  ;;  %15631 = vmatprep.subr.bf16.mxu0 %v17548_v20  ;;  %v17581_v15 = vld [vmem:[%s21356_s3 + $0x338] sm:$0xff]  }
 0x323   :  { %16135 = vmatprep.subr.bf16.mxu1 %v17549_v3 }
 0x325   :  { %15632 = vmatpush3.bf16.msra.mxu0 %v17548_v20  ;;  %v17582_v20 = vld [vmem:[%s21356_s3 + $0x440] sm:$0xff]  }
 0x326   :  { %16136 = vmatpush3.bf16.msra.mxu1 %v17549_v3  ;;  %15641 = vmatprep.subr.bf16.mxu0 %v17550_v30  ;;  %v17583_v3 = vld [vmem:[%s21356_s3 + $0x340] sm:$0xff]  }
 0x327   :  { %16145 = vmatprep.subr.bf16.mxu1 %v17551_v42 }
 0x328   :  { %15634 = vmatmul.mubr.bf16.vlgmr.msra.gmra.mrb[120].mxu0 %v21435_v62  ;;  %v17556_v62 = vld [vmem:[%s21356_s3 + $0x418] sm:$0xff]  }
 0x329   :  { %16138 = vmatmul.mubr.bf16.vlgmr.msra.gmra.mrb[136].mxu1 %v19490_v38  ;;  %15637 = vmatprep.mubr.bf16.mxu0 %v21436_v55  ;;  %v17569_v55 = vld [vmem:[%s21356_s3 + $0x308] sm:$0xff]  }
 0x32a   :  { %15642 = vmatpush3.bf16.msra.mxu0 %v17550_v30  ;;  %16141 = vmatprep.mubr.bf16.mxu1 %v19367_v48  ;;  %v17584_v30 = vld [vmem:[%s21356_s3 + $0x448] sm:$0xff]  }
 0x32b   :  { %16146 = vmatpush3.bf16.msra.mxu1 %v17551_v42  ;;  %15643 = vmatprep.subr.bf16.mxu0 %v17552_v1  ;;  %v17585_v42 = vld [vmem:[%s21356_s3 + $0x348] sm:$0xff]  }
 0x32c   :  { %16147 = vmatprep.subr.bf16.mxu1 %v17553_v40 }
 0x32e   :  { %15644 = vmatpush3.bf16.msra.mxu0 %v17552_v1  ;;  %v17586_v1 = vld [vmem:[%s21356_s3 + $0x450] sm:$0xff]  }
 0x32f   :  { %16148 = vmatpush3.bf16.msra.mxu1 %v17553_v40  ;;  %15645 = vmatprep.subr.bf16.mxu0 %v17554_v32  ;;  %v17589_v40 = vld [vmem:[%s21356_s3 + $0x358] sm:$0xff]  }
 0x330   :  { %15638 = vmatmul.mubr.bf16.gmra.mrb[124].mxu0 %v21437_v63  ;;  %16149 = vmatprep.subr.bf16.mxu1 %v17555_v22  ;;  %v17574_v63 = vld [vmem:[%s21356_s3 + $0x3e0] sm:$0xff]  }
 0x331   :  { %16142 = vmatmul.mubr.bf16.gmra.mrb[140].mxu1 %v19397_v45  ;;  %15657 = vmatprep.mubr.bf16.mxu0 %v19456_v44 }
 0x332   :  { %15646 = vmatpush3.bf16.msra.mxu0 %v17554_v32  ;;  %16161 = vmatprep.mubr.bf16.mxu1 %v19373_v5  ;;  %v17590_v32 = vld [vmem:[%s21356_s3 + $0x460] sm:$0xff]  }
 0x333   :  { %16150 = vmatpush3.bf16.msra.mxu1 %v17555_v22  ;;  %15647 = vmatprep.subr.bf16.mxu0 %v17556_v62  ;;  %v17593_v22 = vld [vmem:[%s21356_s3 + $0x368] sm:$0xff]  }
 0x334   :  { %16151 = vmatprep.subr.bf16.mxu1 %v17557_v10 }
 0x336   :  { %15648 = vmatpush3.bf16.msra.mxu0 %v17556_v62  ;;  %v17594_v62 = vld [vmem:[%s21356_s3 + $0x470] sm:$0xff]  }
 0x337   :  { %16152 = vmatpush3.bf16.msra.mxu1 %v17557_v10  ;;  %15649 = vmatprep.subr.bf16.mxu0 %v17558_v49  ;;  %v17595_v10 = vld [vmem:[%s21356_s3 + $0x370] sm:$0xff]  }
 0x338   :  { %16153 = vmatprep.subr.bf16.mxu1 %v17559_v27 }
 0x33a   :  { %15650 = vmatpush3.bf16.msra.mxu0 %v17558_v49  ;;  %v17596_v49 = vld [vmem:[%s21356_s3 + $0x478] sm:$0xff]  }
 0x33b   :  { %16154 = vmatpush3.bf16.msra.mxu1 %v17559_v27  ;;  %15651 = vmatprep.subr.bf16.mxu0 %v17560_v57  ;;  %v17597_v27 = vld [vmem:[%s21356_s3 + $0x378] sm:$0xff]  }
 0x33c   :  { %16155 = vmatprep.subr.bf16.mxu1 %v17561_v61 }
 0x33e   :  { %15652 = vmatpush3.bf16.msra.mxu0 %v17560_v57  ;;  %v17598_v57 = vld [vmem:[%s21356_s3 + $0x480] sm:$0xff]  }
 0x33f   :  { %16156 = vmatpush3.bf16.msra.mxu1 %v17561_v61  ;;  %15653 = vmatprep.subr.bf16.mxu0 %v17562_v14  ;;  %v17599_v61 = vld [vmem:[%s21356_s3 + $0x380] sm:$0xff]  }
 0x340   :  { %16157 = vmatprep.subr.bf16.mxu1 %v17563_v54 }
 0x342   :  { %15654 = vmatpush3.bf16.msra.mxu0 %v17562_v14  ;;  %v17600_v14 = vld [vmem:[%s21356_s3 + $0x488] sm:$0xff]  }
 0x343   :  { %16158 = vmatpush3.bf16.msra.mxu1 %v17563_v54  ;;  %15655 = vmatprep.subr.bf16.mxu0 %v17564_v47  ;;  %v17601_v54 = vld [vmem:[%s21356_s3 + $0x388] sm:$0xff]  }
 0x344   :  { %16159 = vmatprep.subr.bf16.mxu1 %v17565_v36 }
 0x346   :  { %15656 = vmatpush3.bf16.msra.mxu0 %v17564_v47  ;;  %v17602_v47 = vld [vmem:[%s21356_s3 + $0x490] sm:$0xff]  }
 0x347   :  { %16160 = vmatpush3.bf16.msra.mxu1 %v17565_v36  ;;  %15665 = vmatprep.subr.bf16.mxu0 %v17566_v59  ;;  %v17604_v36 = vld [vmem:[%s21356_s3 + $0x498] sm:$0xff]  }
 0x348   :  { %16169 = vmatprep.subr.bf16.mxu1 %v17567_v25 }
 0x349   :  { %15658 = vmatmul.mubr.bf16.vlgmr.msra.gmra.mrb[120].mxu0 %v19490_v38 }
 0x34a   :  { %16162 = vmatmul.mubr.bf16.vlgmr.msra.gmra.mrb[136].mxu1 %v19378_v8  ;;  %15661 = vmatprep.mubr.bf16.mxu0 %v19367_v48 }
 0x34b   :  { %15666 = vmatpush3.bf16.msra.mxu0 %v17566_v59  ;;  %16165 = vmatprep.mubr.bf16.mxu1 %v19456_v44  ;;  %v17605_v59 = vld [vmem:[%s21356_s3 + $0x398] sm:$0xff]  }
 0x34c   :  { %16170 = vmatpush3.bf16.msra.mxu1 %v17567_v25  ;;  %15667 = vmatprep.subr.bf16.mxu0 %v17568_v12  ;;  %v17606_v25 = vld [vmem:[%s21356_s3 + $0x4a0] sm:$0xff]  }
 0x34d   :  { %16171 = vmatprep.subr.bf16.mxu1 %v17569_v55 }
 0x34f   :  { %15668 = vmatpush3.bf16.msra.mxu0 %v17568_v12  ;;  %v17607_v12 = vld [vmem:[%s21356_s3 + $0x3a0] sm:$0xff]  }
 0x350   :  { %16172 = vmatpush3.bf16.msra.mxu1 %v17569_v55  ;;  %15669 = vmatprep.subr.bf16.mxu0 %v17570_v34  ;;  %v17609_v55 = vld [vmem:[%s21356_s3 + $0x3a8] sm:$0xff]  }
 0x351   :  { %15662 = vmatmul.mubr.bf16.gmra.mrb[124].mxu0 %v19397_v45  ;;  %16173 = vmatprep.subr.bf16.mxu1 %v17571_v23 }
 0x352   :  { %16166 = vmatmul.mubr.bf16.gmra.mrb[140].mxu1 %v19490_v38  ;;  %15681 = vmatprep.mubr.bf16.mxu0 %v19373_v5  ;;  %v17576_v5 = vld [vmem:[%s21356_s3 + $0x3e8] sm:$0xff]  }
 0x353   :  { %15670 = vmatpush3.bf16.msra.mxu0 %v17570_v34  ;;  %16185 = vmatprep.mubr.bf16.mxu1 %v19367_v48  ;;  %v17610_v34 = vld [vmem:[%s21356_s3 + $0x4b0] sm:$0xff]  }
 0x354   :  { %16174 = vmatpush3.bf16.msra.mxu1 %v17571_v23  ;;  %15671 = vmatprep.subr.bf16.mxu0 %v17572_v26  ;;  %v17611_v23 = vld [vmem:[%s21356_s3 + $0x3b0] sm:$0xff]  }
 0x355   :  { %16175 = vmatprep.subr.bf16.mxu1 %v17573_v56 }
 0x357   :  { %15672 = vmatpush3.bf16.msra.mxu0 %v17572_v26  ;;  %v17612_v26 = vld [vmem:[%s21356_s3 + $0x4b8] sm:$0xff]  }
 0x358   :  { %16176 = vmatpush3.bf16.msra.mxu1 %v17573_v56  ;;  %15673 = vmatprep.subr.bf16.mxu0 %v17574_v63  ;;  %v17613_v56 = vld [vmem:[%s21356_s3 + $0x3b8] sm:$0xff]  }
 0x359   :  { %16177 = vmatprep.subr.bf16.mxu1 %v17575_v35 }
 0x35b   :  { %15674 = vmatpush3.bf16.msra.mxu0 %v17574_v63  ;;  %v17614_v63 = vld [vmem:[%s21356_s3 + $0x4c0] sm:$0xff]  }
 0x35c   :  { %16178 = vmatpush3.bf16.msra.mxu1 %v17575_v35  ;;  %15675 = vmatprep.subr.bf16.mxu0 %v17576_v5  ;;  %v17615_v35 = vld [vmem:[%s21356_s3 + $0x400] sm:$0xff]  }
 0x35d   :  { %16179 = vmatprep.subr.bf16.mxu1 %v17577_v31 }
 0x35f   :  { %15676 = vmatpush3.bf16.msra.mxu0 %v17576_v5  ;;  %v17616_v5 = vld [vmem:[%s21356_s3 + $0x4c8] sm:$0xff]  }
 0x360   :  { %16180 = vmatpush3.bf16.msra.mxu1 %v17577_v31  ;;  %15677 = vmatprep.subr.bf16.mxu0 %v17578_v9  ;;  %v17617_v31 = vld [vmem:[%s21356_s3 + $0x408] sm:$0xff]  }
 0x361   :  { %16181 = vmatprep.subr.bf16.mxu1 %v17579_v41 }
 0x363   :  { %15678 = vmatpush3.bf16.msra.mxu0 %v17578_v9  ;;  %v17618_v9 = vld [vmem:[%s21356_s3 + $0x4d0] sm:$0xff]  }
 0x364   :  { %16182 = vmatpush3.bf16.msra.mxu1 %v17579_v41  ;;  %15679 = vmatprep.subr.bf16.mxu0 %v17580_v7  ;;  %v17620_v41 = vld [vmem:[%s21356_s3 + $0x4d8] sm:$0xff]  }
 0x365   :  { %16183 = vmatprep.subr.bf16.mxu1 %v17581_v15 }
 0x367   :  { %15680 = vmatpush3.bf16.msra.mxu0 %v17580_v7  ;;  %v17621_v7 = vld [vmem:[%s21356_s3 + $0x418] sm:$0xff]  }
 0x368   :  { %16184 = vmatpush3.bf16.msra.mxu1 %v17581_v15  ;;  %15689 = vmatprep.subr.bf16.mxu0 %v17582_v20  ;;  %v21438_v15 = vld [vmem:[#allocation16_spill] sm:$0xff] }
 0x369   :  { %16193 = vmatprep.subr.bf16.mxu1 %v17583_v3 }
 0x36a   :  { %15682 = vmatmul.mubr.bf16.vlgmr.msra.gmra.mrb[120].mxu0 %v19378_v8  ;;  %v17587_v8 = vld [vmem:[%s21356_s3 + $0x350] sm:$0xff]  }
 0x36b   :  { %16186 = vmatmul.mubr.bf16.vlgmr.msra.gmra.mrb[136].mxu1 %v19397_v45  ;;  %15685 = vmatprep.mubr.bf16.mxu0 %v19456_v44  ;;  %v17588_v44 = vld [vmem:[%s21356_s3 + $0x458] sm:$0xff]  }
 0x36c   :  { %15690 = vmatpush3.bf16.msra.mxu0 %v17582_v20  ;;  %16189 = vmatprep.mubr.bf16.mxu1 %v19486_v16  ;;  %v17622_v20 = vld [vmem:[%s21356_s3 + $0x4e0] sm:$0xff]  }
 0x36d   :  { %16194 = vmatpush3.bf16.msra.mxu1 %v17583_v3  ;;  %15691 = vmatprep.subr.bf16.mxu0 %v17584_v30  ;;  %v17623_v3 = vld [vmem:[%s21356_s3 + $0x420] sm:$0xff]  }
 0x36e   :  { %16195 = vmatprep.subr.bf16.mxu1 %v17585_v42 }
 0x370   :  { %15692 = vmatpush3.bf16.msra.mxu0 %v17584_v30  ;;  %v17625_v30 = vld [vmem:[%s21356_s3 + $0x428] sm:$0xff]  }
 0x371   :  { %16196 = vmatpush3.bf16.msra.mxu1 %v17585_v42  ;;  %15693 = vmatprep.subr.bf16.mxu0 %v17586_v1  ;;  %v17626_v42 = vld [vmem:[%s21356_s3 + $0x4f0] sm:$0xff]  }
 0x372   :  { %15686 = vmatmul.mubr.bf16.gmra.mrb[124].mxu0 %v19490_v38  ;;  %16197 = vmatprep.subr.bf16.mxu1 %v17587_v8  ;;  %v17591_v38 = vld [vmem:[%s21356_s3 + $0x360] sm:$0xff]  }
 0x373   :  { %16190 = vmatmul.mubr.bf16.gmra.mrb[140].mxu1 %v19521_v28  ;;  %15705 = vmatprep.mubr.bf16.mxu0 %v19367_v48  ;;  %v17592_v48 = vld [vmem:[%s21356_s3 + $0x468] sm:$0xff]  }
 0x374   :  { %15694 = vmatpush3.bf16.msra.mxu0 %v17586_v1  ;;  %16209 = vmatprep.mubr.bf16.mxu1 %v19486_v16  ;;  %v17627_v1 = vld [vmem:[%s21356_s3 + $0x430] sm:$0xff]  }
 0x375   :  { %16198 = vmatpush3.bf16.msra.mxu1 %v17587_v8  ;;  %15695 = vmatprep.subr.bf16.mxu0 %v17588_v44  ;;  %v17628_v8 = vld [vmem:[%s21356_s3 + $0x4f8] sm:$0xff]  }
 0x376   :  { %16199 = vmatprep.subr.bf16.mxu1 %v17589_v40 }
 0x378   :  { %15696 = vmatpush3.bf16.msra.mxu0 %v17588_v44  ;;  %v17629_v44 = vld [vmem:[%s21356_s3 + $0x438] sm:$0xff]  }
 0x379   :  { %16200 = vmatpush3.bf16.msra.mxu1 %v17589_v40  ;;  %15697 = vmatprep.subr.bf16.mxu0 %v17590_v32  ;;  %v17630_v40 = vld [vmem:[%s21356_s3 + $0x540] sm:$0xff]  }
 0x37a   :  { %16201 = vmatprep.subr.bf16.mxu1 %v17591_v38 }
 0x37c   :  { %15698 = vmatpush3.bf16.msra.mxu0 %v17590_v32  ;;  %v17631_v32 = vld [vmem:[%s21356_s3 + $0x3c0] sm:$0xff]  }
 0x37d   :  { %16202 = vmatpush3.bf16.msra.mxu1 %v17591_v38  ;;  %15699 = vmatprep.subr.bf16.mxu0 %v17592_v48  ;;  %v17632_v38 = vld [vmem:[%s21356_s3 + $0x548] sm:$0xff]  }
 0x37e   :  { %16203 = vmatprep.subr.bf16.mxu1 %v17593_v22 }
 0x380   :  { %15700 = vmatpush3.bf16.msra.mxu0 %v17592_v48  ;;  %v17633_v48 = vld [vmem:[%s21356_s3 + $0x3c8] sm:$0xff]  }
 0x381   :  { %16204 = vmatpush3.bf16.msra.mxu1 %v17593_v22  ;;  %15701 = vmatprep.subr.bf16.mxu0 %v17594_v62  ;;  %v21439_v22 = vld [vmem:[#allocation18_spill] sm:$0xff] }
 0x382   :  { %16205 = vmatprep.subr.bf16.mxu1 %v17595_v10 }
 0x384   :  { %15702 = vmatpush3.bf16.msra.mxu0 %v17594_v62  ;;  %v21440_v62 = vld [vmem:[#allocation13_spill] sm:$0xff] }
 0x385   :  { %16206 = vmatpush3.bf16.msra.mxu1 %v17595_v10  ;;  %15703 = vmatprep.subr.bf16.mxu0 %v17596_v49  ;;  %v17634_v10 = vld [vmem:[%s21356_s3 + $0x550] sm:$0xff]  }
 0x386   :  { %16207 = vmatprep.subr.bf16.mxu1 %v17597_v27 }
 0x388   :  { %15704 = vmatpush3.bf16.msra.mxu0 %v17596_v49  ;;  %v17637_v49 = vld [vmem:[%s21356_s3 + $0x3d8] sm:$0xff]  }
 0x389   :  { %16208 = vmatpush3.bf16.msra.mxu1 %v17597_v27  ;;  %15713 = vmatprep.subr.bf16.mxu0 %v17598_v57  ;;  %v21441_v27 = vld [vmem:[#allocation8_spill] sm:$0xff] }
 0x38a   :  { %16217 = vmatprep.subr.bf16.mxu1 %v17599_v61 }
 0x38b   :  { %15706 = vmatmul.mubr.bf16.vlgmr.msra.gmra.mrb[120].mxu0 %v19397_v45  ;;  %v17603_v45 = vld [vmem:[%s21356_s3 + $0x390] sm:$0xff]  }
 0x38c   :  { %16210 = vmatmul.mubr.bf16.vlgmr.msra.gmra.mrb[136].mxu1 %v19521_v28  ;;  %15709 = vmatprep.mubr.bf16.mxu0 %v19486_v16 }
 0x38d   :  { %15714 = vmatpush3.bf16.msra.mxu0 %v17598_v57  ;;  %16213 = vmatprep.mubr.bf16.mxu1 %v19384_v46  ;;  %v21442_v57 = vld [vmem:[#allocation11_spill] sm:$0xff] }
 0x38e   :  { %16218 = vmatpush3.bf16.msra.mxu1 %v17599_v61  ;;  %15715 = vmatprep.subr.bf16.mxu0 %v17600_v14  ;;  %v17638_v61 = vld [vmem:[%s21356_s3 + $0x560] sm:$0xff]  }
 0x38f   :  { %16219 = vmatprep.subr.bf16.mxu1 %v17601_v54 }
 0x391   :  { %15716 = vmatpush3.bf16.msra.mxu0 %v17600_v14  ;;  %v17640_v14 = vld [vmem:[%s21356_s3 + $0x568] sm:$0xff]  }
 0x392   :  { %16220 = vmatpush3.bf16.msra.mxu1 %v17601_v54  ;;  %15717 = vmatprep.subr.bf16.mxu0 %v17602_v47  ;;  %v17641_v54 = vld [vmem:[%s21356_s3 + $0x3e8] sm:$0xff]  }
 0x393   :  { %15710 = vmatmul.mubr.bf16.gmra.mrb[124].mxu0 %v19521_v28  ;;  %16221 = vmatprep.subr.bf16.mxu1 %v17603_v45 }
 0x394   :  { %16214 = vmatmul.mubr.bf16.gmra.mrb[140].mxu1 %v19399_v0  ;;  %15729 = vmatprep.mubr.bf16.mxu0 %v19486_v16  ;;  %v17608_v16 = vld [vmem:[%s21356_s3 + $0x4a8] sm:$0xff]  }
 0x395   :  { %15718 = vmatpush3.bf16.msra.mxu0 %v17602_v47  ;;  %16233 = vmatprep.mubr.bf16.mxu1 %v19384_v46  ;;  %v17642_v47 = vld [vmem:[%s21356_s3 + $0x570] sm:$0xff]  }
 0x396   :  { %16222 = vmatpush3.bf16.msra.mxu1 %v17603_v45  ;;  %15719 = vmatprep.subr.bf16.mxu0 %v17604_v36  ;;  %v17643_v45 = vld [vmem:[%s21356_s3 + $0x3f0] sm:$0xff]  }
 0x397   :  { %16223 = vmatprep.subr.bf16.mxu1 %v17605_v59 }
 0x399   :  { %15720 = vmatpush3.bf16.msra.mxu0 %v17604_v36  ;;  %v17644_v36 = vld [vmem:[%s21356_s3 + $0x578] sm:$0xff]  }
 0x39a   :  { %16224 = vmatpush3.bf16.msra.mxu1 %v17605_v59  ;;  %15721 = vmatprep.subr.bf16.mxu0 %v17606_v25  ;;  %v17645_v59 = vld [vmem:[%s21356_s3 + $0x3f8] sm:$0xff]  }
 0x39b   :  { %16225 = vmatprep.subr.bf16.mxu1 %v17607_v12 }
 0x39d   :  { %15722 = vmatpush3.bf16.msra.mxu0 %v17606_v25  ;;  %v17646_v25 = vld [vmem:[%s21356_s3 + $0x500] sm:$0xff]  }
 0x39e   :  { %16226 = vmatpush3.bf16.msra.mxu1 %v17607_v12  ;;  %15723 = vmatprep.subr.bf16.mxu0 %v17608_v16  ;;  %v17647_v12 = vld [vmem:[%s21356_s3 + $0x440] sm:$0xff]  }
 0x39f   :  { %16227 = vmatprep.subr.bf16.mxu1 %v17609_v55 }
 0x3a1   :  { %15724 = vmatpush3.bf16.msra.mxu0 %v17608_v16  ;;  %v17648_v16 = vld [vmem:[%s21356_s3 + $0x508] sm:$0xff]  }
 0x3a2   :  { %16228 = vmatpush3.bf16.msra.mxu1 %v17609_v55  ;;  %15725 = vmatprep.subr.bf16.mxu0 %v17610_v34  ;;  %v17649_v55 = vld [vmem:[%s21356_s3 + $0x448] sm:$0xff]  }
 0x3a3   :  { %16229 = vmatprep.subr.bf16.mxu1 %v17611_v23 }
 0x3a5   :  { %15726 = vmatpush3.bf16.msra.mxu0 %v17610_v34  ;;  %v21443_v34 = vld [vmem:[#allocation7_spill] sm:$0xff] }
 0x3a6   :  { %16230 = vmatpush3.bf16.msra.mxu1 %v17611_v23  ;;  %15727 = vmatprep.subr.bf16.mxu0 %v17612_v26  ;;  %v17650_v23 = vld [vmem:[%s21356_s3 + $0x510] sm:$0xff]  }
 0x3a7   :  { %16231 = vmatprep.subr.bf16.mxu1 %v17613_v56 }
 0x3a9   :  { %15728 = vmatpush3.bf16.msra.mxu0 %v17612_v26  ;;  %v17651_v26 = vld [vmem:[%s21356_s3 + $0x450] sm:$0xff]  }
 0x3aa   :  { %16232 = vmatpush3.bf16.msra.mxu1 %v17613_v56  ;;  %15737 = vmatprep.subr.bf16.mxu0 %v17614_v63  ;;  %v17652_v56 = vld [vmem:[%s21356_s3 + $0x518] sm:$0xff]  }
 0x3ab   :  { %16241 = vmatprep.subr.bf16.mxu1 %v17615_v35 }
 0x3ac   :  { %15730 = vmatmul.mubr.bf16.vlgmr.msra.gmra.mrb[120].mxu0 %v19521_v28  ;;  %v17619_v28 = vld [vmem:[%s21356_s3 + $0x410] sm:$0xff]  }
 0x3ad   :  { %16234 = vmatmul.mubr.bf16.vlgmr.msra.gmra.mrb[136].mxu1 %v19399_v0  ;;  %15733 = vmatprep.mubr.bf16.mxu0 %v19384_v46 }
 0x3ae   :  { %15738 = vmatpush3.bf16.msra.mxu0 %v17614_v63  ;;  %16237 = vmatprep.mubr.bf16.mxu1 %v19501_v60  ;;  %v17653_v63 = vld [vmem:[%s21356_s3 + $0x458] sm:$0xff]  }
 0x3af   :  { %16242 = vmatpush3.bf16.msra.mxu1 %v17615_v35  ;;  %15739 = vmatprep.subr.bf16.mxu0 %v17616_v5  ;;  %v17654_v35 = vld [vmem:[%s21356_s3 + $0x520] sm:$0xff]  }
 0x3b0   :  { %16243 = vmatprep.subr.bf16.mxu1 %v17617_v31 }
 0x3b2   :  { %15740 = vmatpush3.bf16.msra.mxu0 %v17616_v5  ;;  %v17655_v5 = vld [vmem:[%s21356_s3 + $0x460] sm:$0xff]  }
 0x3b3   :  { %16244 = vmatpush3.bf16.msra.mxu1 %v17617_v31  ;;  %15741 = vmatprep.subr.bf16.mxu0 %v17618_v9  ;;  %v17656_v31 = vld [vmem:[%s21356_s3 + $0x528] sm:$0xff]  }
 0x3b4   :  { %15734 = vmatmul.mubr.bf16.gmra.mrb[124].mxu0 %v19399_v0  ;;  %16245 = vmatprep.subr.bf16.mxu1 %v17619_v28 }
 0x3b5   :  { %16238 = vmatmul.mubr.bf16.gmra.mrb[140].mxu1 %v19524_v18  ;;  %15753 = vmatprep.mubr.bf16.mxu0 %v19384_v46  ;;  %v17624_v46 = vld [vmem:[%s21356_s3 + $0x4e8] sm:$0xff]  }
 0x3b6   :  { %15742 = vmatpush3.bf16.msra.mxu0 %v17618_v9  ;;  %16257 = vmatprep.mubr.bf16.mxu1 %v21438_v15  ;;  %v17657_v9 = vld [vmem:[%s21356_s3 + $0x468] sm:$0xff]  }
 0x3b7   :  { %16246 = vmatpush3.bf16.msra.mxu1 %v17619_v28  ;;  %15743 = vmatprep.subr.bf16.mxu0 %v17620_v41  ;;  %v17658_v28 = vld [vmem:[%s21356_s3 + $0x530] sm:$0xff]  }
 0x3b8   :  { %16247 = vmatprep.subr.bf16.mxu1 %v17621_v7 }
 0x3ba   :  { %15744 = vmatpush3.bf16.msra.mxu0 %v17620_v41  ;;  %v17659_v41 = vld [vmem:[%s21356_s3 + $0x470] sm:$0xff]  }
 0x3bb   :  { %16248 = vmatpush3.bf16.msra.mxu1 %v17621_v7  ;;  %15745 = vmatprep.subr.bf16.mxu0 %v17622_v20  ;;  %v17660_v7 = vld [vmem:[%s21356_s3 + $0x538] sm:$0xff]  }
 0x3bc   :  { %16249 = vmatprep.subr.bf16.mxu1 %v17623_v3 }
 0x3be   :  { %15746 = vmatpush3.bf16.msra.mxu0 %v17622_v20  ;;  %v17661_v20 = vld [vmem:[%s21356_s3 + $0x478] sm:$0xff]  }
 0x3bf   :  { %16250 = vmatpush3.bf16.msra.mxu1 %v17623_v3  ;;  %15747 = vmatprep.subr.bf16.mxu0 %v17624_v46  ;;  %v17662_v3 = vld [vmem:[%s21356_s3 + $0x580] sm:$0xff]  }
 0x3c0   :  { %16251 = vmatprep.subr.bf16.mxu1 %v17625_v30 }
 0x3c2   :  { %15748 = vmatpush3.bf16.msra.mxu0 %v17624_v46  ;;  %v17663_v46 = vld [vmem:[%s21356_s3 + $0x480] sm:$0xff]  }
 0x3c3   :  { %16252 = vmatpush3.bf16.msra.mxu1 %v17625_v30  ;;  %15749 = vmatprep.subr.bf16.mxu0 %v17626_v42  ;;  %v17664_v30 = vld [vmem:[%s21356_s3 + $0x588] sm:$0xff]  }
 0x3c4   :  { %16253 = vmatprep.subr.bf16.mxu1 %v17627_v1 }
 0x3c6   :  { %15750 = vmatpush3.bf16.msra.mxu0 %v17626_v42  ;;  %v17665_v42 = vld [vmem:[%s21356_s3 + $0x488] sm:$0xff]  }
 0x3c7   :  { %16254 = vmatpush3.bf16.msra.mxu1 %v17627_v1  ;;  %15751 = vmatprep.subr.bf16.mxu0 %v17628_v8  ;;  %v17666_v1 = vld [vmem:[%s21356_s3 + $0x590] sm:$0xff]  }
 0x3c8   :  { %16255 = vmatprep.subr.bf16.mxu1 %v17629_v44 }
 0x3ca   :  { %15752 = vmatpush3.bf16.msra.mxu0 %v17628_v8  ;;  %v17667_v8 = vld [vmem:[%s21356_s3 + $0x490] sm:$0xff]  }
 0x3cb   :  { %16256 = vmatpush3.bf16.msra.mxu1 %v17629_v44  ;;  %15761 = vmatprep.subr.bf16.mxu0 %v17630_v40  ;;  %v17669_v44 = vld [vmem:[%s21356_s3 + $0x498] sm:$0xff]  }
 0x3cc   :  { %16265 = vmatprep.subr.bf16.mxu1 %v17631_v32 }
 0x3cd   :  { %15754 = vmatmul.mubr.bf16.vlgmr.msra.gmra.mrb[120].mxu0 %v19399_v0  ;;  %v17635_v0 = vld [vmem:[%s21356_s3 + $0x3d0] sm:$0xff]  }
 0x3ce   :  { %16258 = vmatmul.mubr.bf16.vlgmr.msra.gmra.mrb[136].mxu1 %v21439_v22  ;;  %15757 = vmatprep.mubr.bf16.mxu0 %v19501_v60  ;;  %v17636_v60 = vld [vmem:[%s21356_s3 + $0x558] sm:$0xff]  }
 0x3cf   :  { %15762 = vmatpush3.bf16.msra.mxu0 %v17630_v40  ;;  %16261 = vmatprep.mubr.bf16.mxu1 %v21440_v62  ;;  %v21444_v40 = vld [vmem:[#allocation22_spill] sm:$0xff] }
 0x3d0   :  { %16266 = vmatpush3.bf16.msra.mxu1 %v17631_v32  ;;  %15763 = vmatprep.subr.bf16.mxu0 %v17632_v38  ;;  %v17670_v32 = vld [vmem:[%s21356_s3 + $0x5a0] sm:$0xff]  }
 0x3d1   :  { %16267 = vmatprep.subr.bf16.mxu1 %v17633_v48 }
 0x3d3   :  { %15764 = vmatpush3.bf16.msra.mxu0 %v17632_v38  ;;  %v17671_v38 = vld [vmem:[%s21356_s3 + $0x4a0] sm:$0xff]  }
 0x3d4   :  { %16268 = vmatpush3.bf16.msra.mxu1 %v17633_v48  ;;  %15765 = vmatprep.subr.bf16.mxu0 %v17634_v10  ;;  %v17672_v48 = vld [vmem:[%s21356_s3 + $0x5a8] sm:$0xff]  }
 0x3d5   :  { %15758 = vmatmul.mubr.bf16.gmra.mrb[124].mxu0 %v19524_v18  ;;  %16269 = vmatprep.subr.bf16.mxu1 %v17635_v0  ;;  %v17639_v18 = vld [vmem:[%s21356_s3 + $0x3e0] sm:$0xff]  }
 0x3d6   :  { %16262 = vmatmul.mubr.bf16.gmra.mrb[140].mxu1 %v21441_v27  ;;  %15777 = vmatprep.mubr.bf16.mxu0 %v21438_v15 }
 0x3d7   :  { %15766 = vmatpush3.bf16.msra.mxu0 %v17634_v10  ;;  %16281 = vmatprep.mubr.bf16.mxu1 %v21442_v57  ;;  %v17675_v10 = vld [vmem:[%s21356_s3 + $0x4b0] sm:$0xff]  }
 0x3d8   :  { %16270 = vmatpush3.bf16.msra.mxu1 %v17635_v0  ;;  %15767 = vmatprep.subr.bf16.mxu0 %v17636_v60  ;;  %v17676_v0 = vld [vmem:[%s21356_s3 + $0x5b8] sm:$0xff]  }
 0x3d9   :  { %16271 = vmatprep.subr.bf16.mxu1 %v17637_v49 }
 0x3db   :  { %15768 = vmatpush3.bf16.msra.mxu0 %v17636_v60  ;;  %v17677_v60 = vld [vmem:[%s21356_s3 + $0x4b8] sm:$0xff]  }
 0x3dc   :  { %16272 = vmatpush3.bf16.msra.mxu1 %v17637_v49  ;;  %15769 = vmatprep.subr.bf16.mxu0 %v17638_v61  ;;  %v17678_v49 = vld [vmem:[%s21356_s3 + $0x5c0] sm:$0xff]  }
 0x3dd   :  { %16273 = vmatprep.subr.bf16.mxu1 %v17639_v18 }
 0x3df   :  { %15770 = vmatpush3.bf16.msra.mxu0 %v17638_v61  ;;  %v17680_v61 = vld [vmem:[%s21356_s3 + $0x5c8] sm:$0xff]  }
 0x3e0   :  { %16274 = vmatpush3.bf16.msra.mxu1 %v17639_v18  ;;  %15771 = vmatprep.subr.bf16.mxu0 %v17640_v14  ;;  %v17681_v18 = vld [vmem:[%s21356_s3 + $0x4c8] sm:$0xff]  }
 0x3e1   :  { %16275 = vmatprep.subr.bf16.mxu1 %v17641_v54 }
 0x3e3   :  { %15772 = vmatpush3.bf16.msra.mxu0 %v17640_v14  ;;  %v17682_v14 = vld [vmem:[%s21356_s3 + $0x5d0] sm:$0xff]  }
 0x3e4   :  { %16276 = vmatpush3.bf16.msra.mxu1 %v17641_v54  ;;  %15773 = vmatprep.subr.bf16.mxu0 %v17642_v47  ;;  %v17684_v54 = vld [vmem:[%s21356_s3 + $0x5d8] sm:$0xff]  }
 0x3e5   :  { %16277 = vmatprep.subr.bf16.mxu1 %v17643_v45 }
 0x3e7   :  { %15774 = vmatpush3.bf16.msra.mxu0 %v17642_v47  ;;  %v17685_v47 = vld [vmem:[%s21356_s3 + $0x4d8] sm:$0xff]  }
 0x3e8   :  { %16278 = vmatpush3.bf16.msra.mxu1 %v17643_v45  ;;  %15775 = vmatprep.subr.bf16.mxu0 %v17644_v36  ;;  %v21445_v45 = vld [vmem:[#allocation9_spill] sm:$0xff] }
 0x3e9   :  { %16279 = vmatprep.subr.bf16.mxu1 %v17645_v59 }
 0x3eb   :  { %15776 = vmatpush3.bf16.msra.mxu0 %v17644_v36  ;;  %v17686_v36 = vld [vmem:[%s21356_s3 + $0x5e0] sm:$0xff]  }
 0x3ec   :  { %16280 = vmatpush3.bf16.msra.mxu1 %v17645_v59  ;;  %15785 = vmatprep.subr.bf16.mxu0 %v17646_v25  ;;  %v17687_v59 = vld [vmem:[%s21356_s3 + $0x4e0] sm:$0xff]  }
 0x3ed   :  { %16289 = vmatprep.subr.bf16.mxu1 %v17647_v12 }
 0x3ee   :  { %15778 = vmatmul.mubr.bf16.vlgmr.msra.gmra.mrb[120].mxu0 %v21439_v22 }
 0x3ef   :  { %16282 = vmatmul.mubr.bf16.vlgmr.msra.gmra.mrb[136].mxu1 %v21443_v34  ;;  %15781 = vmatprep.mubr.bf16.mxu0 %v21440_v62 }
 0x3f0   :  { %15786 = vmatpush3.bf16.msra.mxu0 %v17646_v25  ;;  %16285 = vmatprep.mubr.bf16.mxu1 %v21438_v15  ;;  %v17689_v25 = vld [vmem:[%s21356_s3 + $0x4e8] sm:$0xff]  }
 0x3f1   :  { %16290 = vmatpush3.bf16.msra.mxu1 %v17647_v12  ;;  %15787 = vmatprep.subr.bf16.mxu0 %v17648_v16  ;;  %v17690_v12 = vld [vmem:[%s21356_s3 + $0x5f0] sm:$0xff]  }
 0x3f2   :  { %16291 = vmatprep.subr.bf16.mxu1 %v17649_v55 }
 0x3f4   :  { %15788 = vmatpush3.bf16.msra.mxu0 %v17648_v16  ;;  %v17691_v16 = vld [vmem:[%s21356_s3 + $0x4f0] sm:$0xff]  }
 0x3f5   :  { %16292 = vmatpush3.bf16.msra.mxu1 %v17649_v55  ;;  %15789 = vmatprep.subr.bf16.mxu0 %v17650_v23  ;;  %v17692_v55 = vld [vmem:[%s21356_s3 + $0x5f8] sm:$0xff]  }
 0x3f6   :  { %15782 = vmatmul.mubr.bf16.gmra.mrb[124].mxu0 %v21441_v27  ;;  %16293 = vmatprep.subr.bf16.mxu1 %v17651_v26 }
 0x3f7   :  { %16286 = vmatmul.mubr.bf16.gmra.mrb[140].mxu1 %v21439_v22  ;;  %15801 = vmatprep.mubr.bf16.mxu0 %v21442_v57  ;;  %v17679_v57 = vld [vmem:[%s21356_s3 + $0x4c0] sm:$0xff]  }
 0x3f8   :  { %15790 = vmatpush3.bf16.msra.mxu0 %v17650_v23  ;;  %16305 = vmatprep.mubr.bf16.mxu1 %v21440_v62  ;;  %v17694_v23 = vld [vmem:[%s21356_s3 + $0x600] sm:$0xff]  }
 0x3f9   :  { %16294 = vmatpush3.bf16.msra.mxu1 %v17651_v26  ;;  %15791 = vmatprep.subr.bf16.mxu0 %v17652_v56  ;;  %v17695_v26 = vld [vmem:[%s21356_s3 + $0x540] sm:$0xff]  }
 0x3fa   :  { %16295 = vmatprep.subr.bf16.mxu1 %v17653_v63 }
 0x3fc   :  { %15792 = vmatpush3.bf16.msra.mxu0 %v17652_v56  ;;  %v17696_v56 = vld [vmem:[%s21356_s3 + $0x608] sm:$0xff]  }
 0x3fd   :  { %16296 = vmatpush3.bf16.msra.mxu1 %v17653_v63  ;;  %15793 = vmatprep.subr.bf16.mxu0 %v17654_v35  ;;  %v17697_v63 = vld [vmem:[%s21356_s3 + $0x548] sm:$0xff]  }
 0x3fe   :  { %16297 = vmatprep.subr.bf16.mxu1 %v17655_v5 }
 0x400   :  { %15794 = vmatpush3.bf16.msra.mxu0 %v17654_v35  ;;  %v17698_v35 = vld [vmem:[%s21356_s3 + $0x610] sm:$0xff]  }
 0x401   :  { %16298 = vmatpush3.bf16.msra.mxu1 %v17655_v5  ;;  %15795 = vmatprep.subr.bf16.mxu0 %v17656_v31  ;;  %v17699_v5 = vld [vmem:[%s21356_s3 + $0x550] sm:$0xff]  }
 0x402   :  { %16299 = vmatprep.subr.bf16.mxu1 %v17657_v9 }
 0x404   :  { %15796 = vmatpush3.bf16.msra.mxu0 %v17656_v31  ;;  %v17700_v31 = vld [vmem:[%s21356_s3 + $0x618] sm:$0xff]  }
 0x405   :  { %16300 = vmatpush3.bf16.msra.mxu1 %v17657_v9  ;;  %15797 = vmatprep.subr.bf16.mxu0 %v17658_v28  ;;  %v17701_v9 = vld [vmem:[%s21356_s3 + $0x558] sm:$0xff]  }
 0x406   :  { %16301 = vmatprep.subr.bf16.mxu1 %v17659_v41 }
 0x408   :  { %15798 = vmatpush3.bf16.msra.mxu0 %v17658_v28  ;;  %v21446_v28 = vld [vmem:[#allocation23_spill] sm:$0xff] }
 0x409   :  { %16302 = vmatpush3.bf16.msra.mxu1 %v17659_v41  ;;  %15799 = vmatprep.subr.bf16.mxu0 %v17660_v7  ;;  %v17702_v41 = vld [vmem:[%s21356_s3 + $0x620] sm:$0xff]  }
 0x40a   :  { %16303 = vmatprep.subr.bf16.mxu1 %v17661_v20 }
 0x40c   :  { %15800 = vmatpush3.bf16.msra.mxu0 %v17660_v7  ;;  %v17703_v7 = vld [vmem:[%s21356_s3 + $0x560] sm:$0xff]  }
 0x40d   :  { %16304 = vmatpush3.bf16.msra.mxu1 %v17661_v20  ;;  %15809 = vmatprep.subr.bf16.mxu0 %v17662_v3  ;;  %v17705_v20 = vld [vmem:[%s21356_s3 + $0x568] sm:$0xff]  }
 0x40e   :  { %16313 = vmatprep.subr.bf16.mxu1 %v17663_v46 }
 0x40f   :  { %15802 = vmatmul.mubr.bf16.vlgmr.msra.gmra.mrb[120].mxu0 %v21443_v34  ;;  %v17693_v34 = vld [vmem:[%s21356_s3 + $0x4f8] sm:$0xff]  }
 0x410   :  { %16306 = vmatmul.mubr.bf16.vlgmr.msra.gmra.mrb[136].mxu1 %v21441_v27  ;;  %15805 = vmatprep.mubr.bf16.mxu0 %v21438_v15  ;;  %v17668_v15 = vld [vmem:[%s21356_s3 + $0x598] sm:$0xff]  }
 0x411   :  { %15810 = vmatpush3.bf16.msra.mxu0 %v17662_v3  ;;  %16309 = vmatprep.mubr.bf16.mxu1 %v18953_v50  ;;  %v17706_v3 = vld [vmem:[%s21356_s3 + $0x630] sm:$0xff]  }
 0x412   :  { %16314 = vmatpush3.bf16.msra.mxu1 %v17663_v46  ;;  %15811 = vmatprep.subr.bf16.mxu0 %v17664_v30  ;;  %v17707_v46 = vld [vmem:[%s21356_s3 + $0x570] sm:$0xff]  }
 0x413   :  { %16315 = vmatprep.subr.bf16.mxu1 %v17665_v42 }
 0x415   :  { %15812 = vmatpush3.bf16.msra.mxu0 %v17664_v30  ;;  %v17708_v30 = vld [vmem:[%s21356_s3 + $0x638] sm:$0xff]  }
 0x416   :  { %16316 = vmatpush3.bf16.msra.mxu1 %v17665_v42  ;;  %15813 = vmatprep.subr.bf16.mxu0 %v17666_v1  ;;  %v17709_v42 = vld [vmem:[%s21356_s3 + $0x578] sm:$0xff]  }
 0x417   :  { %15806 = vmatmul.mubr.bf16.gmra.mrb[124].mxu0 %v21439_v22  ;;  %16317 = vmatprep.subr.bf16.mxu1 %v17667_v8  ;;  %v17673_v22 = vld [vmem:[%s21356_s3 + $0x4a8] sm:$0xff]  }
 0x418   :  { %16310 = vmatmul.mubr.bf16.gmra.mrb[140].mxu1 %v21444_v40  ;;  %15825 = vmatprep.mubr.bf16.mxu0 %v21440_v62  ;;  %v17674_v62 = vld [vmem:[%s21356_s3 + $0x5b0] sm:$0xff]  }
 0x419   :  { %15814 = vmatpush3.bf16.msra.mxu0 %v17666_v1  ;;  %16329 = vmatprep.mubr.bf16.mxu1 %v18953_v50  ;;  %v17710_v1 = vld [vmem:[%s21356_s3 + $0x500] sm:$0xff]  }
 0x41a   :  { %16318 = vmatpush3.bf16.msra.mxu1 %v17667_v8  ;;  %15815 = vmatprep.subr.bf16.mxu0 %v17668_v15  ;;  %v17711_v8 = vld [vmem:[%s21356_s3 + $0x508] sm:$0xff]  }
 0x41b   :  { %16319 = vmatprep.subr.bf16.mxu1 %v17669_v44 }
 0x41d   :  { %15816 = vmatpush3.bf16.msra.mxu0 %v17668_v15  ;;  %v17712_v15 = vld [vmem:[%s21356_s3 + $0x510] sm:$0xff]  }
 0x41e   :  { %16320 = vmatpush3.bf16.msra.mxu1 %v17669_v44  ;;  %15817 = vmatprep.subr.bf16.mxu0 %v17670_v32  ;;  %v17713_v44 = vld [vmem:[%s21356_s3 + $0x518] sm:$0xff]  }
 0x41f   :  { %16321 = vmatprep.subr.bf16.mxu1 %v17671_v38 }
 0x421   :  { %15818 = vmatpush3.bf16.msra.mxu0 %v17670_v32  ;;  %v17716_v32 = vld [vmem:[%s21356_s3 + $0x530] sm:$0xff]  }
 0x422   :  { %16322 = vmatpush3.bf16.msra.mxu1 %v17671_v38  ;;  %15819 = vmatprep.subr.bf16.mxu0 %v17672_v48  ;;  %v17718_v38 = vld [vmem:[%s21356_s3 + $0x580] sm:$0xff]  }
 0x423   :  { %16323 = vmatprep.subr.bf16.mxu1 %v17673_v22 }
 0x425   :  { %15820 = vmatpush3.bf16.msra.mxu0 %v17672_v48  ;;  %v17719_v48 = vld [vmem:[%s21356_s3 + $0x588] sm:$0xff]  }
 0x426   :  { %16324 = vmatpush3.bf16.msra.mxu1 %v17673_v22  ;;  %15821 = vmatprep.subr.bf16.mxu0 %v17674_v62  ;;  %v17720_v22 = vld [vmem:[%s21356_s3 + $0x590] sm:$0xff]  }
 0x427   :  { %16325 = vmatprep.subr.bf16.mxu1 %v17675_v10 }
 0x429   :  { %15822 = vmatpush3.bf16.msra.mxu0 %v17674_v62  ;;  %v17721_v62 = vld [vmem:[%s21356_s3 + $0x598] sm:$0xff]  }
 0x42a   :  { %16326 = vmatpush3.bf16.msra.mxu1 %v17675_v10  ;;  %15823 = vmatprep.subr.bf16.mxu0 %v17676_v0  ;;  %v17728_v10 = vld [vmem:[%s21356_s3 + $0x5d0] sm:$0xff]  }
 0x42b   :  { %16327 = vmatprep.subr.bf16.mxu1 %v17677_v60 }
 0x42d   :  { %15824 = vmatpush3.bf16.msra.mxu0 %v17676_v0  ;;  %v17729_v0 = vld [vmem:[%s21356_s3 + $0x5d8] sm:$0xff]  }
 0x42e   :  { %16328 = vmatpush3.bf16.msra.mxu1 %v17677_v60  ;;  %15833 = vmatprep.subr.bf16.mxu0 %v17678_v49  ;;  %v17731_v60 = vld [vmem:[%s21356_s3 + $0x5e8] sm:$0xff]  }
 0x42f   :  { %16337 = vmatprep.subr.bf16.mxu1 %v17679_v57 }
 0x430   :  { %15826 = vmatmul.mubr.bf16.vlgmr.msra.gmra.mrb[120].mxu0 %v21441_v27  ;;  %v17683_v27 = vld [vmem:[%s21356_s3 + $0x4d0] sm:$0xff]  }
 0x431   :  { %16330 = vmatmul.mubr.bf16.vlgmr.msra.gmra.mrb[136].mxu1 %v21444_v40  ;;  %15829 = vmatprep.mubr.bf16.mxu0 %v18953_v50 }
 0x432   :  { %15834 = vmatpush3.bf16.msra.mxu0 %v17678_v49  ;;  %16333 = vmatprep.mubr.bf16.mxu1 %v18862_v6  ;;  %v17732_v49 = vld [vmem:[%s21356_s3 + $0x5f0] sm:$0xff]  }
 0x433   :  { %16338 = vmatpush3.bf16.msra.mxu1 %v17679_v57  ;;  %15835 = vmatprep.subr.bf16.mxu0 %v17680_v61  ;;  %v17734_v57 = vld [vmem:[%s21356_s3 + $0x600] sm:$0xff]  }
 0x434   :  { %16339 = vmatprep.subr.bf16.mxu1 %v17681_v18 }
 0x436   :  { %15836 = vmatpush3.bf16.msra.mxu0 %v17680_v61  ;;  %v17743_v61 = vld [vmem:[%s21358_s5 + $0x40] sm:$0xff]  }
 0x437   :  { %16340 = vmatpush3.bf16.msra.mxu1 %v17681_v18  ;;  %15837 = vmatprep.subr.bf16.mxu0 %v17682_v14  ;;  %v17735_v18 = vld [vmem:[%s21356_s3 + $0x608] sm:$0xff]  }
 0x438   :  { %15830 = vmatmul.mubr.bf16.gmra.mrb[124].mxu0 %v21444_v40  ;;  %16341 = vmatprep.subr.bf16.mxu1 %v17683_v27 }
 0x439   :  { %16334 = vmatmul.mubr.bf16.gmra.mrb[140].mxu1 %v21445_v45  ;;  %15849 = vmatprep.mubr.bf16.mxu0 %v18953_v50  ;;  %v17688_v50 = vld [vmem:[%s21356_s3 + $0x5e8] sm:$0xff]  }
 0x43a   :  { %15838 = vmatpush3.bf16.msra.mxu0 %v17682_v14  ;;  %16353 = vmatprep.mubr.bf16.mxu1 %v18862_v6  ;;  %v17909_v14 = vmov 0.0  }
 0x43b   :  { %16342 = vmatpush3.bf16.msra.mxu1 %v17683_v27  ;;  %15839 = vmatprep.subr.bf16.mxu0 %v17684_v54  ;;  %v17745_v27 = vld [vmem:[%s21358_s5 + $0x48] sm:$0xff]  }
 0x43c   :  { %16343 = vmatprep.subr.bf16.mxu1 %v17685_v47 }
 0x43e   :  { %15840 = vmatpush3.bf16.msra.mxu0 %v17684_v54  ;;  %v17736_v54 = vld [vmem:[%s21356_s3 + $0x610] sm:$0xff]  }
 0x43f   :  { %16344 = vmatpush3.bf16.msra.mxu1 %v17685_v47  ;;  %15841 = vmatprep.subr.bf16.mxu0 %v17686_v36  ;;  %v17737_v47 = vld [vmem:[%s21356_s3 + $0x618] sm:$0xff]  }
 0x440   :  { %16345 = vmatprep.subr.bf16.mxu1 %v17687_v59 }
 0x442   :  { %15842 = vmatpush3.bf16.msra.mxu0 %v17686_v36  ;;  %v17740_v36 = vld [vmem:[%s21356_s3 + $0x630] sm:$0xff]  }
 0x443   :  { %16346 = vmatpush3.bf16.msra.mxu1 %v17687_v59  ;;  %15843 = vmatprep.subr.bf16.mxu0 %v17688_v50  ;;  %v17742_v59 = vld [vmem:[%s21358_s5] sm:$0xff]  }
 0x444   :  { %16347 = vmatprep.subr.bf16.mxu1 %v17689_v25 }
 0x446   :  { %15844 = vmatpush3.bf16.msra.mxu0 %v17688_v50  ;;  %v17744_v50 = vld [vmem:[%s21358_s5 + $0x8] sm:$0xff]  }
 0x447   :  { %16348 = vmatpush3.bf16.msra.mxu1 %v17689_v25  ;;  %15845 = vmatprep.subr.bf16.mxu0 %v17690_v12  ;;  %v17746_v25 = vld [vmem:[%s21358_s5 + $0x10] sm:$0xff]  }
 0x448   :  { %16349 = vmatprep.subr.bf16.mxu1 %v17691_v16 }
 0x44a   :  { %15846 = vmatpush3.bf16.msra.mxu0 %v17690_v12 }
 0x44b   :  { %16350 = vmatpush3.bf16.msra.mxu1 %v17691_v16  ;;  %15847 = vmatprep.subr.bf16.mxu0 %v17692_v55  ;;  %v17748_v16 = vld [vmem:[%s21358_s5 + $0x18] sm:$0xff]  }
 0x44c   :  { %16351 = vmatprep.subr.bf16.mxu1 %v17693_v34 }
 0x44e   :  { %15848 = vmatpush3.bf16.msra.mxu0 %v17692_v55 }
 0x44f   :  { %16352 = vmatpush3.bf16.msra.mxu1 %v17693_v34  ;;  %15857 = vmatprep.subr.bf16.mxu0 %v17694_v23 }
 0x450   :  { %16361 = vmatprep.subr.bf16.mxu1 %v17695_v26 }
 0x451   :  { %15850 = vmatmul.mubr.bf16.vlgmr.msra.gmra.mrb[120].mxu0 %v21444_v40  ;;  %v17715_v40 = vld [vmem:[%s21356_s3 + $0x528] sm:$0xff]  }
 0x452   :  { %16354 = vmatmul.mubr.bf16.vlgmr.msra.gmra.mrb[136].mxu1 %v21445_v45  ;;  %15853 = vmatprep.mubr.bf16.mxu0 %v18862_v6 }
 0x453   :  { %15858 = vmatpush3.bf16.msra.mxu0 %v17694_v23  ;;  %16357 = vmatprep.mubr.bf16.mxu1 %v18963_v24 }
 0x454   :  { %16362 = vmatpush3.bf16.msra.mxu1 %v17695_v26  ;;  %15859 = vmatprep.subr.bf16.mxu0 %v17696_v56 }
 0x455   :  { %16363 = vmatprep.subr.bf16.mxu1 %v17697_v63 }
 0x457   :  { %15860 = vmatpush3.bf16.msra.mxu0 %v17696_v56  ;;  %v17752_v56 = vld [vmem:[%s21358_s5 + $0x28] sm:$0xff]  }
 0x458   :  { %16364 = vmatpush3.bf16.msra.mxu1 %v17697_v63  ;;  %15861 = vmatprep.subr.bf16.mxu0 %v17698_v35 }
 0x459   :  { %15854 = vmatmul.mubr.bf16.gmra.mrb[124].mxu0 %v21445_v45  ;;  %16365 = vmatprep.subr.bf16.mxu1 %v17699_v5 }
 0x45a   :  { %16358 = vmatmul.mubr.bf16.gmra.mrb[140].mxu1 %v21446_v28  ;;  %15873 = vmatprep.mubr.bf16.mxu0 %v18862_v6  ;;  %v17704_v6 = vld [vmem:[%s21356_s3 + $0x628] sm:$0xff]  }
 0x45b   :  { %15862 = vmatpush3.bf16.msra.mxu0 %v17698_v35  ;;  %16377 = vmatprep.mubr.bf16.mxu1 %v19447_v13 }
 0x45c   :  { %16366 = vmatpush3.bf16.msra.mxu1 %v17699_v5  ;;  %15863 = vmatprep.subr.bf16.mxu0 %v17700_v31  ;;  %v17753_v5 = vld [vmem:[%s21358_s5 + $0x68] sm:$0xff]  }
 0x45d   :  { %16367 = vmatprep.subr.bf16.mxu1 %v17701_v9 }
 0x45f   :  { %15864 = vmatpush3.bf16.msra.mxu0 %v17700_v31  ;;  %v17754_v31 = vld [vmem:[%s21358_s5 + $0x30] sm:$0xff]  }
 0x460   :  { %16368 = vmatpush3.bf16.msra.mxu1 %v17701_v9  ;;  %15865 = vmatprep.subr.bf16.mxu0 %v17702_v41  ;;  %v17755_v9 = vld [vmem:[%s21358_s5 + $0x70] sm:$0xff]  }
 0x461   :  { %16369 = vmatprep.subr.bf16.mxu1 %v17703_v7 }
 0x463   :  { %15866 = vmatpush3.bf16.msra.mxu0 %v17702_v41  ;;  %v17757_v41 = vld [vmem:[%s21358_s5 + $0x78] sm:$0xff]  }
 0x464   :  { %16370 = vmatpush3.bf16.msra.mxu1 %v17703_v7  ;;  %15867 = vmatprep.subr.bf16.mxu0 %v17704_v6 }
 0x465   :  { %16371 = vmatprep.subr.bf16.mxu1 %v17705_v20 }
 0x467   :  { %15868 = vmatpush3.bf16.msra.mxu0 %v17704_v6 }
 0x468   :  { %16372 = vmatpush3.bf16.msra.mxu1 %v17705_v20  ;;  %15869 = vmatprep.subr.bf16.mxu0 %v17706_v3 }
 0x469   :  { %16373 = vmatprep.subr.bf16.mxu1 %v17707_v46 }
 0x46b   :  { %15870 = vmatpush3.bf16.msra.mxu0 %v17706_v3 }
 0x46c   :  { %16374 = vmatpush3.bf16.msra.mxu1 %v17707_v46  ;;  %15871 = vmatprep.subr.bf16.mxu0 %v17708_v30 }
 0x46d   :  { %16375 = vmatprep.subr.bf16.mxu1 %v17709_v42 }
 0x46f   :  { %15872 = vmatpush3.bf16.msra.mxu0 %v17708_v30 }
 0x470   :  { %16376 = vmatpush3.bf16.msra.mxu1 %v17709_v42  ;;  %16481 = vmatprep.subr.bf16.mxu0 %v17909_v14 }
 0x471   :  { %16385 = vmatprep.subr.bf16.mxu1 %v17710_v1 }
 0x472   :  { %15874 = vmatmul.mubr.bf16.vlgmr.msra.gmra.mrb[120].mxu0 %v21445_v45  ;;  %v17739_v45 = vld [vmem:[%s21356_s3 + $0x628] sm:$0xff]  }
 0x473   :  { %16378 = vmatmul.mubr.bf16.vlgmr.msra.gmra.mrb[136].mxu1 %v19492_v19  ;;  %15877 = vmatprep.mubr.bf16.mxu0 %v18963_v24  ;;  %v17714_v24 = vld [vmem:[%s21356_s3 + $0x520] sm:$0xff]  }
 0x474   :  { %16381 = vmatprep.mubr.bf16.mxu1 %v19349_v21  ;;  %16386 = vmatpush3.bf16.msra.mxu1 %v17710_v1 }
 0x475   :  { %16387 = vmatprep.subr.bf16.mxu1 %v17711_v8  ;;  %16482 = vmatpush3.bf16.msra.mxu0 %v17743_v61  ;;  %v17759_v61 = vld [vmem:[%s21358_s5 + $0x80] sm:$0xff]  }
 0x476   :  { %16483 = vmatprep.subr.bf16.mxu0 %v17909_v14 }
 0x478   :  { %16388 = vmatpush3.bf16.msra.mxu1 %v17711_v8 }
 0x479   :  { %16389 = vmatprep.subr.bf16.mxu1 %v17712_v15  ;;  %16484 = vmatpush3.bf16.msra.mxu0 %v17745_v27  ;;  %v17760_v27 = vld [vmem:[%s21358_s5 + $0xc8] sm:$0xff]  }
 0x47a   :  { %15878 = vmatmul.mubr.bf16.gmra.mrb[124].mxu0 %v21446_v28  ;;  %16485 = vmatprep.subr.bf16.mxu0 %v17909_v14  ;;  %v17756_v28 = vld [vmem:[%s21358_s5 + $0x38] sm:$0xff]  }
 0x47b   :  { %16382 = vmatmul.mubr.bf16.gmra.mrb[140].mxu1 %v19401_v33  ;;  %16497 = vmatprep.mubr.msk.bf16.mxu0 %vm17910_vm3, %v17909_v14 }
 0x47c   :  { %16390 = vmatpush3.bf16.msra.mxu1 %v17712_v15  ;;  %16401 = vmatprep.mubr.bf16.mxu1 %v19318_v58  ;;  %v17717_v58 = vld [vmem:[%s21356_s3 + $0x538] sm:$0xff]  }
 0x47d   :  { %16391 = vmatprep.subr.bf16.mxu1 %v17713_v44 }
 0x480   :  { %16392 = vmatpush3.bf16.msra.mxu1 %v17713_v44 }
 0x481   :  { %16393 = vmatprep.subr.bf16.mxu1 %v17714_v24 }
 0x484   :  { %16394 = vmatpush3.bf16.msra.mxu1 %v17714_v24  ;;  %v13741_v24 = vld [vmem:[%s21357_s4] ss:$0 sm:$0xff] }
 0x485   :  { %16395 = vmatprep.subr.bf16.mxu1 %v17715_v40 }
 0x488   :  { %16396 = vmatpush3.bf16.msra.mxu1 %v17715_v40 }
 0x489   :  { %16397 = vmatprep.subr.bf16.mxu1 %v17716_v32 }
 0x48c   :  { %16398 = vmatpush3.bf16.msra.mxu1 %v17716_v32 }
 0x48d   :  { %16399 = vmatprep.subr.bf16.mxu1 %v17717_v58 }
 0x490   :  { %16400 = vmatpush3.bf16.msra.mxu1 %v17717_v58 }
 0x491   :  { %16409 = vmatprep.subr.bf16.mxu1 %v17718_v38 }
 0x493   :  { %16402 = vmatmul.mubr.bf16.vlgmr.msra.gmra.mrb[136].mxu1 %v2304_v11  ;;  %v17724_v11 = vld [vmem:[%s21356_s3 + $0x5b0] sm:$0xff]  }
 0x494   :  { %16405 = vmatprep.mubr.bf16.mxu1 %v19447_v13  ;;  %16410 = vmatpush3.bf16.msra.mxu1 %v17718_v38  ;;  %v17726_v13 = vld [vmem:[%s21356_s3 + $0x5c0] sm:$0xff]  }
 0x495   :  { %16411 = vmatprep.subr.bf16.mxu1 %v17719_v48 }
 0x498   :  { %16412 = vmatpush3.bf16.msra.mxu1 %v17719_v48 }
 0x499   :  { %16413 = vmatprep.subr.bf16.mxu1 %v17720_v22 }
 0x49b   :  { %16406 = vmatmul.mubr.bf16.gmra.mrb[140].mxu1 %v19492_v19  ;;  %v17727_v19 = vld [vmem:[%s21356_s3 + $0x5c8] sm:$0xff]  }
 0x49c   :  { %16414 = vmatpush3.bf16.msra.mxu1 %v17720_v22  ;;  %16425 = vmatprep.mubr.bf16.mxu1 %v19349_v21  ;;  %v17725_v21 = vld [vmem:[%s21356_s3 + $0x5b8] sm:$0xff]  }
 0x49d   :  { %16415 = vmatprep.subr.bf16.mxu1 %v17721_v62 }
 0x4a0   :  { %16416 = vmatpush3.bf16.msra.mxu1 %v17721_v62 }
 0x4a1   :  { %16417 = vmatprep.subr.bf16.mxu1 %v17722_v52 }
 0x4a4   :  { %16418 = vmatpush3.bf16.msra.mxu1 %v17722_v52 }
 0x4a5   :  { %16419 = vmatprep.subr.bf16.mxu1 %v17723_v29 }
 0x4a8   :  { %16420 = vmatpush3.bf16.msra.mxu1 %v17723_v29 }
 0x4a9   :  { %16421 = vmatprep.subr.bf16.mxu1 %v17724_v11 }
 0x4ac   :  { %16422 = vmatpush3.bf16.msra.mxu1 %v17724_v11 }
 0x4ad   :  { %16423 = vmatprep.subr.bf16.mxu1 %v17725_v21 }
 0x4b0   :  { %16424 = vmatpush3.bf16.msra.mxu1 %v17725_v21 }
 0x4b1   :  { %16433 = vmatprep.subr.bf16.mxu1 %v17726_v13 }
 0x4b3   :  { %16426 = vmatmul.mubr.bf16.vlgmr.msra.gmra.mrb[136].mxu1 %v19401_v33  ;;  %v17730_v33 = vld [vmem:[%s21356_s3 + $0x5e0] sm:$0xff]  }
 0x4b4   :  { %16429 = vmatprep.mubr.bf16.mxu1 %v19476_v51  ;;  %16434 = vmatpush3.bf16.msra.mxu1 %v17726_v13 }
 0x4b5   :  { %16435 = vmatprep.subr.bf16.mxu1 %v17727_v19 }
 0x4b8   :  { %16436 = vmatpush3.bf16.msra.mxu1 %v17727_v19 }
 0x4b9   :  { %16437 = vmatprep.subr.bf16.mxu1 %v17728_v10 }
 0x4bb   :  { %16430 = vmatmul.mubr.bf16.gmra.mrb[140].mxu1 %v19526_v39 }
 0x4bc   :  { %16438 = vmatpush3.bf16.msra.mxu1 %v17728_v10  ;;  %16449 = vmatprep.mubr.bf16.mxu1 %v19476_v51  ;;  %v17733_v51 = vld [vmem:[%s21356_s3 + $0x5f8] sm:$0xff]  }
 0x4bd   :  { %16439 = vmatprep.subr.bf16.mxu1 %v17729_v0 }
 0x4c0   :  { %16440 = vmatpush3.bf16.msra.mxu1 %v17729_v0 }
 0x4c1   :  { %16441 = vmatprep.subr.bf16.mxu1 %v17730_v33 }
 0x4c4   :  { %16442 = vmatpush3.bf16.msra.mxu1 %v17730_v33 }
 0x4c5   :  { %16443 = vmatprep.subr.bf16.mxu1 %v17731_v60 }
 0x4c8   :  { %16444 = vmatpush3.bf16.msra.mxu1 %v17731_v60 }
 0x4c9   :  { %16445 = vmatprep.subr.bf16.mxu1 %v17732_v49 }
 0x4cc   :  { %16446 = vmatpush3.bf16.msra.mxu1 %v17732_v49 }
 0x4cd   :  { %16447 = vmatprep.subr.bf16.mxu1 %v17733_v51 }
 0x4d0   :  { %16448 = vmatpush3.bf16.msra.mxu1 %v17733_v51  ;;  %v17758_v51 = vld [vmem:[%s21358_s5 + $0xc0] sm:$0xff]  }
 0x4d1   :  { %16457 = vmatprep.subr.bf16.mxu1 %v17734_v57 }
 0x4d3   :  { %16450 = vmatmul.mubr.bf16.vlgmr.msra.gmra.mrb[136].mxu1 %v19526_v39  ;;  %v17738_v39 = vld [vmem:[%s21356_s3 + $0x620] sm:$0xff]  }
 0x4d4   :  { %16453 = vmatprep.mubr.bf16.mxu1 %v19351_v53  ;;  %16458 = vmatpush3.bf16.msra.mxu1 %v17734_v57 }
 0x4d5   :  { %16459 = vmatprep.subr.bf16.mxu1 %v17735_v18 }
 0x4d8   :  { %16460 = vmatpush3.bf16.msra.mxu1 %v17735_v18 }
 0x4d9   :  { %16461 = vmatprep.subr.bf16.mxu1 %v17736_v54 }
 0x4db   :  { %16454 = vmatmul.mubr.bf16.gmra.mrb[140].mxu1 %v19403_v4 }
 0x4dc   :  { %16462 = vmatpush3.bf16.msra.mxu1 %v17736_v54  ;;  %16473 = vmatprep.mubr.bf16.mxu1 %v19351_v53  ;;  %v17741_v53 = vld [vmem:[%s21356_s3 + $0x638] sm:$0xff]   ;;  %v17761_v54 = vld [vmem:[%s21358_s5 + $0x88] sm:$0xff]  }
 0x4dd   :  { %16463 = vmatprep.subr.bf16.mxu1 %v17737_v47 }
 0x4e0   :  { %16464 = vmatpush3.bf16.msra.mxu1 %v17737_v47  ;;  %v17762_v47 = vld [vmem:[%s21358_s5 + $0xd0] sm:$0xff]  }
 0x4e1   :  { %16465 = vmatprep.subr.bf16.mxu1 %v17738_v39 }
 0x4e4   :  { %16466 = vmatpush3.bf16.msra.mxu1 %v17738_v39  ;;  %v17763_v39 = vld [vmem:[%s21358_s5 + $0x90] sm:$0xff]  }
 0x4e5   :  { %16467 = vmatprep.subr.bf16.mxu1 %v17739_v45 }
 0x4e8   :  { %16468 = vmatpush3.bf16.msra.mxu1 %v17739_v45  ;;  %v17764_v45 = vld [vmem:[%s21358_s5 + $0xd8] sm:$0xff]  }
 0x4e9   :  { %16469 = vmatprep.subr.bf16.mxu1 %v17740_v36 }
 0x4ec   :  { %16470 = vmatpush3.bf16.msra.mxu1 %v17740_v36  ;;  %v17765_v36 = vld [vmem:[%s21358_s5 + $0x98] sm:$0xff]  }
 0x4ed   :  { %16471 = vmatprep.subr.bf16.mxu1 %v17741_v53 }
 0x4f0   :  { %16472 = vmatpush3.bf16.msra.mxu1 %v17741_v53  ;;  %v17766_v53 = vld [vmem:[%s21358_s5 + $0xe0] sm:$0xff]  }
 0x4f1   :  { %16501 = vmatprep.subr.bf16.mxu1 %v17909_v14 }
 0x4f3   :  { %16474 = vmatmul.mubr.bf16.vlgmr.msra.gmra.mrb[136].mxu1 %v19403_v4  ;;  %v17747_v4 = vld [vmem:[%s21358_s5 + $0x50] sm:$0xff]  }
 0x4f4   :  { %16477 = vmatprep.mubr.bf16.mxu1 %v19488_v2  ;;  %16502 = vmatpush3.bf16.msra.mxu1 %v17742_v59  ;;  %v17767_v59 = vld [vmem:[%s21358_s5 + $0xa0] sm:$0xff]  }
 0x4f5   :  { %16503 = vmatprep.subr.bf16.mxu1 %v17909_v14  ;;  %16486 = vmatpush3.bf16.msra.mxu0 %v17747_v4  ;;  %v17770_v4 = vld [vmem:[%s21358_s5 + $0xf0] sm:$0xff]  }
 0x4f6   :  { %16487 = vmatprep.subr.bf16.mxu0 %v17909_v14 }
 0x4f8   :  { %16504 = vmatpush3.bf16.msra.mxu1 %v17744_v50  ;;  %v17768_v50 = vld [vmem:[%s21358_s5 + $0xe8] sm:$0xff]  }
 0x4f9   :  { %16505 = vmatprep.subr.bf16.mxu1 %v17909_v14  ;;  %16488 = vmatpush3.bf16.msra.mxu0 %v17749_v43  ;;  %v17775_v43 = vld [vmem:[%s21358_s5 + $0x100] sm:$0xff]  }
 0x4fa   :  { %16489 = vmatprep.subr.bf16.mxu0 %v17909_v14 }
 0x4fb   :  { %16478 = vmatmul.mubr.bf16.gmra.mrb[140].mxu1 %v3078_v17  ;;  %v17751_v17 = vld [vmem:[%s21358_s5 + $0x60] sm:$0xff]  }
 0x4fc   :  { %16506 = vmatpush3.bf16.msra.mxu1 %v17746_v25  ;;  %16517 = vmatprep.mubr.msk.bf16.mxu1 %vm17910_vm3, %v17909_v14  ;;  %v17769_v25 = vld [vmem:[%s21358_s5 + $0xa8] sm:$0xff]  }
 0x4fd   :  { %16507 = vmatprep.subr.bf16.mxu1 %v17909_v14  ;;  %16490 = vmatpush3.bf16.msra.mxu0 %v17751_v17  ;;  %v17776_v17 = vld [vmem:[%s21358_s5 + $0x148] sm:$0xff]  }
 0x4fe   :  { %16491 = vmatprep.subr.bf16.mxu0 %v17909_v14 }
 0x500   :  { %16508 = vmatpush3.bf16.msra.mxu1 %v17748_v16  ;;  %v17773_v16 = vld [vmem:[%s21358_s5 + $0xb8] sm:$0xff]  }
 0x501   :  { %16509 = vmatprep.subr.bf16.mxu1 %v17909_v14  ;;  %16492 = vmatpush3.bf16.msra.mxu0 %v17753_v5  ;;  %v17782_v5 = vld [vmem:[%s21358_s5 + $0x160] sm:$0xff]  }
 0x502   :  { %16493 = vmatprep.subr.bf16.mxu0 %v17909_v14 }
 0x504   :  { %16510 = vmatpush3.bf16.msra.mxu1 %v17750_v37 }
 0x505   :  { %16511 = vmatprep.subr.bf16.mxu1 %v17909_v14  ;;  %16494 = vmatpush3.bf16.msra.mxu0 %v17755_v9  ;;  %v17784_v9 = vld [vmem:[%s21358_s5 + $0x168] sm:$0xff]  }
 0x506   :  { %16495 = vmatprep.subr.bf16.mxu0 %v17909_v14 }
 0x508   :  { %16512 = vmatpush3.bf16.msra.mxu1 %v17752_v56  ;;  %v17779_v56 = vld [vmem:[%s21358_s5 + $0x110] sm:$0xff]  }
 0x509   :  { %16513 = vmatprep.subr.bf16.mxu1 %v17909_v14  ;;  %16496 = vmatpush3.bf16.msra.mxu0 %v17757_v41  ;;  %v17786_v41 = vld [vmem:[%s21358_s5 + $0x170] sm:$0xff]  }
 0x50a   :  { %16521 = vmatprep.subr.bf16.mxu0 %v17909_v14 }
 0x50c   :  { %16514 = vmatpush3.bf16.msra.mxu1 %v17754_v31  ;;  %v17783_v31 = vld [vmem:[%s21358_s5 + $0x120] sm:$0xff]  }
 0x50d   :  { %16515 = vmatprep.subr.bf16.mxu1 %v17909_v14 }
 0x510   :  { %16516 = vmatpush3.bf16.msra.mxu1 %v17756_v28  ;;  %v17785_v28 = vld [vmem:[%s21358_s5 + $0x128] sm:$0xff]  }
 0x511   :  { %16541 = vmatprep.subr.bf16.mxu1 %v17909_v14 }
 0x545   :  { %v15875_v2 = vpop.f32.mrb[120].mxu0 }
 0x546   :  { %v6592_v12 = vpop.f32.mrb[121].mxu0 }
 0x547   :  { %v15876_v55 = vpop.f32.mrb[122].mxu0 }
 0x548   :  { %v6595_v34 = vpop.f32.mrb[123].mxu0 }
 0x54d   :  { %v15879_v23 = vpop.f32.mrb[124].mxu0 }
 0x54e   :  { %v6608_v26 = vpop.f32.mrb[125].mxu0 }
 0x54f   :  { %v15880_v63 = vpop.f32.mrb[126].mxu0 }
 0x550   :  { %v6611_v35 = vpop.f32.mrb[127].mxu0 }
 0x5c6   :  { %v16475_v7 = vpop.f32.mrb[136].mxu1 }
 0x5c7   :  { %v10224_v6 = vmax.f32 %v15875_v2, %v16475_v7  ;;  %v10142_v20 = vpop.f32.mrb[137].mxu1  ;;  %v17771_v2 = vld [vmem:[%s21358_s5 + $0xb0] sm:$0xff]  }
 0x5c8   :  { %v10222_v3 = vmax.f32 %v6592_v12, %v10142_v20  ;;  %v16476_v46 = vpop.f32.mrb[138].mxu1  ;;  %v17772_v12 = vld [vmem:[%s21358_s5 + $0xf8] sm:$0xff]   ;;  %v17787_v7 = vld [vmem:[%s21358_s5 + $0x130] sm:$0xff]  }
 0x5c9   :  { %v10225_v30 = vmax.f32 %v15876_v55, %v16476_v46  ;;  %v10145_v42 = vpop.f32.mrb[139].mxu1  ;;  %v17774_v55 = vld [vmem:[%s21358_s5 + $0x140] sm:$0xff]   ;;  %v17789_v20 = vld [vmem:[%s21358_s5 + $0x138] sm:$0xff]  }
 0x5ca   :  { %v10223_v1 = vmax.f32 %v6595_v34, %v10145_v42 }
 0x5ce   :  { %v16479_v8 = vpop.f32.mrb[140].mxu1 }
 0x5cf   :  { %v10228_v15 = vmax.f32 %v15879_v23, %v16479_v8  ;;  %v10158_v44 = vpop.f32.mrb[141].mxu1  ;;  %v17777_v23 = vld [vmem:[%s21358_s5 + $0x108] sm:$0xff]  }
 0x5d0   :  { %v10226_v40 = vmax.f32 %v6608_v26, %v10158_v44  ;;  %v16480_v32 = vpop.f32.mrb[142].mxu1  ;;  %v17778_v26 = vld [vmem:[%s21358_s5 + $0x150] sm:$0xff]   ;;  %v17793_v8 = vld [vmem:[%s21358_s5 + $0x188] sm:$0xff]  }
 0x5d1   :  { %v10232_v58 = vmax.f32 %v10224_v6, %v10228_v15  ;;  %v10229_v38 = vmax.f32 %v15880_v63, %v16480_v32  ;;  %v10161_v48 = vpop.f32.mrb[143].mxu1  ;;  %v17780_v63 = vld [vmem:[%s21358_s5 + $0x158] sm:$0xff]   ;;  %v17794_v15 = vld [vmem:[%s21358_s5 + $0x1d0] sm:$0xff]   ;;  %v17798_v32 = vld [vmem:[%s21358_s5 + $0x1e0] sm:$0xff]  }
 0x5d2   :  { %v10230_v22 = vmax.f32 %v10222_v3, %v10226_v40  ;;  %v10227_v62 = vmax.f32 %v6611_v35, %v10161_v48  ;;  %v17781_v35 = vld [vmem:[%s21358_s5 + $0x118] sm:$0xff]   ;;  %v17790_v3 = vld [vmem:[%s21358_s5 + $0x1c0] sm:$0xff]   ;;  %v17795_v44 = vld [vmem:[%s21358_s5 + $0x190] sm:$0xff]  }
 0x5d3   :  { %v10242_v52 = vadd.f32 %v13741_v24, %v10232_v58  ;;  %v10233_v29 = vmax.f32 %v10225_v30, %v10229_v38  ;;  %v17788_v6 = vld [vmem:[%s21358_s5 + $0x178] sm:$0xff]   ;;  %v17791_v30 = vld [vmem:[%s21358_s5 + $0x180] sm:$0xff]   ;;  %v17800_v38 = vld [vmem:[%s21358_s5 + $0x1e8] sm:$0xff]  }
 0x5d4   :  { %v10240_v11 = vadd.f32 %v13741_v24, %v10230_v22  ;;  %v10231_v21 = vmax.f32 %v10223_v1, %v10227_v62  ;;  %v17792_v1 = vld [vmem:[%s21358_s5 + $0x1c8] sm:$0xff]   ;;  %v17797_v40 = vld [vmem:[%s21358_s5 + $0x198] sm:$0xff]   ;;  %v17799_v58 = vld [vmem:[%s21358_s5 + $0x1a0] sm:$0xff]  }
 0x5d5   :  { %v10243_v13 = vadd.f32 %v13741_v24, %v10233_v29  ;;  %v10246_v10 = vmax.f32 %v10242_v52, 0.0  ;;  %v17801_v48 = vld [vmem:[%s21358_s5 + $0x1a8] sm:$0xff]   ;;  %v17802_v22 = vld [vmem:[%s21358_s5 + $0x1f0] sm:$0xff]   ;;  %v17804_v52 = vld [vmem:[%s21358_s5 + $0x1f8] sm:$0xff]  }
 0x5d6   :  { %v10241_v19 = vadd.f32 %v13741_v24, %v10231_v21  ;;  %v10244_v33 = vmax.f32 %v10240_v11, 0.0  ;;  %v17796_v24 = vld [vmem:[%s21358_s5 + $0x1d8] sm:$0xff]   ;;  %v17803_v62 = vld [vmem:[%s21358_s5 + $0x1b0] sm:$0xff]   ;;  %v17806_v11 = vld [vmem:[%s21358_s5 + $0x240] sm:$0xff]  }
 0x5d7   :  { %v10247_v0 = vmax.f32 %v10243_v13, 0.0  ;;  %v17805_v29 = vld [vmem:[%s21358_s5 + $0x1b8] sm:$0xff]   ;;  %v17807_v13 = vld [vmem:[%s21358_s5 + $0x200] sm:$0xff]  }
 0x5d8   :  { %v10245_v60 = vmax.f32 %v10241_v19, 0.0 }
 0x5d9   :  { %v20807_v49 = vpack.c.bf16 %v10247_v0, %v10246_v10  ;;  %v17808_v10 = vld [vmem:[%s21358_s5 + $0x248] sm:$0xff]  }
 0x5da   :  { %v20812_v57 = vpack.c.bf16 %v10245_v60, %v10244_v33  ;;  %v17809_v0 = vld [vmem:[%s21358_s5 + $0x208] sm:$0xff]   ;;  %v17810_v33 = vld [vmem:[%s21358_s5 + $0x250] sm:$0xff]  }
 0x5db   :  { %v17811_v60 = vld [vmem:[%s21358_s5 + $0x210] sm:$0xff]  }
 0x5dc   :  { %16518 = vmatmul.mubr.bf16.vlgmr.msra.gmra.mrb[144].mxu1 %v20812_v57  ;;  %v10284_v18 = vrot.slane %v20812_v57, 1  ;;  %v10587_v34 = vrot.slane %v20812_v57, 3  ;;  %v10479_v37 = vrot.slane %v20812_v57, 2  ;;  %v10803_v46 = vrot.slane %v20812_v57, 5 }
 0x5dd   :  { %16542 = vmatpush3.bf16.msra.mxu1 %v17758_v51  ;;  %16557 = vmatprep.mubr.msk.bf16.mxu1 %vm17910_vm3, %v17909_v14  ;;  %v10695_v42 = vrot.slane %v20812_v57, 4  ;;  %v11019_v21 = vrot.slane %v20812_v57, 7  ;;  %v10911_v19 = vrot.slane %v20812_v57, 6  ;;  %v17812_v51 = vld [vmem:[%s21358_s5 + $0x258] sm:$0xff]  }
 0x5de   :  { %16498 = vmatmul.mubr.bf16.vlgmr.msra.gmra.mrb[128].mxu0 %v10284_v18  ;;  %16543 = vmatprep.subr.bf16.mxu1 %v17909_v14  ;;  %v17813_v57 = vld [vmem:[%s21358_s5 + $0x218] sm:$0xff]   ;;  %v17815_v18 = vld [vmem:[%s21358_s5 + $0x220] sm:$0xff]  }
 0x5df   :  { %16522 = vmatpush3.bf16.msra.mxu0 %v17759_v61  ;;  %16537 = vmatprep.mubr.msk.bf16.mxu0 %vm17910_vm3, %v17909_v14  ;;  %v17814_v61 = vld [vmem:[%s21358_s5 + $0x260] sm:$0xff]  }
 0x5e0   :  { %16523 = vmatprep.subr.bf16.mxu0 %v17909_v14 }
 0x5e1   :  { %16544 = vmatpush3.bf16.msra.mxu1 %v17760_v27  ;;  %v17816_v27 = vld [vmem:[%s21358_s5 + $0x268] sm:$0xff]  }
 0x5e2   :  { %16545 = vmatprep.subr.bf16.mxu1 %v17909_v14 }
 0x5e3   :  { %16524 = vmatpush3.bf16.msra.mxu0 %v17761_v54  ;;  %v17817_v54 = vld [vmem:[%s21358_s5 + $0x228] sm:$0xff]  }
 0x5e4   :  { %16525 = vmatprep.subr.bf16.mxu0 %v17909_v14 }
 0x5e5   :  { %16546 = vmatpush3.bf16.msra.mxu1 %v17762_v47  ;;  %v17818_v47 = vld [vmem:[%s21358_s5 + $0x270] sm:$0xff]  }
 0x5e6   :  { %16547 = vmatprep.subr.bf16.mxu1 %v17909_v14 }
 0x5e7   :  { %16526 = vmatpush3.bf16.msra.mxu0 %v17763_v39  ;;  %v17819_v39 = vld [vmem:[%s21358_s5 + $0x230] sm:$0xff]  }
 0x5e8   :  { %16527 = vmatprep.subr.bf16.mxu0 %v17909_v14 }
 0x5e9   :  { %16548 = vmatpush3.bf16.msra.mxu1 %v17764_v45  ;;  %v17820_v45 = vld [vmem:[%s21358_s5 + $0x278] sm:$0xff]  }
 0x5ea   :  { %16549 = vmatprep.subr.bf16.mxu1 %v17909_v14 }
 0x5eb   :  { %16528 = vmatpush3.bf16.msra.mxu0 %v17765_v36  ;;  %v17821_v36 = vld [vmem:[%s21358_s5 + $0x238] sm:$0xff]  }
 0x5ec   :  { %16529 = vmatprep.subr.bf16.mxu0 %v17909_v14 }
 0x5ed   :  { %16550 = vmatpush3.bf16.msra.mxu1 %v17766_v53  ;;  %v17822_v53 = vld [vmem:[%s21358_s5 + $0x2c0] sm:$0xff]  }
 0x5ee   :  { %16551 = vmatprep.subr.bf16.mxu1 %v17909_v14 }
 0x5ef   :  { %16530 = vmatpush3.bf16.msra.mxu0 %v17767_v59  ;;  %v11234_v59 = vrot.slane %v20807_v49, 1 }
 0x5f0   :  { %16531 = vmatprep.subr.bf16.mxu0 %v17909_v14 }
 0x5f1   :  { %16552 = vmatpush3.bf16.msra.mxu1 %v17768_v50  ;;  %v17823_v50 = vld [vmem:[%s21358_s5 + $0x280] sm:$0xff]  }
 0x5f2   :  { %16553 = vmatprep.subr.bf16.mxu1 %v17909_v14 }
 0x5f3   :  { %16532 = vmatpush3.bf16.msra.mxu0 %v17769_v25  ;;  %v17824_v25 = vld [vmem:[%s21358_s5 + $0x2c8] sm:$0xff]  }
 0x5f4   :  { %16533 = vmatprep.subr.bf16.mxu0 %v17909_v14 }
 0x5f5   :  { %16554 = vmatpush3.bf16.msra.mxu1 %v17770_v4  ;;  %v17825_v4 = vld [vmem:[%s21358_s5 + $0x288] sm:$0xff]  }
 0x5f6   :  { %16555 = vmatprep.subr.bf16.mxu1 %v17909_v14 }
 0x5f7   :  { %16534 = vmatpush3.bf16.msra.mxu0 %v17771_v2  ;;  %v17826_v2 = vld [vmem:[%s21358_s5 + $0x2d0] sm:$0xff]  }
 0x5f8   :  { %16535 = vmatprep.subr.bf16.mxu0 %v17909_v14 }
 0x5f9   :  { %16556 = vmatpush3.bf16.msra.mxu1 %v17772_v12  ;;  %v17827_v12 = vld [vmem:[%s21358_s5 + $0x290] sm:$0xff]  }
 0x5fa   :  { %16581 = vmatprep.subr.bf16.mxu1 %v17909_v14 }
 0x5fb   :  { %16536 = vmatpush3.bf16.msra.mxu0 %v17773_v16  ;;  %v17828_v16 = vld [vmem:[%s21358_s5 + $0x2d8] sm:$0xff]  }
 0x5fc   :  { %16558 = vmatmul.mubr.bf16.vlgmr.msra.gmra.mrb[148].mxu1 %v10587_v34  ;;  %16561 = vmatprep.subr.bf16.mxu0 %v17909_v14  ;;  %v17830_v34 = vld [vmem:[%s21358_s5 + $0x2e0] sm:$0xff]  }
 0x5fd   :  { %16582 = vmatpush3.bf16.msra.mxu1 %v17774_v55  ;;  %16597 = vmatprep.mubr.msk.bf16.mxu1 %vm17910_vm3, %v17909_v14  ;;  %v17829_v55 = vld [vmem:[%s21358_s5 + $0x298] sm:$0xff]  }
 0x5fe   :  { %16538 = vmatmul.mubr.bf16.vlgmr.msra.gmra.mrb[132].mxu0 %v10479_v37  ;;  %16583 = vmatprep.subr.bf16.mxu1 %v17909_v14  ;;  %v17832_v37 = vld [vmem:[%s21358_s5 + $0x2e8] sm:$0xff]  }
 0x5ff   :  { %16562 = vmatpush3.bf16.msra.mxu0 %v17775_v43  ;;  %16577 = vmatprep.mubr.msk.bf16.mxu0 %vm17910_vm3, %v17909_v14  ;;  %v17831_v43 = vld [vmem:[%s21358_s5 + $0x2a0] sm:$0xff]  }
 0x600   :  { %16563 = vmatprep.subr.bf16.mxu0 %v17909_v14 }
 0x601   :  { %16584 = vmatpush3.bf16.msra.mxu1 %v17776_v17  ;;  %v17833_v17 = vld [vmem:[%s21358_s5 + $0x2a8] sm:$0xff]  }
 0x602   :  { %16585 = vmatprep.subr.bf16.mxu1 %v17909_v14 }
 0x603   :  { %16564 = vmatpush3.bf16.msra.mxu0 %v17777_v23  ;;  %v17834_v23 = vld [vmem:[%s21358_s5 + $0x2f0] sm:$0xff]  }
 0x604   :  { %16565 = vmatprep.subr.bf16.mxu0 %v17909_v14 }
 0x605   :  { %16586 = vmatpush3.bf16.msra.mxu1 %v17778_v26  ;;  %v17835_v26 = vld [vmem:[%s21358_s5 + $0x2b0] sm:$0xff]  }
 0x606   :  { %16587 = vmatprep.subr.bf16.mxu1 %v17909_v14 }
 0x607   :  { %16566 = vmatpush3.bf16.msra.mxu0 %v17779_v56  ;;  %v17836_v56 = vld [vmem:[%s21358_s5 + $0x2f8] sm:$0xff]  }
 0x608   :  { %16567 = vmatprep.subr.bf16.mxu0 %v17909_v14 }
 0x609   :  { %16588 = vmatpush3.bf16.msra.mxu1 %v17780_v63  ;;  %v17837_v63 = vld [vmem:[%s21358_s5 + $0x2b8] sm:$0xff]  }
 0x60a   :  { %16589 = vmatprep.subr.bf16.mxu1 %v17909_v14 }
 0x60b   :  { %16568 = vmatpush3.bf16.msra.mxu0 %v17781_v35  ;;  %v17838_v35 = vld [vmem:[%s21358_s5 + $0x340] sm:$0xff]  }
 0x60c   :  { %16569 = vmatprep.subr.bf16.mxu0 %v17909_v14 }
 0x60d   :  { %16590 = vmatpush3.bf16.msra.mxu1 %v17782_v5  ;;  %v11450_v5 = vrot.slane %v20807_v49, 3 }
 0x60e   :  { %16591 = vmatprep.subr.bf16.mxu1 %v17909_v14 }
 0x60f   :  { %16570 = vmatpush3.bf16.msra.mxu0 %v17783_v31  ;;  %v17839_v31 = vld [vmem:[%s21358_s5 + $0x300] sm:$0xff]  }
 0x610   :  { %16571 = vmatprep.subr.bf16.mxu0 %v17909_v14 }
 0x611   :  { %16592 = vmatpush3.bf16.msra.mxu1 %v17784_v9  ;;  %v11342_v9 = vrot.slane %v20807_v49, 2 }
 0x612   :  { %16593 = vmatprep.subr.bf16.mxu1 %v17909_v14 }
 0x613   :  { %16572 = vmatpush3.bf16.msra.mxu0 %v17785_v28  ;;  %v17840_v28 = vld [vmem:[%s21358_s5 + $0x348] sm:$0xff]  }
 0x614   :  { %16573 = vmatprep.subr.bf16.mxu0 %v17909_v14 }
 0x615   :  { %16594 = vmatpush3.bf16.msra.mxu1 %v17786_v41  ;;  %v17841_v41 = vld [vmem:[%s21358_s5 + $0x308] sm:$0xff]  }
 0x616   :  { %16595 = vmatprep.subr.bf16.mxu1 %v17909_v14 }
 0x617   :  { %16574 = vmatpush3.bf16.msra.mxu0 %v17787_v7  ;;  %v17842_v7 = vld [vmem:[%s21358_s5 + $0x350] sm:$0xff]  }
 0x618   :  { %16575 = vmatprep.subr.bf16.mxu0 %v17909_v14 }
 0x619   :  { %16596 = vmatpush3.bf16.msra.mxu1 %v17788_v6  ;;  %v17843_v6 = vld [vmem:[%s21358_s5 + $0x310] sm:$0xff]  }
 0x61a   :  { %16621 = vmatprep.subr.bf16.mxu1 %v17909_v14 }
 0x61b   :  { %16576 = vmatpush3.bf16.msra.mxu0 %v17789_v20  ;;  %v17844_v20 = vld [vmem:[%s21358_s5 + $0x358] sm:$0xff]  }
 0x61c   :  { %16598 = vmatmul.mubr.bf16.vlgmr.msra.gmra.mrb[152].mxu1 %v10803_v46  ;;  %16601 = vmatprep.subr.bf16.mxu0 %v17909_v14  ;;  %v17846_v46 = vld [vmem:[%s21358_s5 + $0x360] sm:$0xff]  }
 0x61d   :  { %16622 = vmatpush3.bf16.msra.mxu1 %v17790_v3  ;;  %16637 = vmatprep.mubr.msk.bf16.mxu1 %vm17910_vm3, %v17909_v14  ;;  %v17845_v3 = vld [vmem:[%s21358_s5 + $0x318] sm:$0xff]  }
 0x61e   :  { %16578 = vmatmul.mubr.bf16.vlgmr.msra.gmra.mrb[136].mxu0 %v10695_v42  ;;  %16623 = vmatprep.subr.bf16.mxu1 %v17909_v14  ;;  %v17848_v42 = vld [vmem:[%s21358_s5 + $0x368] sm:$0xff]  }
 0x61f   :  { %16602 = vmatpush3.bf16.msra.mxu0 %v17791_v30  ;;  %16617 = vmatprep.mubr.msk.bf16.mxu0 %vm17910_vm3, %v17909_v14  ;;  %v17847_v30 = vld [vmem:[%s21358_s5 + $0x320] sm:$0xff]  }
 0x620   :  { %16603 = vmatprep.subr.bf16.mxu0 %v17909_v14 }
 0x621   :  { %16624 = vmatpush3.bf16.msra.mxu1 %v17792_v1  ;;  %v17849_v1 = vld [vmem:[%s21358_s5 + $0x328] sm:$0xff]  }
 0x622   :  { %16625 = vmatprep.subr.bf16.mxu1 %v17909_v14 }
 0x623   :  { %16604 = vmatpush3.bf16.msra.mxu0 %v17793_v8  ;;  %v17850_v8 = vld [vmem:[%s21358_s5 + $0x370] sm:$0xff]  }
 0x624   :  { %16605 = vmatprep.subr.bf16.mxu0 %v17909_v14 }
 0x625   :  { %16626 = vmatpush3.bf16.msra.mxu1 %v17794_v15  ;;  %v17851_v15 = vld [vmem:[%s21358_s5 + $0x330] sm:$0xff]  }
 0x626   :  { %16627 = vmatprep.subr.bf16.mxu1 %v17909_v14 }
 0x627   :  { %16606 = vmatpush3.bf16.msra.mxu0 %v17795_v44  ;;  %v17852_v44 = vld [vmem:[%s21358_s5 + $0x378] sm:$0xff]  }
 0x628   :  { %16607 = vmatprep.subr.bf16.mxu0 %v17909_v14 }
 0x629   :  { %16628 = vmatpush3.bf16.msra.mxu1 %v17796_v24  ;;  %v17853_v24 = vld [vmem:[%s21358_s5 + $0x338] sm:$0xff]  }
 0x62a   :  { %16629 = vmatprep.subr.bf16.mxu1 %v17909_v14 }
 0x62b   :  { %16608 = vmatpush3.bf16.msra.mxu0 %v17797_v40  ;;  %v17854_v40 = vld [vmem:[%s21358_s5 + $0x3c0] sm:$0xff]  }
 0x62c   :  { %16609 = vmatprep.subr.bf16.mxu0 %v17909_v14 }
 0x62d   :  { %16630 = vmatpush3.bf16.msra.mxu1 %v17798_v32  ;;  %v11666_v32 = vrot.slane %v20807_v49, 5 }
 0x62e   :  { %16631 = vmatprep.subr.bf16.mxu1 %v17909_v14 }
 0x62f   :  { %16610 = vmatpush3.bf16.msra.mxu0 %v17799_v58  ;;  %v17855_v58 = vld [vmem:[%s21358_s5 + $0x380] sm:$0xff]  }
 0x630   :  { %16611 = vmatprep.subr.bf16.mxu0 %v17909_v14 }
 0x631   :  { %16632 = vmatpush3.bf16.msra.mxu1 %v17800_v38  ;;  %v11558_v38 = vrot.slane %v20807_v49, 4 }
 0x632   :  { %16633 = vmatprep.subr.bf16.mxu1 %v17909_v14 }
 0x633   :  { %16612 = vmatpush3.bf16.msra.mxu0 %v17801_v48  ;;  %v17856_v48 = vld [vmem:[%s21358_s5 + $0x3c8] sm:$0xff]  }
 0x634   :  { %16613 = vmatprep.subr.bf16.mxu0 %v17909_v14 }
 0x635   :  { %16634 = vmatpush3.bf16.msra.mxu1 %v17802_v22  ;;  %v17857_v22 = vld [vmem:[%s21358_s5 + $0x388] sm:$0xff]  }
 0x636   :  { %16635 = vmatprep.subr.bf16.mxu1 %v17909_v14 }
 0x637   :  { %16614 = vmatpush3.bf16.msra.mxu0 %v17803_v62  ;;  %v17858_v62 = vld [vmem:[%s21358_s5 + $0x3d0] sm:$0xff]  }
 0x638   :  { %16615 = vmatprep.subr.bf16.mxu0 %v17909_v14 }
 0x639   :  { %16636 = vmatpush3.bf16.msra.mxu1 %v17804_v52  ;;  %v17859_v52 = vld [vmem:[%s21358_s5 + $0x390] sm:$0xff]  }
 0x63a   :  { %16661 = vmatprep.subr.bf16.mxu1 %v17909_v14 }
 0x63b   :  { %16616 = vmatpush3.bf16.msra.mxu0 %v17805_v29  ;;  %v17860_v29 = vld [vmem:[%s21358_s5 + $0x3d8] sm:$0xff]  }
 0x63c   :  { %16638 = vmatmul.mubr.bf16.vlgmr.msra.gmra.mrb[156].mxu1 %v11019_v21  ;;  %16641 = vmatprep.subr.bf16.mxu0 %v17909_v14  ;;  %v17862_v21 = vld [vmem:[%s21358_s5 + $0x3e0] sm:$0xff]  }
 0x63d   :  { %16662 = vmatpush3.bf16.msra.mxu1 %v17806_v11  ;;  %16677 = vmatprep.mubr.msk.bf16.mxu1 %vm17910_vm3, %v17909_v14  ;;  %v17861_v11 = vld [vmem:[%s21358_s5 + $0x398] sm:$0xff]  }
 0x63e   :  { %16618 = vmatmul.mubr.bf16.vlgmr.msra.gmra.mrb[140].mxu0 %v10911_v19  ;;  %16663 = vmatprep.subr.bf16.mxu1 %v17909_v14  ;;  %v17864_v19 = vld [vmem:[%s21358_s5 + $0x3e8] sm:$0xff]  }
 0x63f   :  { %16642 = vmatpush3.bf16.msra.mxu0 %v17807_v13  ;;  %16657 = vmatprep.mubr.msk.bf16.mxu0 %vm17910_vm3, %v17909_v14  ;;  %v17863_v13 = vld [vmem:[%s21358_s5 + $0x3a0] sm:$0xff]  }
 0x640   :  { %16643 = vmatprep.subr.bf16.mxu0 %v17909_v14 }
 0x641   :  { %16664 = vmatpush3.bf16.msra.mxu1 %v17808_v10 }
 0x642   :  { %16665 = vmatprep.subr.bf16.mxu1 %v17909_v14 }
 0x643   :  { %16644 = vmatpush3.bf16.msra.mxu0 %v17809_v0  ;;  %v17865_v0 = vld [vmem:[%s21358_s5 + $0x3a8] sm:$0xff]  }
 0x644   :  { %16645 = vmatprep.subr.bf16.mxu0 %v17909_v14 }
 0x645   :  { %16666 = vmatpush3.bf16.msra.mxu1 %v17810_v33 }
 0x646   :  { %16667 = vmatprep.subr.bf16.mxu1 %v17909_v14 }
 0x647   :  { %16646 = vmatpush3.bf16.msra.mxu0 %v17811_v60 }
 0x648   :  { %16647 = vmatprep.subr.bf16.mxu0 %v17909_v14 }
 0x649   :  { %16668 = vmatpush3.bf16.msra.mxu1 %v17812_v51 }
 0x64a   :  { %16669 = vmatprep.subr.bf16.mxu1 %v17909_v14 }
 0x64b   :  { %16648 = vmatpush3.bf16.msra.mxu0 %v17813_v57  ;;  %v17866_v57 = vld [vmem:[%s21358_s5 + $0x3f0] sm:$0xff]  }
 0x64c   :  { %16649 = vmatprep.subr.bf16.mxu0 %v17909_v14 }
 0x64d   :  { %16670 = vmatpush3.bf16.msra.mxu1 %v17814_v61 }
 0x64e   :  { %16671 = vmatprep.subr.bf16.mxu1 %v17909_v14 }
 0x64f   :  { %16650 = vmatpush3.bf16.msra.mxu0 %v17815_v18 }
 0x650   :  { %16651 = vmatprep.subr.bf16.mxu0 %v17909_v14 }
 0x651   :  { %16672 = vmatpush3.bf16.msra.mxu1 %v17816_v27 }
 0x652   :  { %16673 = vmatprep.subr.bf16.mxu1 %v17909_v14 }
 0x653   :  { %16652 = vmatpush3.bf16.msra.mxu0 %v17817_v54 }
 0x654   :  { %16653 = vmatprep.subr.bf16.mxu0 %v17909_v14 }
 0x655   :  { %16674 = vmatpush3.bf16.msra.mxu1 %v17818_v47  ;;  %v17867_v47 = vld [vmem:[%s21358_s5 + $0x3b0] sm:$0xff]  }
 0x656   :  { %16675 = vmatprep.subr.bf16.mxu1 %v17909_v14 }
 0x657   :  { %16654 = vmatpush3.bf16.msra.mxu0 %v17819_v39 }
 0x658   :  { %16655 = vmatprep.subr.bf16.mxu0 %v17909_v14 }
 0x659   :  { %16676 = vmatpush3.bf16.msra.mxu1 %v17820_v45  ;;  %v17868_v45 = vld [vmem:[%s21358_s5 + $0x3f8] sm:$0xff]  }
 0x65a   :  { %16701 = vmatprep.subr.bf16.mxu1 %v17909_v14 }
 0x65b   :  { %16656 = vmatpush3.bf16.msra.mxu0 %v17821_v36  ;;  %v17869_v36 = vld [vmem:[%s21358_s5 + $0x3b8] sm:$0xff]  }
 0x65c   :  { %16678 = vmatmul.mubr.bf16.vlgmr.msra.gmra.mrb[160].mxu1 %v11234_v59  ;;  %16681 = vmatprep.subr.bf16.mxu0 %v17909_v14  ;;  %v11774_v59 = vrot.slane %v20807_v49, 6 }
 0x65d   :  { %16702 = vmatpush3.bf16.msra.mxu1 %v17822_v53  ;;  %16717 = vmatprep.mubr.msk.bf16.mxu1 %vm17910_vm3, %v17909_v14  ;;  %v11882_v53 = vrot.slane %v20807_v49, 7 }
 0x65e   :  { %16658 = vmatmul.mubr.bf16.vlgmr.msra.gmra.mrb[144].mxu0 %v20807_v49  ;;  %16703 = vmatprep.subr.bf16.mxu1 %v17909_v14 }
 0x65f   :  { %16682 = vmatpush3.bf16.msra.mxu0 %v17823_v50  ;;  %16697 = vmatprep.mubr.msk.bf16.mxu0 %vm17910_vm3, %v17909_v14 }
 0x660   :  { %16683 = vmatprep.subr.bf16.mxu0 %v17909_v14 }
 0x661   :  { %16704 = vmatpush3.bf16.msra.mxu1 %v17824_v25 }
 0x662   :  { %16705 = vmatprep.subr.bf16.mxu1 %v17909_v14 }
 0x663   :  { %16684 = vmatpush3.bf16.msra.mxu0 %v17825_v4 }
 0x664   :  { %16685 = vmatprep.subr.bf16.mxu0 %v17909_v14 }
 0x665   :  { %16706 = vmatpush3.bf16.msra.mxu1 %v17826_v2 }
 0x666   :  { %16707 = vmatprep.subr.bf16.mxu1 %v17909_v14 }
 0x667   :  { %16686 = vmatpush3.bf16.msra.mxu0 %v17827_v12 }
 0x668   :  { %16687 = vmatprep.subr.bf16.mxu0 %v17909_v14 }
 0x669   :  { %16708 = vmatpush3.bf16.msra.mxu1 %v17828_v16 }
 0x66a   :  { %16709 = vmatprep.subr.bf16.mxu1 %v17909_v14 }
 0x66b   :  { %16688 = vmatpush3.bf16.msra.mxu0 %v17829_v55 }
 0x66c   :  { %16689 = vmatprep.subr.bf16.mxu0 %v17909_v14 }
 0x66d   :  { %16710 = vmatpush3.bf16.msra.mxu1 %v17830_v34 }
 0x66e   :  { %16711 = vmatprep.subr.bf16.mxu1 %v17909_v14 }
 0x66f   :  { %16690 = vmatpush3.bf16.msra.mxu0 %v17831_v43 }
 0x670   :  { %16691 = vmatprep.subr.bf16.mxu0 %v17909_v14 }
 0x671   :  { %16712 = vmatpush3.bf16.msra.mxu1 %v17832_v37 }
 0x672   :  { %16713 = vmatprep.subr.bf16.mxu1 %v17909_v14 }
 0x673   :  { %16692 = vmatpush3.bf16.msra.mxu0 %v17833_v17 }
 0x674   :  { %16693 = vmatprep.subr.bf16.mxu0 %v17909_v14 }
 0x675   :  { %16714 = vmatpush3.bf16.msra.mxu1 %v17834_v23 }
 0x676   :  { %16715 = vmatprep.subr.bf16.mxu1 %v17909_v14 }
 0x677   :  { %16694 = vmatpush3.bf16.msra.mxu0 %v17835_v26 }
 0x678   :  { %16695 = vmatprep.subr.bf16.mxu0 %v17909_v14 }
 0x679   :  { %16716 = vmatpush3.bf16.msra.mxu1 %v17836_v56 }
 0x67a   :  { %16741 = vmatprep.subr.bf16.mxu1 %v17909_v14 }
 0x67b   :  { %16696 = vmatpush3.bf16.msra.mxu0 %v17837_v63 }
 0x67c   :  { %16718 = vmatmul.mubr.bf16.vlgmr.msra.gmra.mrb[164].mxu1 %v11450_v5  ;;  %16721 = vmatprep.subr.bf16.mxu0 %v17909_v14 }
 0x67d   :  { %16742 = vmatpush3.bf16.msra.mxu1 %v17838_v35  ;;  %16757 = vmatprep.mubr.msk.bf16.mxu1 %vm17910_vm3, %v17909_v14 }
 0x67e   :  { %16698 = vmatmul.mubr.bf16.vlgmr.msra.gmra.mrb[148].mxu0 %v11342_v9  ;;  %16743 = vmatprep.subr.bf16.mxu1 %v17909_v14 }
 0x67f   :  { %16722 = vmatpush3.bf16.msra.mxu0 %v17839_v31  ;;  %16737 = vmatprep.mubr.msk.bf16.mxu0 %vm17910_vm3, %v17909_v14 }
 0x680   :  { %16723 = vmatprep.subr.bf16.mxu0 %v17909_v14 }
 0x681   :  { %16744 = vmatpush3.bf16.msra.mxu1 %v17840_v28  ;;  %v17870_v28 = vld [vmem:[%s21360_s7] sm:$0xff]  }
 0x682   :  { %16745 = vmatprep.subr.bf16.mxu1 %v17909_v14 }
 0x683   :  { %16724 = vmatpush3.bf16.msra.mxu0 %v17841_v41  ;;  %v17871_v41 = vld [vmem:[%s21360_s7 + $0x8] sm:$0xff]  }
 0x684   :  { %16725 = vmatprep.subr.bf16.mxu0 %v17909_v14 }
 0x685   :  { %16746 = vmatpush3.bf16.msra.mxu1 %v17842_v7  ;;  %v17872_v7 = vld [vmem:[%s21360_s7 + $0x10] sm:$0xff]  }
 0x686   :  { %16747 = vmatprep.subr.bf16.mxu1 %v17909_v14 }
 0x687   :  { %16726 = vmatpush3.bf16.msra.mxu0 %v17843_v6  ;;  %v17873_v6 = vld [vmem:[%s21360_s7 + $0x18] sm:$0xff]  }
 0x688   :  { %16727 = vmatprep.subr.bf16.mxu0 %v17909_v14 }
 0x689   :  { %16748 = vmatpush3.bf16.msra.mxu1 %v17844_v20  ;;  %v17874_v20 = vld [vmem:[%s21360_s7 + $0x20] sm:$0xff]  }
 0x68a   :  { %16749 = vmatprep.subr.bf16.mxu1 %v17909_v14 }
 0x68b   :  { %16728 = vmatpush3.bf16.msra.mxu0 %v17845_v3 }
 0x68c   :  { %16729 = vmatprep.subr.bf16.mxu0 %v17909_v14 }
 0x68d   :  { %16750 = vmatpush3.bf16.msra.mxu1 %v17846_v46 }
 0x68e   :  { %16751 = vmatprep.subr.bf16.mxu1 %v17909_v14 }
 0x68f   :  { %16730 = vmatpush3.bf16.msra.mxu0 %v17847_v30 }
 0x690   :  { %16731 = vmatprep.subr.bf16.mxu0 %v17909_v14 }
 0x691   :  { %16752 = vmatpush3.bf16.msra.mxu1 %v17848_v42 }
 0x692   :  { %16753 = vmatprep.subr.bf16.mxu1 %v17909_v14 }
 0x693   :  { %16732 = vmatpush3.bf16.msra.mxu0 %v17849_v1  ;;  %v17875_v1 = vld [vmem:[%s21360_s7 + $0x28] sm:$0xff]  }
 0x694   :  { %16733 = vmatprep.subr.bf16.mxu0 %v17909_v14 }
 0x695   :  { %16754 = vmatpush3.bf16.msra.mxu1 %v17850_v8 }
 0x696   :  { %16755 = vmatprep.subr.bf16.mxu1 %v17909_v14 }
 0x697   :  { %16734 = vmatpush3.bf16.msra.mxu0 %v17851_v15 }
 0x698   :  { %16735 = vmatprep.subr.bf16.mxu0 %v17909_v14 }
 0x699   :  { %16756 = vmatpush3.bf16.msra.mxu1 %v17852_v44 }
 0x69a   :  { %16781 = vmatprep.subr.bf16.mxu1 %v17909_v14 }
 0x69b   :  { %16736 = vmatpush3.bf16.msra.mxu0 %v17853_v24 }
 0x69c   :  { %16758 = vmatmul.mubr.bf16.vlgmr.msra.gmra.mrb[168].mxu1 %v11666_v32  ;;  %16761 = vmatprep.subr.bf16.mxu0 %v17909_v14 }
 0x69d   :  { %16782 = vmatpush3.bf16.msra.mxu1 %v17854_v40  ;;  %16797 = vmatprep.mubr.msk.bf16.mxu1 %vm17910_vm3, %v17909_v14 }
 0x69e   :  { %16738 = vmatmul.mubr.bf16.vlgmr.msra.gmra.mrb[152].mxu0 %v11558_v38  ;;  %16783 = vmatprep.subr.bf16.mxu1 %v17909_v14  ;;  %v17877_v38 = vld [vmem:[%s21360_s7 + $0x38] sm:$0xff]  }
 0x69f   :  { %16762 = vmatpush3.bf16.msra.mxu0 %v17855_v58  ;;  %16777 = vmatprep.mubr.msk.bf16.mxu0 %vm17910_vm3, %v17909_v14  ;;  %v17876_v58 = vld [vmem:[%s21360_s7 + $0x30] sm:$0xff]  }
 0x6a0   :  { %16763 = vmatprep.subr.bf16.mxu0 %v17909_v14 }
 0x6a1   :  { %16784 = vmatpush3.bf16.msra.mxu1 %v17856_v48 }
 0x6a2   :  { %16785 = vmatprep.subr.bf16.mxu1 %v17909_v14 }
 0x6a3   :  { %16764 = vmatpush3.bf16.msra.mxu0 %v17857_v22 }
 0x6a4   :  { %16765 = vmatprep.subr.bf16.mxu0 %v17909_v14 }
 0x6a5   :  { %16786 = vmatpush3.bf16.msra.mxu1 %v17858_v62 }
 0x6a6   :  { %16787 = vmatprep.subr.bf16.mxu1 %v17909_v14 }
 0x6a7   :  { %16766 = vmatpush3.bf16.msra.mxu0 %v17859_v52 }
 0x6a8   :  { %16767 = vmatprep.subr.bf16.mxu0 %v17909_v14 }
 0x6a9   :  { %16788 = vmatpush3.bf16.msra.mxu1 %v17860_v29 }
 0x6aa   :  { %16789 = vmatprep.subr.bf16.mxu1 %v17909_v14 }
 0x6ab   :  { %16768 = vmatpush3.bf16.msra.mxu0 %v17861_v11 }
 0x6ac   :  { %16769 = vmatprep.subr.bf16.mxu0 %v17909_v14 }
 0x6ad   :  { %16790 = vmatpush3.bf16.msra.mxu1 %v17862_v21 }
 0x6ae   :  { %16791 = vmatprep.subr.bf16.mxu1 %v17909_v14 }
 0x6af   :  { %16770 = vmatpush3.bf16.msra.mxu0 %v17863_v13  ;;  %v10456_v10 = vpop.f32.mrb[144].mxu1 }
 0x6b0   :  { %v16519_v33 = vpop.f32.mrb[145].mxu1  ;;  %16771 = vmatprep.subr.bf16.mxu0 %v17909_v14 }
 0x6b1   :  { %16792 = vmatpush3.bf16.msra.mxu1 %v17864_v19  ;;  %v10368_v60 = vpop.f32.mrb[128].mxu0  ;;  %v10459_v51 = vpop.f32.mrb[146].mxu1 }
 0x6b2   :  { %v10457_v61 = vadd.f32 %v10456_v10, %v10368_v60  ;;  %v16499_v18 = vpop.f32.mrb[129].mxu0  ;;  %v16520_v27 = vpop.f32.mrb[147].mxu1  ;;  %16793 = vmatprep.subr.bf16.mxu1 %v17909_v14 }
 0x6b3   :  { %16772 = vmatpush3.bf16.msra.mxu0 %v17865_v0  ;;  %v10371_v54 = vpop.f32.mrb[130].mxu0 }
 0x6b4   :  { %v16500_v39 = vpop.f32.mrb[131].mxu0  ;;  %16773 = vmatprep.subr.bf16.mxu0 %v17909_v14 }
 0x6b5   :  { %16794 = vmatpush3.bf16.msra.mxu1 %v17866_v57 }
 0x6b6   :  { %16795 = vmatprep.subr.bf16.mxu1 %v17909_v14 }
 0x6b7   :  { %16774 = vmatpush3.bf16.msra.mxu0 %v17867_v47 }
 0x6b8   :  { %16775 = vmatprep.subr.bf16.mxu0 %v17909_v14 }
 0x6b9   :  { %16796 = vmatpush3.bf16.msra.mxu1 %v17868_v45 }
 0x6bb   :  { %16776 = vmatpush3.bf16.msra.mxu0 %v17869_v36 }
 0x6bc   :  { %16798 = vmatmul.mubr.bf16.vlgmr.msra.gmra.mrb[172].mxu1 %v11882_v53  ;;  %16801 = vmatprep.subr.bf16.mxu0 %v17909_v14 }
 0x6be   :  { %16778 = vmatmul.mubr.bf16.vlgmr.msra.gmra.mrb[156].mxu0 %v11774_v59 }
 0x6bf   :  { %16817 = vmatprep.mubr.msk.bf16.mxu0 %vm17910_vm3, %v17909_v14  ;;  %16802 = vmatpush3.bf16.msra.mxu0 %v17870_v28 }
 0x6c0   :  { %16803 = vmatprep.subr.bf16.mxu0 %v17909_v14 }
 0x6c3   :  { %16804 = vmatpush3.bf16.msra.mxu0 %v17871_v41 }
 0x6c4   :  { %16805 = vmatprep.subr.bf16.mxu0 %v17909_v14 }
 0x6c7   :  { %16806 = vmatpush3.bf16.msra.mxu0 %v17872_v7 }
 0x6c8   :  { %16807 = vmatprep.subr.bf16.mxu0 %v17909_v14 }
 0x6cb   :  { %16808 = vmatpush3.bf16.msra.mxu0 %v17873_v6 }
 0x6cc   :  { %16809 = vmatprep.subr.bf16.mxu0 %v17909_v14 }
 0x6cf   :  { %v10671_v50 = vpop.f32.mrb[148].mxu1  ;;  %16810 = vmatpush3.bf16.msra.mxu0 %v17874_v20 }
 0x6d0   :  { %v16559_v25 = vpop.f32.mrb[149].mxu1  ;;  %16811 = vmatprep.subr.bf16.mxu0 %v17909_v14 }
 0x6d1   :  { %v10563_v4 = vpop.f32.mrb[132].mxu0  ;;  %v10674_v2 = vpop.f32.mrb[150].mxu1 }
 0x6d2   :  { %v10569_v12 = vadd.f32 %v10563_v4, %v10457_v61  ;;  %v16539_v16 = vpop.f32.mrb[133].mxu0  ;;  %v16560_v55 = vpop.f32.mrb[151].mxu1 }
 0x6d3   :  { %v10566_v34 = vpop.f32.mrb[134].mxu0  ;;  %16812 = vmatpush3.bf16.msra.mxu0 %v17875_v1 }
 0x6d4   :  { %v16540_v43 = vpop.f32.mrb[135].mxu0  ;;  %v10677_v37 = vadd.f32 %v10671_v50, %v10569_v12  ;;  %16813 = vmatprep.subr.bf16.mxu0 %v17909_v14 }
 0x6d7   :  { %16814 = vmatpush3.bf16.msra.mxu0 %v17876_v58 }
 0x6d8   :  { %16815 = vmatprep.subr.bf16.mxu0 %v17909_v14 }
 0x6db   :  { %16816 = vmatpush3.bf16.msra.mxu0 %v17877_v38 }
 0x6ef   :  { %v10887_v17 = vpop.f32.mrb[152].mxu1 }
 0x6f0   :  { %v16599_v23 = vpop.f32.mrb[153].mxu1 }
 0x6f1   :  { %v10779_v26 = vpop.f32.mrb[136].mxu0  ;;  %v10890_v49 = vpop.f32.mrb[154].mxu1  ;;  %v14110_v23 = vld [vmem:[%s21359_s6] ss:$0 sm:$0xff]  ;;  %s17911_s6 = smov [#allocation4]  }
 0x6f2   :  { %v10785_v56 = vadd.f32 %v10779_v26, %v10677_v37  ;;  %v16579_v63 = vpop.f32.mrb[137].mxu0  ;;  %v16600_v35 = vpop.f32.mrb[155].mxu1 }
 0x6f3   :  { %v10782_v5 = vpop.f32.mrb[138].mxu0 }
 0x6f4   :  { %v16580_v31 = vpop.f32.mrb[139].mxu0  ;;  %v10893_v9 = vadd.f32 %v10887_v17, %v10785_v56 }
 0x6f5   :  { %v14111_v31 = vld [vmem:[%s21361_s8] ss:$0 sm:$0xff]  ;;  %s12114_s8 = sshll.u32 %s17911_s6, 4  ;;  %s12115_s8 = int_to_ptr.vmem [resolvable:$true] %s12114_s8 }
 0x6f6   :  { %s17885_s16 = scalar_lea.vmem %s12115_s8, 32  ;;  %p17890_p1 = scmp.lt.s32.totalorder %s12115_s8, %s12115_s8 }
 0x6f7   :  { %p17886_p0 = scmp.ne.s32.totalorder %s12115_s8, %s17885_s16  ;;  %p17891_p2 = scmp.lt.s32.totalorder %s17885_s16, %s17885_s16 }
 0x6f9   :  { %p17892_p3 = por %p17891_p2, %p17890_p1 }
 0x6fb   :  { %p17893_p4 = pnand %p17892_p3, %p17886_p0 }
 0x70f   :  { %v11103_v3 = vpop.f32.mrb[156].mxu1 }
 0x710   :  { %v16639_v46 = vpop.f32.mrb[157].mxu1 }
 0x711   :  { %v10995_v30 = vpop.f32.mrb[140].mxu0  ;;  %v11106_v42 = vpop.f32.mrb[158].mxu1 }
 0x712   :  { %v11001_v8 = vadd.f32 %v10995_v30, %v10893_v9  ;;  %v16619_v15 = vpop.f32.mrb[141].mxu0  ;;  %v16640_v44 = vpop.f32.mrb[159].mxu1 }
 0x713   :  { %v10998_v24 = vpop.f32.mrb[142].mxu0 }
 0x714   :  { %v16620_v40 = vpop.f32.mrb[143].mxu0  ;;  %v11109_v32 = vadd.f32 %v11103_v3, %v11001_v8 }
 0x72f   :  { %v11318_v48 = vpop.f32.mrb[160].mxu1 }
 0x730   :  { %v16679_v22 = vpop.f32.mrb[161].mxu1 }
 0x731   :  { %v11209_v62 = vpop.f32.mrb[144].mxu0  ;;  %v11321_v52 = vpop.f32.mrb[162].mxu1 }
 0x732   :  { %v11215_v29 = vadd.f32 %v11209_v62, %v11109_v32  ;;  %v16659_v11 = vpop.f32.mrb[145].mxu0  ;;  %v16680_v21 = vpop.f32.mrb[163].mxu1 }
 0x733   :  { %v11212_v13 = vpop.f32.mrb[146].mxu0 }
 0x734   :  { %v16660_v19 = vpop.f32.mrb[147].mxu0  ;;  %v11324_v10 = vadd.f32 %v11318_v48, %v11215_v29 }
 0x74f   :  { %v11534_v0 = vpop.f32.mrb[164].mxu1 }
 0x750   :  { %v16719_v33 = vpop.f32.mrb[165].mxu1 }
 0x751   :  { %v11426_v60 = vpop.f32.mrb[148].mxu0  ;;  %v11537_v51 = vpop.f32.mrb[166].mxu1 }
 0x752   :  { %v11432_v14 = vadd.f32 %v11426_v60, %v11324_v10  ;;  %v16699_v57 = vpop.f32.mrb[149].mxu0  ;;  %v16720_v61 = vpop.f32.mrb[167].mxu1 }
 0x753   :  { %v11429_v18 = vpop.f32.mrb[150].mxu0 }
 0x754   :  { %v16700_v27 = vpop.f32.mrb[151].mxu0  ;;  %v11540_v54 = vadd.f32 %v11534_v0, %v11432_v14 }
 0x76f   :  { %v11750_v47 = vpop.f32.mrb[168].mxu1 }
 0x770   :  { %v16759_v39 = vpop.f32.mrb[169].mxu1 }
 0x771   :  { %v11642_v45 = vpop.f32.mrb[152].mxu0  ;;  %v11753_v36 = vpop.f32.mrb[170].mxu1 }
 0x772   :  { %v11648_v53 = vadd.f32 %v11642_v45, %v11540_v54  ;;  %v16739_v59 = vpop.f32.mrb[153].mxu0  ;;  %v16760_v50 = vpop.f32.mrb[171].mxu1 }
 0x773   :  { %v11645_v25 = vpop.f32.mrb[154].mxu0 }
 0x774   :  { %v16740_v4 = vpop.f32.mrb[155].mxu0  ;;  %v11756_v2 = vadd.f32 %v11750_v47, %v11648_v53 }
 0x78f   :  { %v11966_v12 = vpop.f32.mrb[172].mxu1 }
 0x790   :  { %v16799_v16 = vpop.f32.mrb[173].mxu1 }
 0x791   :  { %v11858_v55 = vpop.f32.mrb[156].mxu0  ;;  %v11969_v34 = vpop.f32.mrb[174].mxu1 }
 0x792   :  { %v11864_v43 = vadd.f32 %v11858_v55, %v11756_v2  ;;  %v16779_v37 = vpop.f32.mrb[157].mxu0  ;;  %v16800_v17 = vpop.f32.mrb[175].mxu1 }
 0x793   :  { %v11861_v26 = vpop.f32.mrb[158].mxu0 }
 0x794   :  { %v11972_v49 = vadd.f32 %v11966_v12, %v11864_v43  ;;  %v16780_v56 = vpop.f32.mrb[159].mxu0 }
 0x796   :  { %v11980_v63 = vadd.f32 %v14110_v23, %v11972_v49 }
 0x798   :  { %v11981_v35 = vmax.f32 %v11980_v63, 0.0 }
 0x79a   :  { %v11982_v5 = vpack.c.bf16 %v11981_v35, %v11981_v35 }
 0x79c   :  { %16818 = vmatmul.mubr.bf16.vlgmr.msra.gmra.mrb[160].mxu0 %v11982_v5 }
 0x86f   :  { %v12088_v9 = vpop.f32.mrb[160].mxu0 }
 0x870   :  { %v12089_v28 = vadd.f32 %v14111_v31, %v12088_v9  ;;  %v16819_v41 = vpop.f32.mrb[161].mxu0 }
 0x871   :  { %v12091_v7 = vpop.f32.mrb[162].mxu0 }
 0x872   :  { %v16820_v6 = vpop.f32.mrb[163].mxu0  ;;  %v12095_v20 = vsel %vm12094_vm4, %v12089_v28, -inf }
 0x873   :  { %12096 = vmax.xlane.f32.xlu0 %v12095_v20 }
 0x900   :  { %v12097_v3 = vpop.xlane.xlu0 %12096 }
 0x901   :  { %v12098_v46 = vsub.f32 %v12089_v28, %v12097_v3 }
 0x903   :  { %v12099_v30 = vmul.f32 1.442695, %v12098_v46 }
 0x905   :  { %17878 = vpow2.f32 %v12099_v30 }
 0x90f   :  { %v17879_v42 = vpop.eup %17878 }
 0x910   :  { %v12101_v1 = vsel %vm12094_vm4, %v17879_v42, 0.0 }
 0x911   :  { %12102 = vadd.xlane.f32.xlu0 %v12101_v1 }
 0x99e   :  { %v12103_v8 = vpop.xlane.xlu0 %12102 }
 0x99f   :  { %17880 = vlog2.f32 %v12103_v8 }
 0x9a9   :  { %v17881_v15 = vpop.eup %17880 }
 0x9aa   :  { %v12105_v44 = vmul.f32 0.6931472, %v17881_v15 }
 0x9ac   :  { %v12106_v24 = vsub.f32 %v12098_v46, %v12105_v44 }
 0x9ae   :  { %12107 = vst [vmem:[#allocation4] sm:$0x3] %v12106_v24 }
 0x9af   :  { %17896 = shalt.err (!%p17893_p4)
}
 0x9b0   :  { %s17897_s0 = scalar_lea.hbm %s21362_s9, 32 }
 0x9b1   :  { %p17898_p5 = scmp.ne.s32.totalorder %s21362_s9, %s17897_s0  ;;  %p17901_p6 = scmp.lt.u32.totalorder %s17897_s0, %s21362_s9 }
 0x9b3   :  { %p17903_p7 = pnand %p17901_p6, %p17898_p5 }
 0x9b5   :  { %17906 = shalt.err (!%p17903_p7)
}
 0x9b6   :  { %12117 = dma.vmem_to_hbm [thread:$0]  %s12115_s8, 32, %s21362_s9, [#allocation5]  }
 0x9b7   :  { %17907 = dma.done.wait [#allocation5], 32  }
 0x9b8   :  { %17908 = vsyncadd [#allocation5], 4294967264 }
 0x9b9   :  { %12121 = vsyncpa [#allocation5], 1 }

</bundles_post_ra>
